<compile_context>
chip_gen: v7x
topology: tpu7x:2x2x1
jax: 0.10.0
libtpu: 0.0.40
codegen_flags: <defaults>
</compile_context>

<pallas_src>
import functools

import jax
import jax.numpy as jnp
import numpy as np
from jax.experimental import pallas as pl
from jax.experimental.pallas import tpu as pltpu

BT_MAX = 128   # v5e/v7x sweet spot (MXU M=128); on v6e, 256 also fully feeds the MXU
N_PAD = 128    # lane-dense padded width of the final (fc2) output


def _round_up(a, b):
    return ((a + b - 1) // b) * b


def _choose_batch_tile(batch):
    """Adaptive batch tile: sublane aligned, MXU-sized, >=2 grid tiles if possible."""
    b8 = _round_up(batch, 8)
    if b8 >= 2 * BT_MAX:
        bt = BT_MAX
    elif b8 >= 16:
        bt = _round_up(b8 // 2, 8)          # keep 2 tiles for v7x megacore
    else:
        bt = b8                             # tiny batch: single 8-row tile
    n_tiles = -(-batch // bt)
    return bt, n_tiles, n_tiles * bt


# ------------------------------ fused kernel ------------------------------- #
def _dqn_fused_kernel(p1_ref, w1_ref, b1_ref, w2_ref, b2_ref, w3_ref, b3_ref,
                      wf1_ref, bf1_ref, wf2_ref, bf2_ref, out_ref):
    f32 = jnp.float32
    n_pos1 = p1_ref.shape[0]
    bt = p1_ref.shape[1]
    n2 = w2_ref.shape[2]

    w1 = w1_ref[...]
    b1 = b1_ref[...]

    # conv1 + conv2 fused: K-split accumulation over conv1 output positions.
    # p1_ref[p] and w2_ref[p] are contiguous slabs -> no masked stores, no
    # repack scratch; MXU is fed with M=bt rows every matmul.
    y2 = jnp.zeros((bt, n2), f32)
    for p in range(n_pos1):
        xp = p1_ref[p]                                          # (bt, k1) bf16
        y1p = jnp.dot(xp, w1, preferred_element_type=f32)       # (bt, 32)
        y1p = jnp.maximum(y1p + b1, 0.0).astype(w2_ref.dtype)
        y2 = y2 + jnp.dot(y1p, w2_ref[p], preferred_element_type=f32)
    y2 = jnp.maximum(y2 + b2_ref[...], 0.0)                     # conv2 bias + relu

    def ffn(xv, w_ref, b_ref, relu):
        y = jnp.dot(xv.astype(w_ref.dtype), w_ref[...],
                    preferred_element_type=f32) + b_ref[...]
        return jnp.maximum(y, 0.0) if relu else y

    y3 = ffn(y2, w3_ref, b3_ref, True)      # conv3 (densified)
    y4 = ffn(y3, wf1_ref, bf1_ref, True)    # fc1
    y5 = ffn(y4, wf2_ref, bf2_ref, False)   # fc2 (padded to 128 lanes)
    out_ref[...] = y5.astype(out_ref.dtype)


def _fused_forward(p1, kp, *, bt, n_tiles):
    n_pos1, _, k1 = p1.shape

    weights = (kp["w1"], kp["b1"], kp["w2"], kp["b2"], kp["w3"], kp["b3"],
               kp["wf1"], kp["bf1"], kp["wf2"], kp["bf2"])

    in_specs = [pl.BlockSpec((n_pos1, bt, k1), lambda i: (0, i, 0))]
    # Weights/biases: full-array blocks, constant index map -> fetched into
    # VMEM once and resident across the whole batch grid.
    in_specs += [pl.BlockSpec(w.shape, lambda i, nd=w.ndim: (0,) * nd)
                 for w in weights]

    # Right-size the VMEM budget: 2 buffers of the streamed p1 block, weights
    # (conservatively counted twice), output, plus headroom for temporaries.
    p1_bytes = n_pos1 * bt * k1 * p1.dtype.itemsize
    w_bytes = sum(int(np.prod(w.shape)) * w.dtype.itemsize for w in weights)
    out_bytes = bt * N_PAD * 4
    vmem_limit = 2 * p1_bytes + 2 * w_bytes + 2 * out_bytes + (16 << 20)
    vmem_limit = int(min(max(vmem_limit, 32 << 20), 96 << 20))

    return pl.pallas_call(
        _dqn_fused_kernel,
        out_shape=jax.ShapeDtypeStruct((n_tiles * bt, N_PAD), jnp.float32),
        grid_spec=pltpu.PrefetchScalarGridSpec(
            num_scalar_prefetch=0,
            grid=(n_tiles,),
            in_specs=in_specs,
            out_specs=pl.BlockSpec((bt, N_PAD), lambda i: (i, 0)),
        ),
        compiler_params=pltpu.CompilerParams(
            dimension_semantics=("parallel",),
            vmem_limit_bytes=vmem_limit,
        ),
    )(p1, *weights)


# ------------------------------- JAX glue ---------------------------------- #
def _im2col_pos_major(x_hwbc, kh, kw, stride):
    """x: (H, W, B, C) -> (OH, OW, B, KH*KW*C); columns ordered (dy, dx, c)."""
    H, W, _, _ = x_hwbc.shape
    oh = (H - kh) // stride + 1
    ow = (W - kw) // stride + 1
    cols = []
    for dy in range(kh):
        for dx in range(kw):
            cols.append(x_hwbc[dy:dy + stride * oh:stride,
                               dx:dx + stride * ow:stride, :, :])
    return jnp.concatenate(cols, axis=-1), oh, ow


def dqn_forward(kp, x, *, num_actions):
    """x: (B, C, H, W) float32, PyTorch-style NCHW."""
    B = x.shape[0]
    bt, n_tiles, b_pad = _choose_batch_tile(B)

    # Pad / cast / transpose on the *raw* input (cheap); the inflated im2col
    # patch tensor is then materialized exactly once, already position-major
    # and bf16, so no extra HBM passes over it are needed.
    if b_pad != B:
        x = jnp.pad(x, ((0, b_pad - B), (0, 0), (0, 0), (0, 0)))
    x_hwbc = jnp.transpose(x.astype(jnp.bfloat16), (2, 3, 0, 1))   # (H, W, B, C)
    patches, oh1, ow1 = _im2col_pos_major(x_hwbc, 8, 8, 4)         # (OH, OW, B, K1)
    n_pos1 = oh1 * ow1
    k1 = patches.shape[-1]
    p1 = patches.reshape(n_pos1, b_pad, k1)                        # position-major

    out = _fused_forward(p1, kp, bt=bt, n_tiles=n_tiles)
    return out[:B, :num_actions]


# --------------------------- parameter handling ----------------------------- #
def _uniform(key, shape, bound):
    return jax.random.uniform(key, shape, jnp.float32, -bound, bound)


def init_dqn_params(key, input_shape, num_actions):
    """PyTorch-layout params: conv w (OC,IC,KH,KW); fc w (in,out)."""
    c_in, h, w = input_shape
    keys = jax.random.split(key, 10)

    def conv_init(kw_, kb_, oc, ic, k):
        bound = 1.0 / np.sqrt(ic * k * k)
        return _uniform(kw_, (oc, ic, k, k), bound), _uniform(kb_, (oc,), bound)

    def fc_init(kw_, kb_, out_f, in_f):
        bound = 1.0 / np.sqrt(in_f)
        return _uniform(kw_, (in_f, out_f), bound), _uniform(kb_, (out_f,), bound)

    p = {}
    p["conv1_w"], p["conv1_b"] = conv_init(keys[0], keys[1], 32, c_in, 8)
    p["conv2_w"], p["conv2_b"] = conv_init(keys[2], keys[3], 64, 32, 4)
    p["conv3_w"], p["conv3_b"] = conv_init(keys[4], keys[5], 64, 64, 3)

    def out_dim(d, k, s):
        return (d - k) // s + 1
    h1, w1 = out_dim(h, 8, 4), out_dim(w, 8, 4)
    h2, w2 = out_dim(h1, 4, 2), out_dim(w1, 4, 2)
    h3, w3 = out_dim(h2, 3, 1), out_dim(w2, 3, 1)
    fc_input_size = 64 * h3 * w3

    p["fc1_w"], p["fc1_b"] = fc_init(keys[6], keys[7], 512, fc_input_size)
    p["fc2_w"], p["fc2_b"] = fc_init(keys[8], keys[9], num_actions, 512)
    return p


def _densify_conv(w, b, hin, win, stride):
    """Conv (OC,IC,KH,KW) as a dense map flat(h,w,c)_in -> flat(h,w,c)_out."""
    oc, ic, kh, kw = w.shape
    hout = (hin - kh) // stride + 1
    wout = (win - kw) // stride + 1
    wd = np.zeros((hin * win * ic, hout * wout * oc), np.float32)
    for oh in range(hout):
        for ow in range(wout):
            c0 = (oh * wout + ow) * oc
            for dy in range(kh):
                for dx in range(kw):
                    iy, ix = oh * stride + dy, ow * stride + dx
                    r0 = (iy * win + ix) * ic
                    wd[r0:r0 + ic, c0:c0 + oc] = w[:, :, dy, dx].T
    return wd, np.tile(b, hout * wout), hout, wout


def prepare_kernel_params(params, input_shape):
    """One-time packing: transposes, densification, fc1 row permute, fc2 pad."""
    c_in, h, w = input_shape

    def out_dim(d, k, s):
        return (d - k) // s + 1
    h1, w1 = out_dim(h, 8, 4), out_dim(w, 8, 4)

    kp = {}
    # conv1: (OC,IC,KH,KW) -> (KH*KW*IC, OC), rows ordered (dy, dx, ic)
    w1c = np.asarray(params["conv1_w"])
    oc1 = w1c.shape[0]
    kp["w1"] = jnp.asarray(w1c.transpose(2, 3, 1, 0).reshape(-1, oc1),
                           dtype=jnp.bfloat16)
    kp["b1"] = jnp.asarray(np.asarray(params["conv1_b"]).reshape(1, -1),
                           dtype=jnp.float32)

    # conv2 / conv3 densified
    w2d, b2d, h2, w2 = _densify_conv(np.asarray(params["conv2_w"]),
                                     np.asarray(params["conv2_b"]), h1, w1, 2)
    w3d, b3d, h3, w3 = _densify_conv(np.asarray(params["conv3_w"]),
                                     np.asarray(params["conv3_b"]), h2, w2, 1)
    # conv2 weight pre-split per conv1 output position for the in-kernel
    # K-split: (h1*w1*32, n2) -> (h1*w1, 32, n2)
    kp["w2"] = jnp.asarray(w2d.reshape(h1 * w1, oc1, -1), dtype=jnp.bfloat16)
    kp["b2"] = jnp.asarray(b2d.reshape(1, -1), dtype=jnp.float32)
    kp["w3"] = jnp.asarray(w3d, dtype=jnp.bfloat16)
    kp["b3"] = jnp.asarray(b3d.reshape(1, -1), dtype=jnp.float32)

    # fc1: permute rows from PyTorch (c,h,w) flatten order to our (h,w,c) order
    fc1_w = np.asarray(params["fc1_w"])          # (64*h3*w3, 512)
    oc3 = np.asarray(params["conv3_w"]).shape[0]
    perm = np.zeros((h3 * w3 * oc3,), np.int64)
    for hh in range(h3):
        for ww in range(w3):
            for cc in range(oc3):
                perm[(hh * w3 + ww) * oc3 + cc] = cc * (h3 * w3) + hh * w3 + ww
    kp["wf1"] = jnp.asarray(fc1_w[perm, :], dtype=jnp.bfloat16)
    kp["bf1"] = jnp.asarray(np.asarray(params["fc1_b"]).reshape(1, -1),
                            dtype=jnp.float32)

    # fc2: pad outputs to N_PAD lanes (lane-dense HBM store); slice outside.
    fc2_w = np.asarray(params["fc2_w"])          # (512, A)
    a = fc2_w.shape[1]
    assert a <= N_PAD, f"num_actions={a} exceeds padded output width {N_PAD}"
    wf2 = np.zeros((fc2_w.shape[0], N_PAD), np.float32)
    wf2[:, :a] = fc2_w
    bf2 = np.zeros((1, N_PAD), np.float32)
    bf2[0, :a] = np.asarray(params["fc2_b"])
    kp["wf2"] = jnp.asarray(wf2, dtype=jnp.bfloat16)
    kp["bf2"] = jnp.asarray(bf2, dtype=jnp.float32)
    return kp


# --------------------------- reference (pure JAX) --------------------------- #
def dqn_forward_ref(params, x):
    def conv(x, w, b, s):
        y = jax.lax.conv_general_dilated(
            x, w, window_strides=(s, s), padding="VALID",
            dimension_numbers=("NCHW", "OIHW", "NCHW"))
        return jax.nn.relu(y + b[None, :, None, None])

    x = conv(x, params["conv1_w"], params["conv1_b"], 4)
    x = conv(x, params["conv2_w"], params["conv2_b"], 2)
    x = conv(x, params["conv3_w"], params["conv3_b"], 1)
    x = x.reshape(x.shape[0], -1)
    x = jax.nn.relu(x @ params["fc1_w"] + params["fc1_b"])
    return x @ params["fc2_w"] + params["fc2_b"]


if __name__ == "__main__":
    # Smallest spatial size surviving the three strided convs: 36 -> 8 -> 3 -> 1.
    input_shape = (4, 36, 36)
    num_actions = 6
    batch = 2

    key = jax.random.PRNGKey(0)
    k_param, k_x = jax.random.split(key)
    params = init_dqn_params(k_param, input_shape, num_actions)
    kparams = prepare_kernel_params(params, input_shape)
    x = jax.random.normal(k_x, (batch,) + input_shape, dtype=jnp.float32)

    fwd = jax.jit(functools.partial(dqn_forward, num_actions=num_actions))
    out = jax.block_until_ready(fwd(kparams, x))

    ref = jax.block_until_ready(dqn_forward_ref(params, x))
    assert out.shape == (batch, num_actions), out.shape
    # bf16 matmul inputs with f32 accumulation -> loose tolerance.
    np.testing.assert_allclose(np.asarray(out), np.asarray(ref),
                               rtol=5e-2, atol=5e-2)
    print("KERNEL_OK")
</pallas_src>

<mosaic_0001>
module attributes {stable_mosaic.version = 11 : i64} {
  func.func @_dqn_fused_kernel(%arg0: i32, %arg1: memref<64x8x256xbf16, #tpu.memory_space<vmem>>, %arg2: memref<256x32xbf16, #tpu.memory_space<vmem>>, %arg3: memref<1x32xf32, #tpu.memory_space<vmem>>, %arg4: memref<64x32x576xbf16, #tpu.memory_space<vmem>>, %arg5: memref<1x576xf32, #tpu.memory_space<vmem>>, %arg6: memref<576x64xbf16, #tpu.memory_space<vmem>>, %arg7: memref<1x64xf32, #tpu.memory_space<vmem>>, %arg8: memref<64x512xbf16, #tpu.memory_space<vmem>>, %arg9: memref<1x512xf32, #tpu.memory_space<vmem>>, %arg10: memref<512x128xbf16, #tpu.memory_space<vmem>>, %arg11: memref<1x128xf32, #tpu.memory_space<vmem>>, %arg12: memref<8x128xf32, #tpu.memory_space<vmem>>) attributes {dimension_semantics = [#tpu.dimension_semantics<parallel>], iteration_bounds = array<i64: 1>, scalar_prefetch = 0 : i64, scratch_operands = 0 : i64, tpu.core_type = #tpu.core_type<tc>, window_params = [{transform_indices = @transform_0, window_bounds = array<i64: 64, 8, 256>}, {pipeline_mode = #tpu.pipeline_mode<synchronous>, transform_indices = @transform_1, window_bounds = array<i64: 256, 32>}, {pipeline_mode = #tpu.pipeline_mode<synchronous>, transform_indices = @transform_2, window_bounds = array<i64: 1, 32>}, {pipeline_mode = #tpu.pipeline_mode<synchronous>, transform_indices = @transform_3, window_bounds = array<i64: 64, 32, 576>}, {pipeline_mode = #tpu.pipeline_mode<synchronous>, transform_indices = @transform_4, window_bounds = array<i64: 1, 576>}, {pipeline_mode = #tpu.pipeline_mode<synchronous>, transform_indices = @transform_5, window_bounds = array<i64: 576, 64>}, {pipeline_mode = #tpu.pipeline_mode<synchronous>, transform_indices = @transform_6, window_bounds = array<i64: 1, 64>}, {pipeline_mode = #tpu.pipeline_mode<synchronous>, transform_indices = @transform_7, window_bounds = array<i64: 64, 512>}, {pipeline_mode = #tpu.pipeline_mode<synchronous>, transform_indices = @transform_8, window_bounds = array<i64: 1, 512>}, {pipeline_mode = #tpu.pipeline_mode<synchronous>, transform_indices = @transform_9, window_bounds = array<i64: 512, 128>}, {pipeline_mode = #tpu.pipeline_mode<synchronous>, transform_indices = @transform_10, window_bounds = array<i64: 1, 128>}, {transform_indices = @transform_11, window_bounds = array<i64: 8, 128>}]} {
    %c0 = arith.constant 0 : index
    %c0_0 = arith.constant 0 : index
    %0 = vector.load %arg2[%c0, %c0_0] : memref<256x32xbf16, #tpu.memory_space<vmem>>, vector<256x32xbf16>
    %c0_1 = arith.constant 0 : index
    %c0_2 = arith.constant 0 : index
    %1 = vector.load %arg3[%c0_1, %c0_2] : memref<1x32xf32, #tpu.memory_space<vmem>>, vector<1x32xf32>
    %cst = arith.constant 0.000000e+00 : f32
    %2 = vector.broadcast %cst : f32 to vector<8x576xf32>
    %c0_3 = arith.constant 0 : index
    %c0_4 = arith.constant 0 : index
    %c0_5 = arith.constant 0 : index
    %3 = vector.load %arg1[%c0_3, %c0_4, %c0_5] : memref<64x8x256xbf16, #tpu.memory_space<vmem>>, vector<1x8x256xbf16>
    %4 = vector.shape_cast %3 : vector<1x8x256xbf16> to vector<8x256xbf16>
    %cst_6 = arith.constant dense<0.000000e+00> : vector<8x32xf32>
    %5 = tpu.matmul %4, %0, %cst_6 {dimension_numbers = #tpu.dot_dimension_numbers<[1], [0], [0], [1], [0, 0, 1, 1], [], []>} : vector<8x256xbf16>, vector<256x32xbf16>, vector<8x32xf32> -> vector<8x32xf32>
    %6 = vector.broadcast %1 : vector<1x32xf32> to vector<8x32xf32>
    %7 = arith.addf %5, %6 : vector<8x32xf32>
    %cst_7 = arith.constant 0.000000e+00 : f32
    %8 = vector.broadcast %cst_7 : f32 to vector<8x32xf32>
    %9 = arith.maximumf %7, %8 : vector<8x32xf32>
    %10 = arith.truncf %9 : vector<8x32xf32> to vector<8x32xbf16>
    %c0_8 = arith.constant 0 : index
    %c0_9 = arith.constant 0 : index
    %c0_10 = arith.constant 0 : index
    %11 = vector.load %arg4[%c0_8, %c0_9, %c0_10] : memref<64x32x576xbf16, #tpu.memory_space<vmem>>, vector<1x32x576xbf16>
    %12 = vector.shape_cast %11 : vector<1x32x576xbf16> to vector<32x576xbf16>
    %cst_11 = arith.constant dense<0.000000e+00> : vector<8x576xf32>
    %13 = tpu.matmul %10, %12, %cst_11 {dimension_numbers = #tpu.dot_dimension_numbers<[1], [0], [0], [1], [0, 0, 1, 1], [], []>} : vector<8x32xbf16>, vector<32x576xbf16>, vector<8x576xf32> -> vector<8x576xf32>
    %14 = arith.addf %2, %13 : vector<8x576xf32>
    %c1 = arith.constant 1 : index
    %c0_12 = arith.constant 0 : index
    %c0_13 = arith.constant 0 : index
    %15 = vector.load %arg1[%c1, %c0_12, %c0_13] : memref<64x8x256xbf16, #tpu.memory_space<vmem>>, vector<1x8x256xbf16>
    %16 = vector.shape_cast %15 : vector<1x8x256xbf16> to vector<8x256xbf16>
    %cst_14 = arith.constant dense<0.000000e+00> : vector<8x32xf32>
    %17 = tpu.matmul %16, %0, %cst_14 {dimension_numbers = #tpu.dot_dimension_numbers<[1], [0], [0], [1], [0, 0, 1, 1], [], []>} : vector<8x256xbf16>, vector<256x32xbf16>, vector<8x32xf32> -> vector<8x32xf32>
    %18 = vector.broadcast %1 : vector<1x32xf32> to vector<8x32xf32>
    %19 = arith.addf %17, %18 : vector<8x32xf32>
    %cst_15 = arith.constant 0.000000e+00 : f32
    %20 = vector.broadcast %cst_15 : f32 to vector<8x32xf32>
    %21 = arith.maximumf %19, %20 : vector<8x32xf32>
    %22 = arith.truncf %21 : vector<8x32xf32> to vector<8x32xbf16>
    %c1_16 = arith.constant 1 : index
    %c0_17 = arith.constant 0 : index
    %c0_18 = arith.constant 0 : index
    %23 = vector.load %arg4[%c1_16, %c0_17, %c0_18] : memref<64x32x576xbf16, #tpu.memory_space<vmem>>, vector<1x32x576xbf16>
    %24 = vector.shape_cast %23 : vector<1x32x576xbf16> to vector<32x576xbf16>
    %cst_19 = arith.constant dense<0.000000e+00> : vector<8x576xf32>
    %25 = tpu.matmul %22, %24, %cst_19 {dimension_numbers = #tpu.dot_dimension_numbers<[1], [0], [0], [1], [0, 0, 1, 1], [], []>} : vector<8x32xbf16>, vector<32x576xbf16>, vector<8x576xf32> -> vector<8x576xf32>
    %26 = arith.addf %14, %25 : vector<8x576xf32>
    %c2 = arith.constant 2 : index
    %c0_20 = arith.constant 0 : index
    %c0_21 = arith.constant 0 : index
    %27 = vector.load %arg1[%c2, %c0_20, %c0_21] : memref<64x8x256xbf16, #tpu.memory_space<vmem>>, vector<1x8x256xbf16>
    %28 = vector.shape_cast %27 : vector<1x8x256xbf16> to vector<8x256xbf16>
    %cst_22 = arith.constant dense<0.000000e+00> : vector<8x32xf32>
    %29 = tpu.matmul %28, %0, %cst_22 {dimension_numbers = #tpu.dot_dimension_numbers<[1], [0], [0], [1], [0, 0, 1, 1], [], []>} : vector<8x256xbf16>, vector<256x32xbf16>, vector<8x32xf32> -> vector<8x32xf32>
    %30 = vector.broadcast %1 : vector<1x32xf32> to vector<8x32xf32>
    %31 = arith.addf %29, %30 : vector<8x32xf32>
    %cst_23 = arith.constant 0.000000e+00 : f32
    %32 = vector.broadcast %cst_23 : f32 to vector<8x32xf32>
    %33 = arith.maximumf %31, %32 : vector<8x32xf32>
    %34 = arith.truncf %33 : vector<8x32xf32> to vector<8x32xbf16>
    %c2_24 = arith.constant 2 : index
    %c0_25 = arith.constant 0 : index
    %c0_26 = arith.constant 0 : index
    %35 = vector.load %arg4[%c2_24, %c0_25, %c0_26] : memref<64x32x576xbf16, #tpu.memory_space<vmem>>, vector<1x32x576xbf16>
    %36 = vector.shape_cast %35 : vector<1x32x576xbf16> to vector<32x576xbf16>
    %cst_27 = arith.constant dense<0.000000e+00> : vector<8x576xf32>
    %37 = tpu.matmul %34, %36, %cst_27 {dimension_numbers = #tpu.dot_dimension_numbers<[1], [0], [0], [1], [0, 0, 1, 1], [], []>} : vector<8x32xbf16>, vector<32x576xbf16>, vector<8x576xf32> -> vector<8x576xf32>
    %38 = arith.addf %26, %37 : vector<8x576xf32>
    %c3 = arith.constant 3 : index
    %c0_28 = arith.constant 0 : index
    %c0_29 = arith.constant 0 : index
    %39 = vector.load %arg1[%c3, %c0_28, %c0_29] : memref<64x8x256xbf16, #tpu.memory_space<vmem>>, vector<1x8x256xbf16>
    %40 = vector.shape_cast %39 : vector<1x8x256xbf16> to vector<8x256xbf16>
    %cst_30 = arith.constant dense<0.000000e+00> : vector<8x32xf32>
    %41 = tpu.matmul %40, %0, %cst_30 {dimension_numbers = #tpu.dot_dimension_numbers<[1], [0], [0], [1], [0, 0, 1, 1], [], []>} : vector<8x256xbf16>, vector<256x32xbf16>, vector<8x32xf32> -> vector<8x32xf32>
    %42 = vector.broadcast %1 : vector<1x32xf32> to vector<8x32xf32>
    %43 = arith.addf %41, %42 : vector<8x32xf32>
    %cst_31 = arith.constant 0.000000e+00 : f32
    %44 = vector.broadcast %cst_31 : f32 to vector<8x32xf32>
    %45 = arith.maximumf %43, %44 : vector<8x32xf32>
    %46 = arith.truncf %45 : vector<8x32xf32> to vector<8x32xbf16>
    %c3_32 = arith.constant 3 : index
    %c0_33 = arith.constant 0 : index
    %c0_34 = arith.constant 0 : index
    %47 = vector.load %arg4[%c3_32, %c0_33, %c0_34] : memref<64x32x576xbf16, #tpu.memory_space<vmem>>, vector<1x32x576xbf16>
    %48 = vector.shape_cast %47 : vector<1x32x576xbf16> to vector<32x576xbf16>
    %cst_35 = arith.constant dense<0.000000e+00> : vector<8x576xf32>
    %49 = tpu.matmul %46, %48, %cst_35 {dimension_numbers = #tpu.dot_dimension_numbers<[1], [0], [0], [1], [0, 0, 1, 1], [], []>} : vector<8x32xbf16>, vector<32x576xbf16>, vector<8x576xf32> -> vector<8x576xf32>
    %50 = arith.addf %38, %49 : vector<8x576xf32>
    %c4 = arith.constant 4 : index
    %c0_36 = arith.constant 0 : index
    %c0_37 = arith.constant 0 : index
    %51 = vector.load %arg1[%c4, %c0_36, %c0_37] : memref<64x8x256xbf16, #tpu.memory_space<vmem>>, vector<1x8x256xbf16>
    %52 = vector.shape_cast %51 : vector<1x8x256xbf16> to vector<8x256xbf16>
    %cst_38 = arith.constant dense<0.000000e+00> : vector<8x32xf32>
    %53 = tpu.matmul %52, %0, %cst_38 {dimension_numbers = #tpu.dot_dimension_numbers<[1], [0], [0], [1], [0, 0, 1, 1], [], []>} : vector<8x256xbf16>, vector<256x32xbf16>, vector<8x32xf32> -> vector<8x32xf32>
    %54 = vector.broadcast %1 : vector<1x32xf32> to vector<8x32xf32>
    %55 = arith.addf %53, %54 : vector<8x32xf32>
    %cst_39 = arith.constant 0.000000e+00 : f32
    %56 = vector.broadcast %cst_39 : f32 to vector<8x32xf32>
    %57 = arith.maximumf %55, %56 : vector<8x32xf32>
    %58 = arith.truncf %57 : vector<8x32xf32> to vector<8x32xbf16>
    %c4_40 = arith.constant 4 : index
    %c0_41 = arith.constant 0 : index
    %c0_42 = arith.constant 0 : index
    %59 = vector.load %arg4[%c4_40, %c0_41, %c0_42] : memref<64x32x576xbf16, #tpu.memory_space<vmem>>, vector<1x32x576xbf16>
    %60 = vector.shape_cast %59 : vector<1x32x576xbf16> to vector<32x576xbf16>
    %cst_43 = arith.constant dense<0.000000e+00> : vector<8x576xf32>
    %61 = tpu.matmul %58, %60, %cst_43 {dimension_numbers = #tpu.dot_dimension_numbers<[1], [0], [0], [1], [0, 0, 1, 1], [], []>} : vector<8x32xbf16>, vector<32x576xbf16>, vector<8x576xf32> -> vector<8x576xf32>
    %62 = arith.addf %50, %61 : vector<8x576xf32>
    %c5 = arith.constant 5 : index
    %c0_44 = arith.constant 0 : index
    %c0_45 = arith.constant 0 : index
    %63 = vector.load %arg1[%c5, %c0_44, %c0_45] : memref<64x8x256xbf16, #tpu.memory_space<vmem>>, vector<1x8x256xbf16>
    %64 = vector.shape_cast %63 : vector<1x8x256xbf16> to vector<8x256xbf16>
    %cst_46 = arith.constant dense<0.000000e+00> : vector<8x32xf32>
    %65 = tpu.matmul %64, %0, %cst_46 {dimension_numbers = #tpu.dot_dimension_numbers<[1], [0], [0], [1], [0, 0, 1, 1], [], []>} : vector<8x256xbf16>, vector<256x32xbf16>, vector<8x32xf32> -> vector<8x32xf32>
    %66 = vector.broadcast %1 : vector<1x32xf32> to vector<8x32xf32>
    %67 = arith.addf %65, %66 : vector<8x32xf32>
    %cst_47 = arith.constant 0.000000e+00 : f32
    %68 = vector.broadcast %cst_47 : f32 to vector<8x32xf32>
    %69 = arith.maximumf %67, %68 : vector<8x32xf32>
    %70 = arith.truncf %69 : vector<8x32xf32> to vector<8x32xbf16>
    %c5_48 = arith.constant 5 : index
    %c0_49 = arith.constant 0 : index
    %c0_50 = arith.constant 0 : index
    %71 = vector.load %arg4[%c5_48, %c0_49, %c0_50] : memref<64x32x576xbf16, #tpu.memory_space<vmem>>, vector<1x32x576xbf16>
    %72 = vector.shape_cast %71 : vector<1x32x576xbf16> to vector<32x576xbf16>
    %cst_51 = arith.constant dense<0.000000e+00> : vector<8x576xf32>
    %73 = tpu.matmul %70, %72, %cst_51 {dimension_numbers = #tpu.dot_dimension_numbers<[1], [0], [0], [1], [0, 0, 1, 1], [], []>} : vector<8x32xbf16>, vector<32x576xbf16>, vector<8x576xf32> -> vector<8x576xf32>
    %74 = arith.addf %62, %73 : vector<8x576xf32>
    %c6 = arith.constant 6 : index
    %c0_52 = arith.constant 0 : index
    %c0_53 = arith.constant 0 : index
    %75 = vector.load %arg1[%c6, %c0_52, %c0_53] : memref<64x8x256xbf16, #tpu.memory_space<vmem>>, vector<1x8x256xbf16>
    %76 = vector.shape_cast %75 : vector<1x8x256xbf16> to vector<8x256xbf16>
    %cst_54 = arith.constant dense<0.000000e+00> : vector<8x32xf32>
    %77 = tpu.matmul %76, %0, %cst_54 {dimension_numbers = #tpu.dot_dimension_numbers<[1], [0], [0], [1], [0, 0, 1, 1], [], []>} : vector<8x256xbf16>, vector<256x32xbf16>, vector<8x32xf32> -> vector<8x32xf32>
    %78 = vector.broadcast %1 : vector<1x32xf32> to vector<8x32xf32>
    %79 = arith.addf %77, %78 : vector<8x32xf32>
    %cst_55 = arith.constant 0.000000e+00 : f32
    %80 = vector.broadcast %cst_55 : f32 to vector<8x32xf32>
    %81 = arith.maximumf %79, %80 : vector<8x32xf32>
    %82 = arith.truncf %81 : vector<8x32xf32> to vector<8x32xbf16>
    %c6_56 = arith.constant 6 : index
    %c0_57 = arith.constant 0 : index
    %c0_58 = arith.constant 0 : index
    %83 = vector.load %arg4[%c6_56, %c0_57, %c0_58] : memref<64x32x576xbf16, #tpu.memory_space<vmem>>, vector<1x32x576xbf16>
    %84 = vector.shape_cast %83 : vector<1x32x576xbf16> to vector<32x576xbf16>
    %cst_59 = arith.constant dense<0.000000e+00> : vector<8x576xf32>
    %85 = tpu.matmul %82, %84, %cst_59 {dimension_numbers = #tpu.dot_dimension_numbers<[1], [0], [0], [1], [0, 0, 1, 1], [], []>} : vector<8x32xbf16>, vector<32x576xbf16>, vector<8x576xf32> -> vector<8x576xf32>
    %86 = arith.addf %74, %85 : vector<8x576xf32>
    %c7 = arith.constant 7 : index
    %c0_60 = arith.constant 0 : index
    %c0_61 = arith.constant 0 : index
    %87 = vector.load %arg1[%c7, %c0_60, %c0_61] : memref<64x8x256xbf16, #tpu.memory_space<vmem>>, vector<1x8x256xbf16>
    %88 = vector.shape_cast %87 : vector<1x8x256xbf16> to vector<8x256xbf16>
    %cst_62 = arith.constant dense<0.000000e+00> : vector<8x32xf32>
    %89 = tpu.matmul %88, %0, %cst_62 {dimension_numbers = #tpu.dot_dimension_numbers<[1], [0], [0], [1], [0, 0, 1, 1], [], []>} : vector<8x256xbf16>, vector<256x32xbf16>, vector<8x32xf32> -> vector<8x32xf32>
    %90 = vector.broadcast %1 : vector<1x32xf32> to vector<8x32xf32>
    %91 = arith.addf %89, %90 : vector<8x32xf32>
    %cst_63 = arith.constant 0.000000e+00 : f32
    %92 = vector.broadcast %cst_63 : f32 to vector<8x32xf32>
    %93 = arith.maximumf %91, %92 : vector<8x32xf32>
    %94 = arith.truncf %93 : vector<8x32xf32> to vector<8x32xbf16>
    %c7_64 = arith.constant 7 : index
    %c0_65 = arith.constant 0 : index
    %c0_66 = arith.constant 0 : index
    %95 = vector.load %arg4[%c7_64, %c0_65, %c0_66] : memref<64x32x576xbf16, #tpu.memory_space<vmem>>, vector<1x32x576xbf16>
    %96 = vector.shape_cast %95 : vector<1x32x576xbf16> to vector<32x576xbf16>
    %cst_67 = arith.constant dense<0.000000e+00> : vector<8x576xf32>
    %97 = tpu.matmul %94, %96, %cst_67 {dimension_numbers = #tpu.dot_dimension_numbers<[1], [0], [0], [1], [0, 0, 1, 1], [], []>} : vector<8x32xbf16>, vector<32x576xbf16>, vector<8x576xf32> -> vector<8x576xf32>
    %98 = arith.addf %86, %97 : vector<8x576xf32>
    %c8 = arith.constant 8 : index
    %c0_68 = arith.constant 0 : index
    %c0_69 = arith.constant 0 : index
    %99 = vector.load %arg1[%c8, %c0_68, %c0_69] : memref<64x8x256xbf16, #tpu.memory_space<vmem>>, vector<1x8x256xbf16>
    %100 = vector.shape_cast %99 : vector<1x8x256xbf16> to vector<8x256xbf16>
    %cst_70 = arith.constant dense<0.000000e+00> : vector<8x32xf32>
    %101 = tpu.matmul %100, %0, %cst_70 {dimension_numbers = #tpu.dot_dimension_numbers<[1], [0], [0], [1], [0, 0, 1, 1], [], []>} : vector<8x256xbf16>, vector<256x32xbf16>, vector<8x32xf32> -> vector<8x32xf32>
    %102 = vector.broadcast %1 : vector<1x32xf32> to vector<8x32xf32>
    %103 = arith.addf %101, %102 : vector<8x32xf32>
    %cst_71 = arith.constant 0.000000e+00 : f32
    %104 = vector.broadcast %cst_71 : f32 to vector<8x32xf32>
    %105 = arith.maximumf %103, %104 : vector<8x32xf32>
    %106 = arith.truncf %105 : vector<8x32xf32> to vector<8x32xbf16>
    %c8_72 = arith.constant 8 : index
    %c0_73 = arith.constant 0 : index
    %c0_74 = arith.constant 0 : index
    %107 = vector.load %arg4[%c8_72, %c0_73, %c0_74] : memref<64x32x576xbf16, #tpu.memory_space<vmem>>, vector<1x32x576xbf16>
    %108 = vector.shape_cast %107 : vector<1x32x576xbf16> to vector<32x576xbf16>
    %cst_75 = arith.constant dense<0.000000e+00> : vector<8x576xf32>
    %109 = tpu.matmul %106, %108, %cst_75 {dimension_numbers = #tpu.dot_dimension_numbers<[1], [0], [0], [1], [0, 0, 1, 1], [], []>} : vector<8x32xbf16>, vector<32x576xbf16>, vector<8x576xf32> -> vector<8x576xf32>
    %110 = arith.addf %98, %109 : vector<8x576xf32>
    %c9 = arith.constant 9 : index
    %c0_76 = arith.constant 0 : index
    %c0_77 = arith.constant 0 : index
    %111 = vector.load %arg1[%c9, %c0_76, %c0_77] : memref<64x8x256xbf16, #tpu.memory_space<vmem>>, vector<1x8x256xbf16>
    %112 = vector.shape_cast %111 : vector<1x8x256xbf16> to vector<8x256xbf16>
    %cst_78 = arith.constant dense<0.000000e+00> : vector<8x32xf32>
    %113 = tpu.matmul %112, %0, %cst_78 {dimension_numbers = #tpu.dot_dimension_numbers<[1], [0], [0], [1], [0, 0, 1, 1], [], []>} : vector<8x256xbf16>, vector<256x32xbf16>, vector<8x32xf32> -> vector<8x32xf32>
    %114 = vector.broadcast %1 : vector<1x32xf32> to vector<8x32xf32>
    %115 = arith.addf %113, %114 : vector<8x32xf32>
    %cst_79 = arith.constant 0.000000e+00 : f32
    %116 = vector.broadcast %cst_79 : f32 to vector<8x32xf32>
    %117 = arith.maximumf %115, %116 : vector<8x32xf32>
    %118 = arith.truncf %117 : vector<8x32xf32> to vector<8x32xbf16>
    %c9_80 = arith.constant 9 : index
    %c0_81 = arith.constant 0 : index
    %c0_82 = arith.constant 0 : index
    %119 = vector.load %arg4[%c9_80, %c0_81, %c0_82] : memref<64x32x576xbf16, #tpu.memory_space<vmem>>, vector<1x32x576xbf16>
    %120 = vector.shape_cast %119 : vector<1x32x576xbf16> to vector<32x576xbf16>
    %cst_83 = arith.constant dense<0.000000e+00> : vector<8x576xf32>
    %121 = tpu.matmul %118, %120, %cst_83 {dimension_numbers = #tpu.dot_dimension_numbers<[1], [0], [0], [1], [0, 0, 1, 1], [], []>} : vector<8x32xbf16>, vector<32x576xbf16>, vector<8x576xf32> -> vector<8x576xf32>
    %122 = arith.addf %110, %121 : vector<8x576xf32>
    %c10 = arith.constant 10 : index
    %c0_84 = arith.constant 0 : index
    %c0_85 = arith.constant 0 : index
    %123 = vector.load %arg1[%c10, %c0_84, %c0_85] : memref<64x8x256xbf16, #tpu.memory_space<vmem>>, vector<1x8x256xbf16>
    %124 = vector.shape_cast %123 : vector<1x8x256xbf16> to vector<8x256xbf16>
    %cst_86 = arith.constant dense<0.000000e+00> : vector<8x32xf32>
    %125 = tpu.matmul %124, %0, %cst_86 {dimension_numbers = #tpu.dot_dimension_numbers<[1], [0], [0], [1], [0, 0, 1, 1], [], []>} : vector<8x256xbf16>, vector<256x32xbf16>, vector<8x32xf32> -> vector<8x32xf32>
    %126 = vector.broadcast %1 : vector<1x32xf32> to vector<8x32xf32>
    %127 = arith.addf %125, %126 : vector<8x32xf32>
    %cst_87 = arith.constant 0.000000e+00 : f32
    %128 = vector.broadcast %cst_87 : f32 to vector<8x32xf32>
    %129 = arith.maximumf %127, %128 : vector<8x32xf32>
    %130 = arith.truncf %129 : vector<8x32xf32> to vector<8x32xbf16>
    %c10_88 = arith.constant 10 : index
    %c0_89 = arith.constant 0 : index
    %c0_90 = arith.constant 0 : index
    %131 = vector.load %arg4[%c10_88, %c0_89, %c0_90] : memref<64x32x576xbf16, #tpu.memory_space<vmem>>, vector<1x32x576xbf16>
    %132 = vector.shape_cast %131 : vector<1x32x576xbf16> to vector<32x576xbf16>
    %cst_91 = arith.constant dense<0.000000e+00> : vector<8x576xf32>
    %133 = tpu.matmul %130, %132, %cst_91 {dimension_numbers = #tpu.dot_dimension_numbers<[1], [0], [0], [1], [0, 0, 1, 1], [], []>} : vector<8x32xbf16>, vector<32x576xbf16>, vector<8x576xf32> -> vector<8x576xf32>
    %134 = arith.addf %122, %133 : vector<8x576xf32>
    %c11 = arith.constant 11 : index
    %c0_92 = arith.constant 0 : index
    %c0_93 = arith.constant 0 : index
    %135 = vector.load %arg1[%c11, %c0_92, %c0_93] : memref<64x8x256xbf16, #tpu.memory_space<vmem>>, vector<1x8x256xbf16>
    %136 = vector.shape_cast %135 : vector<1x8x256xbf16> to vector<8x256xbf16>
    %cst_94 = arith.constant dense<0.000000e+00> : vector<8x32xf32>
    %137 = tpu.matmul %136, %0, %cst_94 {dimension_numbers = #tpu.dot_dimension_numbers<[1], [0], [0], [1], [0, 0, 1, 1], [], []>} : vector<8x256xbf16>, vector<256x32xbf16>, vector<8x32xf32> -> vector<8x32xf32>
    %138 = vector.broadcast %1 : vector<1x32xf32> to vector<8x32xf32>
    %139 = arith.addf %137, %138 : vector<8x32xf32>
    %cst_95 = arith.constant 0.000000e+00 : f32
    %140 = vector.broadcast %cst_95 : f32 to vector<8x32xf32>
    %141 = arith.maximumf %139, %140 : vector<8x32xf32>
    %142 = arith.truncf %141 : vector<8x32xf32> to vector<8x32xbf16>
    %c11_96 = arith.constant 11 : index
    %c0_97 = arith.constant 0 : index
    %c0_98 = arith.constant 0 : index
    %143 = vector.load %arg4[%c11_96, %c0_97, %c0_98] : memref<64x32x576xbf16, #tpu.memory_space<vmem>>, vector<1x32x576xbf16>
    %144 = vector.shape_cast %143 : vector<1x32x576xbf16> to vector<32x576xbf16>
    %cst_99 = arith.constant dense<0.000000e+00> : vector<8x576xf32>
    %145 = tpu.matmul %142, %144, %cst_99 {dimension_numbers = #tpu.dot_dimension_numbers<[1], [0], [0], [1], [0, 0, 1, 1], [], []>} : vector<8x32xbf16>, vector<32x576xbf16>, vector<8x576xf32> -> vector<8x576xf32>
    %146 = arith.addf %134, %145 : vector<8x576xf32>
    %c12 = arith.constant 12 : index
    %c0_100 = arith.constant 0 : index
    %c0_101 = arith.constant 0 : index
    %147 = vector.load %arg1[%c12, %c0_100, %c0_101] : memref<64x8x256xbf16, #tpu.memory_space<vmem>>, vector<1x8x256xbf16>
    %148 = vector.shape_cast %147 : vector<1x8x256xbf16> to vector<8x256xbf16>
    %cst_102 = arith.constant dense<0.000000e+00> : vector<8x32xf32>
    %149 = tpu.matmul %148, %0, %cst_102 {dimension_numbers = #tpu.dot_dimension_numbers<[1], [0], [0], [1], [0, 0, 1, 1], [], []>} : vector<8x256xbf16>, vector<256x32xbf16>, vector<8x32xf32> -> vector<8x32xf32>
    %150 = vector.broadcast %1 : vector<1x32xf32> to vector<8x32xf32>
    %151 = arith.addf %149, %150 : vector<8x32xf32>
    %cst_103 = arith.constant 0.000000e+00 : f32
    %152 = vector.broadcast %cst_103 : f32 to vector<8x32xf32>
    %153 = arith.maximumf %151, %152 : vector<8x32xf32>
    %154 = arith.truncf %153 : vector<8x32xf32> to vector<8x32xbf16>
    %c12_104 = arith.constant 12 : index
    %c0_105 = arith.constant 0 : index
    %c0_106 = arith.constant 0 : index
    %155 = vector.load %arg4[%c12_104, %c0_105, %c0_106] : memref<64x32x576xbf16, #tpu.memory_space<vmem>>, vector<1x32x576xbf16>
    %156 = vector.shape_cast %155 : vector<1x32x576xbf16> to vector<32x576xbf16>
    %cst_107 = arith.constant dense<0.000000e+00> : vector<8x576xf32>
    %157 = tpu.matmul %154, %156, %cst_107 {dimension_numbers = #tpu.dot_dimension_numbers<[1], [0], [0], [1], [0, 0, 1, 1], [], []>} : vector<8x32xbf16>, vector<32x576xbf16>, vector<8x576xf32> -> vector<8x576xf32>
    %158 = arith.addf %146, %157 : vector<8x576xf32>
    %c13 = arith.constant 13 : index
    %c0_108 = arith.constant 0 : index
    %c0_109 = arith.constant 0 : index
    %159 = vector.load %arg1[%c13, %c0_108, %c0_109] : memref<64x8x256xbf16, #tpu.memory_space<vmem>>, vector<1x8x256xbf16>
    %160 = vector.shape_cast %159 : vector<1x8x256xbf16> to vector<8x256xbf16>
    %cst_110 = arith.constant dense<0.000000e+00> : vector<8x32xf32>
    %161 = tpu.matmul %160, %0, %cst_110 {dimension_numbers = #tpu.dot_dimension_numbers<[1], [0], [0], [1], [0, 0, 1, 1], [], []>} : vector<8x256xbf16>, vector<256x32xbf16>, vector<8x32xf32> -> vector<8x32xf32>
    %162 = vector.broadcast %1 : vector<1x32xf32> to vector<8x32xf32>
    %163 = arith.addf %161, %162 : vector<8x32xf32>
    %cst_111 = arith.constant 0.000000e+00 : f32
    %164 = vector.broadcast %cst_111 : f32 to vector<8x32xf32>
    %165 = arith.maximumf %163, %164 : vector<8x32xf32>
    %166 = arith.truncf %165 : vector<8x32xf32> to vector<8x32xbf16>
    %c13_112 = arith.constant 13 : index
    %c0_113 = arith.constant 0 : index
    %c0_114 = arith.constant 0 : index
    %167 = vector.load %arg4[%c13_112, %c0_113, %c0_114] : memref<64x32x576xbf16, #tpu.memory_space<vmem>>, vector<1x32x576xbf16>
    %168 = vector.shape_cast %167 : vector<1x32x576xbf16> to vector<32x576xbf16>
    %cst_115 = arith.constant dense<0.000000e+00> : vector<8x576xf32>
    %169 = tpu.matmul %166, %168, %cst_115 {dimension_numbers = #tpu.dot_dimension_numbers<[1], [0], [0], [1], [0, 0, 1, 1], [], []>} : vector<8x32xbf16>, vector<32x576xbf16>, vector<8x576xf32> -> vector<8x576xf32>
    %170 = arith.addf %158, %169 : vector<8x576xf32>
    %c14 = arith.constant 14 : index
    %c0_116 = arith.constant 0 : index
    %c0_117 = arith.constant 0 : index
    %171 = vector.load %arg1[%c14, %c0_116, %c0_117] : memref<64x8x256xbf16, #tpu.memory_space<vmem>>, vector<1x8x256xbf16>
    %172 = vector.shape_cast %171 : vector<1x8x256xbf16> to vector<8x256xbf16>
    %cst_118 = arith.constant dense<0.000000e+00> : vector<8x32xf32>
    %173 = tpu.matmul %172, %0, %cst_118 {dimension_numbers = #tpu.dot_dimension_numbers<[1], [0], [0], [1], [0, 0, 1, 1], [], []>} : vector<8x256xbf16>, vector<256x32xbf16>, vector<8x32xf32> -> vector<8x32xf32>
    %174 = vector.broadcast %1 : vector<1x32xf32> to vector<8x32xf32>
    %175 = arith.addf %173, %174 : vector<8x32xf32>
    %cst_119 = arith.constant 0.000000e+00 : f32
    %176 = vector.broadcast %cst_119 : f32 to vector<8x32xf32>
    %177 = arith.maximumf %175, %176 : vector<8x32xf32>
    %178 = arith.truncf %177 : vector<8x32xf32> to vector<8x32xbf16>
    %c14_120 = arith.constant 14 : index
    %c0_121 = arith.constant 0 : index
    %c0_122 = arith.constant 0 : index
    %179 = vector.load %arg4[%c14_120, %c0_121, %c0_122] : memref<64x32x576xbf16, #tpu.memory_space<vmem>>, vector<1x32x576xbf16>
    %180 = vector.shape_cast %179 : vector<1x32x576xbf16> to vector<32x576xbf16>
    %cst_123 = arith.constant dense<0.000000e+00> : vector<8x576xf32>
    %181 = tpu.matmul %178, %180, %cst_123 {dimension_numbers = #tpu.dot_dimension_numbers<[1], [0], [0], [1], [0, 0, 1, 1], [], []>} : vector<8x32xbf16>, vector<32x576xbf16>, vector<8x576xf32> -> vector<8x576xf32>
    %182 = arith.addf %170, %181 : vector<8x576xf32>
    %c15 = arith.constant 15 : index
    %c0_124 = arith.constant 0 : index
    %c0_125 = arith.constant 0 : index
    %183 = vector.load %arg1[%c15, %c0_124, %c0_125] : memref<64x8x256xbf16, #tpu.memory_space<vmem>>, vector<1x8x256xbf16>
    %184 = vector.shape_cast %183 : vector<1x8x256xbf16> to vector<8x256xbf16>
    %cst_126 = arith.constant dense<0.000000e+00> : vector<8x32xf32>
    %185 = tpu.matmul %184, %0, %cst_126 {dimension_numbers = #tpu.dot_dimension_numbers<[1], [0], [0], [1], [0, 0, 1, 1], [], []>} : vector<8x256xbf16>, vector<256x32xbf16>, vector<8x32xf32> -> vector<8x32xf32>
    %186 = vector.broadcast %1 : vector<1x32xf32> to vector<8x32xf32>
    %187 = arith.addf %185, %186 : vector<8x32xf32>
    %cst_127 = arith.constant 0.000000e+00 : f32
    %188 = vector.broadcast %cst_127 : f32 to vector<8x32xf32>
    %189 = arith.maximumf %187, %188 : vector<8x32xf32>
    %190 = arith.truncf %189 : vector<8x32xf32> to vector<8x32xbf16>
    %c15_128 = arith.constant 15 : index
    %c0_129 = arith.constant 0 : index
    %c0_130 = arith.constant 0 : index
    %191 = vector.load %arg4[%c15_128, %c0_129, %c0_130] : memref<64x32x576xbf16, #tpu.memory_space<vmem>>, vector<1x32x576xbf16>
    %192 = vector.shape_cast %191 : vector<1x32x576xbf16> to vector<32x576xbf16>
    %cst_131 = arith.constant dense<0.000000e+00> : vector<8x576xf32>
    %193 = tpu.matmul %190, %192, %cst_131 {dimension_numbers = #tpu.dot_dimension_numbers<[1], [0], [0], [1], [0, 0, 1, 1], [], []>} : vector<8x32xbf16>, vector<32x576xbf16>, vector<8x576xf32> -> vector<8x576xf32>
    %194 = arith.addf %182, %193 : vector<8x576xf32>
    %c16 = arith.constant 16 : index
    %c0_132 = arith.constant 0 : index
    %c0_133 = arith.constant 0 : index
    %195 = vector.load %arg1[%c16, %c0_132, %c0_133] : memref<64x8x256xbf16, #tpu.memory_space<vmem>>, vector<1x8x256xbf16>
    %196 = vector.shape_cast %195 : vector<1x8x256xbf16> to vector<8x256xbf16>
    %cst_134 = arith.constant dense<0.000000e+00> : vector<8x32xf32>
    %197 = tpu.matmul %196, %0, %cst_134 {dimension_numbers = #tpu.dot_dimension_numbers<[1], [0], [0], [1], [0, 0, 1, 1], [], []>} : vector<8x256xbf16>, vector<256x32xbf16>, vector<8x32xf32> -> vector<8x32xf32>
    %198 = vector.broadcast %1 : vector<1x32xf32> to vector<8x32xf32>
    %199 = arith.addf %197, %198 : vector<8x32xf32>
    %cst_135 = arith.constant 0.000000e+00 : f32
    %200 = vector.broadcast %cst_135 : f32 to vector<8x32xf32>
    %201 = arith.maximumf %199, %200 : vector<8x32xf32>
    %202 = arith.truncf %201 : vector<8x32xf32> to vector<8x32xbf16>
    %c16_136 = arith.constant 16 : index
    %c0_137 = arith.constant 0 : index
    %c0_138 = arith.constant 0 : index
    %203 = vector.load %arg4[%c16_136, %c0_137, %c0_138] : memref<64x32x576xbf16, #tpu.memory_space<vmem>>, vector<1x32x576xbf16>
    %204 = vector.shape_cast %203 : vector<1x32x576xbf16> to vector<32x576xbf16>
    %cst_139 = arith.constant dense<0.000000e+00> : vector<8x576xf32>
    %205 = tpu.matmul %202, %204, %cst_139 {dimension_numbers = #tpu.dot_dimension_numbers<[1], [0], [0], [1], [0, 0, 1, 1], [], []>} : vector<8x32xbf16>, vector<32x576xbf16>, vector<8x576xf32> -> vector<8x576xf32>
    %206 = arith.addf %194, %205 : vector<8x576xf32>
    %c17 = arith.constant 17 : index
    %c0_140 = arith.constant 0 : index
    %c0_141 = arith.constant 0 : index
    %207 = vector.load %arg1[%c17, %c0_140, %c0_141] : memref<64x8x256xbf16, #tpu.memory_space<vmem>>, vector<1x8x256xbf16>
    %208 = vector.shape_cast %207 : vector<1x8x256xbf16> to vector<8x256xbf16>
    %cst_142 = arith.constant dense<0.000000e+00> : vector<8x32xf32>
    %209 = tpu.matmul %208, %0, %cst_142 {dimension_numbers = #tpu.dot_dimension_numbers<[1], [0], [0], [1], [0, 0, 1, 1], [], []>} : vector<8x256xbf16>, vector<256x32xbf16>, vector<8x32xf32> -> vector<8x32xf32>
    %210 = vector.broadcast %1 : vector<1x32xf32> to vector<8x32xf32>
    %211 = arith.addf %209, %210 : vector<8x32xf32>
    %cst_143 = arith.constant 0.000000e+00 : f32
    %212 = vector.broadcast %cst_143 : f32 to vector<8x32xf32>
    %213 = arith.maximumf %211, %212 : vector<8x32xf32>
    %214 = arith.truncf %213 : vector<8x32xf32> to vector<8x32xbf16>
    %c17_144 = arith.constant 17 : index
    %c0_145 = arith.constant 0 : index
    %c0_146 = arith.constant 0 : index
    %215 = vector.load %arg4[%c17_144, %c0_145, %c0_146] : memref<64x32x576xbf16, #tpu.memory_space<vmem>>, vector<1x32x576xbf16>
    %216 = vector.shape_cast %215 : vector<1x32x576xbf16> to vector<32x576xbf16>
    %cst_147 = arith.constant dense<0.000000e+00> : vector<8x576xf32>
    %217 = tpu.matmul %214, %216, %cst_147 {dimension_numbers = #tpu.dot_dimension_numbers<[1], [0], [0], [1], [0, 0, 1, 1], [], []>} : vector<8x32xbf16>, vector<32x576xbf16>, vector<8x576xf32> -> vector<8x576xf32>
    %218 = arith.addf %206, %217 : vector<8x576xf32>
    %c18 = arith.constant 18 : index
    %c0_148 = arith.constant 0 : index
    %c0_149 = arith.constant 0 : index
    %219 = vector.load %arg1[%c18, %c0_148, %c0_149] : memref<64x8x256xbf16, #tpu.memory_space<vmem>>, vector<1x8x256xbf16>
    %220 = vector.shape_cast %219 : vector<1x8x256xbf16> to vector<8x256xbf16>
    %cst_150 = arith.constant dense<0.000000e+00> : vector<8x32xf32>
    %221 = tpu.matmul %220, %0, %cst_150 {dimension_numbers = #tpu.dot_dimension_numbers<[1], [0], [0], [1], [0, 0, 1, 1], [], []>} : vector<8x256xbf16>, vector<256x32xbf16>, vector<8x32xf32> -> vector<8x32xf32>
    %222 = vector.broadcast %1 : vector<1x32xf32> to vector<8x32xf32>
    %223 = arith.addf %221, %222 : vector<8x32xf32>
    %cst_151 = arith.constant 0.000000e+00 : f32
    %224 = vector.broadcast %cst_151 : f32 to vector<8x32xf32>
    %225 = arith.maximumf %223, %224 : vector<8x32xf32>
    %226 = arith.truncf %225 : vector<8x32xf32> to vector<8x32xbf16>
    %c18_152 = arith.constant 18 : index
    %c0_153 = arith.constant 0 : index
    %c0_154 = arith.constant 0 : index
    %227 = vector.load %arg4[%c18_152, %c0_153, %c0_154] : memref<64x32x576xbf16, #tpu.memory_space<vmem>>, vector<1x32x576xbf16>
    %228 = vector.shape_cast %227 : vector<1x32x576xbf16> to vector<32x576xbf16>
    %cst_155 = arith.constant dense<0.000000e+00> : vector<8x576xf32>
    %229 = tpu.matmul %226, %228, %cst_155 {dimension_numbers = #tpu.dot_dimension_numbers<[1], [0], [0], [1], [0, 0, 1, 1], [], []>} : vector<8x32xbf16>, vector<32x576xbf16>, vector<8x576xf32> -> vector<8x576xf32>
    %230 = arith.addf %218, %229 : vector<8x576xf32>
    %c19 = arith.constant 19 : index
    %c0_156 = arith.constant 0 : index
    %c0_157 = arith.constant 0 : index
    %231 = vector.load %arg1[%c19, %c0_156, %c0_157] : memref<64x8x256xbf16, #tpu.memory_space<vmem>>, vector<1x8x256xbf16>
    %232 = vector.shape_cast %231 : vector<1x8x256xbf16> to vector<8x256xbf16>
    %cst_158 = arith.constant dense<0.000000e+00> : vector<8x32xf32>
    %233 = tpu.matmul %232, %0, %cst_158 {dimension_numbers = #tpu.dot_dimension_numbers<[1], [0], [0], [1], [0, 0, 1, 1], [], []>} : vector<8x256xbf16>, vector<256x32xbf16>, vector<8x32xf32> -> vector<8x32xf32>
    %234 = vector.broadcast %1 : vector<1x32xf32> to vector<8x32xf32>
    %235 = arith.addf %233, %234 : vector<8x32xf32>
    %cst_159 = arith.constant 0.000000e+00 : f32
    %236 = vector.broadcast %cst_159 : f32 to vector<8x32xf32>
    %237 = arith.maximumf %235, %236 : vector<8x32xf32>
    %238 = arith.truncf %237 : vector<8x32xf32> to vector<8x32xbf16>
    %c19_160 = arith.constant 19 : index
    %c0_161 = arith.constant 0 : index
    %c0_162 = arith.constant 0 : index
    %239 = vector.load %arg4[%c19_160, %c0_161, %c0_162] : memref<64x32x576xbf16, #tpu.memory_space<vmem>>, vector<1x32x576xbf16>
    %240 = vector.shape_cast %239 : vector<1x32x576xbf16> to vector<32x576xbf16>
    %cst_163 = arith.constant dense<0.000000e+00> : vector<8x576xf32>
    %241 = tpu.matmul %238, %240, %cst_163 {dimension_numbers = #tpu.dot_dimension_numbers<[1], [0], [0], [1], [0, 0, 1, 1], [], []>} : vector<8x32xbf16>, vector<32x576xbf16>, vector<8x576xf32> -> vector<8x576xf32>
    %242 = arith.addf %230, %241 : vector<8x576xf32>
    %c20 = arith.constant 20 : index
    %c0_164 = arith.constant 0 : index
    %c0_165 = arith.constant 0 : index
    %243 = vector.load %arg1[%c20, %c0_164, %c0_165] : memref<64x8x256xbf16, #tpu.memory_space<vmem>>, vector<1x8x256xbf16>
    %244 = vector.shape_cast %243 : vector<1x8x256xbf16> to vector<8x256xbf16>
    %cst_166 = arith.constant dense<0.000000e+00> : vector<8x32xf32>
    %245 = tpu.matmul %244, %0, %cst_166 {dimension_numbers = #tpu.dot_dimension_numbers<[1], [0], [0], [1], [0, 0, 1, 1], [], []>} : vector<8x256xbf16>, vector<256x32xbf16>, vector<8x32xf32> -> vector<8x32xf32>
    %246 = vector.broadcast %1 : vector<1x32xf32> to vector<8x32xf32>
    %247 = arith.addf %245, %246 : vector<8x32xf32>
    %cst_167 = arith.constant 0.000000e+00 : f32
    %248 = vector.broadcast %cst_167 : f32 to vector<8x32xf32>
    %249 = arith.maximumf %247, %248 : vector<8x32xf32>
    %250 = arith.truncf %249 : vector<8x32xf32> to vector<8x32xbf16>
    %c20_168 = arith.constant 20 : index
    %c0_169 = arith.constant 0 : index
    %c0_170 = arith.constant 0 : index
    %251 = vector.load %arg4[%c20_168, %c0_169, %c0_170] : memref<64x32x576xbf16, #tpu.memory_space<vmem>>, vector<1x32x576xbf16>
    %252 = vector.shape_cast %251 : vector<1x32x576xbf16> to vector<32x576xbf16>
    %cst_171 = arith.constant dense<0.000000e+00> : vector<8x576xf32>
    %253 = tpu.matmul %250, %252, %cst_171 {dimension_numbers = #tpu.dot_dimension_numbers<[1], [0], [0], [1], [0, 0, 1, 1], [], []>} : vector<8x32xbf16>, vector<32x576xbf16>, vector<8x576xf32> -> vector<8x576xf32>
    %254 = arith.addf %242, %253 : vector<8x576xf32>
    %c21 = arith.constant 21 : index
    %c0_172 = arith.constant 0 : index
    %c0_173 = arith.constant 0 : index
    %255 = vector.load %arg1[%c21, %c0_172, %c0_173] : memref<64x8x256xbf16, #tpu.memory_space<vmem>>, vector<1x8x256xbf16>
    %256 = vector.shape_cast %255 : vector<1x8x256xbf16> to vector<8x256xbf16>
    %cst_174 = arith.constant dense<0.000000e+00> : vector<8x32xf32>
    %257 = tpu.matmul %256, %0, %cst_174 {dimension_numbers = #tpu.dot_dimension_numbers<[1], [0], [0], [1], [0, 0, 1, 1], [], []>} : vector<8x256xbf16>, vector<256x32xbf16>, vector<8x32xf32> -> vector<8x32xf32>
    %258 = vector.broadcast %1 : vector<1x32xf32> to vector<8x32xf32>
    %259 = arith.addf %257, %258 : vector<8x32xf32>
    %cst_175 = arith.constant 0.000000e+00 : f32
    %260 = vector.broadcast %cst_175 : f32 to vector<8x32xf32>
    %261 = arith.maximumf %259, %260 : vector<8x32xf32>
    %262 = arith.truncf %261 : vector<8x32xf32> to vector<8x32xbf16>
    %c21_176 = arith.constant 21 : index
    %c0_177 = arith.constant 0 : index
    %c0_178 = arith.constant 0 : index
    %263 = vector.load %arg4[%c21_176, %c0_177, %c0_178] : memref<64x32x576xbf16, #tpu.memory_space<vmem>>, vector<1x32x576xbf16>
    %264 = vector.shape_cast %263 : vector<1x32x576xbf16> to vector<32x576xbf16>
    %cst_179 = arith.constant dense<0.000000e+00> : vector<8x576xf32>
    %265 = tpu.matmul %262, %264, %cst_179 {dimension_numbers = #tpu.dot_dimension_numbers<[1], [0], [0], [1], [0, 0, 1, 1], [], []>} : vector<8x32xbf16>, vector<32x576xbf16>, vector<8x576xf32> -> vector<8x576xf32>
    %266 = arith.addf %254, %265 : vector<8x576xf32>
    %c22 = arith.constant 22 : index
    %c0_180 = arith.constant 0 : index
    %c0_181 = arith.constant 0 : index
    %267 = vector.load %arg1[%c22, %c0_180, %c0_181] : memref<64x8x256xbf16, #tpu.memory_space<vmem>>, vector<1x8x256xbf16>
    %268 = vector.shape_cast %267 : vector<1x8x256xbf16> to vector<8x256xbf16>
    %cst_182 = arith.constant dense<0.000000e+00> : vector<8x32xf32>
    %269 = tpu.matmul %268, %0, %cst_182 {dimension_numbers = #tpu.dot_dimension_numbers<[1], [0], [0], [1], [0, 0, 1, 1], [], []>} : vector<8x256xbf16>, vector<256x32xbf16>, vector<8x32xf32> -> vector<8x32xf32>
    %270 = vector.broadcast %1 : vector<1x32xf32> to vector<8x32xf32>
    %271 = arith.addf %269, %270 : vector<8x32xf32>
    %cst_183 = arith.constant 0.000000e+00 : f32
    %272 = vector.broadcast %cst_183 : f32 to vector<8x32xf32>
    %273 = arith.maximumf %271, %272 : vector<8x32xf32>
    %274 = arith.truncf %273 : vector<8x32xf32> to vector<8x32xbf16>
    %c22_184 = arith.constant 22 : index
    %c0_185 = arith.constant 0 : index
    %c0_186 = arith.constant 0 : index
    %275 = vector.load %arg4[%c22_184, %c0_185, %c0_186] : memref<64x32x576xbf16, #tpu.memory_space<vmem>>, vector<1x32x576xbf16>
    %276 = vector.shape_cast %275 : vector<1x32x576xbf16> to vector<32x576xbf16>
    %cst_187 = arith.constant dense<0.000000e+00> : vector<8x576xf32>
    %277 = tpu.matmul %274, %276, %cst_187 {dimension_numbers = #tpu.dot_dimension_numbers<[1], [0], [0], [1], [0, 0, 1, 1], [], []>} : vector<8x32xbf16>, vector<32x576xbf16>, vector<8x576xf32> -> vector<8x576xf32>
    %278 = arith.addf %266, %277 : vector<8x576xf32>
    %c23 = arith.constant 23 : index
    %c0_188 = arith.constant 0 : index
    %c0_189 = arith.constant 0 : index
    %279 = vector.load %arg1[%c23, %c0_188, %c0_189] : memref<64x8x256xbf16, #tpu.memory_space<vmem>>, vector<1x8x256xbf16>
    %280 = vector.shape_cast %279 : vector<1x8x256xbf16> to vector<8x256xbf16>
    %cst_190 = arith.constant dense<0.000000e+00> : vector<8x32xf32>
    %281 = tpu.matmul %280, %0, %cst_190 {dimension_numbers = #tpu.dot_dimension_numbers<[1], [0], [0], [1], [0, 0, 1, 1], [], []>} : vector<8x256xbf16>, vector<256x32xbf16>, vector<8x32xf32> -> vector<8x32xf32>
    %282 = vector.broadcast %1 : vector<1x32xf32> to vector<8x32xf32>
    %283 = arith.addf %281, %282 : vector<8x32xf32>
    %cst_191 = arith.constant 0.000000e+00 : f32
    %284 = vector.broadcast %cst_191 : f32 to vector<8x32xf32>
    %285 = arith.maximumf %283, %284 : vector<8x32xf32>
    %286 = arith.truncf %285 : vector<8x32xf32> to vector<8x32xbf16>
    %c23_192 = arith.constant 23 : index
    %c0_193 = arith.constant 0 : index
    %c0_194 = arith.constant 0 : index
    %287 = vector.load %arg4[%c23_192, %c0_193, %c0_194] : memref<64x32x576xbf16, #tpu.memory_space<vmem>>, vector<1x32x576xbf16>
    %288 = vector.shape_cast %287 : vector<1x32x576xbf16> to vector<32x576xbf16>
    %cst_195 = arith.constant dense<0.000000e+00> : vector<8x576xf32>
    %289 = tpu.matmul %286, %288, %cst_195 {dimension_numbers = #tpu.dot_dimension_numbers<[1], [0], [0], [1], [0, 0, 1, 1], [], []>} : vector<8x32xbf16>, vector<32x576xbf16>, vector<8x576xf32> -> vector<8x576xf32>
    %290 = arith.addf %278, %289 : vector<8x576xf32>
    %c24 = arith.constant 24 : index
    %c0_196 = arith.constant 0 : index
    %c0_197 = arith.constant 0 : index
    %291 = vector.load %arg1[%c24, %c0_196, %c0_197] : memref<64x8x256xbf16, #tpu.memory_space<vmem>>, vector<1x8x256xbf16>
    %292 = vector.shape_cast %291 : vector<1x8x256xbf16> to vector<8x256xbf16>
    %cst_198 = arith.constant dense<0.000000e+00> : vector<8x32xf32>
    %293 = tpu.matmul %292, %0, %cst_198 {dimension_numbers = #tpu.dot_dimension_numbers<[1], [0], [0], [1], [0, 0, 1, 1], [], []>} : vector<8x256xbf16>, vector<256x32xbf16>, vector<8x32xf32> -> vector<8x32xf32>
    %294 = vector.broadcast %1 : vector<1x32xf32> to vector<8x32xf32>
    %295 = arith.addf %293, %294 : vector<8x32xf32>
    %cst_199 = arith.constant 0.000000e+00 : f32
    %296 = vector.broadcast %cst_199 : f32 to vector<8x32xf32>
    %297 = arith.maximumf %295, %296 : vector<8x32xf32>
    %298 = arith.truncf %297 : vector<8x32xf32> to vector<8x32xbf16>
    %c24_200 = arith.constant 24 : index
    %c0_201 = arith.constant 0 : index
    %c0_202 = arith.constant 0 : index
    %299 = vector.load %arg4[%c24_200, %c0_201, %c0_202] : memref<64x32x576xbf16, #tpu.memory_space<vmem>>, vector<1x32x576xbf16>
    %300 = vector.shape_cast %299 : vector<1x32x576xbf16> to vector<32x576xbf16>
    %cst_203 = arith.constant dense<0.000000e+00> : vector<8x576xf32>
    %301 = tpu.matmul %298, %300, %cst_203 {dimension_numbers = #tpu.dot_dimension_numbers<[1], [0], [0], [1], [0, 0, 1, 1], [], []>} : vector<8x32xbf16>, vector<32x576xbf16>, vector<8x576xf32> -> vector<8x576xf32>
    %302 = arith.addf %290, %301 : vector<8x576xf32>
    %c25 = arith.constant 25 : index
    %c0_204 = arith.constant 0 : index
    %c0_205 = arith.constant 0 : index
    %303 = vector.load %arg1[%c25, %c0_204, %c0_205] : memref<64x8x256xbf16, #tpu.memory_space<vmem>>, vector<1x8x256xbf16>
    %304 = vector.shape_cast %303 : vector<1x8x256xbf16> to vector<8x256xbf16>
    %cst_206 = arith.constant dense<0.000000e+00> : vector<8x32xf32>
    %305 = tpu.matmul %304, %0, %cst_206 {dimension_numbers = #tpu.dot_dimension_numbers<[1], [0], [0], [1], [0, 0, 1, 1], [], []>} : vector<8x256xbf16>, vector<256x32xbf16>, vector<8x32xf32> -> vector<8x32xf32>
    %306 = vector.broadcast %1 : vector<1x32xf32> to vector<8x32xf32>
    %307 = arith.addf %305, %306 : vector<8x32xf32>
    %cst_207 = arith.constant 0.000000e+00 : f32
    %308 = vector.broadcast %cst_207 : f32 to vector<8x32xf32>
    %309 = arith.maximumf %307, %308 : vector<8x32xf32>
    %310 = arith.truncf %309 : vector<8x32xf32> to vector<8x32xbf16>
    %c25_208 = arith.constant 25 : index
    %c0_209 = arith.constant 0 : index
    %c0_210 = arith.constant 0 : index
    %311 = vector.load %arg4[%c25_208, %c0_209, %c0_210] : memref<64x32x576xbf16, #tpu.memory_space<vmem>>, vector<1x32x576xbf16>
    %312 = vector.shape_cast %311 : vector<1x32x576xbf16> to vector<32x576xbf16>
    %cst_211 = arith.constant dense<0.000000e+00> : vector<8x576xf32>
    %313 = tpu.matmul %310, %312, %cst_211 {dimension_numbers = #tpu.dot_dimension_numbers<[1], [0], [0], [1], [0, 0, 1, 1], [], []>} : vector<8x32xbf16>, vector<32x576xbf16>, vector<8x576xf32> -> vector<8x576xf32>
    %314 = arith.addf %302, %313 : vector<8x576xf32>
    %c26 = arith.constant 26 : index
    %c0_212 = arith.constant 0 : index
    %c0_213 = arith.constant 0 : index
    %315 = vector.load %arg1[%c26, %c0_212, %c0_213] : memref<64x8x256xbf16, #tpu.memory_space<vmem>>, vector<1x8x256xbf16>
    %316 = vector.shape_cast %315 : vector<1x8x256xbf16> to vector<8x256xbf16>
    %cst_214 = arith.constant dense<0.000000e+00> : vector<8x32xf32>
    %317 = tpu.matmul %316, %0, %cst_214 {dimension_numbers = #tpu.dot_dimension_numbers<[1], [0], [0], [1], [0, 0, 1, 1], [], []>} : vector<8x256xbf16>, vector<256x32xbf16>, vector<8x32xf32> -> vector<8x32xf32>
    %318 = vector.broadcast %1 : vector<1x32xf32> to vector<8x32xf32>
    %319 = arith.addf %317, %318 : vector<8x32xf32>
    %cst_215 = arith.constant 0.000000e+00 : f32
    %320 = vector.broadcast %cst_215 : f32 to vector<8x32xf32>
    %321 = arith.maximumf %319, %320 : vector<8x32xf32>
    %322 = arith.truncf %321 : vector<8x32xf32> to vector<8x32xbf16>
    %c26_216 = arith.constant 26 : index
    %c0_217 = arith.constant 0 : index
    %c0_218 = arith.constant 0 : index
    %323 = vector.load %arg4[%c26_216, %c0_217, %c0_218] : memref<64x32x576xbf16, #tpu.memory_space<vmem>>, vector<1x32x576xbf16>
    %324 = vector.shape_cast %323 : vector<1x32x576xbf16> to vector<32x576xbf16>
    %cst_219 = arith.constant dense<0.000000e+00> : vector<8x576xf32>
    %325 = tpu.matmul %322, %324, %cst_219 {dimension_numbers = #tpu.dot_dimension_numbers<[1], [0], [0], [1], [0, 0, 1, 1], [], []>} : vector<8x32xbf16>, vector<32x576xbf16>, vector<8x576xf32> -> vector<8x576xf32>
    %326 = arith.addf %314, %325 : vector<8x576xf32>
    %c27 = arith.constant 27 : index
    %c0_220 = arith.constant 0 : index
    %c0_221 = arith.constant 0 : index
    %327 = vector.load %arg1[%c27, %c0_220, %c0_221] : memref<64x8x256xbf16, #tpu.memory_space<vmem>>, vector<1x8x256xbf16>
    %328 = vector.shape_cast %327 : vector<1x8x256xbf16> to vector<8x256xbf16>
    %cst_222 = arith.constant dense<0.000000e+00> : vector<8x32xf32>
    %329 = tpu.matmul %328, %0, %cst_222 {dimension_numbers = #tpu.dot_dimension_numbers<[1], [0], [0], [1], [0, 0, 1, 1], [], []>} : vector<8x256xbf16>, vector<256x32xbf16>, vector<8x32xf32> -> vector<8x32xf32>
    %330 = vector.broadcast %1 : vector<1x32xf32> to vector<8x32xf32>
    %331 = arith.addf %329, %330 : vector<8x32xf32>
    %cst_223 = arith.constant 0.000000e+00 : f32
    %332 = vector.broadcast %cst_223 : f32 to vector<8x32xf32>
    %333 = arith.maximumf %331, %332 : vector<8x32xf32>
    %334 = arith.truncf %333 : vector<8x32xf32> to vector<8x32xbf16>
    %c27_224 = arith.constant 27 : index
    %c0_225 = arith.constant 0 : index
    %c0_226 = arith.constant 0 : index
    %335 = vector.load %arg4[%c27_224, %c0_225, %c0_226] : memref<64x32x576xbf16, #tpu.memory_space<vmem>>, vector<1x32x576xbf16>
    %336 = vector.shape_cast %335 : vector<1x32x576xbf16> to vector<32x576xbf16>
    %cst_227 = arith.constant dense<0.000000e+00> : vector<8x576xf32>
    %337 = tpu.matmul %334, %336, %cst_227 {dimension_numbers = #tpu.dot_dimension_numbers<[1], [0], [0], [1], [0, 0, 1, 1], [], []>} : vector<8x32xbf16>, vector<32x576xbf16>, vector<8x576xf32> -> vector<8x576xf32>
    %338 = arith.addf %326, %337 : vector<8x576xf32>
    %c28 = arith.constant 28 : index
    %c0_228 = arith.constant 0 : index
    %c0_229 = arith.constant 0 : index
    %339 = vector.load %arg1[%c28, %c0_228, %c0_229] : memref<64x8x256xbf16, #tpu.memory_space<vmem>>, vector<1x8x256xbf16>
    %340 = vector.shape_cast %339 : vector<1x8x256xbf16> to vector<8x256xbf16>
    %cst_230 = arith.constant dense<0.000000e+00> : vector<8x32xf32>
    %341 = tpu.matmul %340, %0, %cst_230 {dimension_numbers = #tpu.dot_dimension_numbers<[1], [0], [0], [1], [0, 0, 1, 1], [], []>} : vector<8x256xbf16>, vector<256x32xbf16>, vector<8x32xf32> -> vector<8x32xf32>
    %342 = vector.broadcast %1 : vector<1x32xf32> to vector<8x32xf32>
    %343 = arith.addf %341, %342 : vector<8x32xf32>
    %cst_231 = arith.constant 0.000000e+00 : f32
    %344 = vector.broadcast %cst_231 : f32 to vector<8x32xf32>
    %345 = arith.maximumf %343, %344 : vector<8x32xf32>
    %346 = arith.truncf %345 : vector<8x32xf32> to vector<8x32xbf16>
    %c28_232 = arith.constant 28 : index
    %c0_233 = arith.constant 0 : index
    %c0_234 = arith.constant 0 : index
    %347 = vector.load %arg4[%c28_232, %c0_233, %c0_234] : memref<64x32x576xbf16, #tpu.memory_space<vmem>>, vector<1x32x576xbf16>
    %348 = vector.shape_cast %347 : vector<1x32x576xbf16> to vector<32x576xbf16>
    %cst_235 = arith.constant dense<0.000000e+00> : vector<8x576xf32>
    %349 = tpu.matmul %346, %348, %cst_235 {dimension_numbers = #tpu.dot_dimension_numbers<[1], [0], [0], [1], [0, 0, 1, 1], [], []>} : vector<8x32xbf16>, vector<32x576xbf16>, vector<8x576xf32> -> vector<8x576xf32>
    %350 = arith.addf %338, %349 : vector<8x576xf32>
    %c29 = arith.constant 29 : index
    %c0_236 = arith.constant 0 : index
    %c0_237 = arith.constant 0 : index
    %351 = vector.load %arg1[%c29, %c0_236, %c0_237] : memref<64x8x256xbf16, #tpu.memory_space<vmem>>, vector<1x8x256xbf16>
    %352 = vector.shape_cast %351 : vector<1x8x256xbf16> to vector<8x256xbf16>
    %cst_238 = arith.constant dense<0.000000e+00> : vector<8x32xf32>
    %353 = tpu.matmul %352, %0, %cst_238 {dimension_numbers = #tpu.dot_dimension_numbers<[1], [0], [0], [1], [0, 0, 1, 1], [], []>} : vector<8x256xbf16>, vector<256x32xbf16>, vector<8x32xf32> -> vector<8x32xf32>
    %354 = vector.broadcast %1 : vector<1x32xf32> to vector<8x32xf32>
    %355 = arith.addf %353, %354 : vector<8x32xf32>
    %cst_239 = arith.constant 0.000000e+00 : f32
    %356 = vector.broadcast %cst_239 : f32 to vector<8x32xf32>
    %357 = arith.maximumf %355, %356 : vector<8x32xf32>
    %358 = arith.truncf %357 : vector<8x32xf32> to vector<8x32xbf16>
    %c29_240 = arith.constant 29 : index
    %c0_241 = arith.constant 0 : index
    %c0_242 = arith.constant 0 : index
    %359 = vector.load %arg4[%c29_240, %c0_241, %c0_242] : memref<64x32x576xbf16, #tpu.memory_space<vmem>>, vector<1x32x576xbf16>
    %360 = vector.shape_cast %359 : vector<1x32x576xbf16> to vector<32x576xbf16>
    %cst_243 = arith.constant dense<0.000000e+00> : vector<8x576xf32>
    %361 = tpu.matmul %358, %360, %cst_243 {dimension_numbers = #tpu.dot_dimension_numbers<[1], [0], [0], [1], [0, 0, 1, 1], [], []>} : vector<8x32xbf16>, vector<32x576xbf16>, vector<8x576xf32> -> vector<8x576xf32>
    %362 = arith.addf %350, %361 : vector<8x576xf32>
    %c30 = arith.constant 30 : index
    %c0_244 = arith.constant 0 : index
    %c0_245 = arith.constant 0 : index
    %363 = vector.load %arg1[%c30, %c0_244, %c0_245] : memref<64x8x256xbf16, #tpu.memory_space<vmem>>, vector<1x8x256xbf16>
    %364 = vector.shape_cast %363 : vector<1x8x256xbf16> to vector<8x256xbf16>
    %cst_246 = arith.constant dense<0.000000e+00> : vector<8x32xf32>
    %365 = tpu.matmul %364, %0, %cst_246 {dimension_numbers = #tpu.dot_dimension_numbers<[1], [0], [0], [1], [0, 0, 1, 1], [], []>} : vector<8x256xbf16>, vector<256x32xbf16>, vector<8x32xf32> -> vector<8x32xf32>
    %366 = vector.broadcast %1 : vector<1x32xf32> to vector<8x32xf32>
    %367 = arith.addf %365, %366 : vector<8x32xf32>
    %cst_247 = arith.constant 0.000000e+00 : f32
    %368 = vector.broadcast %cst_247 : f32 to vector<8x32xf32>
    %369 = arith.maximumf %367, %368 : vector<8x32xf32>
    %370 = arith.truncf %369 : vector<8x32xf32> to vector<8x32xbf16>
    %c30_248 = arith.constant 30 : index
    %c0_249 = arith.constant 0 : index
    %c0_250 = arith.constant 0 : index
    %371 = vector.load %arg4[%c30_248, %c0_249, %c0_250] : memref<64x32x576xbf16, #tpu.memory_space<vmem>>, vector<1x32x576xbf16>
    %372 = vector.shape_cast %371 : vector<1x32x576xbf16> to vector<32x576xbf16>
    %cst_251 = arith.constant dense<0.000000e+00> : vector<8x576xf32>
    %373 = tpu.matmul %370, %372, %cst_251 {dimension_numbers = #tpu.dot_dimension_numbers<[1], [0], [0], [1], [0, 0, 1, 1], [], []>} : vector<8x32xbf16>, vector<32x576xbf16>, vector<8x576xf32> -> vector<8x576xf32>
    %374 = arith.addf %362, %373 : vector<8x576xf32>
    %c31 = arith.constant 31 : index
    %c0_252 = arith.constant 0 : index
    %c0_253 = arith.constant 0 : index
    %375 = vector.load %arg1[%c31, %c0_252, %c0_253] : memref<64x8x256xbf16, #tpu.memory_space<vmem>>, vector<1x8x256xbf16>
    %376 = vector.shape_cast %375 : vector<1x8x256xbf16> to vector<8x256xbf16>
    %cst_254 = arith.constant dense<0.000000e+00> : vector<8x32xf32>
    %377 = tpu.matmul %376, %0, %cst_254 {dimension_numbers = #tpu.dot_dimension_numbers<[1], [0], [0], [1], [0, 0, 1, 1], [], []>} : vector<8x256xbf16>, vector<256x32xbf16>, vector<8x32xf32> -> vector<8x32xf32>
    %378 = vector.broadcast %1 : vector<1x32xf32> to vector<8x32xf32>
    %379 = arith.addf %377, %378 : vector<8x32xf32>
    %cst_255 = arith.constant 0.000000e+00 : f32
    %380 = vector.broadcast %cst_255 : f32 to vector<8x32xf32>
    %381 = arith.maximumf %379, %380 : vector<8x32xf32>
    %382 = arith.truncf %381 : vector<8x32xf32> to vector<8x32xbf16>
    %c31_256 = arith.constant 31 : index
    %c0_257 = arith.constant 0 : index
    %c0_258 = arith.constant 0 : index
    %383 = vector.load %arg4[%c31_256, %c0_257, %c0_258] : memref<64x32x576xbf16, #tpu.memory_space<vmem>>, vector<1x32x576xbf16>
    %384 = vector.shape_cast %383 : vector<1x32x576xbf16> to vector<32x576xbf16>
    %cst_259 = arith.constant dense<0.000000e+00> : vector<8x576xf32>
    %385 = tpu.matmul %382, %384, %cst_259 {dimension_numbers = #tpu.dot_dimension_numbers<[1], [0], [0], [1], [0, 0, 1, 1], [], []>} : vector<8x32xbf16>, vector<32x576xbf16>, vector<8x576xf32> -> vector<8x576xf32>
    %386 = arith.addf %374, %385 : vector<8x576xf32>
    %c32 = arith.constant 32 : index
    %c0_260 = arith.constant 0 : index
    %c0_261 = arith.constant 0 : index
    %387 = vector.load %arg1[%c32, %c0_260, %c0_261] : memref<64x8x256xbf16, #tpu.memory_space<vmem>>, vector<1x8x256xbf16>
    %388 = vector.shape_cast %387 : vector<1x8x256xbf16> to vector<8x256xbf16>
    %cst_262 = arith.constant dense<0.000000e+00> : vector<8x32xf32>
    %389 = tpu.matmul %388, %0, %cst_262 {dimension_numbers = #tpu.dot_dimension_numbers<[1], [0], [0], [1], [0, 0, 1, 1], [], []>} : vector<8x256xbf16>, vector<256x32xbf16>, vector<8x32xf32> -> vector<8x32xf32>
    %390 = vector.broadcast %1 : vector<1x32xf32> to vector<8x32xf32>
    %391 = arith.addf %389, %390 : vector<8x32xf32>
    %cst_263 = arith.constant 0.000000e+00 : f32
    %392 = vector.broadcast %cst_263 : f32 to vector<8x32xf32>
    %393 = arith.maximumf %391, %392 : vector<8x32xf32>
    %394 = arith.truncf %393 : vector<8x32xf32> to vector<8x32xbf16>
    %c32_264 = arith.constant 32 : index
    %c0_265 = arith.constant 0 : index
    %c0_266 = arith.constant 0 : index
    %395 = vector.load %arg4[%c32_264, %c0_265, %c0_266] : memref<64x32x576xbf16, #tpu.memory_space<vmem>>, vector<1x32x576xbf16>
    %396 = vector.shape_cast %395 : vector<1x32x576xbf16> to vector<32x576xbf16>
    %cst_267 = arith.constant dense<0.000000e+00> : vector<8x576xf32>
    %397 = tpu.matmul %394, %396, %cst_267 {dimension_numbers = #tpu.dot_dimension_numbers<[1], [0], [0], [1], [0, 0, 1, 1], [], []>} : vector<8x32xbf16>, vector<32x576xbf16>, vector<8x576xf32> -> vector<8x576xf32>
    %398 = arith.addf %386, %397 : vector<8x576xf32>
    %c33 = arith.constant 33 : index
    %c0_268 = arith.constant 0 : index
    %c0_269 = arith.constant 0 : index
    %399 = vector.load %arg1[%c33, %c0_268, %c0_269] : memref<64x8x256xbf16, #tpu.memory_space<vmem>>, vector<1x8x256xbf16>
    %400 = vector.shape_cast %399 : vector<1x8x256xbf16> to vector<8x256xbf16>
    %cst_270 = arith.constant dense<0.000000e+00> : vector<8x32xf32>
    %401 = tpu.matmul %400, %0, %cst_270 {dimension_numbers = #tpu.dot_dimension_numbers<[1], [0], [0], [1], [0, 0, 1, 1], [], []>} : vector<8x256xbf16>, vector<256x32xbf16>, vector<8x32xf32> -> vector<8x32xf32>
    %402 = vector.broadcast %1 : vector<1x32xf32> to vector<8x32xf32>
    %403 = arith.addf %401, %402 : vector<8x32xf32>
    %cst_271 = arith.constant 0.000000e+00 : f32
    %404 = vector.broadcast %cst_271 : f32 to vector<8x32xf32>
    %405 = arith.maximumf %403, %404 : vector<8x32xf32>
    %406 = arith.truncf %405 : vector<8x32xf32> to vector<8x32xbf16>
    %c33_272 = arith.constant 33 : index
    %c0_273 = arith.constant 0 : index
    %c0_274 = arith.constant 0 : index
    %407 = vector.load %arg4[%c33_272, %c0_273, %c0_274] : memref<64x32x576xbf16, #tpu.memory_space<vmem>>, vector<1x32x576xbf16>
    %408 = vector.shape_cast %407 : vector<1x32x576xbf16> to vector<32x576xbf16>
    %cst_275 = arith.constant dense<0.000000e+00> : vector<8x576xf32>
    %409 = tpu.matmul %406, %408, %cst_275 {dimension_numbers = #tpu.dot_dimension_numbers<[1], [0], [0], [1], [0, 0, 1, 1], [], []>} : vector<8x32xbf16>, vector<32x576xbf16>, vector<8x576xf32> -> vector<8x576xf32>
    %410 = arith.addf %398, %409 : vector<8x576xf32>
    %c34 = arith.constant 34 : index
    %c0_276 = arith.constant 0 : index
    %c0_277 = arith.constant 0 : index
    %411 = vector.load %arg1[%c34, %c0_276, %c0_277] : memref<64x8x256xbf16, #tpu.memory_space<vmem>>, vector<1x8x256xbf16>
    %412 = vector.shape_cast %411 : vector<1x8x256xbf16> to vector<8x256xbf16>
    %cst_278 = arith.constant dense<0.000000e+00> : vector<8x32xf32>
    %413 = tpu.matmul %412, %0, %cst_278 {dimension_numbers = #tpu.dot_dimension_numbers<[1], [0], [0], [1], [0, 0, 1, 1], [], []>} : vector<8x256xbf16>, vector<256x32xbf16>, vector<8x32xf32> -> vector<8x32xf32>
    %414 = vector.broadcast %1 : vector<1x32xf32> to vector<8x32xf32>
    %415 = arith.addf %413, %414 : vector<8x32xf32>
    %cst_279 = arith.constant 0.000000e+00 : f32
    %416 = vector.broadcast %cst_279 : f32 to vector<8x32xf32>
    %417 = arith.maximumf %415, %416 : vector<8x32xf32>
    %418 = arith.truncf %417 : vector<8x32xf32> to vector<8x32xbf16>
    %c34_280 = arith.constant 34 : index
    %c0_281 = arith.constant 0 : index
    %c0_282 = arith.constant 0 : index
    %419 = vector.load %arg4[%c34_280, %c0_281, %c0_282] : memref<64x32x576xbf16, #tpu.memory_space<vmem>>, vector<1x32x576xbf16>
    %420 = vector.shape_cast %419 : vector<1x32x576xbf16> to vector<32x576xbf16>
    %cst_283 = arith.constant dense<0.000000e+00> : vector<8x576xf32>
    %421 = tpu.matmul %418, %420, %cst_283 {dimension_numbers = #tpu.dot_dimension_numbers<[1], [0], [0], [1], [0, 0, 1, 1], [], []>} : vector<8x32xbf16>, vector<32x576xbf16>, vector<8x576xf32> -> vector<8x576xf32>
    %422 = arith.addf %410, %421 : vector<8x576xf32>
    %c35 = arith.constant 35 : index
    %c0_284 = arith.constant 0 : index
    %c0_285 = arith.constant 0 : index
    %423 = vector.load %arg1[%c35, %c0_284, %c0_285] : memref<64x8x256xbf16, #tpu.memory_space<vmem>>, vector<1x8x256xbf16>
    %424 = vector.shape_cast %423 : vector<1x8x256xbf16> to vector<8x256xbf16>
    %cst_286 = arith.constant dense<0.000000e+00> : vector<8x32xf32>
    %425 = tpu.matmul %424, %0, %cst_286 {dimension_numbers = #tpu.dot_dimension_numbers<[1], [0], [0], [1], [0, 0, 1, 1], [], []>} : vector<8x256xbf16>, vector<256x32xbf16>, vector<8x32xf32> -> vector<8x32xf32>
    %426 = vector.broadcast %1 : vector<1x32xf32> to vector<8x32xf32>
    %427 = arith.addf %425, %426 : vector<8x32xf32>
    %cst_287 = arith.constant 0.000000e+00 : f32
    %428 = vector.broadcast %cst_287 : f32 to vector<8x32xf32>
    %429 = arith.maximumf %427, %428 : vector<8x32xf32>
    %430 = arith.truncf %429 : vector<8x32xf32> to vector<8x32xbf16>
    %c35_288 = arith.constant 35 : index
    %c0_289 = arith.constant 0 : index
    %c0_290 = arith.constant 0 : index
    %431 = vector.load %arg4[%c35_288, %c0_289, %c0_290] : memref<64x32x576xbf16, #tpu.memory_space<vmem>>, vector<1x32x576xbf16>
    %432 = vector.shape_cast %431 : vector<1x32x576xbf16> to vector<32x576xbf16>
    %cst_291 = arith.constant dense<0.000000e+00> : vector<8x576xf32>
    %433 = tpu.matmul %430, %432, %cst_291 {dimension_numbers = #tpu.dot_dimension_numbers<[1], [0], [0], [1], [0, 0, 1, 1], [], []>} : vector<8x32xbf16>, vector<32x576xbf16>, vector<8x576xf32> -> vector<8x576xf32>
    %434 = arith.addf %422, %433 : vector<8x576xf32>
    %c36 = arith.constant 36 : index
    %c0_292 = arith.constant 0 : index
    %c0_293 = arith.constant 0 : index
    %435 = vector.load %arg1[%c36, %c0_292, %c0_293] : memref<64x8x256xbf16, #tpu.memory_space<vmem>>, vector<1x8x256xbf16>
    %436 = vector.shape_cast %435 : vector<1x8x256xbf16> to vector<8x256xbf16>
    %cst_294 = arith.constant dense<0.000000e+00> : vector<8x32xf32>
    %437 = tpu.matmul %436, %0, %cst_294 {dimension_numbers = #tpu.dot_dimension_numbers<[1], [0], [0], [1], [0, 0, 1, 1], [], []>} : vector<8x256xbf16>, vector<256x32xbf16>, vector<8x32xf32> -> vector<8x32xf32>
    %438 = vector.broadcast %1 : vector<1x32xf32> to vector<8x32xf32>
    %439 = arith.addf %437, %438 : vector<8x32xf32>
    %cst_295 = arith.constant 0.000000e+00 : f32
    %440 = vector.broadcast %cst_295 : f32 to vector<8x32xf32>
    %441 = arith.maximumf %439, %440 : vector<8x32xf32>
    %442 = arith.truncf %441 : vector<8x32xf32> to vector<8x32xbf16>
    %c36_296 = arith.constant 36 : index
    %c0_297 = arith.constant 0 : index
    %c0_298 = arith.constant 0 : index
    %443 = vector.load %arg4[%c36_296, %c0_297, %c0_298] : memref<64x32x576xbf16, #tpu.memory_space<vmem>>, vector<1x32x576xbf16>
    %444 = vector.shape_cast %443 : vector<1x32x576xbf16> to vector<32x576xbf16>
    %cst_299 = arith.constant dense<0.000000e+00> : vector<8x576xf32>
    %445 = tpu.matmul %442, %444, %cst_299 {dimension_numbers = #tpu.dot_dimension_numbers<[1], [0], [0], [1], [0, 0, 1, 1], [], []>} : vector<8x32xbf16>, vector<32x576xbf16>, vector<8x576xf32> -> vector<8x576xf32>
    %446 = arith.addf %434, %445 : vector<8x576xf32>
    %c37 = arith.constant 37 : index
    %c0_300 = arith.constant 0 : index
    %c0_301 = arith.constant 0 : index
    %447 = vector.load %arg1[%c37, %c0_300, %c0_301] : memref<64x8x256xbf16, #tpu.memory_space<vmem>>, vector<1x8x256xbf16>
    %448 = vector.shape_cast %447 : vector<1x8x256xbf16> to vector<8x256xbf16>
    %cst_302 = arith.constant dense<0.000000e+00> : vector<8x32xf32>
    %449 = tpu.matmul %448, %0, %cst_302 {dimension_numbers = #tpu.dot_dimension_numbers<[1], [0], [0], [1], [0, 0, 1, 1], [], []>} : vector<8x256xbf16>, vector<256x32xbf16>, vector<8x32xf32> -> vector<8x32xf32>
    %450 = vector.broadcast %1 : vector<1x32xf32> to vector<8x32xf32>
    %451 = arith.addf %449, %450 : vector<8x32xf32>
    %cst_303 = arith.constant 0.000000e+00 : f32
    %452 = vector.broadcast %cst_303 : f32 to vector<8x32xf32>
    %453 = arith.maximumf %451, %452 : vector<8x32xf32>
    %454 = arith.truncf %453 : vector<8x32xf32> to vector<8x32xbf16>
    %c37_304 = arith.constant 37 : index
    %c0_305 = arith.constant 0 : index
    %c0_306 = arith.constant 0 : index
    %455 = vector.load %arg4[%c37_304, %c0_305, %c0_306] : memref<64x32x576xbf16, #tpu.memory_space<vmem>>, vector<1x32x576xbf16>
    %456 = vector.shape_cast %455 : vector<1x32x576xbf16> to vector<32x576xbf16>
    %cst_307 = arith.constant dense<0.000000e+00> : vector<8x576xf32>
    %457 = tpu.matmul %454, %456, %cst_307 {dimension_numbers = #tpu.dot_dimension_numbers<[1], [0], [0], [1], [0, 0, 1, 1], [], []>} : vector<8x32xbf16>, vector<32x576xbf16>, vector<8x576xf32> -> vector<8x576xf32>
    %458 = arith.addf %446, %457 : vector<8x576xf32>
    %c38 = arith.constant 38 : index
    %c0_308 = arith.constant 0 : index
    %c0_309 = arith.constant 0 : index
    %459 = vector.load %arg1[%c38, %c0_308, %c0_309] : memref<64x8x256xbf16, #tpu.memory_space<vmem>>, vector<1x8x256xbf16>
    %460 = vector.shape_cast %459 : vector<1x8x256xbf16> to vector<8x256xbf16>
    %cst_310 = arith.constant dense<0.000000e+00> : vector<8x32xf32>
    %461 = tpu.matmul %460, %0, %cst_310 {dimension_numbers = #tpu.dot_dimension_numbers<[1], [0], [0], [1], [0, 0, 1, 1], [], []>} : vector<8x256xbf16>, vector<256x32xbf16>, vector<8x32xf32> -> vector<8x32xf32>
    %462 = vector.broadcast %1 : vector<1x32xf32> to vector<8x32xf32>
    %463 = arith.addf %461, %462 : vector<8x32xf32>
    %cst_311 = arith.constant 0.000000e+00 : f32
    %464 = vector.broadcast %cst_311 : f32 to vector<8x32xf32>
    %465 = arith.maximumf %463, %464 : vector<8x32xf32>
    %466 = arith.truncf %465 : vector<8x32xf32> to vector<8x32xbf16>
    %c38_312 = arith.constant 38 : index
    %c0_313 = arith.constant 0 : index
    %c0_314 = arith.constant 0 : index
    %467 = vector.load %arg4[%c38_312, %c0_313, %c0_314] : memref<64x32x576xbf16, #tpu.memory_space<vmem>>, vector<1x32x576xbf16>
    %468 = vector.shape_cast %467 : vector<1x32x576xbf16> to vector<32x576xbf16>
    %cst_315 = arith.constant dense<0.000000e+00> : vector<8x576xf32>
    %469 = tpu.matmul %466, %468, %cst_315 {dimension_numbers = #tpu.dot_dimension_numbers<[1], [0], [0], [1], [0, 0, 1, 1], [], []>} : vector<8x32xbf16>, vector<32x576xbf16>, vector<8x576xf32> -> vector<8x576xf32>
    %470 = arith.addf %458, %469 : vector<8x576xf32>
    %c39 = arith.constant 39 : index
    %c0_316 = arith.constant 0 : index
    %c0_317 = arith.constant 0 : index
    %471 = vector.load %arg1[%c39, %c0_316, %c0_317] : memref<64x8x256xbf16, #tpu.memory_space<vmem>>, vector<1x8x256xbf16>
    %472 = vector.shape_cast %471 : vector<1x8x256xbf16> to vector<8x256xbf16>
    %cst_318 = arith.constant dense<0.000000e+00> : vector<8x32xf32>
    %473 = tpu.matmul %472, %0, %cst_318 {dimension_numbers = #tpu.dot_dimension_numbers<[1], [0], [0], [1], [0, 0, 1, 1], [], []>} : vector<8x256xbf16>, vector<256x32xbf16>, vector<8x32xf32> -> vector<8x32xf32>
    %474 = vector.broadcast %1 : vector<1x32xf32> to vector<8x32xf32>
    %475 = arith.addf %473, %474 : vector<8x32xf32>
    %cst_319 = arith.constant 0.000000e+00 : f32
    %476 = vector.broadcast %cst_319 : f32 to vector<8x32xf32>
    %477 = arith.maximumf %475, %476 : vector<8x32xf32>
    %478 = arith.truncf %477 : vector<8x32xf32> to vector<8x32xbf16>
    %c39_320 = arith.constant 39 : index
    %c0_321 = arith.constant 0 : index
    %c0_322 = arith.constant 0 : index
    %479 = vector.load %arg4[%c39_320, %c0_321, %c0_322] : memref<64x32x576xbf16, #tpu.memory_space<vmem>>, vector<1x32x576xbf16>
    %480 = vector.shape_cast %479 : vector<1x32x576xbf16> to vector<32x576xbf16>
    %cst_323 = arith.constant dense<0.000000e+00> : vector<8x576xf32>
    %481 = tpu.matmul %478, %480, %cst_323 {dimension_numbers = #tpu.dot_dimension_numbers<[1], [0], [0], [1], [0, 0, 1, 1], [], []>} : vector<8x32xbf16>, vector<32x576xbf16>, vector<8x576xf32> -> vector<8x576xf32>
    %482 = arith.addf %470, %481 : vector<8x576xf32>
    %c40 = arith.constant 40 : index
    %c0_324 = arith.constant 0 : index
    %c0_325 = arith.constant 0 : index
    %483 = vector.load %arg1[%c40, %c0_324, %c0_325] : memref<64x8x256xbf16, #tpu.memory_space<vmem>>, vector<1x8x256xbf16>
    %484 = vector.shape_cast %483 : vector<1x8x256xbf16> to vector<8x256xbf16>
    %cst_326 = arith.constant dense<0.000000e+00> : vector<8x32xf32>
    %485 = tpu.matmul %484, %0, %cst_326 {dimension_numbers = #tpu.dot_dimension_numbers<[1], [0], [0], [1], [0, 0, 1, 1], [], []>} : vector<8x256xbf16>, vector<256x32xbf16>, vector<8x32xf32> -> vector<8x32xf32>
    %486 = vector.broadcast %1 : vector<1x32xf32> to vector<8x32xf32>
    %487 = arith.addf %485, %486 : vector<8x32xf32>
    %cst_327 = arith.constant 0.000000e+00 : f32
    %488 = vector.broadcast %cst_327 : f32 to vector<8x32xf32>
    %489 = arith.maximumf %487, %488 : vector<8x32xf32>
    %490 = arith.truncf %489 : vector<8x32xf32> to vector<8x32xbf16>
    %c40_328 = arith.constant 40 : index
    %c0_329 = arith.constant 0 : index
    %c0_330 = arith.constant 0 : index
    %491 = vector.load %arg4[%c40_328, %c0_329, %c0_330] : memref<64x32x576xbf16, #tpu.memory_space<vmem>>, vector<1x32x576xbf16>
    %492 = vector.shape_cast %491 : vector<1x32x576xbf16> to vector<32x576xbf16>
    %cst_331 = arith.constant dense<0.000000e+00> : vector<8x576xf32>
    %493 = tpu.matmul %490, %492, %cst_331 {dimension_numbers = #tpu.dot_dimension_numbers<[1], [0], [0], [1], [0, 0, 1, 1], [], []>} : vector<8x32xbf16>, vector<32x576xbf16>, vector<8x576xf32> -> vector<8x576xf32>
    %494 = arith.addf %482, %493 : vector<8x576xf32>
    %c41 = arith.constant 41 : index
    %c0_332 = arith.constant 0 : index
    %c0_333 = arith.constant 0 : index
    %495 = vector.load %arg1[%c41, %c0_332, %c0_333] : memref<64x8x256xbf16, #tpu.memory_space<vmem>>, vector<1x8x256xbf16>
    %496 = vector.shape_cast %495 : vector<1x8x256xbf16> to vector<8x256xbf16>
    %cst_334 = arith.constant dense<0.000000e+00> : vector<8x32xf32>
    %497 = tpu.matmul %496, %0, %cst_334 {dimension_numbers = #tpu.dot_dimension_numbers<[1], [0], [0], [1], [0, 0, 1, 1], [], []>} : vector<8x256xbf16>, vector<256x32xbf16>, vector<8x32xf32> -> vector<8x32xf32>
    %498 = vector.broadcast %1 : vector<1x32xf32> to vector<8x32xf32>
    %499 = arith.addf %497, %498 : vector<8x32xf32>
    %cst_335 = arith.constant 0.000000e+00 : f32
    %500 = vector.broadcast %cst_335 : f32 to vector<8x32xf32>
    %501 = arith.maximumf %499, %500 : vector<8x32xf32>
    %502 = arith.truncf %501 : vector<8x32xf32> to vector<8x32xbf16>
    %c41_336 = arith.constant 41 : index
    %c0_337 = arith.constant 0 : index
    %c0_338 = arith.constant 0 : index
    %503 = vector.load %arg4[%c41_336, %c0_337, %c0_338] : memref<64x32x576xbf16, #tpu.memory_space<vmem>>, vector<1x32x576xbf16>
    %504 = vector.shape_cast %503 : vector<1x32x576xbf16> to vector<32x576xbf16>
    %cst_339 = arith.constant dense<0.000000e+00> : vector<8x576xf32>
    %505 = tpu.matmul %502, %504, %cst_339 {dimension_numbers = #tpu.dot_dimension_numbers<[1], [0], [0], [1], [0, 0, 1, 1], [], []>} : vector<8x32xbf16>, vector<32x576xbf16>, vector<8x576xf32> -> vector<8x576xf32>
    %506 = arith.addf %494, %505 : vector<8x576xf32>
    %c42 = arith.constant 42 : index
    %c0_340 = arith.constant 0 : index
    %c0_341 = arith.constant 0 : index
    %507 = vector.load %arg1[%c42, %c0_340, %c0_341] : memref<64x8x256xbf16, #tpu.memory_space<vmem>>, vector<1x8x256xbf16>
    %508 = vector.shape_cast %507 : vector<1x8x256xbf16> to vector<8x256xbf16>
    %cst_342 = arith.constant dense<0.000000e+00> : vector<8x32xf32>
    %509 = tpu.matmul %508, %0, %cst_342 {dimension_numbers = #tpu.dot_dimension_numbers<[1], [0], [0], [1], [0, 0, 1, 1], [], []>} : vector<8x256xbf16>, vector<256x32xbf16>, vector<8x32xf32> -> vector<8x32xf32>
    %510 = vector.broadcast %1 : vector<1x32xf32> to vector<8x32xf32>
    %511 = arith.addf %509, %510 : vector<8x32xf32>
    %cst_343 = arith.constant 0.000000e+00 : f32
    %512 = vector.broadcast %cst_343 : f32 to vector<8x32xf32>
    %513 = arith.maximumf %511, %512 : vector<8x32xf32>
    %514 = arith.truncf %513 : vector<8x32xf32> to vector<8x32xbf16>
    %c42_344 = arith.constant 42 : index
    %c0_345 = arith.constant 0 : index
    %c0_346 = arith.constant 0 : index
    %515 = vector.load %arg4[%c42_344, %c0_345, %c0_346] : memref<64x32x576xbf16, #tpu.memory_space<vmem>>, vector<1x32x576xbf16>
    %516 = vector.shape_cast %515 : vector<1x32x576xbf16> to vector<32x576xbf16>
    %cst_347 = arith.constant dense<0.000000e+00> : vector<8x576xf32>
    %517 = tpu.matmul %514, %516, %cst_347 {dimension_numbers = #tpu.dot_dimension_numbers<[1], [0], [0], [1], [0, 0, 1, 1], [], []>} : vector<8x32xbf16>, vector<32x576xbf16>, vector<8x576xf32> -> vector<8x576xf32>
    %518 = arith.addf %506, %517 : vector<8x576xf32>
    %c43 = arith.constant 43 : index
    %c0_348 = arith.constant 0 : index
    %c0_349 = arith.constant 0 : index
    %519 = vector.load %arg1[%c43, %c0_348, %c0_349] : memref<64x8x256xbf16, #tpu.memory_space<vmem>>, vector<1x8x256xbf16>
    %520 = vector.shape_cast %519 : vector<1x8x256xbf16> to vector<8x256xbf16>
    %cst_350 = arith.constant dense<0.000000e+00> : vector<8x32xf32>
    %521 = tpu.matmul %520, %0, %cst_350 {dimension_numbers = #tpu.dot_dimension_numbers<[1], [0], [0], [1], [0, 0, 1, 1], [], []>} : vector<8x256xbf16>, vector<256x32xbf16>, vector<8x32xf32> -> vector<8x32xf32>
    %522 = vector.broadcast %1 : vector<1x32xf32> to vector<8x32xf32>
    %523 = arith.addf %521, %522 : vector<8x32xf32>
    %cst_351 = arith.constant 0.000000e+00 : f32
    %524 = vector.broadcast %cst_351 : f32 to vector<8x32xf32>
    %525 = arith.maximumf %523, %524 : vector<8x32xf32>
    %526 = arith.truncf %525 : vector<8x32xf32> to vector<8x32xbf16>
    %c43_352 = arith.constant 43 : index
    %c0_353 = arith.constant 0 : index
    %c0_354 = arith.constant 0 : index
    %527 = vector.load %arg4[%c43_352, %c0_353, %c0_354] : memref<64x32x576xbf16, #tpu.memory_space<vmem>>, vector<1x32x576xbf16>
    %528 = vector.shape_cast %527 : vector<1x32x576xbf16> to vector<32x576xbf16>
    %cst_355 = arith.constant dense<0.000000e+00> : vector<8x576xf32>
    %529 = tpu.matmul %526, %528, %cst_355 {dimension_numbers = #tpu.dot_dimension_numbers<[1], [0], [0], [1], [0, 0, 1, 1], [], []>} : vector<8x32xbf16>, vector<32x576xbf16>, vector<8x576xf32> -> vector<8x576xf32>
    %530 = arith.addf %518, %529 : vector<8x576xf32>
    %c44 = arith.constant 44 : index
    %c0_356 = arith.constant 0 : index
    %c0_357 = arith.constant 0 : index
    %531 = vector.load %arg1[%c44, %c0_356, %c0_357] : memref<64x8x256xbf16, #tpu.memory_space<vmem>>, vector<1x8x256xbf16>
    %532 = vector.shape_cast %531 : vector<1x8x256xbf16> to vector<8x256xbf16>
    %cst_358 = arith.constant dense<0.000000e+00> : vector<8x32xf32>
    %533 = tpu.matmul %532, %0, %cst_358 {dimension_numbers = #tpu.dot_dimension_numbers<[1], [0], [0], [1], [0, 0, 1, 1], [], []>} : vector<8x256xbf16>, vector<256x32xbf16>, vector<8x32xf32> -> vector<8x32xf32>
    %534 = vector.broadcast %1 : vector<1x32xf32> to vector<8x32xf32>
    %535 = arith.addf %533, %534 : vector<8x32xf32>
    %cst_359 = arith.constant 0.000000e+00 : f32
    %536 = vector.broadcast %cst_359 : f32 to vector<8x32xf32>
    %537 = arith.maximumf %535, %536 : vector<8x32xf32>
    %538 = arith.truncf %537 : vector<8x32xf32> to vector<8x32xbf16>
    %c44_360 = arith.constant 44 : index
    %c0_361 = arith.constant 0 : index
    %c0_362 = arith.constant 0 : index
    %539 = vector.load %arg4[%c44_360, %c0_361, %c0_362] : memref<64x32x576xbf16, #tpu.memory_space<vmem>>, vector<1x32x576xbf16>
    %540 = vector.shape_cast %539 : vector<1x32x576xbf16> to vector<32x576xbf16>
    %cst_363 = arith.constant dense<0.000000e+00> : vector<8x576xf32>
    %541 = tpu.matmul %538, %540, %cst_363 {dimension_numbers = #tpu.dot_dimension_numbers<[1], [0], [0], [1], [0, 0, 1, 1], [], []>} : vector<8x32xbf16>, vector<32x576xbf16>, vector<8x576xf32> -> vector<8x576xf32>
    %542 = arith.addf %530, %541 : vector<8x576xf32>
    %c45 = arith.constant 45 : index
    %c0_364 = arith.constant 0 : index
    %c0_365 = arith.constant 0 : index
    %543 = vector.load %arg1[%c45, %c0_364, %c0_365] : memref<64x8x256xbf16, #tpu.memory_space<vmem>>, vector<1x8x256xbf16>
    %544 = vector.shape_cast %543 : vector<1x8x256xbf16> to vector<8x256xbf16>
    %cst_366 = arith.constant dense<0.000000e+00> : vector<8x32xf32>
    %545 = tpu.matmul %544, %0, %cst_366 {dimension_numbers = #tpu.dot_dimension_numbers<[1], [0], [0], [1], [0, 0, 1, 1], [], []>} : vector<8x256xbf16>, vector<256x32xbf16>, vector<8x32xf32> -> vector<8x32xf32>
    %546 = vector.broadcast %1 : vector<1x32xf32> to vector<8x32xf32>
    %547 = arith.addf %545, %546 : vector<8x32xf32>
    %cst_367 = arith.constant 0.000000e+00 : f32
    %548 = vector.broadcast %cst_367 : f32 to vector<8x32xf32>
    %549 = arith.maximumf %547, %548 : vector<8x32xf32>
    %550 = arith.truncf %549 : vector<8x32xf32> to vector<8x32xbf16>
    %c45_368 = arith.constant 45 : index
    %c0_369 = arith.constant 0 : index
    %c0_370 = arith.constant 0 : index
    %551 = vector.load %arg4[%c45_368, %c0_369, %c0_370] : memref<64x32x576xbf16, #tpu.memory_space<vmem>>, vector<1x32x576xbf16>
    %552 = vector.shape_cast %551 : vector<1x32x576xbf16> to vector<32x576xbf16>
    %cst_371 = arith.constant dense<0.000000e+00> : vector<8x576xf32>
    %553 = tpu.matmul %550, %552, %cst_371 {dimension_numbers = #tpu.dot_dimension_numbers<[1], [0], [0], [1], [0, 0, 1, 1], [], []>} : vector<8x32xbf16>, vector<32x576xbf16>, vector<8x576xf32> -> vector<8x576xf32>
    %554 = arith.addf %542, %553 : vector<8x576xf32>
    %c46 = arith.constant 46 : index
    %c0_372 = arith.constant 0 : index
    %c0_373 = arith.constant 0 : index
    %555 = vector.load %arg1[%c46, %c0_372, %c0_373] : memref<64x8x256xbf16, #tpu.memory_space<vmem>>, vector<1x8x256xbf16>
    %556 = vector.shape_cast %555 : vector<1x8x256xbf16> to vector<8x256xbf16>
    %cst_374 = arith.constant dense<0.000000e+00> : vector<8x32xf32>
    %557 = tpu.matmul %556, %0, %cst_374 {dimension_numbers = #tpu.dot_dimension_numbers<[1], [0], [0], [1], [0, 0, 1, 1], [], []>} : vector<8x256xbf16>, vector<256x32xbf16>, vector<8x32xf32> -> vector<8x32xf32>
    %558 = vector.broadcast %1 : vector<1x32xf32> to vector<8x32xf32>
    %559 = arith.addf %557, %558 : vector<8x32xf32>
    %cst_375 = arith.constant 0.000000e+00 : f32
    %560 = vector.broadcast %cst_375 : f32 to vector<8x32xf32>
    %561 = arith.maximumf %559, %560 : vector<8x32xf32>
    %562 = arith.truncf %561 : vector<8x32xf32> to vector<8x32xbf16>
    %c46_376 = arith.constant 46 : index
    %c0_377 = arith.constant 0 : index
    %c0_378 = arith.constant 0 : index
    %563 = vector.load %arg4[%c46_376, %c0_377, %c0_378] : memref<64x32x576xbf16, #tpu.memory_space<vmem>>, vector<1x32x576xbf16>
    %564 = vector.shape_cast %563 : vector<1x32x576xbf16> to vector<32x576xbf16>
    %cst_379 = arith.constant dense<0.000000e+00> : vector<8x576xf32>
    %565 = tpu.matmul %562, %564, %cst_379 {dimension_numbers = #tpu.dot_dimension_numbers<[1], [0], [0], [1], [0, 0, 1, 1], [], []>} : vector<8x32xbf16>, vector<32x576xbf16>, vector<8x576xf32> -> vector<8x576xf32>
    %566 = arith.addf %554, %565 : vector<8x576xf32>
    %c47 = arith.constant 47 : index
    %c0_380 = arith.constant 0 : index
    %c0_381 = arith.constant 0 : index
    %567 = vector.load %arg1[%c47, %c0_380, %c0_381] : memref<64x8x256xbf16, #tpu.memory_space<vmem>>, vector<1x8x256xbf16>
    %568 = vector.shape_cast %567 : vector<1x8x256xbf16> to vector<8x256xbf16>
    %cst_382 = arith.constant dense<0.000000e+00> : vector<8x32xf32>
    %569 = tpu.matmul %568, %0, %cst_382 {dimension_numbers = #tpu.dot_dimension_numbers<[1], [0], [0], [1], [0, 0, 1, 1], [], []>} : vector<8x256xbf16>, vector<256x32xbf16>, vector<8x32xf32> -> vector<8x32xf32>
    %570 = vector.broadcast %1 : vector<1x32xf32> to vector<8x32xf32>
    %571 = arith.addf %569, %570 : vector<8x32xf32>
    %cst_383 = arith.constant 0.000000e+00 : f32
    %572 = vector.broadcast %cst_383 : f32 to vector<8x32xf32>
    %573 = arith.maximumf %571, %572 : vector<8x32xf32>
    %574 = arith.truncf %573 : vector<8x32xf32> to vector<8x32xbf16>
    %c47_384 = arith.constant 47 : index
    %c0_385 = arith.constant 0 : index
    %c0_386 = arith.constant 0 : index
    %575 = vector.load %arg4[%c47_384, %c0_385, %c0_386] : memref<64x32x576xbf16, #tpu.memory_space<vmem>>, vector<1x32x576xbf16>
    %576 = vector.shape_cast %575 : vector<1x32x576xbf16> to vector<32x576xbf16>
    %cst_387 = arith.constant dense<0.000000e+00> : vector<8x576xf32>
    %577 = tpu.matmul %574, %576, %cst_387 {dimension_numbers = #tpu.dot_dimension_numbers<[1], [0], [0], [1], [0, 0, 1, 1], [], []>} : vector<8x32xbf16>, vector<32x576xbf16>, vector<8x576xf32> -> vector<8x576xf32>
    %578 = arith.addf %566, %577 : vector<8x576xf32>
    %c48 = arith.constant 48 : index
    %c0_388 = arith.constant 0 : index
    %c0_389 = arith.constant 0 : index
    %579 = vector.load %arg1[%c48, %c0_388, %c0_389] : memref<64x8x256xbf16, #tpu.memory_space<vmem>>, vector<1x8x256xbf16>
    %580 = vector.shape_cast %579 : vector<1x8x256xbf16> to vector<8x256xbf16>
    %cst_390 = arith.constant dense<0.000000e+00> : vector<8x32xf32>
    %581 = tpu.matmul %580, %0, %cst_390 {dimension_numbers = #tpu.dot_dimension_numbers<[1], [0], [0], [1], [0, 0, 1, 1], [], []>} : vector<8x256xbf16>, vector<256x32xbf16>, vector<8x32xf32> -> vector<8x32xf32>
    %582 = vector.broadcast %1 : vector<1x32xf32> to vector<8x32xf32>
    %583 = arith.addf %581, %582 : vector<8x32xf32>
    %cst_391 = arith.constant 0.000000e+00 : f32
    %584 = vector.broadcast %cst_391 : f32 to vector<8x32xf32>
    %585 = arith.maximumf %583, %584 : vector<8x32xf32>
    %586 = arith.truncf %585 : vector<8x32xf32> to vector<8x32xbf16>
    %c48_392 = arith.constant 48 : index
    %c0_393 = arith.constant 0 : index
    %c0_394 = arith.constant 0 : index
    %587 = vector.load %arg4[%c48_392, %c0_393, %c0_394] : memref<64x32x576xbf16, #tpu.memory_space<vmem>>, vector<1x32x576xbf16>
    %588 = vector.shape_cast %587 : vector<1x32x576xbf16> to vector<32x576xbf16>
    %cst_395 = arith.constant dense<0.000000e+00> : vector<8x576xf32>
    %589 = tpu.matmul %586, %588, %cst_395 {dimension_numbers = #tpu.dot_dimension_numbers<[1], [0], [0], [1], [0, 0, 1, 1], [], []>} : vector<8x32xbf16>, vector<32x576xbf16>, vector<8x576xf32> -> vector<8x576xf32>
    %590 = arith.addf %578, %589 : vector<8x576xf32>
    %c49 = arith.constant 49 : index
    %c0_396 = arith.constant 0 : index
    %c0_397 = arith.constant 0 : index
    %591 = vector.load %arg1[%c49, %c0_396, %c0_397] : memref<64x8x256xbf16, #tpu.memory_space<vmem>>, vector<1x8x256xbf16>
    %592 = vector.shape_cast %591 : vector<1x8x256xbf16> to vector<8x256xbf16>
    %cst_398 = arith.constant dense<0.000000e+00> : vector<8x32xf32>
    %593 = tpu.matmul %592, %0, %cst_398 {dimension_numbers = #tpu.dot_dimension_numbers<[1], [0], [0], [1], [0, 0, 1, 1], [], []>} : vector<8x256xbf16>, vector<256x32xbf16>, vector<8x32xf32> -> vector<8x32xf32>
    %594 = vector.broadcast %1 : vector<1x32xf32> to vector<8x32xf32>
    %595 = arith.addf %593, %594 : vector<8x32xf32>
    %cst_399 = arith.constant 0.000000e+00 : f32
    %596 = vector.broadcast %cst_399 : f32 to vector<8x32xf32>
    %597 = arith.maximumf %595, %596 : vector<8x32xf32>
    %598 = arith.truncf %597 : vector<8x32xf32> to vector<8x32xbf16>
    %c49_400 = arith.constant 49 : index
    %c0_401 = arith.constant 0 : index
    %c0_402 = arith.constant 0 : index
    %599 = vector.load %arg4[%c49_400, %c0_401, %c0_402] : memref<64x32x576xbf16, #tpu.memory_space<vmem>>, vector<1x32x576xbf16>
    %600 = vector.shape_cast %599 : vector<1x32x576xbf16> to vector<32x576xbf16>
    %cst_403 = arith.constant dense<0.000000e+00> : vector<8x576xf32>
    %601 = tpu.matmul %598, %600, %cst_403 {dimension_numbers = #tpu.dot_dimension_numbers<[1], [0], [0], [1], [0, 0, 1, 1], [], []>} : vector<8x32xbf16>, vector<32x576xbf16>, vector<8x576xf32> -> vector<8x576xf32>
    %602 = arith.addf %590, %601 : vector<8x576xf32>
    %c50 = arith.constant 50 : index
    %c0_404 = arith.constant 0 : index
    %c0_405 = arith.constant 0 : index
    %603 = vector.load %arg1[%c50, %c0_404, %c0_405] : memref<64x8x256xbf16, #tpu.memory_space<vmem>>, vector<1x8x256xbf16>
    %604 = vector.shape_cast %603 : vector<1x8x256xbf16> to vector<8x256xbf16>
    %cst_406 = arith.constant dense<0.000000e+00> : vector<8x32xf32>
    %605 = tpu.matmul %604, %0, %cst_406 {dimension_numbers = #tpu.dot_dimension_numbers<[1], [0], [0], [1], [0, 0, 1, 1], [], []>} : vector<8x256xbf16>, vector<256x32xbf16>, vector<8x32xf32> -> vector<8x32xf32>
    %606 = vector.broadcast %1 : vector<1x32xf32> to vector<8x32xf32>
    %607 = arith.addf %605, %606 : vector<8x32xf32>
    %cst_407 = arith.constant 0.000000e+00 : f32
    %608 = vector.broadcast %cst_407 : f32 to vector<8x32xf32>
    %609 = arith.maximumf %607, %608 : vector<8x32xf32>
    %610 = arith.truncf %609 : vector<8x32xf32> to vector<8x32xbf16>
    %c50_408 = arith.constant 50 : index
    %c0_409 = arith.constant 0 : index
    %c0_410 = arith.constant 0 : index
    %611 = vector.load %arg4[%c50_408, %c0_409, %c0_410] : memref<64x32x576xbf16, #tpu.memory_space<vmem>>, vector<1x32x576xbf16>
    %612 = vector.shape_cast %611 : vector<1x32x576xbf16> to vector<32x576xbf16>
    %cst_411 = arith.constant dense<0.000000e+00> : vector<8x576xf32>
    %613 = tpu.matmul %610, %612, %cst_411 {dimension_numbers = #tpu.dot_dimension_numbers<[1], [0], [0], [1], [0, 0, 1, 1], [], []>} : vector<8x32xbf16>, vector<32x576xbf16>, vector<8x576xf32> -> vector<8x576xf32>
    %614 = arith.addf %602, %613 : vector<8x576xf32>
    %c51 = arith.constant 51 : index
    %c0_412 = arith.constant 0 : index
    %c0_413 = arith.constant 0 : index
    %615 = vector.load %arg1[%c51, %c0_412, %c0_413] : memref<64x8x256xbf16, #tpu.memory_space<vmem>>, vector<1x8x256xbf16>
    %616 = vector.shape_cast %615 : vector<1x8x256xbf16> to vector<8x256xbf16>
    %cst_414 = arith.constant dense<0.000000e+00> : vector<8x32xf32>
    %617 = tpu.matmul %616, %0, %cst_414 {dimension_numbers = #tpu.dot_dimension_numbers<[1], [0], [0], [1], [0, 0, 1, 1], [], []>} : vector<8x256xbf16>, vector<256x32xbf16>, vector<8x32xf32> -> vector<8x32xf32>
    %618 = vector.broadcast %1 : vector<1x32xf32> to vector<8x32xf32>
    %619 = arith.addf %617, %618 : vector<8x32xf32>
    %cst_415 = arith.constant 0.000000e+00 : f32
    %620 = vector.broadcast %cst_415 : f32 to vector<8x32xf32>
    %621 = arith.maximumf %619, %620 : vector<8x32xf32>
    %622 = arith.truncf %621 : vector<8x32xf32> to vector<8x32xbf16>
    %c51_416 = arith.constant 51 : index
    %c0_417 = arith.constant 0 : index
    %c0_418 = arith.constant 0 : index
    %623 = vector.load %arg4[%c51_416, %c0_417, %c0_418] : memref<64x32x576xbf16, #tpu.memory_space<vmem>>, vector<1x32x576xbf16>
    %624 = vector.shape_cast %623 : vector<1x32x576xbf16> to vector<32x576xbf16>
    %cst_419 = arith.constant dense<0.000000e+00> : vector<8x576xf32>
    %625 = tpu.matmul %622, %624, %cst_419 {dimension_numbers = #tpu.dot_dimension_numbers<[1], [0], [0], [1], [0, 0, 1, 1], [], []>} : vector<8x32xbf16>, vector<32x576xbf16>, vector<8x576xf32> -> vector<8x576xf32>
    %626 = arith.addf %614, %625 : vector<8x576xf32>
    %c52 = arith.constant 52 : index
    %c0_420 = arith.constant 0 : index
    %c0_421 = arith.constant 0 : index
    %627 = vector.load %arg1[%c52, %c0_420, %c0_421] : memref<64x8x256xbf16, #tpu.memory_space<vmem>>, vector<1x8x256xbf16>
    %628 = vector.shape_cast %627 : vector<1x8x256xbf16> to vector<8x256xbf16>
    %cst_422 = arith.constant dense<0.000000e+00> : vector<8x32xf32>
    %629 = tpu.matmul %628, %0, %cst_422 {dimension_numbers = #tpu.dot_dimension_numbers<[1], [0], [0], [1], [0, 0, 1, 1], [], []>} : vector<8x256xbf16>, vector<256x32xbf16>, vector<8x32xf32> -> vector<8x32xf32>
    %630 = vector.broadcast %1 : vector<1x32xf32> to vector<8x32xf32>
    %631 = arith.addf %629, %630 : vector<8x32xf32>
    %cst_423 = arith.constant 0.000000e+00 : f32
    %632 = vector.broadcast %cst_423 : f32 to vector<8x32xf32>
    %633 = arith.maximumf %631, %632 : vector<8x32xf32>
    %634 = arith.truncf %633 : vector<8x32xf32> to vector<8x32xbf16>
    %c52_424 = arith.constant 52 : index
    %c0_425 = arith.constant 0 : index
    %c0_426 = arith.constant 0 : index
    %635 = vector.load %arg4[%c52_424, %c0_425, %c0_426] : memref<64x32x576xbf16, #tpu.memory_space<vmem>>, vector<1x32x576xbf16>
    %636 = vector.shape_cast %635 : vector<1x32x576xbf16> to vector<32x576xbf16>
    %cst_427 = arith.constant dense<0.000000e+00> : vector<8x576xf32>
    %637 = tpu.matmul %634, %636, %cst_427 {dimension_numbers = #tpu.dot_dimension_numbers<[1], [0], [0], [1], [0, 0, 1, 1], [], []>} : vector<8x32xbf16>, vector<32x576xbf16>, vector<8x576xf32> -> vector<8x576xf32>
    %638 = arith.addf %626, %637 : vector<8x576xf32>
    %c53 = arith.constant 53 : index
    %c0_428 = arith.constant 0 : index
    %c0_429 = arith.constant 0 : index
    %639 = vector.load %arg1[%c53, %c0_428, %c0_429] : memref<64x8x256xbf16, #tpu.memory_space<vmem>>, vector<1x8x256xbf16>
    %640 = vector.shape_cast %639 : vector<1x8x256xbf16> to vector<8x256xbf16>
    %cst_430 = arith.constant dense<0.000000e+00> : vector<8x32xf32>
    %641 = tpu.matmul %640, %0, %cst_430 {dimension_numbers = #tpu.dot_dimension_numbers<[1], [0], [0], [1], [0, 0, 1, 1], [], []>} : vector<8x256xbf16>, vector<256x32xbf16>, vector<8x32xf32> -> vector<8x32xf32>
    %642 = vector.broadcast %1 : vector<1x32xf32> to vector<8x32xf32>
    %643 = arith.addf %641, %642 : vector<8x32xf32>
    %cst_431 = arith.constant 0.000000e+00 : f32
    %644 = vector.broadcast %cst_431 : f32 to vector<8x32xf32>
    %645 = arith.maximumf %643, %644 : vector<8x32xf32>
    %646 = arith.truncf %645 : vector<8x32xf32> to vector<8x32xbf16>
    %c53_432 = arith.constant 53 : index
    %c0_433 = arith.constant 0 : index
    %c0_434 = arith.constant 0 : index
    %647 = vector.load %arg4[%c53_432, %c0_433, %c0_434] : memref<64x32x576xbf16, #tpu.memory_space<vmem>>, vector<1x32x576xbf16>
    %648 = vector.shape_cast %647 : vector<1x32x576xbf16> to vector<32x576xbf16>
    %cst_435 = arith.constant dense<0.000000e+00> : vector<8x576xf32>
    %649 = tpu.matmul %646, %648, %cst_435 {dimension_numbers = #tpu.dot_dimension_numbers<[1], [0], [0], [1], [0, 0, 1, 1], [], []>} : vector<8x32xbf16>, vector<32x576xbf16>, vector<8x576xf32> -> vector<8x576xf32>
    %650 = arith.addf %638, %649 : vector<8x576xf32>
    %c54 = arith.constant 54 : index
    %c0_436 = arith.constant 0 : index
    %c0_437 = arith.constant 0 : index
    %651 = vector.load %arg1[%c54, %c0_436, %c0_437] : memref<64x8x256xbf16, #tpu.memory_space<vmem>>, vector<1x8x256xbf16>
    %652 = vector.shape_cast %651 : vector<1x8x256xbf16> to vector<8x256xbf16>
    %cst_438 = arith.constant dense<0.000000e+00> : vector<8x32xf32>
    %653 = tpu.matmul %652, %0, %cst_438 {dimension_numbers = #tpu.dot_dimension_numbers<[1], [0], [0], [1], [0, 0, 1, 1], [], []>} : vector<8x256xbf16>, vector<256x32xbf16>, vector<8x32xf32> -> vector<8x32xf32>
    %654 = vector.broadcast %1 : vector<1x32xf32> to vector<8x32xf32>
    %655 = arith.addf %653, %654 : vector<8x32xf32>
    %cst_439 = arith.constant 0.000000e+00 : f32
    %656 = vector.broadcast %cst_439 : f32 to vector<8x32xf32>
    %657 = arith.maximumf %655, %656 : vector<8x32xf32>
    %658 = arith.truncf %657 : vector<8x32xf32> to vector<8x32xbf16>
    %c54_440 = arith.constant 54 : index
    %c0_441 = arith.constant 0 : index
    %c0_442 = arith.constant 0 : index
    %659 = vector.load %arg4[%c54_440, %c0_441, %c0_442] : memref<64x32x576xbf16, #tpu.memory_space<vmem>>, vector<1x32x576xbf16>
    %660 = vector.shape_cast %659 : vector<1x32x576xbf16> to vector<32x576xbf16>
    %cst_443 = arith.constant dense<0.000000e+00> : vector<8x576xf32>
    %661 = tpu.matmul %658, %660, %cst_443 {dimension_numbers = #tpu.dot_dimension_numbers<[1], [0], [0], [1], [0, 0, 1, 1], [], []>} : vector<8x32xbf16>, vector<32x576xbf16>, vector<8x576xf32> -> vector<8x576xf32>
    %662 = arith.addf %650, %661 : vector<8x576xf32>
    %c55 = arith.constant 55 : index
    %c0_444 = arith.constant 0 : index
    %c0_445 = arith.constant 0 : index
    %663 = vector.load %arg1[%c55, %c0_444, %c0_445] : memref<64x8x256xbf16, #tpu.memory_space<vmem>>, vector<1x8x256xbf16>
    %664 = vector.shape_cast %663 : vector<1x8x256xbf16> to vector<8x256xbf16>
    %cst_446 = arith.constant dense<0.000000e+00> : vector<8x32xf32>
    %665 = tpu.matmul %664, %0, %cst_446 {dimension_numbers = #tpu.dot_dimension_numbers<[1], [0], [0], [1], [0, 0, 1, 1], [], []>} : vector<8x256xbf16>, vector<256x32xbf16>, vector<8x32xf32> -> vector<8x32xf32>
    %666 = vector.broadcast %1 : vector<1x32xf32> to vector<8x32xf32>
    %667 = arith.addf %665, %666 : vector<8x32xf32>
    %cst_447 = arith.constant 0.000000e+00 : f32
    %668 = vector.broadcast %cst_447 : f32 to vector<8x32xf32>
    %669 = arith.maximumf %667, %668 : vector<8x32xf32>
    %670 = arith.truncf %669 : vector<8x32xf32> to vector<8x32xbf16>
    %c55_448 = arith.constant 55 : index
    %c0_449 = arith.constant 0 : index
    %c0_450 = arith.constant 0 : index
    %671 = vector.load %arg4[%c55_448, %c0_449, %c0_450] : memref<64x32x576xbf16, #tpu.memory_space<vmem>>, vector<1x32x576xbf16>
    %672 = vector.shape_cast %671 : vector<1x32x576xbf16> to vector<32x576xbf16>
    %cst_451 = arith.constant dense<0.000000e+00> : vector<8x576xf32>
    %673 = tpu.matmul %670, %672, %cst_451 {dimension_numbers = #tpu.dot_dimension_numbers<[1], [0], [0], [1], [0, 0, 1, 1], [], []>} : vector<8x32xbf16>, vector<32x576xbf16>, vector<8x576xf32> -> vector<8x576xf32>
    %674 = arith.addf %662, %673 : vector<8x576xf32>
    %c56 = arith.constant 56 : index
    %c0_452 = arith.constant 0 : index
    %c0_453 = arith.constant 0 : index
    %675 = vector.load %arg1[%c56, %c0_452, %c0_453] : memref<64x8x256xbf16, #tpu.memory_space<vmem>>, vector<1x8x256xbf16>
    %676 = vector.shape_cast %675 : vector<1x8x256xbf16> to vector<8x256xbf16>
    %cst_454 = arith.constant dense<0.000000e+00> : vector<8x32xf32>
    %677 = tpu.matmul %676, %0, %cst_454 {dimension_numbers = #tpu.dot_dimension_numbers<[1], [0], [0], [1], [0, 0, 1, 1], [], []>} : vector<8x256xbf16>, vector<256x32xbf16>, vector<8x32xf32> -> vector<8x32xf32>
    %678 = vector.broadcast %1 : vector<1x32xf32> to vector<8x32xf32>
    %679 = arith.addf %677, %678 : vector<8x32xf32>
    %cst_455 = arith.constant 0.000000e+00 : f32
    %680 = vector.broadcast %cst_455 : f32 to vector<8x32xf32>
    %681 = arith.maximumf %679, %680 : vector<8x32xf32>
    %682 = arith.truncf %681 : vector<8x32xf32> to vector<8x32xbf16>
    %c56_456 = arith.constant 56 : index
    %c0_457 = arith.constant 0 : index
    %c0_458 = arith.constant 0 : index
    %683 = vector.load %arg4[%c56_456, %c0_457, %c0_458] : memref<64x32x576xbf16, #tpu.memory_space<vmem>>, vector<1x32x576xbf16>
    %684 = vector.shape_cast %683 : vector<1x32x576xbf16> to vector<32x576xbf16>
    %cst_459 = arith.constant dense<0.000000e+00> : vector<8x576xf32>
    %685 = tpu.matmul %682, %684, %cst_459 {dimension_numbers = #tpu.dot_dimension_numbers<[1], [0], [0], [1], [0, 0, 1, 1], [], []>} : vector<8x32xbf16>, vector<32x576xbf16>, vector<8x576xf32> -> vector<8x576xf32>
    %686 = arith.addf %674, %685 : vector<8x576xf32>
    %c57 = arith.constant 57 : index
    %c0_460 = arith.constant 0 : index
    %c0_461 = arith.constant 0 : index
    %687 = vector.load %arg1[%c57, %c0_460, %c0_461] : memref<64x8x256xbf16, #tpu.memory_space<vmem>>, vector<1x8x256xbf16>
    %688 = vector.shape_cast %687 : vector<1x8x256xbf16> to vector<8x256xbf16>
    %cst_462 = arith.constant dense<0.000000e+00> : vector<8x32xf32>
    %689 = tpu.matmul %688, %0, %cst_462 {dimension_numbers = #tpu.dot_dimension_numbers<[1], [0], [0], [1], [0, 0, 1, 1], [], []>} : vector<8x256xbf16>, vector<256x32xbf16>, vector<8x32xf32> -> vector<8x32xf32>
    %690 = vector.broadcast %1 : vector<1x32xf32> to vector<8x32xf32>
    %691 = arith.addf %689, %690 : vector<8x32xf32>
    %cst_463 = arith.constant 0.000000e+00 : f32
    %692 = vector.broadcast %cst_463 : f32 to vector<8x32xf32>
    %693 = arith.maximumf %691, %692 : vector<8x32xf32>
    %694 = arith.truncf %693 : vector<8x32xf32> to vector<8x32xbf16>
    %c57_464 = arith.constant 57 : index
    %c0_465 = arith.constant 0 : index
    %c0_466 = arith.constant 0 : index
    %695 = vector.load %arg4[%c57_464, %c0_465, %c0_466] : memref<64x32x576xbf16, #tpu.memory_space<vmem>>, vector<1x32x576xbf16>
    %696 = vector.shape_cast %695 : vector<1x32x576xbf16> to vector<32x576xbf16>
    %cst_467 = arith.constant dense<0.000000e+00> : vector<8x576xf32>
    %697 = tpu.matmul %694, %696, %cst_467 {dimension_numbers = #tpu.dot_dimension_numbers<[1], [0], [0], [1], [0, 0, 1, 1], [], []>} : vector<8x32xbf16>, vector<32x576xbf16>, vector<8x576xf32> -> vector<8x576xf32>
    %698 = arith.addf %686, %697 : vector<8x576xf32>
    %c58 = arith.constant 58 : index
    %c0_468 = arith.constant 0 : index
    %c0_469 = arith.constant 0 : index
    %699 = vector.load %arg1[%c58, %c0_468, %c0_469] : memref<64x8x256xbf16, #tpu.memory_space<vmem>>, vector<1x8x256xbf16>
    %700 = vector.shape_cast %699 : vector<1x8x256xbf16> to vector<8x256xbf16>
    %cst_470 = arith.constant dense<0.000000e+00> : vector<8x32xf32>
    %701 = tpu.matmul %700, %0, %cst_470 {dimension_numbers = #tpu.dot_dimension_numbers<[1], [0], [0], [1], [0, 0, 1, 1], [], []>} : vector<8x256xbf16>, vector<256x32xbf16>, vector<8x32xf32> -> vector<8x32xf32>
    %702 = vector.broadcast %1 : vector<1x32xf32> to vector<8x32xf32>
    %703 = arith.addf %701, %702 : vector<8x32xf32>
    %cst_471 = arith.constant 0.000000e+00 : f32
    %704 = vector.broadcast %cst_471 : f32 to vector<8x32xf32>
    %705 = arith.maximumf %703, %704 : vector<8x32xf32>
    %706 = arith.truncf %705 : vector<8x32xf32> to vector<8x32xbf16>
    %c58_472 = arith.constant 58 : index
    %c0_473 = arith.constant 0 : index
    %c0_474 = arith.constant 0 : index
    %707 = vector.load %arg4[%c58_472, %c0_473, %c0_474] : memref<64x32x576xbf16, #tpu.memory_space<vmem>>, vector<1x32x576xbf16>
    %708 = vector.shape_cast %707 : vector<1x32x576xbf16> to vector<32x576xbf16>
    %cst_475 = arith.constant dense<0.000000e+00> : vector<8x576xf32>
    %709 = tpu.matmul %706, %708, %cst_475 {dimension_numbers = #tpu.dot_dimension_numbers<[1], [0], [0], [1], [0, 0, 1, 1], [], []>} : vector<8x32xbf16>, vector<32x576xbf16>, vector<8x576xf32> -> vector<8x576xf32>
    %710 = arith.addf %698, %709 : vector<8x576xf32>
    %c59 = arith.constant 59 : index
    %c0_476 = arith.constant 0 : index
    %c0_477 = arith.constant 0 : index
    %711 = vector.load %arg1[%c59, %c0_476, %c0_477] : memref<64x8x256xbf16, #tpu.memory_space<vmem>>, vector<1x8x256xbf16>
    %712 = vector.shape_cast %711 : vector<1x8x256xbf16> to vector<8x256xbf16>
    %cst_478 = arith.constant dense<0.000000e+00> : vector<8x32xf32>
    %713 = tpu.matmul %712, %0, %cst_478 {dimension_numbers = #tpu.dot_dimension_numbers<[1], [0], [0], [1], [0, 0, 1, 1], [], []>} : vector<8x256xbf16>, vector<256x32xbf16>, vector<8x32xf32> -> vector<8x32xf32>
    %714 = vector.broadcast %1 : vector<1x32xf32> to vector<8x32xf32>
    %715 = arith.addf %713, %714 : vector<8x32xf32>
    %cst_479 = arith.constant 0.000000e+00 : f32
    %716 = vector.broadcast %cst_479 : f32 to vector<8x32xf32>
    %717 = arith.maximumf %715, %716 : vector<8x32xf32>
    %718 = arith.truncf %717 : vector<8x32xf32> to vector<8x32xbf16>
    %c59_480 = arith.constant 59 : index
    %c0_481 = arith.constant 0 : index
    %c0_482 = arith.constant 0 : index
    %719 = vector.load %arg4[%c59_480, %c0_481, %c0_482] : memref<64x32x576xbf16, #tpu.memory_space<vmem>>, vector<1x32x576xbf16>
    %720 = vector.shape_cast %719 : vector<1x32x576xbf16> to vector<32x576xbf16>
    %cst_483 = arith.constant dense<0.000000e+00> : vector<8x576xf32>
    %721 = tpu.matmul %718, %720, %cst_483 {dimension_numbers = #tpu.dot_dimension_numbers<[1], [0], [0], [1], [0, 0, 1, 1], [], []>} : vector<8x32xbf16>, vector<32x576xbf16>, vector<8x576xf32> -> vector<8x576xf32>
    %722 = arith.addf %710, %721 : vector<8x576xf32>
    %c60 = arith.constant 60 : index
    %c0_484 = arith.constant 0 : index
    %c0_485 = arith.constant 0 : index
    %723 = vector.load %arg1[%c60, %c0_484, %c0_485] : memref<64x8x256xbf16, #tpu.memory_space<vmem>>, vector<1x8x256xbf16>
    %724 = vector.shape_cast %723 : vector<1x8x256xbf16> to vector<8x256xbf16>
    %cst_486 = arith.constant dense<0.000000e+00> : vector<8x32xf32>
    %725 = tpu.matmul %724, %0, %cst_486 {dimension_numbers = #tpu.dot_dimension_numbers<[1], [0], [0], [1], [0, 0, 1, 1], [], []>} : vector<8x256xbf16>, vector<256x32xbf16>, vector<8x32xf32> -> vector<8x32xf32>
    %726 = vector.broadcast %1 : vector<1x32xf32> to vector<8x32xf32>
    %727 = arith.addf %725, %726 : vector<8x32xf32>
    %cst_487 = arith.constant 0.000000e+00 : f32
    %728 = vector.broadcast %cst_487 : f32 to vector<8x32xf32>
    %729 = arith.maximumf %727, %728 : vector<8x32xf32>
    %730 = arith.truncf %729 : vector<8x32xf32> to vector<8x32xbf16>
    %c60_488 = arith.constant 60 : index
    %c0_489 = arith.constant 0 : index
    %c0_490 = arith.constant 0 : index
    %731 = vector.load %arg4[%c60_488, %c0_489, %c0_490] : memref<64x32x576xbf16, #tpu.memory_space<vmem>>, vector<1x32x576xbf16>
    %732 = vector.shape_cast %731 : vector<1x32x576xbf16> to vector<32x576xbf16>
    %cst_491 = arith.constant dense<0.000000e+00> : vector<8x576xf32>
    %733 = tpu.matmul %730, %732, %cst_491 {dimension_numbers = #tpu.dot_dimension_numbers<[1], [0], [0], [1], [0, 0, 1, 1], [], []>} : vector<8x32xbf16>, vector<32x576xbf16>, vector<8x576xf32> -> vector<8x576xf32>
    %734 = arith.addf %722, %733 : vector<8x576xf32>
    %c61 = arith.constant 61 : index
    %c0_492 = arith.constant 0 : index
    %c0_493 = arith.constant 0 : index
    %735 = vector.load %arg1[%c61, %c0_492, %c0_493] : memref<64x8x256xbf16, #tpu.memory_space<vmem>>, vector<1x8x256xbf16>
    %736 = vector.shape_cast %735 : vector<1x8x256xbf16> to vector<8x256xbf16>
    %cst_494 = arith.constant dense<0.000000e+00> : vector<8x32xf32>
    %737 = tpu.matmul %736, %0, %cst_494 {dimension_numbers = #tpu.dot_dimension_numbers<[1], [0], [0], [1], [0, 0, 1, 1], [], []>} : vector<8x256xbf16>, vector<256x32xbf16>, vector<8x32xf32> -> vector<8x32xf32>
    %738 = vector.broadcast %1 : vector<1x32xf32> to vector<8x32xf32>
    %739 = arith.addf %737, %738 : vector<8x32xf32>
    %cst_495 = arith.constant 0.000000e+00 : f32
    %740 = vector.broadcast %cst_495 : f32 to vector<8x32xf32>
    %741 = arith.maximumf %739, %740 : vector<8x32xf32>
    %742 = arith.truncf %741 : vector<8x32xf32> to vector<8x32xbf16>
    %c61_496 = arith.constant 61 : index
    %c0_497 = arith.constant 0 : index
    %c0_498 = arith.constant 0 : index
    %743 = vector.load %arg4[%c61_496, %c0_497, %c0_498] : memref<64x32x576xbf16, #tpu.memory_space<vmem>>, vector<1x32x576xbf16>
    %744 = vector.shape_cast %743 : vector<1x32x576xbf16> to vector<32x576xbf16>
    %cst_499 = arith.constant dense<0.000000e+00> : vector<8x576xf32>
    %745 = tpu.matmul %742, %744, %cst_499 {dimension_numbers = #tpu.dot_dimension_numbers<[1], [0], [0], [1], [0, 0, 1, 1], [], []>} : vector<8x32xbf16>, vector<32x576xbf16>, vector<8x576xf32> -> vector<8x576xf32>
    %746 = arith.addf %734, %745 : vector<8x576xf32>
    %c62 = arith.constant 62 : index
    %c0_500 = arith.constant 0 : index
    %c0_501 = arith.constant 0 : index
    %747 = vector.load %arg1[%c62, %c0_500, %c0_501] : memref<64x8x256xbf16, #tpu.memory_space<vmem>>, vector<1x8x256xbf16>
    %748 = vector.shape_cast %747 : vector<1x8x256xbf16> to vector<8x256xbf16>
    %cst_502 = arith.constant dense<0.000000e+00> : vector<8x32xf32>
    %749 = tpu.matmul %748, %0, %cst_502 {dimension_numbers = #tpu.dot_dimension_numbers<[1], [0], [0], [1], [0, 0, 1, 1], [], []>} : vector<8x256xbf16>, vector<256x32xbf16>, vector<8x32xf32> -> vector<8x32xf32>
    %750 = vector.broadcast %1 : vector<1x32xf32> to vector<8x32xf32>
    %751 = arith.addf %749, %750 : vector<8x32xf32>
    %cst_503 = arith.constant 0.000000e+00 : f32
    %752 = vector.broadcast %cst_503 : f32 to vector<8x32xf32>
    %753 = arith.maximumf %751, %752 : vector<8x32xf32>
    %754 = arith.truncf %753 : vector<8x32xf32> to vector<8x32xbf16>
    %c62_504 = arith.constant 62 : index
    %c0_505 = arith.constant 0 : index
    %c0_506 = arith.constant 0 : index
    %755 = vector.load %arg4[%c62_504, %c0_505, %c0_506] : memref<64x32x576xbf16, #tpu.memory_space<vmem>>, vector<1x32x576xbf16>
    %756 = vector.shape_cast %755 : vector<1x32x576xbf16> to vector<32x576xbf16>
    %cst_507 = arith.constant dense<0.000000e+00> : vector<8x576xf32>
    %757 = tpu.matmul %754, %756, %cst_507 {dimension_numbers = #tpu.dot_dimension_numbers<[1], [0], [0], [1], [0, 0, 1, 1], [], []>} : vector<8x32xbf16>, vector<32x576xbf16>, vector<8x576xf32> -> vector<8x576xf32>
    %758 = arith.addf %746, %757 : vector<8x576xf32>
    %c63 = arith.constant 63 : index
    %c0_508 = arith.constant 0 : index
    %c0_509 = arith.constant 0 : index
    %759 = vector.load %arg1[%c63, %c0_508, %c0_509] : memref<64x8x256xbf16, #tpu.memory_space<vmem>>, vector<1x8x256xbf16>
    %760 = vector.shape_cast %759 : vector<1x8x256xbf16> to vector<8x256xbf16>
    %cst_510 = arith.constant dense<0.000000e+00> : vector<8x32xf32>
    %761 = tpu.matmul %760, %0, %cst_510 {dimension_numbers = #tpu.dot_dimension_numbers<[1], [0], [0], [1], [0, 0, 1, 1], [], []>} : vector<8x256xbf16>, vector<256x32xbf16>, vector<8x32xf32> -> vector<8x32xf32>
    %762 = vector.broadcast %1 : vector<1x32xf32> to vector<8x32xf32>
    %763 = arith.addf %761, %762 : vector<8x32xf32>
    %cst_511 = arith.constant 0.000000e+00 : f32
    %764 = vector.broadcast %cst_511 : f32 to vector<8x32xf32>
    %765 = arith.maximumf %763, %764 : vector<8x32xf32>
    %766 = arith.truncf %765 : vector<8x32xf32> to vector<8x32xbf16>
    %c63_512 = arith.constant 63 : index
    %c0_513 = arith.constant 0 : index
    %c0_514 = arith.constant 0 : index
    %767 = vector.load %arg4[%c63_512, %c0_513, %c0_514] : memref<64x32x576xbf16, #tpu.memory_space<vmem>>, vector<1x32x576xbf16>
    %768 = vector.shape_cast %767 : vector<1x32x576xbf16> to vector<32x576xbf16>
    %cst_515 = arith.constant dense<0.000000e+00> : vector<8x576xf32>
    %769 = tpu.matmul %766, %768, %cst_515 {dimension_numbers = #tpu.dot_dimension_numbers<[1], [0], [0], [1], [0, 0, 1, 1], [], []>} : vector<8x32xbf16>, vector<32x576xbf16>, vector<8x576xf32> -> vector<8x576xf32>
    %770 = arith.addf %758, %769 : vector<8x576xf32>
    %c0_516 = arith.constant 0 : index
    %c0_517 = arith.constant 0 : index
    %771 = vector.load %arg5[%c0_516, %c0_517] : memref<1x576xf32, #tpu.memory_space<vmem>>, vector<1x576xf32>
    %772 = vector.broadcast %771 : vector<1x576xf32> to vector<8x576xf32>
    %773 = arith.addf %770, %772 : vector<8x576xf32>
    %cst_518 = arith.constant 0.000000e+00 : f32
    %774 = vector.broadcast %cst_518 : f32 to vector<8x576xf32>
    %775 = arith.maximumf %773, %774 : vector<8x576xf32>
    %776 = arith.truncf %775 : vector<8x576xf32> to vector<8x576xbf16>
    %c0_519 = arith.constant 0 : index
    %c0_520 = arith.constant 0 : index
    %777 = vector.load %arg6[%c0_519, %c0_520] : memref<576x64xbf16, #tpu.memory_space<vmem>>, vector<576x64xbf16>
    %cst_521 = arith.constant dense<0.000000e+00> : vector<8x64xf32>
    %778 = tpu.matmul %776, %777, %cst_521 {dimension_numbers = #tpu.dot_dimension_numbers<[1], [0], [0], [1], [0, 0, 1, 1], [], []>} : vector<8x576xbf16>, vector<576x64xbf16>, vector<8x64xf32> -> vector<8x64xf32>
    %c0_522 = arith.constant 0 : index
    %c0_523 = arith.constant 0 : index
    %779 = vector.load %arg7[%c0_522, %c0_523] : memref<1x64xf32, #tpu.memory_space<vmem>>, vector<1x64xf32>
    %780 = vector.broadcast %779 : vector<1x64xf32> to vector<8x64xf32>
    %781 = arith.addf %778, %780 : vector<8x64xf32>
    %cst_524 = arith.constant 0.000000e+00 : f32
    %782 = vector.broadcast %cst_524 : f32 to vector<8x64xf32>
    %783 = arith.maximumf %781, %782 : vector<8x64xf32>
    %784 = arith.truncf %783 : vector<8x64xf32> to vector<8x64xbf16>
    %c0_525 = arith.constant 0 : index
    %c0_526 = arith.constant 0 : index
    %785 = vector.load %arg8[%c0_525, %c0_526] : memref<64x512xbf16, #tpu.memory_space<vmem>>, vector<64x512xbf16>
    %cst_527 = arith.constant dense<0.000000e+00> : vector<8x512xf32>
    %786 = tpu.matmul %784, %785, %cst_527 {dimension_numbers = #tpu.dot_dimension_numbers<[1], [0], [0], [1], [0, 0, 1, 1], [], []>} : vector<8x64xbf16>, vector<64x512xbf16>, vector<8x512xf32> -> vector<8x512xf32>
    %c0_528 = arith.constant 0 : index
    %c0_529 = arith.constant 0 : index
    %787 = vector.load %arg9[%c0_528, %c0_529] : memref<1x512xf32, #tpu.memory_space<vmem>>, vector<1x512xf32>
    %788 = vector.broadcast %787 : vector<1x512xf32> to vector<8x512xf32>
    %789 = arith.addf %786, %788 : vector<8x512xf32>
    %cst_530 = arith.constant 0.000000e+00 : f32
    %790 = vector.broadcast %cst_530 : f32 to vector<8x512xf32>
    %791 = arith.maximumf %789, %790 : vector<8x512xf32>
    %792 = arith.truncf %791 : vector<8x512xf32> to vector<8x512xbf16>
    %c0_531 = arith.constant 0 : index
    %c0_532 = arith.constant 0 : index
    %793 = vector.load %arg10[%c0_531, %c0_532] : memref<512x128xbf16, #tpu.memory_space<vmem>>, vector<512x128xbf16>
    %cst_533 = arith.constant dense<0.000000e+00> : vector<8x128xf32>
    %794 = tpu.matmul %792, %793, %cst_533 {dimension_numbers = #tpu.dot_dimension_numbers<[1], [0], [0], [1], [0, 0, 1, 1], [], []>} : vector<8x512xbf16>, vector<512x128xbf16>, vector<8x128xf32> -> vector<8x128xf32>
    %c0_534 = arith.constant 0 : index
    %c0_535 = arith.constant 0 : index
    %795 = vector.load %arg11[%c0_534, %c0_535] : memref<1x128xf32, #tpu.memory_space<vmem>>, vector<1x128xf32>
    %796 = vector.broadcast %795 : vector<1x128xf32> to vector<8x128xf32>
    %797 = arith.addf %794, %796 : vector<8x128xf32>
    %c0_536 = arith.constant 0 : index
    %c0_537 = arith.constant 0 : index
    %798 = vector.load %arg12[%c0_536, %c0_537] : memref<8x128xf32, #tpu.memory_space<vmem>>, vector<8x128xf32>
    tpu.vector_store %arg12[%c0_536, %c0_537], %797 {strides = array<i32>} : memref<8x128xf32, #tpu.memory_space<vmem>>, vector<8x128xf32>,
    return
  }
  func.func @transform_0(%arg0: i32) -> (i32, i32, i32) {
    %c0_i32 = arith.constant 0 : i32
    %c0_i32_0 = arith.constant 0 : i32
    %c0_i32_1 = arith.constant 0 : i32
    return %c0_i32, %arg0, %c0_i32_0 : i32, i32, i32
  }
  func.func @transform_1(%arg0: i32) -> (i32, i32) {
    %c0_i32 = arith.constant 0 : i32
    %c0_i32_0 = arith.constant 0 : i32
    %c0_i32_1 = arith.constant 0 : i32
    return %c0_i32, %c0_i32_0 : i32, i32
  }
  func.func @transform_2(%arg0: i32) -> (i32, i32) {
    %c0_i32 = arith.constant 0 : i32
    %c0_i32_0 = arith.constant 0 : i32
    %c0_i32_1 = arith.constant 0 : i32
    return %c0_i32, %c0_i32_0 : i32, i32
  }
  func.func @transform_3(%arg0: i32) -> (i32, i32, i32) {
    %c0_i32 = arith.constant 0 : i32
    %c0_i32_0 = arith.constant 0 : i32
    %c0_i32_1 = arith.constant 0 : i32
    %c0_i32_2 = arith.constant 0 : i32
    return %c0_i32, %c0_i32_0, %c0_i32_1 : i32, i32, i32
  }
  func.func @transform_4(%arg0: i32) -> (i32, i32) {
    %c0_i32 = arith.constant 0 : i32
    %c0_i32_0 = arith.constant 0 : i32
    %c0_i32_1 = arith.constant 0 : i32
    return %c0_i32, %c0_i32_0 : i32, i32
  }
  func.func @transform_5(%arg0: i32) -> (i32, i32) {
    %c0_i32 = arith.constant 0 : i32
    %c0_i32_0 = arith.constant 0 : i32
    %c0_i32_1 = arith.constant 0 : i32
    return %c0_i32, %c0_i32_0 : i32, i32
  }
  func.func @transform_6(%arg0: i32) -> (i32, i32) {
    %c0_i32 = arith.constant 0 : i32
    %c0_i32_0 = arith.constant 0 : i32
    %c0_i32_1 = arith.constant 0 : i32
    return %c0_i32, %c0_i32_0 : i32, i32
  }
  func.func @transform_7(%arg0: i32) -> (i32, i32) {
    %c0_i32 = arith.constant 0 : i32
    %c0_i32_0 = arith.constant 0 : i32
    %c0_i32_1 = arith.constant 0 : i32
    return %c0_i32, %c0_i32_0 : i32, i32
  }
  func.func @transform_8(%arg0: i32) -> (i32, i32) {
    %c0_i32 = arith.constant 0 : i32
    %c0_i32_0 = arith.constant 0 : i32
    %c0_i32_1 = arith.constant 0 : i32
    return %c0_i32, %c0_i32_0 : i32, i32
  }
  func.func @transform_9(%arg0: i32) -> (i32, i32) {
    %c0_i32 = arith.constant 0 : i32
    %c0_i32_0 = arith.constant 0 : i32
    %c0_i32_1 = arith.constant 0 : i32
    return %c0_i32, %c0_i32_0 : i32, i32
  }
  func.func @transform_10(%arg0: i32) -> (i32, i32) {
    %c0_i32 = arith.constant 0 : i32
    %c0_i32_0 = arith.constant 0 : i32
    %c0_i32_1 = arith.constant 0 : i32
    return %c0_i32, %c0_i32_0 : i32, i32
  }
  func.func @transform_11(%arg0: i32) -> (i32, i32) {
    %c0_i32 = arith.constant 0 : i32
    %c0_i32_0 = arith.constant 0 : i32
    return %arg0, %c0_i32 : i32, i32
  }
}

</mosaic_0001>

<bundles_post_ra>
// kernel: dqn_forward.1
= control target key start
LH: loop header
LB: loop body
LE: loop exit
PB: predicated region body
PF: predicated region fallthrough
CT: control target
= control target key end

     0   :  { %v22335_v23 = vmov 0.0   ;;  %v22336_v30 = vmov 0   ;;  %vm22337_vm0 = vmmov 0   ;;  %vm352_vm1 = vcmask 261120   ;;  %s28267_s1 = inlined_call_operand.vmem [shape: bf16[256,32], index: 1, kind: input, shape index: {}]   ;;  %s28268_s0 = inlined_call_operand.vmem [shape: bf16[64,8,256], index: 0, kind: input, shape index: {}]   ;;  %s28269_s3 = inlined_call_operand.vmem [shape: bf16[64,32,576], index: 3, kind: input, shape index: {}]   ;;  %s28270_s2 = inlined_call_operand.vmem [shape: f32[1,32], index: 2, kind: input, shape index: {}]   ;;  %s28271_s5 = inlined_call_operand.vmem [shape: bf16[576,64], index: 5, kind: input, shape index: {}]   ;;  %s28272_s4 = inlined_call_operand.vmem [shape: f32[1,576], index: 4, kind: input, shape index: {}]   ;;  %s28273_s7 = inlined_call_operand.vmem [shape: bf16[64,512], index: 7, kind: input, shape index: {}]   ;;  %s28274_s9 = inlined_call_operand.vmem [shape: bf16[512,128], index: 9, kind: input, shape index: {}]   ;;  %s28275_s6 = inlined_call_operand.vmem [shape: f32[1,64], index: 6, kind: input, shape index: {}]   ;;  %s28276_s8 = inlined_call_operand.vmem [shape: f32[1,512], index: 8, kind: input, shape index: {}]   ;;  %s28277_s10 = inlined_call_operand.vmem [shape: f32[1,128], index: 10, kind: input, shape index: {}]   ;;  %s28278_s11 = inlined_call_operand.vmem [shape: f32[8,128], index: 11, kind: output, shape index: {}]  }
   0x1   :  { %v21034_v0 = vld [vmem:[%s28267_s1 + $0x40] sm:$0xff]   ;;  %v21036_v2 = vld [vmem:[%s28267_s1 + $0x48] sm:$0xff]   ;;  %v21038_v4 = vld [vmem:[%s28267_s1 + $0x50] sm:$0xff]   ;;  %vm16244_vm2 = vcmask 523264  }
   0x2   :  { %v21035_v1 = vld [vmem:[%s28267_s1] sm:$0xff]   ;;  %18836 = vmatprep.subr.bf16.mxu1 %v21034_v0  ;;  %18814 = vmatprep.subr.bf16.mxu0 %v21034_v0  ;;  %v21037_v3 = vld [vmem:[%s28267_s1 + $0x8] sm:$0xff]   ;;  %v21039_v5 = vld [vmem:[%s28267_s1 + $0x10] sm:$0xff]  }
   0x3   :  { %18837 = vmatpush3.bf16.msra.mxu1 %v21035_v1  ;;  %18815 = vmatpush3.bf16.msra.mxu0 %v21035_v1  ;;  %v21040_v6 = vld [vmem:[%s28267_s1 + $0x58] sm:$0xff]   ;;  %v21042_v8 = vld [vmem:[%s28267_s1 + $0x60] sm:$0xff]   ;;  %v21044_v10 = vld [vmem:[%s28267_s1 + $0x68] sm:$0xff]  }
   0x4   :  { %18838 = vmatprep.subr.bf16.mxu1 %v21036_v2  ;;  %18816 = vmatprep.subr.bf16.mxu0 %v21036_v2  ;;  %v21041_v7 = vld [vmem:[%s28267_s1 + $0x18] sm:$0xff]   ;;  %v21043_v9 = vld [vmem:[%s28267_s1 + $0x20] sm:$0xff]   ;;  %v16948_v11 = vld [vmem:[%s28268_s0 + $0x8] sm:$0xff] }
   0x5   :  { %v72_v12 = vld [vmem:[%s28268_s0] sm:$0xff]  ;;  %v16950_v13 = vcombine.high %v16948_v11, %v16948_v11  ;;  %v21045_v15 = vld [vmem:[%s28267_s1 + $0x28] sm:$0xff]   ;;  %v21046_v16 = vld [vmem:[%s28267_s1 + $0x70] sm:$0xff]   ;;  %v16949_v20 = vcombine.low %v16948_v11, %v16948_v11 }
   0x6   :  { %v16931_v14 = vcombine.high %v72_v12, %v72_v12  ;;  %v21047_v17 = vld [vmem:[%s28267_s1 + $0x30] sm:$0xff]   ;;  %v21048_v18 = vld [vmem:[%s28267_s1 + $0x78] sm:$0xff]   ;;  %v16930_v21 = vcombine.low %v72_v12, %v72_v12  ;;  %v21064_v29 = vld [vmem:[%s28269_s3 + $0xc] ss:$20 sps:$4 sm:$0xff]  }
   0x7   :  { %18839 = vmatpush3.bf16.msra.mxu1 %v21037_v3  ;;  %18817 = vmatpush3.bf16.msra.mxu0 %v21037_v3  ;;  %v21049_v19 = vld [vmem:[%s28267_s1 + $0x38] sm:$0xff]   ;;  %v21056_v22 = vld [vmem:[%s28269_s3 + $0x54] ss:$20 sps:$4 sm:$0xff]   ;;  %v21054_v24 = vld [vmem:[%s28269_s3 + $0x50] ss:$20 sps:$4 sm:$0xff]  }
   0x8   :  { %18840 = vmatprep.subr.bf16.mxu1 %v21038_v4  ;;  %18818 = vmatprep.subr.bf16.mxu0 %v21038_v4  ;;  %v21057_v25 = vld [vmem:[%s28269_s3 + $0x60] ss:$20 sps:$4 sm:$0xff]   ;;  %v21060_v26 = vld [vmem:[%s28269_s3 + $0x7c] ss:$20 sps:$4 sm:$0xff]   ;;  %v21058_v28 = vld [vmem:[%s28269_s3 + $0x78] ss:$20 sps:$4 sm:$0xff]  }
   0x9   :  { %277 = vmatprep.mubr.bf16.mxu1 %v16950_v13  ;;  %214 = vmatprep.mubr.bf16.mxu0 %v16931_v14  ;;  %v21061_v27 = vld [vmem:[%s28269_s3 + $0x88] ss:$20 sps:$4 sm:$0xff]   ;;  %v16929_v32 = vld [vmem:[%s28270_s2] ss:$0 sm:$0xff]  ;;  %v21065_v45 = vld [vmem:[%s28269_s3 + $0x58] ss:$20 sps:$4 sm:$0xff]  }
   0xa   :  { %v21067_v31 = vld [vmem:[%s28269_s3 + $0x5c] ss:$20 sps:$4 sm:$0xff]   ;;  %v21070_v48 = vld [vmem:[%s28269_s3 + $0x34] ss:$20 sps:$4 sm:$0xff]   ;;  %v21073_v49 = vld [vmem:[%s28269_s3 + $0x84] ss:$20 sps:$4 sm:$0xff]  }
   0xb   :  { %18841 = vmatpush3.bf16.msra.mxu1 %v21039_v5  ;;  %18819 = vmatpush3.bf16.msra.mxu0 %v21039_v5  ;;  %v21062_v44 = vld [vmem:[%s28269_s3 + $0x8] ss:$20 sps:$4 sm:$0xff]   ;;  %v21068_v51 = vld [vmem:[%s28269_s3 + $0x30] ss:$20 sps:$4 sm:$0xff]   ;;  %v21071_v52 = vld [vmem:[%s28269_s3 + $0x80] ss:$20 sps:$4 sm:$0xff]  }
   0xc   :  { %18842 = vmatprep.subr.bf16.mxu1 %v21040_v6  ;;  %18820 = vmatprep.subr.bf16.mxu0 %v21040_v6  ;;  %v21076_v54 = vld [vmem:[%s28269_s3 + $0x4] ss:$20 sps:$4 sm:$0xff]   ;;  %v16989_v55 = vld [vmem:[%s28268_s0 + $0x10] sm:$0xff]  ;;  %v21079_v58 = vld [vmem:[%s28269_s3 + $0x2c] ss:$20 sps:$4 sm:$0xff]  }
   0xd   :  { %v21074_v56 = vld [vmem:[%s28269_s3] ss:$20 sps:$4 sm:$0xff]   ;;  %v21077_v60 = vld [vmem:[%s28269_s3 + $0x28] ss:$20 sps:$4 sm:$0xff]   ;;  %v16991_v61 = vcombine.high %v16989_v55, %v16989_v55  ;;  %v21080_v0 = vld [vmem:[%s28269_s3 + $0x10] ss:$20 sps:$4 sm:$0xff]   ;;  %v16990_v14 = vcombine.low %v16989_v55, %v16989_v55 }
   0xe   :  { %v22521_v59 = vld [vmem:[%s28267_s1 + $0x40] sm:$0xff]   ;;  %v22538_v63 = vld [vmem:[%s28267_s1 + $0x48] sm:$0xff]   ;;  %v22554_v2 = vld [vmem:[%s28267_s1 + $0x50] sm:$0xff]  }
   0xf   :  { %18843 = vmatpush3.bf16.msra.mxu1 %v21041_v7  ;;  %18821 = vmatpush3.bf16.msra.mxu0 %v21041_v7  ;;  %v22532_v62 = vld [vmem:[%s28267_s1] sm:$0xff]   ;;  %v22548_v1 = vld [vmem:[%s28267_s1 + $0x8] sm:$0xff]   ;;  %v22565_v4 = vld [vmem:[%s28267_s1 + $0x10] sm:$0xff]  }
  0x10   :  { %18844 = vmatprep.subr.bf16.mxu1 %v21042_v8  ;;  %18822 = vmatprep.subr.bf16.mxu0 %v21042_v8  ;;  %v21081_v3 = vld [vmem:[%s28269_s3 + $0x38] ss:$20 sps:$4 sm:$0xff]   ;;  %v22586_v7 = vld [vmem:[%s28267_s1 + $0x60] sm:$0xff]   ;;  %v22612_v11 = vld [vmem:[%s28267_s1 + $0x70] sm:$0xff]  }
  0x11   :  { %v22571_v5 = vld [vmem:[%s28267_s1 + $0x58] sm:$0xff]   ;;  %v22593_v8 = vld [vmem:[%s28267_s1 + $0x20] sm:$0xff]   ;;  %v22618_v12 = vld [vmem:[%s28267_s1 + $0x30] sm:$0xff]  }
  0x12   :  { %v22580_v6 = vld [vmem:[%s28267_s1 + $0x18] sm:$0xff]  }
  0x13   :  { %18845 = vmatpush3.bf16.msra.mxu1 %v21043_v9  ;;  %18823 = vmatpush3.bf16.msra.mxu0 %v21043_v9  ;;  %v22600_v9 = vld [vmem:[%s28267_s1 + $0x68] sm:$0xff]   ;;  %v22624_v13 = vld [vmem:[%s28267_s1 + $0x78] sm:$0xff]  }
  0x14   :  { %18846 = vmatprep.subr.bf16.mxu1 %v21044_v10  ;;  %18824 = vmatprep.subr.bf16.mxu0 %v21044_v10  ;;  %v22606_v10 = vld [vmem:[%s28267_s1 + $0x28] sm:$0xff]  }
  0x17   :  { %18847 = vmatpush3.bf16.msra.mxu1 %v21045_v15  ;;  %18825 = vmatpush3.bf16.msra.mxu0 %v21045_v15  ;;  %v22630_v15 = vld [vmem:[%s28267_s1 + $0x38] sm:$0xff]  }
  0x18   :  { %18848 = vmatprep.subr.bf16.mxu1 %v21046_v16  ;;  %18826 = vmatprep.subr.bf16.mxu0 %v21046_v16  ;;  %v21086_v16 = vld [vmem:[%s28269_s3 + $0xa4] ss:$20 sps:$4 sm:$0xff]  }
  0x1b   :  { %18849 = vmatpush3.bf16.msra.mxu1 %v21047_v17  ;;  %18827 = vmatpush3.bf16.msra.mxu0 %v21047_v17  ;;  %v21084_v17 = vld [vmem:[%s28269_s3 + $0xa0] ss:$20 sps:$4 sm:$0xff]  }
  0x1c   :  { %18850 = vmatprep.subr.bf16.mxu1 %v21048_v18  ;;  %18828 = vmatprep.subr.bf16.mxu0 %v21048_v18  ;;  %v21089_v18 = vld [vmem:[%s28269_s3 + $0xcc] ss:$20 sps:$4 sm:$0xff]  }
  0x1f   :  { %18851 = vmatpush3.bf16.msra.mxu1 %v21049_v19  ;;  %18829 = vmatpush3.bf16.msra.mxu0 %v21049_v19  ;;  %v21087_v19 = vld [vmem:[%s28269_s3 + $0xc8] ss:$20 sps:$4 sm:$0xff]  }
  0x20   :  { %20507 = vmatprep.subr.bf16.mxu0 %v22335_v23  ;;  %356 = vmatprep.subr.bf16.mxu1 %v21056_v22 }
  0x22   :  { %278 = vmatmul.mubr.bf16.vlgmr.msra.gmra.mrb[0].mxu1 %v16949_v20  ;;  %215 = vmatmul.mubr.bf16.vlgmr.msra.gmra.mrb[0].mxu0 %v16930_v21  ;;  %v21092_v20 = vld [vmem:[%s28269_s3 + $0xac] ss:$20 sps:$4 sm:$0xff]  }
  0x23   :  { %357 = vmatpush1.bf16.msra.mxu1 %v21054_v24  ;;  %20508 = vmatpush3.bf16.msra.mxu0 %v21057_v25 }
  0x24   :  { %20509 = vmatprep.subr.bf16.mxu0 %v22335_v23  ;;  %358 = vmatprep.subr.bf16.mxu1 %v21060_v26 }
  0x25   :  { %388 = vmatprep.mubr.bf16.mxu1 %v22336_v30  ;;  %20511 = vmatprep.mubr.msk.bf16.mxu0 %vm22337_vm0, %v22335_v23 }
  0x27   :  { %359 = vmatpush1.bf16.msra.mxu1 %v21058_v28  ;;  %20510 = vmatpush3.bf16.msra.mxu0 %v21061_v27 }
  0x28   :  { %574 = vmatprep.subr.bf16.mxu0 %v21064_v29  ;;  %397 = vmatprep.subr.bf16.mxu1 %v21067_v31 }
  0xf5   :  { %v18852_v33 = vpop.f32.mrb[0].mxu1  ;;  %v18830_v34 = vpop.f32.mrb[0].mxu0 }
  0xf6   :  { %v18853_v35 = vpop.f32.mrb[1].mxu1  ;;  %v18831_v36 = vpop.f32.mrb[1].mxu0 }
  0xf7   :  { %v18854_v37 = vadd.f32 %v18853_v35, %v18852_v33  ;;  %v18855_v38 = vpop.f32.mrb[2].mxu1  ;;  %v18832_v39 = vadd.f32 %v18831_v36, %v18830_v34  ;;  %v18833_v40 = vpop.f32.mrb[2].mxu0 }
  0xf8   :  { %v18856_v41 = vpop.f32.mrb[3].mxu1  ;;  %v18834_v42 = vpop.f32.mrb[3].mxu0 }
  0xf9   :  { %v280_v43 = vadd.f32 %v18854_v37, %v16929_v32  ;;  %v217_v47 = vadd.f32 %v18832_v39, %v16929_v32 }
  0xfb   :  { %v285_v46 = vmax.f32 %v280_v43, 0.0  ;;  %v222_v53 = vmax.f32 %v217_v47, 0.0 }
  0xfd   :  { %v286_v50 = vpack.c.bf16 %v285_v46, %v285_v46  ;;  %v223_v57 = vpack.c.bf16 %v222_v53, %v222_v53 }
  0xff   :  { %16973 = vmatmul.mubr.msk.bf16.vlgmr.msra.gmra.mrb[4].mxu1 %vm352_vm1, %v286_v50  ;;  %20512 = vmatmul.mubr.msk.bf16.vlgmr.msra.gmra.mrb[4].mxu0 %vm352_vm1, %v286_v50 }
 0x100   :  { %575 = vmatpush1.bf16.msra.mxu0 %v21062_v44  ;;  %398 = vmatpush1.bf16.msra.mxu1 %v21065_v45 }
 0x101   :  { %576 = vmatprep.subr.bf16.mxu0 %v21070_v48  ;;  %399 = vmatprep.subr.bf16.mxu1 %v21073_v49 }
 0x102   :  { %429 = vmatprep.mubr.bf16.mxu1 %v22336_v30  ;;  %606 = vmatprep.mubr.bf16.mxu0 %v22336_v30 }
 0x104   :  { %577 = vmatpush1.bf16.msra.mxu0 %v21068_v51  ;;  %400 = vmatpush1.bf16.msra.mxu1 %v21071_v52 }
 0x105   :  { %18864 = vmatprep.subr.bf16.mxu0 %v22521_v59  ;;  %533 = vmatprep.subr.bf16.mxu1 %v21076_v54 }
 0x107   :  { %16974 = vmatmul.mubr.msk.bf16.vlgmr.msra.gmra.mrb[8].mxu1 %vm352_vm1, %v286_v50  ;;  %16987 = vmatmul.mubr.msk.bf16.vlgmr.msra.gmra.mrb[8].mxu0 %vm352_vm1, %v223_v57 }
 0x108   :  { %18865 = vmatpush3.bf16.msra.mxu0 %v22532_v62  ;;  %534 = vmatpush1.bf16.msra.mxu1 %v21074_v56 }
 0x109   :  { %18866 = vmatprep.subr.bf16.mxu0 %v22538_v63  ;;  %535 = vmatprep.subr.bf16.mxu1 %v21079_v58 }
 0x10a   :  { %565 = vmatprep.mubr.bf16.mxu1 %v22336_v30  ;;  %696 = vmatprep.mubr.bf16.mxu0 %v16991_v61  ;;  %v21090_v61 = vld [vmem:[%s28269_s3 + $0xa8] ss:$20 sps:$4 sm:$0xff]  }
 0x10c   :  { %18867 = vmatpush3.bf16.msra.mxu0 %v22548_v1  ;;  %536 = vmatpush1.bf16.msra.mxu1 %v21077_v60 }
 0x10d   :  { %18868 = vmatprep.subr.bf16.mxu0 %v22554_v2  ;;  %20515 = vmatprep.subr.bf16.mxu1 %v22335_v23 }
 0x10f   :  { %16986 = vmatmul.mubr.msk.bf16.vlgmr.msra.gmra.mrb[12].mxu1 %vm352_vm1, %v223_v57 }
 0x110   :  { %18869 = vmatpush3.bf16.msra.mxu0 %v22565_v4  ;;  %20516 = vmatpush3.bf16.msra.mxu1 %v21080_v0 }
 0x111   :  { %18870 = vmatprep.subr.bf16.mxu0 %v22571_v5  ;;  %20517 = vmatprep.subr.bf16.mxu1 %v22335_v23 }
 0x112   :  { %20519 = vmatprep.mubr.msk.bf16.mxu1 %vm22337_vm0, %v22335_v23 }
 0x114   :  { %18871 = vmatpush3.bf16.msra.mxu0 %v22580_v6  ;;  %20518 = vmatpush3.bf16.msra.mxu1 %v21081_v3  ;;  %v21095_v3 = vld [vmem:[%s28269_s3 + $0xd4] ss:$20 sps:$4 sm:$0xff]  }
 0x115   :  { %18872 = vmatprep.subr.bf16.mxu0 %v22586_v7  ;;  %774 = vmatprep.subr.bf16.mxu1 %v21086_v16  ;;  %v21096_v16 = vld [vmem:[%s28269_s3 + $0xb0] ss:$20 sps:$4 sm:$0xff]  }
 0x117   :  { %20520 = vmatmul.mubr.msk.bf16.vlgmr.msra.gmra.mrb[16].mxu1 %vm352_vm1, %v223_v57  ;;  %v22662_v57 = vld [vmem:[%s28270_s2] ss:$0 sm:$0xff] }
 0x118   :  { %18873 = vmatpush3.bf16.msra.mxu0 %v22593_v8  ;;  %806 = vmatprep.mubr.bf16.mxu1 %v22336_v30 }
 0x119   :  { %18874 = vmatprep.subr.bf16.mxu0 %v22600_v9  ;;  %775 = vmatpush1.bf16.msra.mxu1 %v21084_v17  ;;  %v21097_v17 = vld [vmem:[%s28269_s3 + $0xd8] ss:$20 sps:$4 sm:$0xff]  }
 0x11a   :  { %776 = vmatprep.subr.bf16.mxu1 %v21089_v18  ;;  %v17017_v18 = vld [vmem:[%s28268_s0 + $0x18] sm:$0xff] }
 0x11c   :  { %18875 = vmatpush3.bf16.msra.mxu0 %v22606_v10 }
 0x11d   :  { %18876 = vmatprep.subr.bf16.mxu0 %v22612_v11  ;;  %777 = vmatpush1.bf16.msra.mxu1 %v21087_v19  ;;  %v17019_v19 = vcombine.high %v17017_v18, %v17017_v18 }
 0x11e   :  { %815 = vmatprep.subr.bf16.mxu1 %v21092_v20  ;;  %v21105_v20 = vld [vmem:[%s28269_s3 + $0x11c] ss:$20 sps:$4 sm:$0xff]  }
 0x120   :  { %18877 = vmatpush3.bf16.msra.mxu0 %v22618_v12 }
 0x121   :  { %18878 = vmatprep.subr.bf16.mxu0 %v22624_v13 }
 0x124   :  { %18879 = vmatpush3.bf16.msra.mxu0 %v22630_v15 }
 0x127   :  { %697 = vmatmul.mubr.bf16.vlgmr.msra.gmra.mrb[12].mxu0 %v16990_v14  ;;  %v21093_v14 = vld [vmem:[%s28269_s3 + $0xd0] ss:$20 sps:$4 sm:$0xff]  }
 0x128   :  { %1052 = vmatprep.mubr.bf16.mxu0 %v22336_v30 }
 0x1d2   :  { %v390_v21 = vpop.f32.mrb[4].mxu1  ;;  %v472_v22 = vpop.f32.mrb[4].mxu0 }
 0x1d3   :  { %v392_v24 = vpop.f32.mrb[5].mxu1  ;;  %v20513_v25 = vpop.f32.mrb[5].mxu0 }
 0x1d4   :  { %v394_v26 = vpop.f32.mrb[6].mxu1  ;;  %v475_v27 = vpop.f32.mrb[6].mxu0 }
 0x1d5   :  { %v395_v28 = vpop.f32.mrb[7].mxu1  ;;  %v20514_v29 = vpop.f32.mrb[7].mxu0 }
 0x1da   :  { %v431_v31 = vpop.f32.mrb[8].mxu1  ;;  %v608_v32 = vpop.f32.mrb[8].mxu0 }
 0x1db   :  { %v22649_v33 = vadd.f32 %v608_v32, %v431_v31  ;;  %v433_v34 = vpop.f32.mrb[9].mxu1  ;;  %v610_v35 = vpop.f32.mrb[9].mxu0 }
 0x1dc   :  { %v22651_v36 = vadd.f32 %v610_v35, %v433_v34  ;;  %v435_v37 = vpop.f32.mrb[10].mxu1  ;;  %v612_v38 = vpop.f32.mrb[10].mxu0 }
 0x1dd   :  { %v436_v39 = vpop.f32.mrb[11].mxu1  ;;  %v613_v40 = vpop.f32.mrb[11].mxu0 }
 0x1e2   :  { %v567_v41 = vpop.f32.mrb[12].mxu1 }
 0x1e3   :  { %v22653_v42 = vadd.f32 %v567_v41, %v390_v21  ;;  %v569_v43 = vpop.f32.mrb[13].mxu1  ;;  %v21103_v21 = vld [vmem:[%s28269_s3 + $0x118] ss:$20 sps:$4 sm:$0xff]  }
 0x1e4   :  { %v22655_v44 = vadd.f32 %v569_v43, %v392_v24  ;;  %v571_v45 = vpop.f32.mrb[14].mxu1 }
 0x1e5   :  { %v572_v46 = vpop.f32.mrb[15].mxu1 }
 0x1ea   :  { %v649_v47 = vpop.f32.mrb[16].mxu1 }
 0x1eb   :  { %v22657_v48 = vadd.f32 %v649_v47, %v472_v22  ;;  %v20521_v49 = vpop.f32.mrb[17].mxu1  ;;  %v21108_v22 = vld [vmem:[%s28269_s3 + $0xfc] ss:$20 sps:$4 sm:$0xff]  }
 0x1ec   :  { %v652_v50 = vpop.f32.mrb[18].mxu1 }
 0x1ed   :  { %v20522_v51 = vpop.f32.mrb[19].mxu1 }
 0x1fa   :  { %v18880_v52 = vpop.f32.mrb[12].mxu0 }
 0x1fb   :  { %v18881_v53 = vpop.f32.mrb[13].mxu0 }
 0x1fc   :  { %v18882_v54 = vadd.f32 %v18881_v53, %v18880_v52  ;;  %v18883_v55 = vpop.f32.mrb[14].mxu0  ;;  %v21109_v52 = vld [vmem:[%s28269_s3 + $0x120] ss:$20 sps:$4 sm:$0xff]  }
 0x1fd   :  { %v18884_v56 = vpop.f32.mrb[15].mxu0  ;;  %v21112_v53 = vld [vmem:[%s28269_s3 + $0x100] ss:$20 sps:$4 sm:$0xff]  }
 0x1fe   :  { %v699_v58 = vadd.f32 %v22662_v57, %v18882_v54  ;;  %v21113_v54 = vld [vmem:[%s28269_s3 + $0x128] ss:$20 sps:$4 sm:$0xff]   ;;  %v17045_v55 = vld [vmem:[%s28268_s0 + $0x20] sm:$0xff] }
 0x1ff   :  { %v17047_v56 = vcombine.high %v17045_v55, %v17045_v55 }
 0x200   :  { %v704_v60 = vmax.f32 %v699_v58, 0.0  ;;  %v22767_v58 = vld [vmem:[%s28267_s1 + $0x40] sm:$0xff]  }
 0x202   :  { %v705_v0 = vpack.c.bf16 %v704_v60, %v704_v60  ;;  %v22774_v60 = vld [vmem:[%s28267_s1] sm:$0xff]  }
 0x204   :  { %17014 = vmatmul.mubr.msk.bf16.vlgmr.msra.gmra.mrb[20].mxu1 %vm352_vm1, %v705_v0 }
 0x205   :  { %816 = vmatpush1.bf16.msra.mxu1 %v21090_v61  ;;  %847 = vmatprep.mubr.bf16.mxu1 %v22336_v30  ;;  %v22780_v61 = vld [vmem:[%s28267_s1 + $0x48] sm:$0xff]  }
 0x206   :  { %817 = vmatprep.subr.bf16.mxu1 %v21095_v3 }
 0x209   :  { %818 = vmatpush1.bf16.msra.mxu1 %v21093_v14 }
 0x20a   :  { %20523 = vmatprep.subr.bf16.mxu1 %v22335_v23 }
 0x20c   :  { %17015 = vmatmul.mubr.msk.bf16.vlgmr.msra.gmra.mrb[24].mxu1 %vm352_vm1, %v705_v0 }
 0x20d   :  { %20524 = vmatpush3.bf16.msra.mxu1 %v21096_v16  ;;  %20527 = vmatprep.mubr.msk.bf16.mxu1 %vm22337_vm0, %v22335_v23 }
 0x20e   :  { %20525 = vmatprep.subr.bf16.mxu1 %v22335_v23 }
 0x211   :  { %20526 = vmatpush3.bf16.msra.mxu1 %v21097_v17 }
 0x212   :  { %18889 = vmatprep.subr.bf16.mxu1 %v22521_v59  ;;  %v17018_v59 = vcombine.low %v17017_v18, %v17017_v18 }
 0x214   :  { %20528 = vmatmul.mubr.msk.bf16.vlgmr.msra.gmra.mrb[28].mxu1 %vm352_vm1, %v705_v0 }
 0x215   :  { %18890 = vmatpush3.bf16.msra.mxu1 %v22532_v62  ;;  %942 = vmatprep.mubr.bf16.mxu1 %v17019_v19  ;;  %v21102_v62 = vld [vmem:[%s28269_s3 + $0xf4] ss:$20 sps:$4 sm:$0xff]  }
 0x216   :  { %18891 = vmatprep.subr.bf16.mxu1 %v22538_v63  ;;  %v21100_v63 = vld [vmem:[%s28269_s3 + $0xf0] ss:$20 sps:$4 sm:$0xff]   ;;  %1020 = vmatprep.subr.bf16.mxu0 %v21102_v62 }
 0x217   :  { %1021 = vmatpush1.bf16.msra.mxu0 %v21100_v63 }
 0x218   :  { %1022 = vmatprep.subr.bf16.mxu0 %v21105_v20 }
 0x219   :  { %18892 = vmatpush3.bf16.msra.mxu1 %v22548_v1 }
 0x21a   :  { %18893 = vmatprep.subr.bf16.mxu1 %v22554_v2 }
 0x21b   :  { %1023 = vmatpush1.bf16.msra.mxu0 %v21103_v21 }
 0x21c   :  { %1061 = vmatprep.subr.bf16.mxu0 %v21108_v22 }
 0x21d   :  { %18894 = vmatpush3.bf16.msra.mxu1 %v22565_v4 }
 0x21e   :  { %18895 = vmatprep.subr.bf16.mxu1 %v22571_v5 }
 0x221   :  { %18896 = vmatpush3.bf16.msra.mxu1 %v22580_v6 }
 0x222   :  { %18897 = vmatprep.subr.bf16.mxu1 %v22586_v7 }
 0x225   :  { %18898 = vmatpush3.bf16.msra.mxu1 %v22593_v8 }
 0x226   :  { %18899 = vmatprep.subr.bf16.mxu1 %v22600_v9 }
 0x229   :  { %18900 = vmatpush3.bf16.msra.mxu1 %v22606_v10 }
 0x22a   :  { %18901 = vmatprep.subr.bf16.mxu1 %v22612_v11 }
 0x22d   :  { %18902 = vmatpush3.bf16.msra.mxu1 %v22618_v12 }
 0x22e   :  { %18903 = vmatprep.subr.bf16.mxu1 %v22624_v13 }
 0x231   :  { %18904 = vmatpush3.bf16.msra.mxu1 %v22630_v15 }
 0x234   :  { %943 = vmatmul.mubr.bf16.vlgmr.msra.gmra.mrb[32].mxu1 %v17018_v59 }
 0x235   :  { %1298 = vmatprep.mubr.bf16.mxu1 %v22336_v30 }
 0x2d7   :  { %v808_v24 = vpop.f32.mrb[20].mxu1 }
 0x2d8   :  { %v22724_v25 = vadd.f32 %v808_v24, %v22653_v42  ;;  %v810_v26 = vpop.f32.mrb[21].mxu1 }
 0x2d9   :  { %v22727_v27 = vadd.f32 %v810_v26, %v22655_v44  ;;  %v812_v28 = vpop.f32.mrb[22].mxu1 }
 0x2da   :  { %v813_v29 = vpop.f32.mrb[23].mxu1 }
 0x2df   :  { %v849_v31 = vpop.f32.mrb[24].mxu1 }
 0x2e0   :  { %v22730_v32 = vadd.f32 %v849_v31, %v22649_v33  ;;  %v851_v34 = vpop.f32.mrb[25].mxu1  ;;  %v21122_v31 = vld [vmem:[%s28269_s3 + $0x148] ss:$20 sps:$4 sm:$0xff]  }
 0x2e1   :  { %v22733_v35 = vadd.f32 %v851_v34, %v22651_v36  ;;  %v853_v37 = vpop.f32.mrb[26].mxu1  ;;  %v21106_v36 = vld [vmem:[%s28269_s3 + $0xf8] ss:$20 sps:$4 sm:$0xff]   ;;  %v21127_v34 = vld [vmem:[%s28269_s3 + $0x174] ss:$20 sps:$4 sm:$0xff]  }
 0x2e2   :  { %v854_v38 = vpop.f32.mrb[27].mxu1  ;;  %v21128_v37 = vld [vmem:[%s28269_s3 + $0x150] ss:$20 sps:$4 sm:$0xff]  }
 0x2e3   :  { %v21129_v38 = vld [vmem:[%s28269_s3 + $0x178] ss:$20 sps:$4 sm:$0xff]  }
 0x2e7   :  { %v890_v39 = vpop.f32.mrb[28].mxu1 }
 0x2e8   :  { %v22736_v40 = vadd.f32 %v890_v39, %v22657_v48  ;;  %v20529_v41 = vpop.f32.mrb[29].mxu1  ;;  %v21111_v48 = vld [vmem:[%s28269_s3 + $0x124] ss:$20 sps:$4 sm:$0xff]   ;;  %v17073_v39 = vld [vmem:[%s28268_s0 + $0x28] sm:$0xff] }
 0x2e9   :  { %v893_v42 = vpop.f32.mrb[30].mxu1  ;;  %v22860_v41 = vld [vmem:[%s28267_s1 + $0x8] sm:$0xff]  }
 0x2ea   :  { %v20530_v43 = vpop.f32.mrb[31].mxu1  ;;  %v22866_v42 = vld [vmem:[%s28267_s1 + $0x50] sm:$0xff]  }
 0x2eb   :  { %v22872_v43 = vld [vmem:[%s28267_s1 + $0x10] sm:$0xff]  }
 0x307   :  { %v18905_v44 = vpop.f32.mrb[32].mxu1 }
 0x308   :  { %v18906_v45 = vpop.f32.mrb[33].mxu1 }
 0x309   :  { %v18907_v46 = vadd.f32 %v18906_v45, %v18905_v44  ;;  %v18908_v47 = vpop.f32.mrb[34].mxu1  ;;  %v22878_v44 = vld [vmem:[%s28267_s1 + $0x58] sm:$0xff]  }
 0x30a   :  { %v18909_v49 = vpop.f32.mrb[35].mxu1  ;;  %v22884_v45 = vld [vmem:[%s28267_s1 + $0x18] sm:$0xff]   ;;  %v22896_v47 = vld [vmem:[%s28267_s1 + $0x20] sm:$0xff]  }
 0x30b   :  { %v945_v33 = vadd.f32 %v22662_v57, %v18907_v46  ;;  %v22890_v46 = vld [vmem:[%s28267_s1 + $0x60] sm:$0xff]   ;;  %v22902_v49 = vld [vmem:[%s28267_s1 + $0x68] sm:$0xff]  }
 0x30d   :  { %v950_v50 = vmax.f32 %v945_v33, 0.0  ;;  %v22908_v33 = vld [vmem:[%s28267_s1 + $0x28] sm:$0xff]  }
 0x30f   :  { %v951_v51 = vpack.c.bf16 %v950_v50, %v950_v50  ;;  %v22914_v50 = vld [vmem:[%s28267_s1 + $0x70] sm:$0xff]  }
 0x311   :  { %17042 = vmatmul.mubr.msk.bf16.vlgmr.msra.gmra.mrb[16].mxu0 %vm352_vm1, %v951_v51 }
 0x312   :  { %1062 = vmatpush1.bf16.msra.mxu0 %v21106_v36  ;;  %1093 = vmatprep.mubr.bf16.mxu0 %v22336_v30  ;;  %v22920_v36 = vld [vmem:[%s28267_s1 + $0x30] sm:$0xff]  }
 0x313   :  { %1063 = vmatprep.subr.bf16.mxu0 %v21111_v48  ;;  %v21134_v48 = vld [vmem:[%s28269_s3 + $0x194] ss:$20 sps:$4 sm:$0xff]  }
 0x316   :  { %1064 = vmatpush1.bf16.msra.mxu0 %v21109_v52  ;;  %v21132_v52 = vld [vmem:[%s28269_s3 + $0x190] ss:$20 sps:$4 sm:$0xff]  }
 0x317   :  { %20531 = vmatprep.subr.bf16.mxu0 %v22335_v23 }
 0x319   :  { %17043 = vmatmul.mubr.msk.bf16.vlgmr.msra.gmra.mrb[20].mxu0 %vm352_vm1, %v951_v51 }
 0x31a   :  { %20532 = vmatpush3.bf16.msra.mxu0 %v21112_v53  ;;  %20535 = vmatprep.mubr.msk.bf16.mxu0 %vm22337_vm0, %v22335_v23  ;;  %v21140_v53 = vld [vmem:[%s28269_s3 + $0x19c] ss:$20 sps:$4 sm:$0xff]  }
 0x31b   :  { %20533 = vmatprep.subr.bf16.mxu0 %v22335_v23 }
 0x31e   :  { %20534 = vmatpush3.bf16.msra.mxu0 %v21113_v54 }
 0x31f   :  { %18914 = vmatprep.subr.bf16.mxu0 %v22767_v58 }
 0x321   :  { %20536 = vmatmul.mubr.msk.bf16.vlgmr.msra.gmra.mrb[24].mxu0 %vm352_vm1, %v951_v51  ;;  %v17074_v51 = vcombine.low %v17073_v39, %v17073_v39 }
 0x322   :  { %18915 = vmatpush3.bf16.msra.mxu0 %v22774_v60  ;;  %1188 = vmatprep.mubr.bf16.mxu0 %v17047_v56 }
 0x323   :  { %18916 = vmatprep.subr.bf16.mxu0 %v22780_v61 }
 0x326   :  { %18917 = vmatpush3.bf16.msra.mxu0 %v22548_v1  ;;  %v17046_v1 = vcombine.low %v17045_v55, %v17045_v55 }
 0x327   :  { %18918 = vmatprep.subr.bf16.mxu0 %v22554_v2  ;;  %v21118_v2 = vld [vmem:[%s28269_s3 + $0x144] ss:$20 sps:$4 sm:$0xff]  }
 0x328   :  { %1266 = vmatprep.subr.bf16.mxu1 %v21118_v2 }
 0x32a   :  { %18919 = vmatpush3.bf16.msra.mxu0 %v22565_v4  ;;  %v21116_v4 = vld [vmem:[%s28269_s3 + $0x140] ss:$20 sps:$4 sm:$0xff]  }
 0x32b   :  { %18920 = vmatprep.subr.bf16.mxu0 %v22571_v5  ;;  %1267 = vmatpush1.bf16.msra.mxu1 %v21116_v4  ;;  %v21121_v5 = vld [vmem:[%s28269_s3 + $0x16c] ss:$20 sps:$4 sm:$0xff]  }
 0x32c   :  { %1268 = vmatprep.subr.bf16.mxu1 %v21121_v5 }
 0x32e   :  { %18921 = vmatpush3.bf16.msra.mxu0 %v22580_v6  ;;  %v21119_v6 = vld [vmem:[%s28269_s3 + $0x168] ss:$20 sps:$4 sm:$0xff]  }
 0x32f   :  { %18922 = vmatprep.subr.bf16.mxu0 %v22586_v7  ;;  %1269 = vmatpush1.bf16.msra.mxu1 %v21119_v6  ;;  %v21124_v7 = vld [vmem:[%s28269_s3 + $0x14c] ss:$20 sps:$4 sm:$0xff]  }
 0x330   :  { %1307 = vmatprep.subr.bf16.mxu1 %v21124_v7 }
 0x332   :  { %18923 = vmatpush3.bf16.msra.mxu0 %v22593_v8 }
 0x333   :  { %18924 = vmatprep.subr.bf16.mxu0 %v22600_v9 }
 0x336   :  { %18925 = vmatpush3.bf16.msra.mxu0 %v22606_v10 }
 0x337   :  { %18926 = vmatprep.subr.bf16.mxu0 %v22612_v11 }
 0x33a   :  { %18927 = vmatpush3.bf16.msra.mxu0 %v22618_v12 }
 0x33b   :  { %18928 = vmatprep.subr.bf16.mxu0 %v22624_v13 }
 0x33e   :  { %18929 = vmatpush3.bf16.msra.mxu0 %v22630_v15 }
 0x33f   :  { %1512 = vmatprep.subr.bf16.mxu0 %v21134_v48 }
 0x341   :  { %1189 = vmatmul.mubr.bf16.vlgmr.msra.gmra.mrb[28].mxu0 %v17046_v1 }
 0x342   :  { %1544 = vmatprep.mubr.bf16.mxu0 %v22336_v30  ;;  %1513 = vmatpush1.bf16.msra.mxu0 %v21132_v52 }
 0x3e4   :  { %v1054_v8 = vpop.f32.mrb[16].mxu0 }
 0x3e5   :  { %v22813_v9 = vadd.f32 %v1054_v8, %v22724_v25  ;;  %v1056_v10 = vpop.f32.mrb[17].mxu0 }
 0x3e6   :  { %v22816_v11 = vadd.f32 %v1056_v10, %v22727_v27  ;;  %v1058_v12 = vpop.f32.mrb[18].mxu0 }
 0x3e7   :  { %v1059_v0 = vpop.f32.mrb[19].mxu0 }
 0x3ec   :  { %v1095_v3 = vpop.f32.mrb[20].mxu0 }
 0x3ed   :  { %v22819_v14 = vadd.f32 %v1095_v3, %v22730_v32  ;;  %v1097_v16 = vpop.f32.mrb[21].mxu0 }
 0x3ee   :  { %v22822_v17 = vadd.f32 %v1097_v16, %v22733_v35  ;;  %v1099_v18 = vpop.f32.mrb[22].mxu0  ;;  %v21125_v35 = vld [vmem:[%s28269_s3 + $0x170] ss:$20 sps:$4 sm:$0xff]  }
 0x3ef   :  { %v1100_v19 = vpop.f32.mrb[23].mxu0 }
 0x3f4   :  { %v1136_v59 = vpop.f32.mrb[24].mxu0 }
 0x3f5   :  { %v22825_v62 = vadd.f32 %v1136_v59, %v22736_v40  ;;  %v20537_v63 = vpop.f32.mrb[25].mxu0  ;;  %v17075_v40 = vcombine.high %v17073_v39, %v17073_v39  ;;  %v21156_v39 = vld [vmem:[%s28269_s3 + $0x1ec] ss:$20 sps:$4 sm:$0xff]  }
 0x3f6   :  { %v1139_v20 = vpop.f32.mrb[26].mxu0 }
 0x3f7   :  { %v20538_v21 = vpop.f32.mrb[27].mxu0 }
 0x414   :  { %v18930_v22 = vpop.f32.mrb[28].mxu0 }
 0x415   :  { %v18931_v24 = vpop.f32.mrb[29].mxu0 }
 0x416   :  { %v18932_v25 = vadd.f32 %v18931_v24, %v18930_v22  ;;  %v18933_v26 = vpop.f32.mrb[30].mxu0  ;;  %v21141_v24 = vld [vmem:[%s28269_s3 + $0x1c0] ss:$20 sps:$4 sm:$0xff]  }
 0x417   :  { %v18934_v27 = vpop.f32.mrb[31].mxu0  ;;  %v21145_v26 = vld [vmem:[%s28269_s3 + $0x1c8] ss:$20 sps:$4 sm:$0xff]  }
 0x418   :  { %v1191_v28 = vadd.f32 %v22662_v57, %v18932_v25  ;;  %v21144_v25 = vld [vmem:[%s28269_s3 + $0x1a0] ss:$20 sps:$4 sm:$0xff]  }
 0x419   :  { %v17101_v27 = vld [vmem:[%s28268_s0 + $0x30] sm:$0xff] }
 0x41a   :  { %v1196_v29 = vmax.f32 %v1191_v28, 0.0  ;;  %v17103_v28 = vcombine.high %v17101_v27, %v17101_v27 }
 0x41c   :  { %v1197_v32 = vpack.c.bf16 %v1196_v29, %v1196_v29  ;;  %v23000_v29 = vld [vmem:[%s28267_s1 + $0x78] sm:$0xff]  }
 0x41e   :  { %17070 = vmatmul.mubr.msk.bf16.vlgmr.msra.gmra.mrb[36].mxu1 %vm352_vm1, %v1197_v32 }
 0x41f   :  { %1308 = vmatpush1.bf16.msra.mxu1 %v21122_v31  ;;  %1339 = vmatprep.mubr.bf16.mxu1 %v22336_v30  ;;  %v17102_v31 = vcombine.low %v17101_v27, %v17101_v27  ;;  %v21172_v27 = vld [vmem:[%s28269_s3 + $0x23c] ss:$20 sps:$4 sm:$0xff]  }
 0x420   :  { %1309 = vmatprep.subr.bf16.mxu1 %v21127_v34  ;;  %v21150_v34 = vld [vmem:[%s28269_s3 + $0x1e4] ss:$20 sps:$4 sm:$0xff]  }
 0x423   :  { %1310 = vmatpush1.bf16.msra.mxu1 %v21125_v35  ;;  %v21148_v35 = vld [vmem:[%s28269_s3 + $0x1e0] ss:$20 sps:$4 sm:$0xff]  }
 0x424   :  { %20539 = vmatprep.subr.bf16.mxu1 %v22335_v23 }
 0x426   :  { %17071 = vmatmul.mubr.msk.bf16.vlgmr.msra.gmra.mrb[40].mxu1 %vm352_vm1, %v1197_v32 }
 0x427   :  { %20540 = vmatpush3.bf16.msra.mxu1 %v21128_v37  ;;  %20543 = vmatprep.mubr.msk.bf16.mxu1 %vm22337_vm0, %v22335_v23  ;;  %v21153_v37 = vld [vmem:[%s28269_s3 + $0x20c] ss:$20 sps:$4 sm:$0xff]  }
 0x428   :  { %20541 = vmatprep.subr.bf16.mxu1 %v22335_v23 }
 0x42b   :  { %20542 = vmatpush3.bf16.msra.mxu1 %v21129_v38  ;;  %v21151_v38 = vld [vmem:[%s28269_s3 + $0x208] ss:$20 sps:$4 sm:$0xff]  }
 0x42c   :  { %18939 = vmatprep.subr.bf16.mxu1 %v22767_v58 }
 0x42e   :  { %20544 = vmatmul.mubr.msk.bf16.vlgmr.msra.gmra.mrb[44].mxu1 %vm352_vm1, %v1197_v32  ;;  %v23006_v32 = vld [vmem:[%s28267_s1 + $0x38] sm:$0xff]  }
 0x42f   :  { %18940 = vmatpush3.bf16.msra.mxu1 %v22774_v60  ;;  %1434 = vmatprep.mubr.bf16.mxu1 %v17075_v40 }
 0x430   :  { %18941 = vmatprep.subr.bf16.mxu1 %v22780_v61 }
 0x433   :  { %18942 = vmatpush3.bf16.msra.mxu1 %v22860_v41 }
 0x434   :  { %18943 = vmatprep.subr.bf16.mxu1 %v22866_v42 }
 0x437   :  { %18944 = vmatpush3.bf16.msra.mxu1 %v22872_v43 }
 0x438   :  { %18945 = vmatprep.subr.bf16.mxu1 %v22878_v44 }
 0x43b   :  { %18946 = vmatpush3.bf16.msra.mxu1 %v22884_v45 }
 0x43c   :  { %18947 = vmatprep.subr.bf16.mxu1 %v22890_v46 }
 0x43f   :  { %18948 = vmatpush3.bf16.msra.mxu1 %v22896_v47 }
 0x440   :  { %18949 = vmatprep.subr.bf16.mxu1 %v22902_v49 }
 0x443   :  { %18950 = vmatpush3.bf16.msra.mxu1 %v22908_v33 }
 0x444   :  { %18951 = vmatprep.subr.bf16.mxu1 %v22914_v50 }
 0x447   :  { %18952 = vmatpush3.bf16.msra.mxu1 %v22920_v36 }
 0x448   :  { %18953 = vmatprep.subr.bf16.mxu1 %v22624_v13  ;;  %v21137_v13 = vld [vmem:[%s28269_s3 + $0x1bc] ss:$20 sps:$4 sm:$0xff]  }
 0x449   :  { %1514 = vmatprep.subr.bf16.mxu0 %v21137_v13 }
 0x44b   :  { %18954 = vmatpush3.bf16.msra.mxu1 %v22630_v15  ;;  %v21135_v15 = vld [vmem:[%s28269_s3 + $0x1b8] ss:$20 sps:$4 sm:$0xff]  }
 0x44c   :  { %1515 = vmatpush1.bf16.msra.mxu0 %v21135_v15  ;;  %1758 = vmatprep.subr.bf16.mxu1 %v21150_v34 }
 0x44d   :  { %1553 = vmatprep.subr.bf16.mxu0 %v21140_v53 }
 0x44e   :  { %1435 = vmatmul.mubr.bf16.vlgmr.msra.gmra.mrb[48].mxu1 %v17074_v51 }
 0x44f   :  { %1790 = vmatprep.mubr.bf16.mxu1 %v22336_v30  ;;  %1759 = vmatpush1.bf16.msra.mxu1 %v21148_v35 }
 0x450   :  { %1760 = vmatprep.subr.bf16.mxu1 %v21153_v37 }
 0x453   :  { %1761 = vmatpush1.bf16.msra.mxu1 %v21151_v38 }
 0x454   :  { %1799 = vmatprep.subr.bf16.mxu1 %v21156_v39 }
 0x4f1   :  { %v1300_v54 = vpop.f32.mrb[36].mxu1 }
 0x4f2   :  { %v22942_v55 = vadd.f32 %v1300_v54, %v22813_v9  ;;  %v1302_v56 = vpop.f32.mrb[37].mxu1 }
 0x4f3   :  { %v22945_v1 = vadd.f32 %v1302_v56, %v22816_v11  ;;  %v1304_v2 = vpop.f32.mrb[38].mxu1 }
 0x4f4   :  { %v1305_v4 = vpop.f32.mrb[39].mxu1 }
 0x4f9   :  { %v1341_v5 = vpop.f32.mrb[40].mxu1 }
 0x4fa   :  { %v22948_v6 = vadd.f32 %v1341_v5, %v22819_v14  ;;  %v1343_v7 = vpop.f32.mrb[41].mxu1 }
 0x4fb   :  { %v22951_v8 = vadd.f32 %v1343_v7, %v22822_v17  ;;  %v1345_v10 = vpop.f32.mrb[42].mxu1  ;;  %v21138_v17 = vld [vmem:[%s28269_s3 + $0x198] ss:$20 sps:$4 sm:$0xff]  }
 0x4fc   :  { %v1346_v12 = vpop.f32.mrb[43].mxu1 }
 0x501   :  { %v1382_v0 = vpop.f32.mrb[44].mxu1 }
 0x502   :  { %v22954_v9 = vadd.f32 %v1382_v0, %v22825_v62  ;;  %v20545_v3 = vpop.f32.mrb[45].mxu1  ;;  %v21143_v62 = vld [vmem:[%s28269_s3 + $0x1c4] ss:$20 sps:$4 sm:$0xff]  }
 0x503   :  { %v1385_v16 = vpop.f32.mrb[46].mxu1 }
 0x504   :  { %v20546_v11 = vpop.f32.mrb[47].mxu1 }
 0x521   :  { %v18955_v18 = vpop.f32.mrb[48].mxu1 }
 0x522   :  { %v18956_v19 = vpop.f32.mrb[49].mxu1 }
 0x523   :  { %v18957_v59 = vadd.f32 %v18956_v19, %v18955_v18  ;;  %v18958_v63 = vpop.f32.mrb[50].mxu1 }
 0x524   :  { %v18959_v20 = vpop.f32.mrb[51].mxu1  ;;  %v21157_v63 = vld [vmem:[%s28269_s3 + $0x210] ss:$20 sps:$4 sm:$0xff]  }
 0x525   :  { %v1437_v14 = vadd.f32 %v22662_v57, %v18957_v59  ;;  %v21160_v20 = vld [vmem:[%s28269_s3 + $0x1f0] ss:$20 sps:$4 sm:$0xff]  }
 0x527   :  { %v1442_v21 = vmax.f32 %v1437_v14, 0.0  ;;  %v21161_v14 = vld [vmem:[%s28269_s3 + $0x218] ss:$20 sps:$4 sm:$0xff]  }
 0x529   :  { %v1443_v22 = vpack.c.bf16 %v1442_v21, %v1442_v21  ;;  %v17129_v21 = vld [vmem:[%s28268_s0 + $0x38] sm:$0xff] }
 0x52b   :  { %17098 = vmatmul.mubr.msk.bf16.vlgmr.msra.gmra.mrb[32].mxu0 %vm352_vm1, %v1443_v22 }
 0x52c   :  { %1554 = vmatpush1.bf16.msra.mxu0 %v21138_v17  ;;  %1585 = vmatprep.mubr.bf16.mxu0 %v22336_v30  ;;  %v17131_v17 = vcombine.high %v17129_v21, %v17129_v21 }
 0x52d   :  { %1555 = vmatprep.subr.bf16.mxu0 %v21143_v62  ;;  %v21166_v62 = vld [vmem:[%s28269_s3 + $0x234] ss:$20 sps:$4 sm:$0xff]  }
 0x530   :  { %1556 = vmatpush1.bf16.msra.mxu0 %v21141_v24  ;;  %v21164_v24 = vld [vmem:[%s28269_s3 + $0x230] ss:$20 sps:$4 sm:$0xff]  }
 0x531   :  { %20547 = vmatprep.subr.bf16.mxu0 %v22335_v23 }
 0x533   :  { %17099 = vmatmul.mubr.msk.bf16.vlgmr.msra.gmra.mrb[36].mxu0 %vm352_vm1, %v1443_v22 }
 0x534   :  { %20548 = vmatpush3.bf16.msra.mxu0 %v21144_v25  ;;  %20551 = vmatprep.mubr.msk.bf16.mxu0 %vm22337_vm0, %v22335_v23  ;;  %v21169_v25 = vld [vmem:[%s28269_s3 + $0x25c] ss:$20 sps:$4 sm:$0xff]  }
 0x535   :  { %20549 = vmatprep.subr.bf16.mxu0 %v22335_v23 }
 0x538   :  { %20550 = vmatpush3.bf16.msra.mxu0 %v21145_v26  ;;  %v21167_v26 = vld [vmem:[%s28269_s3 + $0x258] ss:$20 sps:$4 sm:$0xff]  }
 0x539   :  { %18964 = vmatprep.subr.bf16.mxu0 %v22767_v58 }
 0x53b   :  { %20552 = vmatmul.mubr.msk.bf16.vlgmr.msra.gmra.mrb[40].mxu0 %vm352_vm1, %v1443_v22  ;;  %v17130_v22 = vcombine.low %v17129_v21, %v17129_v21  ;;  %v21188_v21 = vld [vmem:[%s28269_s3 + $0x28c] ss:$20 sps:$4 sm:$0xff]  }
 0x53c   :  { %18965 = vmatpush3.bf16.msra.mxu0 %v22774_v60  ;;  %1680 = vmatprep.mubr.bf16.mxu0 %v17103_v28 }
 0x53d   :  { %18966 = vmatprep.subr.bf16.mxu0 %v22780_v61 }
 0x540   :  { %18967 = vmatpush3.bf16.msra.mxu0 %v22860_v41 }
 0x541   :  { %18968 = vmatprep.subr.bf16.mxu0 %v22866_v42 }
 0x544   :  { %18969 = vmatpush3.bf16.msra.mxu0 %v22872_v43 }
 0x545   :  { %18970 = vmatprep.subr.bf16.mxu0 %v22878_v44 }
 0x548   :  { %18971 = vmatpush3.bf16.msra.mxu0 %v22884_v45 }
 0x549   :  { %18972 = vmatprep.subr.bf16.mxu0 %v22890_v46 }
 0x54c   :  { %18973 = vmatpush3.bf16.msra.mxu0 %v22896_v47 }
 0x54d   :  { %18974 = vmatprep.subr.bf16.mxu0 %v22902_v49 }
 0x550   :  { %18975 = vmatpush3.bf16.msra.mxu0 %v22908_v33 }
 0x551   :  { %18976 = vmatprep.subr.bf16.mxu0 %v22914_v50 }
 0x554   :  { %18977 = vmatpush3.bf16.msra.mxu0 %v22920_v36 }
 0x555   :  { %18978 = vmatprep.subr.bf16.mxu0 %v23000_v29 }
 0x558   :  { %18979 = vmatpush3.bf16.msra.mxu0 %v23006_v32 }
 0x559   :  { %2004 = vmatprep.subr.bf16.mxu0 %v21166_v62 }
 0x55b   :  { %1681 = vmatmul.mubr.bf16.vlgmr.msra.gmra.mrb[44].mxu0 %v17102_v31 }
 0x55c   :  { %2036 = vmatprep.mubr.bf16.mxu0 %v22336_v30  ;;  %2005 = vmatpush1.bf16.msra.mxu0 %v21164_v24 }
 0x55d   :  { %2006 = vmatprep.subr.bf16.mxu0 %v21169_v25 }
 0x560   :  { %2007 = vmatpush1.bf16.msra.mxu0 %v21167_v26 }
 0x561   :  { %2045 = vmatprep.subr.bf16.mxu0 %v21172_v27 }
 0x5fe   :  { %v1546_v40 = vpop.f32.mrb[32].mxu0 }
 0x5ff   :  { %v23026_v51 = vadd.f32 %v1546_v40, %v22942_v55  ;;  %v1548_v48 = vpop.f32.mrb[33].mxu0 }
 0x600   :  { %v23029_v52 = vadd.f32 %v1548_v48, %v22945_v1  ;;  %v1550_v13 = vpop.f32.mrb[34].mxu0 }
 0x601   :  { %v1551_v15 = vpop.f32.mrb[35].mxu0 }
 0x606   :  { %v1587_v53 = vpop.f32.mrb[36].mxu0 }
 0x607   :  { %v23032_v54 = vadd.f32 %v1587_v53, %v22948_v6  ;;  %v1589_v56 = vpop.f32.mrb[37].mxu0 }
 0x608   :  { %v23035_v2 = vadd.f32 %v1589_v56, %v22951_v8  ;;  %v1591_v4 = vpop.f32.mrb[38].mxu0  ;;  %v21154_v8 = vld [vmem:[%s28269_s3 + $0x1e8] ss:$20 sps:$4 sm:$0xff]  }
 0x609   :  { %v1592_v5 = vpop.f32.mrb[39].mxu0 }
 0x60e   :  { %v1628_v7 = vpop.f32.mrb[40].mxu0 }
 0x60f   :  { %v23038_v55 = vadd.f32 %v1628_v7, %v22954_v9  ;;  %v20553_v10 = vpop.f32.mrb[41].mxu0  ;;  %v21159_v9 = vld [vmem:[%s28269_s3 + $0x214] ss:$20 sps:$4 sm:$0xff]  }
 0x610   :  { %v1631_v12 = vpop.f32.mrb[42].mxu0 }
 0x611   :  { %v20554_v1 = vpop.f32.mrb[43].mxu0 }
 0x62e   :  { %v18980_v0 = vpop.f32.mrb[44].mxu0 }
 0x62f   :  { %v18981_v3 = vpop.f32.mrb[45].mxu0 }
 0x630   :  { %v18982_v16 = vadd.f32 %v18981_v3, %v18980_v0  ;;  %v18983_v11 = vpop.f32.mrb[46].mxu0 }
 0x631   :  { %v18984_v18 = vpop.f32.mrb[47].mxu0  ;;  %v21173_v11 = vld [vmem:[%s28269_s3 + $0x260] ss:$20 sps:$4 sm:$0xff]  }
 0x632   :  { %v1683_v6 = vadd.f32 %v22662_v57, %v18982_v16  ;;  %v21176_v18 = vld [vmem:[%s28269_s3 + $0x240] ss:$20 sps:$4 sm:$0xff]  }
 0x634   :  { %v1688_v19 = vmax.f32 %v1683_v6, 0.0  ;;  %v21177_v6 = vld [vmem:[%s28269_s3 + $0x268] ss:$20 sps:$4 sm:$0xff]  }
 0x636   :  { %v1689_v59 = vpack.c.bf16 %v1688_v19, %v1688_v19  ;;  %v17157_v19 = vld [vmem:[%s28268_s0 + $0x40] sm:$0xff] }
 0x638   :  { %17126 = vmatmul.mubr.msk.bf16.vlgmr.msra.gmra.mrb[52].mxu1 %vm352_vm1, %v1689_v59 }
 0x639   :  { %1800 = vmatpush1.bf16.msra.mxu1 %v21154_v8  ;;  %1831 = vmatprep.mubr.bf16.mxu1 %v22336_v30  ;;  %v17159_v8 = vcombine.high %v17157_v19, %v17157_v19 }
 0x63a   :  { %1801 = vmatprep.subr.bf16.mxu1 %v21159_v9  ;;  %v21182_v9 = vld [vmem:[%s28269_s3 + $0x284] ss:$20 sps:$4 sm:$0xff]  }
 0x63d   :  { %1802 = vmatpush1.bf16.msra.mxu1 %v21157_v63  ;;  %v21180_v63 = vld [vmem:[%s28269_s3 + $0x280] ss:$20 sps:$4 sm:$0xff]  }
 0x63e   :  { %20555 = vmatprep.subr.bf16.mxu1 %v22335_v23 }
 0x640   :  { %17127 = vmatmul.mubr.msk.bf16.vlgmr.msra.gmra.mrb[56].mxu1 %vm352_vm1, %v1689_v59 }
 0x641   :  { %20556 = vmatpush3.bf16.msra.mxu1 %v21160_v20  ;;  %20559 = vmatprep.mubr.msk.bf16.mxu1 %vm22337_vm0, %v22335_v23  ;;  %v21185_v20 = vld [vmem:[%s28269_s3 + $0x2ac] ss:$20 sps:$4 sm:$0xff]  }
 0x642   :  { %20557 = vmatprep.subr.bf16.mxu1 %v22335_v23 }
 0x645   :  { %20558 = vmatpush3.bf16.msra.mxu1 %v21161_v14  ;;  %v21183_v14 = vld [vmem:[%s28269_s3 + $0x2a8] ss:$20 sps:$4 sm:$0xff]  }
 0x646   :  { %18989 = vmatprep.subr.bf16.mxu1 %v22767_v58 }
 0x648   :  { %20560 = vmatmul.mubr.msk.bf16.vlgmr.msra.gmra.mrb[60].mxu1 %vm352_vm1, %v1689_v59  ;;  %v17158_v59 = vcombine.low %v17157_v19, %v17157_v19 }
 0x649   :  { %18990 = vmatpush3.bf16.msra.mxu1 %v22774_v60  ;;  %1926 = vmatprep.mubr.bf16.mxu1 %v17131_v17 }
 0x64a   :  { %18991 = vmatprep.subr.bf16.mxu1 %v22780_v61 }
 0x64d   :  { %18992 = vmatpush3.bf16.msra.mxu1 %v22860_v41 }
 0x64e   :  { %18993 = vmatprep.subr.bf16.mxu1 %v22866_v42 }
 0x651   :  { %18994 = vmatpush3.bf16.msra.mxu1 %v22872_v43 }
 0x652   :  { %18995 = vmatprep.subr.bf16.mxu1 %v22878_v44 }
 0x655   :  { %18996 = vmatpush3.bf16.msra.mxu1 %v22884_v45 }
 0x656   :  { %18997 = vmatprep.subr.bf16.mxu1 %v22890_v46 }
 0x659   :  { %18998 = vmatpush3.bf16.msra.mxu1 %v22896_v47 }
 0x65a   :  { %18999 = vmatprep.subr.bf16.mxu1 %v22902_v49 }
 0x65d   :  { %19000 = vmatpush3.bf16.msra.mxu1 %v22908_v33 }
 0x65e   :  { %19001 = vmatprep.subr.bf16.mxu1 %v22914_v50 }
 0x661   :  { %19002 = vmatpush3.bf16.msra.mxu1 %v22920_v36 }
 0x662   :  { %19003 = vmatprep.subr.bf16.mxu1 %v23000_v29 }
 0x665   :  { %19004 = vmatpush3.bf16.msra.mxu1 %v23006_v32 }
 0x666   :  { %2250 = vmatprep.subr.bf16.mxu1 %v21182_v9 }
 0x668   :  { %1927 = vmatmul.mubr.bf16.vlgmr.msra.gmra.mrb[64].mxu1 %v17130_v22 }
 0x669   :  { %2282 = vmatprep.mubr.bf16.mxu1 %v22336_v30  ;;  %2251 = vmatpush1.bf16.msra.mxu1 %v21180_v63 }
 0x66a   :  { %2252 = vmatprep.subr.bf16.mxu1 %v21185_v20 }
 0x66d   :  { %2253 = vmatpush1.bf16.msra.mxu1 %v21183_v14 }
 0x66e   :  { %2291 = vmatprep.subr.bf16.mxu1 %v21188_v21 }
 0x70b   :  { %v1792_v28 = vpop.f32.mrb[52].mxu1 }
 0x70c   :  { %v23100_v31 = vadd.f32 %v1792_v28, %v23026_v51  ;;  %v1794_v34 = vpop.f32.mrb[53].mxu1 }
 0x70d   :  { %v23103_v35 = vadd.f32 %v1794_v34, %v23029_v52  ;;  %v1796_v37 = vpop.f32.mrb[54].mxu1 }
 0x70e   :  { %v1797_v38 = vpop.f32.mrb[55].mxu1 }
 0x713   :  { %v1833_v39 = vpop.f32.mrb[56].mxu1 }
 0x714   :  { %v23106_v40 = vadd.f32 %v1833_v39, %v23032_v54  ;;  %v1835_v48 = vpop.f32.mrb[57].mxu1 }
 0x715   :  { %v23109_v13 = vadd.f32 %v1835_v48, %v23035_v2  ;;  %v1837_v15 = vpop.f32.mrb[58].mxu1  ;;  %v21170_v2 = vld [vmem:[%s28269_s3 + $0x238] ss:$20 sps:$4 sm:$0xff]  }
 0x716   :  { %v1838_v53 = vpop.f32.mrb[59].mxu1 }
 0x71b   :  { %v1874_v56 = vpop.f32.mrb[60].mxu1 }
 0x71c   :  { %v23112_v51 = vadd.f32 %v1874_v56, %v23038_v55  ;;  %v20561_v4 = vpop.f32.mrb[61].mxu1  ;;  %v21175_v55 = vld [vmem:[%s28269_s3 + $0x264] ss:$20 sps:$4 sm:$0xff]  }
 0x71d   :  { %v1877_v5 = vpop.f32.mrb[62].mxu1 }
 0x71e   :  { %v20562_v52 = vpop.f32.mrb[63].mxu1 }
 0x73b   :  { %v19005_v7 = vpop.f32.mrb[64].mxu1 }
 0x73c   :  { %v19006_v10 = vpop.f32.mrb[65].mxu1 }
 0x73d   :  { %v19007_v12 = vadd.f32 %v19006_v10, %v19005_v7  ;;  %v19008_v1 = vpop.f32.mrb[66].mxu1 }
 0x73e   :  { %v19009_v0 = vpop.f32.mrb[67].mxu1  ;;  %v21189_v1 = vld [vmem:[%s28269_s3 + $0x2b0] ss:$20 sps:$4 sm:$0xff]  }
 0x73f   :  { %v1929_v54 = vadd.f32 %v22662_v57, %v19007_v12  ;;  %v21193_v0 = vld [vmem:[%s28269_s3 + $0x2b8] ss:$20 sps:$4 sm:$0xff]  }
 0x741   :  { %v1934_v3 = vmax.f32 %v1929_v54, 0.0  ;;  %v17185_v54 = vld [vmem:[%s28268_s0 + $0x48] sm:$0xff] }
 0x743   :  { %v1935_v16 = vpack.c.bf16 %v1934_v3, %v1934_v3  ;;  %v17187_v3 = vcombine.high %v17185_v54, %v17185_v54 }
 0x745   :  { %17154 = vmatmul.mubr.msk.bf16.vlgmr.msra.gmra.mrb[48].mxu0 %vm352_vm1, %v1935_v16 }
 0x746   :  { %2046 = vmatpush1.bf16.msra.mxu0 %v21170_v2  ;;  %2077 = vmatprep.mubr.bf16.mxu0 %v22336_v30  ;;  %v17186_v2 = vcombine.low %v17185_v54, %v17185_v54 }
 0x747   :  { %2047 = vmatprep.subr.bf16.mxu0 %v21175_v55  ;;  %v21196_v55 = vld [vmem:[%s28269_s3 + $0x2d0] ss:$20 sps:$4 sm:$0xff]  }
 0x74a   :  { %2048 = vmatpush1.bf16.msra.mxu0 %v21173_v11  ;;  %v21201_v11 = vld [vmem:[%s28269_s3 + $0x2fc] ss:$20 sps:$4 sm:$0xff]  }
 0x74b   :  { %20563 = vmatprep.subr.bf16.mxu0 %v22335_v23 }
 0x74d   :  { %17155 = vmatmul.mubr.msk.bf16.vlgmr.msra.gmra.mrb[52].mxu0 %vm352_vm1, %v1935_v16 }
 0x74e   :  { %20564 = vmatpush3.bf16.msra.mxu0 %v21176_v18  ;;  %20567 = vmatprep.mubr.msk.bf16.mxu0 %vm22337_vm0, %v22335_v23  ;;  %v21199_v18 = vld [vmem:[%s28269_s3 + $0x2f8] ss:$20 sps:$4 sm:$0xff]  }
 0x74f   :  { %20565 = vmatprep.subr.bf16.mxu0 %v22335_v23 }
 0x752   :  { %20566 = vmatpush3.bf16.msra.mxu0 %v21177_v6  ;;  %v21204_v6 = vld [vmem:[%s28269_s3 + $0x2dc] ss:$20 sps:$4 sm:$0xff]  }
 0x753   :  { %19014 = vmatprep.subr.bf16.mxu0 %v22767_v58 }
 0x755   :  { %20568 = vmatmul.mubr.msk.bf16.vlgmr.msra.gmra.mrb[56].mxu0 %vm352_vm1, %v1935_v16  ;;  %v21198_v16 = vld [vmem:[%s28269_s3 + $0x2d4] ss:$20 sps:$4 sm:$0xff]  }
 0x756   :  { %19015 = vmatpush3.bf16.msra.mxu0 %v22774_v60  ;;  %2172 = vmatprep.mubr.bf16.mxu0 %v17159_v8 }
 0x757   :  { %19016 = vmatprep.subr.bf16.mxu0 %v22780_v61 }
 0x75a   :  { %19017 = vmatpush3.bf16.msra.mxu0 %v22860_v41 }
 0x75b   :  { %19018 = vmatprep.subr.bf16.mxu0 %v22866_v42 }
 0x75e   :  { %19019 = vmatpush3.bf16.msra.mxu0 %v22872_v43 }
 0x75f   :  { %19020 = vmatprep.subr.bf16.mxu0 %v22878_v44 }
 0x762   :  { %19021 = vmatpush3.bf16.msra.mxu0 %v22884_v45 }
 0x763   :  { %19022 = vmatprep.subr.bf16.mxu0 %v22890_v46 }
 0x766   :  { %19023 = vmatpush3.bf16.msra.mxu0 %v22896_v47 }
 0x767   :  { %19024 = vmatprep.subr.bf16.mxu0 %v22902_v49 }
 0x76a   :  { %19025 = vmatpush3.bf16.msra.mxu0 %v22908_v33 }
 0x76b   :  { %19026 = vmatprep.subr.bf16.mxu0 %v22914_v50 }
 0x76e   :  { %19027 = vmatpush3.bf16.msra.mxu0 %v22920_v36 }
 0x76f   :  { %19028 = vmatprep.subr.bf16.mxu0 %v23000_v29 }
 0x772   :  { %19029 = vmatpush3.bf16.msra.mxu0 %v23006_v32 }
 0x773   :  { %2496 = vmatprep.subr.bf16.mxu0 %v21198_v16 }
 0x775   :  { %2173 = vmatmul.mubr.bf16.vlgmr.msra.gmra.mrb[60].mxu0 %v17158_v59 }
 0x776   :  { %2528 = vmatprep.mubr.bf16.mxu0 %v22336_v30  ;;  %2497 = vmatpush1.bf16.msra.mxu0 %v21196_v55 }
 0x777   :  { %2498 = vmatprep.subr.bf16.mxu0 %v21201_v11 }
 0x77a   :  { %2499 = vmatpush1.bf16.msra.mxu0 %v21199_v18 }
 0x77b   :  { %2537 = vmatprep.subr.bf16.mxu0 %v21204_v6 }
 0x818   :  { %v2038_v17 = vpop.f32.mrb[48].mxu0 }
 0x819   :  { %v23174_v22 = vadd.f32 %v2038_v17, %v23100_v31  ;;  %v2040_v62 = vpop.f32.mrb[49].mxu0 }
 0x81a   :  { %v23177_v24 = vadd.f32 %v2040_v62, %v23103_v35  ;;  %v2042_v25 = vpop.f32.mrb[50].mxu0 }
 0x81b   :  { %v2043_v26 = vpop.f32.mrb[51].mxu0 }
 0x820   :  { %v2079_v27 = vpop.f32.mrb[52].mxu0 }
 0x821   :  { %v23180_v28 = vadd.f32 %v2079_v27, %v23106_v40  ;;  %v2081_v34 = vpop.f32.mrb[53].mxu0 }
 0x822   :  { %v23183_v37 = vadd.f32 %v2081_v34, %v23109_v13  ;;  %v2083_v38 = vpop.f32.mrb[54].mxu0  ;;  %v21186_v13 = vld [vmem:[%s28269_s3 + $0x288] ss:$20 sps:$4 sm:$0xff]  }
 0x823   :  { %v2084_v39 = vpop.f32.mrb[55].mxu0 }
 0x828   :  { %v2120_v48 = vpop.f32.mrb[56].mxu0 }
 0x829   :  { %v23186_v31 = vadd.f32 %v2120_v48, %v23112_v51  ;;  %v20569_v15 = vpop.f32.mrb[57].mxu0  ;;  %v21191_v51 = vld [vmem:[%s28269_s3 + $0x2b4] ss:$20 sps:$4 sm:$0xff]  }
 0x82a   :  { %v2123_v53 = vpop.f32.mrb[58].mxu0 }
 0x82b   :  { %v20570_v35 = vpop.f32.mrb[59].mxu0 }
 0x848   :  { %v19030_v56 = vpop.f32.mrb[60].mxu0 }
 0x849   :  { %v19031_v4 = vpop.f32.mrb[61].mxu0 }
 0x84a   :  { %v19032_v5 = vadd.f32 %v19031_v4, %v19030_v56  ;;  %v19033_v52 = vpop.f32.mrb[62].mxu0 }
 0x84b   :  { %v19034_v7 = vpop.f32.mrb[63].mxu0  ;;  %v21205_v52 = vld [vmem:[%s28269_s3 + $0x300] ss:$20 sps:$4 sm:$0xff]  }
 0x84c   :  { %v2175_v40 = vadd.f32 %v22662_v57, %v19032_v5  ;;  %v21192_v57 = vld [vmem:[%s28269_s3 + $0x290] ss:$20 sps:$4 sm:$0xff]   ;;  %v21208_v7 = vld [vmem:[%s28269_s3 + $0x2e0] ss:$20 sps:$4 sm:$0xff]  }
 0x84d   :  { %v21207_v5 = vld [vmem:[%s28269_s3 + $0x304] ss:$20 sps:$4 sm:$0xff]  }
 0x84e   :  { %v2180_v10 = vmax.f32 %v2175_v40, 0.0  ;;  %v21209_v40 = vld [vmem:[%s28269_s3 + $0x308] ss:$20 sps:$4 sm:$0xff]  }
 0x850   :  { %v2181_v12 = vpack.c.bf16 %v2180_v10, %v2180_v10  ;;  %v17213_v10 = vld [vmem:[%s28268_s0 + $0x50] sm:$0xff] }
 0x852   :  { %17182 = vmatmul.mubr.msk.bf16.vlgmr.msra.gmra.mrb[68].mxu1 %vm352_vm1, %v2181_v12 }
 0x853   :  { %2292 = vmatpush1.bf16.msra.mxu1 %v21186_v13  ;;  %2323 = vmatprep.mubr.bf16.mxu1 %v22336_v30  ;;  %v17215_v13 = vcombine.high %v17213_v10, %v17213_v10 }
 0x854   :  { %2293 = vmatprep.subr.bf16.mxu1 %v21191_v51  ;;  %v21215_v51 = vld [vmem:[%s28269_s3 + $0x348] ss:$20 sps:$4 sm:$0xff]  }
 0x857   :  { %2294 = vmatpush1.bf16.msra.mxu1 %v21189_v1  ;;  %v21220_v1 = vld [vmem:[%s28269_s3 + $0x32c] ss:$20 sps:$4 sm:$0xff]  }
 0x858   :  { %20571 = vmatprep.subr.bf16.mxu1 %v22335_v23 }
 0x85a   :  { %17183 = vmatmul.mubr.msk.bf16.vlgmr.msra.gmra.mrb[72].mxu1 %vm352_vm1, %v2181_v12 }
 0x85b   :  { %20572 = vmatpush3.bf16.msra.mxu1 %v21192_v57  ;;  %20575 = vmatprep.mubr.msk.bf16.mxu1 %vm22337_vm0, %v22335_v23 }
 0x85c   :  { %20573 = vmatprep.subr.bf16.mxu1 %v22335_v23 }
 0x85f   :  { %20574 = vmatpush3.bf16.msra.mxu1 %v21193_v0 }
 0x860   :  { %19039 = vmatprep.subr.bf16.mxu1 %v22767_v58 }
 0x862   :  { %20576 = vmatmul.mubr.msk.bf16.vlgmr.msra.gmra.mrb[76].mxu1 %vm352_vm1, %v2181_v12  ;;  %v21217_v12 = vld [vmem:[%s28269_s3 + $0x34c] ss:$20 sps:$4 sm:$0xff]  }
 0x863   :  { %19040 = vmatpush3.bf16.msra.mxu1 %v22774_v60  ;;  %2418 = vmatprep.mubr.bf16.mxu1 %v17187_v3 }
 0x864   :  { %19041 = vmatprep.subr.bf16.mxu1 %v22780_v61 }
 0x867   :  { %19042 = vmatpush3.bf16.msra.mxu1 %v22860_v41 }
 0x868   :  { %19043 = vmatprep.subr.bf16.mxu1 %v22866_v42 }
 0x86b   :  { %19044 = vmatpush3.bf16.msra.mxu1 %v22872_v43 }
 0x86c   :  { %19045 = vmatprep.subr.bf16.mxu1 %v22878_v44 }
 0x86f   :  { %19046 = vmatpush3.bf16.msra.mxu1 %v22884_v45 }
 0x870   :  { %19047 = vmatprep.subr.bf16.mxu1 %v22890_v46 }
 0x873   :  { %19048 = vmatpush3.bf16.msra.mxu1 %v22896_v47 }
 0x874   :  { %19049 = vmatprep.subr.bf16.mxu1 %v22902_v49 }
 0x877   :  { %19050 = vmatpush3.bf16.msra.mxu1 %v22908_v33 }
 0x878   :  { %19051 = vmatprep.subr.bf16.mxu1 %v22914_v50 }
 0x87b   :  { %19052 = vmatpush3.bf16.msra.mxu1 %v22920_v36 }
 0x87c   :  { %19053 = vmatprep.subr.bf16.mxu1 %v23000_v29 }
 0x87f   :  { %19054 = vmatpush3.bf16.msra.mxu1 %v23006_v32 }
 0x882   :  { %2419 = vmatmul.mubr.bf16.vlgmr.msra.gmra.mrb[80].mxu1 %v17186_v2 }
 0x883   :  { %2774 = vmatprep.mubr.bf16.mxu1 %v22336_v30 }
 0x925   :  { %v2284_v19 = vpop.f32.mrb[68].mxu1 }
 0x926   :  { %v23248_v8 = vadd.f32 %v2284_v19, %v23174_v22  ;;  %v2286_v59 = vpop.f32.mrb[69].mxu1 }
 0x927   :  { %v23251_v9 = vadd.f32 %v2286_v59, %v23177_v24  ;;  %v2288_v63 = vpop.f32.mrb[70].mxu1 }
 0x928   :  { %v2289_v20 = vpop.f32.mrb[71].mxu1 }
 0x92d   :  { %v2325_v14 = vpop.f32.mrb[72].mxu1 }
 0x92e   :  { %v23254_v21 = vadd.f32 %v2325_v14, %v23180_v28  ;;  %v2327_v17 = vpop.f32.mrb[73].mxu1  ;;  %v23265_v28 = vld [vmem:[%s28270_s2] ss:$0 sm:$0xff] }
 0x92f   :  { %v23257_v62 = vadd.f32 %v2327_v17, %v23183_v37  ;;  %v2329_v25 = vpop.f32.mrb[74].mxu1 }
 0x930   :  { %v2330_v26 = vpop.f32.mrb[75].mxu1 }
 0x935   :  { %v2366_v27 = vpop.f32.mrb[76].mxu1 }
 0x936   :  { %v23260_v22 = vadd.f32 %v2366_v27, %v23186_v31  ;;  %v20577_v34 = vpop.f32.mrb[77].mxu1  ;;  %v21202_v31 = vld [vmem:[%s28269_s3 + $0x2d8] ss:$20 sps:$4 sm:$0xff]  }
 0x937   :  { %v2369_v38 = vpop.f32.mrb[78].mxu1 }
 0x938   :  { %v20578_v24 = vpop.f32.mrb[79].mxu1 }
 0x955   :  { %v19055_v39 = vpop.f32.mrb[80].mxu1 }
 0x956   :  { %v19056_v48 = vpop.f32.mrb[81].mxu1 }
 0x957   :  { %v19057_v15 = vadd.f32 %v19056_v48, %v19055_v39  ;;  %v19058_v53 = vpop.f32.mrb[82].mxu1  ;;  %v21221_v39 = vld [vmem:[%s28269_s3 + $0x350] ss:$20 sps:$4 sm:$0xff]  }
 0x958   :  { %v19059_v35 = vpop.f32.mrb[83].mxu1  ;;  %v21224_v48 = vld [vmem:[%s28269_s3 + $0x330] ss:$20 sps:$4 sm:$0xff]   ;;  %v17241_v53 = vld [vmem:[%s28268_s0 + $0x58] sm:$0xff] }
 0x959   :  { %v2421_v37 = vadd.f32 %v23265_v28, %v19057_v15  ;;  %v21225_v15 = vld [vmem:[%s28269_s3 + $0x358] ss:$20 sps:$4 sm:$0xff]   ;;  %v17243_v35 = vcombine.high %v17241_v53, %v17241_v53 }
 0x95b   :  { %v2426_v56 = vmax.f32 %v2421_v37, 0.0  ;;  %v23370_v37 = vld [vmem:[%s28267_s1 + $0x40] sm:$0xff]  }
 0x95d   :  { %v2427_v4 = vpack.c.bf16 %v2426_v56, %v2426_v56  ;;  %v23377_v56 = vld [vmem:[%s28267_s1] sm:$0xff]  }
 0x95f   :  { %17210 = vmatmul.mubr.msk.bf16.vlgmr.msra.gmra.mrb[64].mxu0 %vm352_vm1, %v2427_v4 }
 0x960   :  { %2538 = vmatpush1.bf16.msra.mxu0 %v21202_v31  ;;  %2569 = vmatprep.mubr.bf16.mxu0 %v22336_v30  ;;  %v23383_v31 = vld [vmem:[%s28267_s1 + $0x48] sm:$0xff]  }
 0x961   :  { %2539 = vmatprep.subr.bf16.mxu0 %v21207_v5 }
 0x964   :  { %2540 = vmatpush1.bf16.msra.mxu0 %v21205_v52 }
 0x965   :  { %20579 = vmatprep.subr.bf16.mxu0 %v22335_v23 }
 0x967   :  { %17211 = vmatmul.mubr.msk.bf16.vlgmr.msra.gmra.mrb[68].mxu0 %vm352_vm1, %v2427_v4 }
 0x968   :  { %20580 = vmatpush3.bf16.msra.mxu0 %v21208_v7  ;;  %20583 = vmatprep.mubr.msk.bf16.mxu0 %vm22337_vm0, %v22335_v23 }
 0x969   :  { %20581 = vmatprep.subr.bf16.mxu0 %v22335_v23 }
 0x96c   :  { %20582 = vmatpush3.bf16.msra.mxu0 %v21209_v40 }
 0x96d   :  { %19064 = vmatprep.subr.bf16.mxu0 %v22767_v58  ;;  %v17214_v58 = vcombine.low %v17213_v10, %v17213_v10 }
 0x96f   :  { %20584 = vmatmul.mubr.msk.bf16.vlgmr.msra.gmra.mrb[72].mxu0 %vm352_vm1, %v2427_v4 }
 0x970   :  { %19065 = vmatpush3.bf16.msra.mxu0 %v22774_v60  ;;  %2664 = vmatprep.mubr.bf16.mxu0 %v17215_v13  ;;  %v21214_v60 = vld [vmem:[%s28269_s3 + $0x324] ss:$20 sps:$4 sm:$0xff]  }
 0x971   :  { %19066 = vmatprep.subr.bf16.mxu0 %v22780_v61  ;;  %v21212_v61 = vld [vmem:[%s28269_s3 + $0x320] ss:$20 sps:$4 sm:$0xff]   ;;  %2742 = vmatprep.subr.bf16.mxu1 %v21214_v60 }
 0x972   :  { %2743 = vmatpush1.bf16.msra.mxu1 %v21212_v61 }
 0x973   :  { %2744 = vmatprep.subr.bf16.mxu1 %v21217_v12 }
 0x974   :  { %19067 = vmatpush3.bf16.msra.mxu0 %v22860_v41 }
 0x975   :  { %19068 = vmatprep.subr.bf16.mxu0 %v22866_v42 }
 0x976   :  { %2745 = vmatpush1.bf16.msra.mxu1 %v21215_v51 }
 0x977   :  { %2783 = vmatprep.subr.bf16.mxu1 %v21220_v1 }
 0x978   :  { %19069 = vmatpush3.bf16.msra.mxu0 %v22872_v43 }
 0x979   :  { %19070 = vmatprep.subr.bf16.mxu0 %v22878_v44 }
 0x97c   :  { %19071 = vmatpush3.bf16.msra.mxu0 %v22884_v45 }
 0x97d   :  { %19072 = vmatprep.subr.bf16.mxu0 %v22890_v46 }
 0x980   :  { %19073 = vmatpush3.bf16.msra.mxu0 %v22896_v47 }
 0x981   :  { %19074 = vmatprep.subr.bf16.mxu0 %v22902_v49 }
 0x984   :  { %19075 = vmatpush3.bf16.msra.mxu0 %v22908_v33 }
 0x985   :  { %19076 = vmatprep.subr.bf16.mxu0 %v22914_v50 }
 0x988   :  { %19077 = vmatpush3.bf16.msra.mxu0 %v22920_v36 }
 0x989   :  { %19078 = vmatprep.subr.bf16.mxu0 %v23000_v29 }
 0x98c   :  { %19079 = vmatpush3.bf16.msra.mxu0 %v23006_v32 }
 0x98f   :  { %2665 = vmatmul.mubr.bf16.vlgmr.msra.gmra.mrb[76].mxu0 %v17214_v58 }
 0x990   :  { %3020 = vmatprep.mubr.bf16.mxu0 %v22336_v30 }
 0xa32   :  { %v2530_v57 = vpop.f32.mrb[64].mxu0 }
 0xa33   :  { %v23327_v0 = vadd.f32 %v2530_v57, %v23248_v8  ;;  %v2532_v54 = vpop.f32.mrb[65].mxu0 }
 0xa34   :  { %v23330_v3 = vadd.f32 %v2532_v54, %v23251_v9  ;;  %v2534_v2 = vpop.f32.mrb[66].mxu0 }
 0xa35   :  { %v2535_v16 = vpop.f32.mrb[67].mxu0 }
 0xa3a   :  { %v2571_v55 = vpop.f32.mrb[68].mxu0 }
 0xa3b   :  { %v23333_v11 = vadd.f32 %v2571_v55, %v23254_v21  ;;  %v2573_v18 = vpop.f32.mrb[69].mxu0  ;;  %v21234_v55 = vld [vmem:[%s28269_s3 + $0x378] ss:$20 sps:$4 sm:$0xff]  }
 0xa3c   :  { %v23336_v6 = vadd.f32 %v2573_v18, %v23257_v62  ;;  %v2575_v19 = vpop.f32.mrb[70].mxu0  ;;  %v21218_v62 = vld [vmem:[%s28269_s3 + $0x328] ss:$20 sps:$4 sm:$0xff]   ;;  %v21239_v18 = vld [vmem:[%s28269_s3 + $0x3a4] ss:$20 sps:$4 sm:$0xff]  }
 0xa3d   :  { %v2576_v59 = vpop.f32.mrb[71].mxu0  ;;  %v21240_v19 = vld [vmem:[%s28269_s3 + $0x380] ss:$20 sps:$4 sm:$0xff]  }
 0xa3e   :  { %v21241_v59 = vld [vmem:[%s28269_s3 + $0x3a8] ss:$20 sps:$4 sm:$0xff]  }
 0xa42   :  { %v2612_v63 = vpop.f32.mrb[72].mxu0 }
 0xa43   :  { %v23339_v8 = vadd.f32 %v2612_v63, %v23260_v22  ;;  %v20585_v20 = vpop.f32.mrb[73].mxu0  ;;  %v21223_v22 = vld [vmem:[%s28269_s3 + $0x354] ss:$20 sps:$4 sm:$0xff]   ;;  %v17269_v63 = vld [vmem:[%s28268_s0 + $0x60] sm:$0xff] }
 0xa44   :  { %v2615_v14 = vpop.f32.mrb[74].mxu0  ;;  %v23463_v20 = vld [vmem:[%s28267_s1 + $0x8] sm:$0xff]  }
 0xa45   :  { %v20586_v9 = vpop.f32.mrb[75].mxu0  ;;  %v23469_v14 = vld [vmem:[%s28267_s1 + $0x50] sm:$0xff]  }
 0xa46   :  { %v23475_v9 = vld [vmem:[%s28267_s1 + $0x10] sm:$0xff]  }
 0xa62   :  { %v19080_v17 = vpop.f32.mrb[76].mxu0 }
 0xa63   :  { %v19081_v25 = vpop.f32.mrb[77].mxu0 }
 0xa64   :  { %v19082_v26 = vadd.f32 %v19081_v25, %v19080_v17  ;;  %v19083_v27 = vpop.f32.mrb[78].mxu0  ;;  %v23481_v17 = vld [vmem:[%s28267_s1 + $0x58] sm:$0xff]  }
 0xa65   :  { %v19084_v34 = vpop.f32.mrb[79].mxu0  ;;  %v23487_v25 = vld [vmem:[%s28267_s1 + $0x18] sm:$0xff]   ;;  %v23499_v27 = vld [vmem:[%s28267_s1 + $0x20] sm:$0xff]  }
 0xa66   :  { %v2667_v21 = vadd.f32 %v23265_v28, %v19082_v26  ;;  %v23493_v26 = vld [vmem:[%s28267_s1 + $0x60] sm:$0xff]   ;;  %v23505_v34 = vld [vmem:[%s28267_s1 + $0x68] sm:$0xff]  }
 0xa68   :  { %v2672_v38 = vmax.f32 %v2667_v21, 0.0  ;;  %v23511_v21 = vld [vmem:[%s28267_s1 + $0x28] sm:$0xff]  }
 0xa6a   :  { %v2673_v24 = vpack.c.bf16 %v2672_v38, %v2672_v38  ;;  %v23517_v38 = vld [vmem:[%s28267_s1 + $0x70] sm:$0xff]  }
 0xa6c   :  { %17238 = vmatmul.mubr.msk.bf16.vlgmr.msra.gmra.mrb[84].mxu1 %vm352_vm1, %v2673_v24 }
 0xa6d   :  { %2784 = vmatpush1.bf16.msra.mxu1 %v21218_v62  ;;  %2815 = vmatprep.mubr.bf16.mxu1 %v22336_v30  ;;  %v23523_v62 = vld [vmem:[%s28267_s1 + $0x30] sm:$0xff]  }
 0xa6e   :  { %2785 = vmatprep.subr.bf16.mxu1 %v21223_v22  ;;  %v21246_v22 = vld [vmem:[%s28269_s3 + $0x3c4] ss:$20 sps:$4 sm:$0xff]  }
 0xa71   :  { %2786 = vmatpush1.bf16.msra.mxu1 %v21221_v39  ;;  %v21244_v39 = vld [vmem:[%s28269_s3 + $0x3c0] ss:$20 sps:$4 sm:$0xff]  }
 0xa72   :  { %20587 = vmatprep.subr.bf16.mxu1 %v22335_v23 }
 0xa74   :  { %17239 = vmatmul.mubr.msk.bf16.vlgmr.msra.gmra.mrb[88].mxu1 %vm352_vm1, %v2673_v24 }
 0xa75   :  { %20588 = vmatpush3.bf16.msra.mxu1 %v21224_v48  ;;  %20591 = vmatprep.mubr.msk.bf16.mxu1 %vm22337_vm0, %v22335_v23  ;;  %v21252_v48 = vld [vmem:[%s28269_s3 + $0x3cc] ss:$20 sps:$4 sm:$0xff]  }
 0xa76   :  { %20589 = vmatprep.subr.bf16.mxu1 %v22335_v23 }
 0xa79   :  { %20590 = vmatpush3.bf16.msra.mxu1 %v21225_v15 }
 0xa7a   :  { %19089 = vmatprep.subr.bf16.mxu1 %v23370_v37 }
 0xa7c   :  { %20592 = vmatmul.mubr.msk.bf16.vlgmr.msra.gmra.mrb[92].mxu1 %vm352_vm1, %v2673_v24  ;;  %v17270_v24 = vcombine.low %v17269_v63, %v17269_v63 }
 0xa7d   :  { %19090 = vmatpush3.bf16.msra.mxu1 %v23377_v56  ;;  %2910 = vmatprep.mubr.bf16.mxu1 %v17243_v35 }
 0xa7e   :  { %19091 = vmatprep.subr.bf16.mxu1 %v23383_v31 }
 0xa81   :  { %19092 = vmatpush3.bf16.msra.mxu1 %v22860_v41  ;;  %v17242_v41 = vcombine.low %v17241_v53, %v17241_v53 }
 0xa82   :  { %19093 = vmatprep.subr.bf16.mxu1 %v22866_v42  ;;  %v21230_v42 = vld [vmem:[%s28269_s3 + $0x374] ss:$20 sps:$4 sm:$0xff]  }
 0xa83   :  { %2988 = vmatprep.subr.bf16.mxu0 %v21230_v42 }
 0xa85   :  { %19094 = vmatpush3.bf16.msra.mxu1 %v22872_v43  ;;  %v21228_v43 = vld [vmem:[%s28269_s3 + $0x370] ss:$20 sps:$4 sm:$0xff]  }
 0xa86   :  { %19095 = vmatprep.subr.bf16.mxu1 %v22878_v44  ;;  %2989 = vmatpush1.bf16.msra.mxu0 %v21228_v43  ;;  %v21233_v44 = vld [vmem:[%s28269_s3 + $0x39c] ss:$20 sps:$4 sm:$0xff]  }
 0xa87   :  { %2990 = vmatprep.subr.bf16.mxu0 %v21233_v44 }
 0xa89   :  { %19096 = vmatpush3.bf16.msra.mxu1 %v22884_v45  ;;  %v21231_v45 = vld [vmem:[%s28269_s3 + $0x398] ss:$20 sps:$4 sm:$0xff]  }
 0xa8a   :  { %19097 = vmatprep.subr.bf16.mxu1 %v22890_v46  ;;  %2991 = vmatpush1.bf16.msra.mxu0 %v21231_v45  ;;  %v21236_v46 = vld [vmem:[%s28269_s3 + $0x37c] ss:$20 sps:$4 sm:$0xff]  }
 0xa8b   :  { %3029 = vmatprep.subr.bf16.mxu0 %v21236_v46 }
 0xa8d   :  { %19098 = vmatpush3.bf16.msra.mxu1 %v22896_v47 }
 0xa8e   :  { %19099 = vmatprep.subr.bf16.mxu1 %v22902_v49 }
 0xa91   :  { %19100 = vmatpush3.bf16.msra.mxu1 %v22908_v33 }
 0xa92   :  { %19101 = vmatprep.subr.bf16.mxu1 %v22914_v50 }
 0xa95   :  { %19102 = vmatpush3.bf16.msra.mxu1 %v22920_v36 }
 0xa96   :  { %19103 = vmatprep.subr.bf16.mxu1 %v23000_v29 }
 0xa99   :  { %19104 = vmatpush3.bf16.msra.mxu1 %v23006_v32 }
 0xa9a   :  { %3234 = vmatprep.subr.bf16.mxu1 %v21246_v22 }
 0xa9c   :  { %2911 = vmatmul.mubr.bf16.vlgmr.msra.gmra.mrb[96].mxu1 %v17242_v41 }
 0xa9d   :  { %3266 = vmatprep.mubr.bf16.mxu1 %v22336_v30  ;;  %3235 = vmatpush1.bf16.msra.mxu1 %v21244_v39 }
 0xb3f   :  { %v2776_v47 = vpop.f32.mrb[84].mxu1 }
 0xb40   :  { %v23416_v49 = vadd.f32 %v2776_v47, %v23327_v0  ;;  %v2778_v33 = vpop.f32.mrb[85].mxu1 }
 0xb41   :  { %v23419_v50 = vadd.f32 %v2778_v33, %v23330_v3  ;;  %v2780_v36 = vpop.f32.mrb[86].mxu1 }
 0xb42   :  { %v2781_v4 = vpop.f32.mrb[87].mxu1 }
 0xb47   :  { %v2817_v5 = vpop.f32.mrb[88].mxu1 }
 0xb48   :  { %v23422_v52 = vadd.f32 %v2817_v5, %v23333_v11  ;;  %v2819_v7 = vpop.f32.mrb[89].mxu1 }
 0xb49   :  { %v23425_v40 = vadd.f32 %v2819_v7, %v23336_v6  ;;  %v2821_v10 = vpop.f32.mrb[90].mxu1  ;;  %v21237_v6 = vld [vmem:[%s28269_s3 + $0x3a0] ss:$20 sps:$4 sm:$0xff]  }
 0xb4a   :  { %v2822_v13 = vpop.f32.mrb[91].mxu1 }
 0xb4f   :  { %v2858_v58 = vpop.f32.mrb[92].mxu1 }
 0xb50   :  { %v23428_v60 = vadd.f32 %v2858_v58, %v23339_v8  ;;  %v20593_v61 = vpop.f32.mrb[93].mxu1  ;;  %v17271_v8 = vcombine.high %v17269_v63, %v17269_v63  ;;  %v21268_v63 = vld [vmem:[%s28269_s3 + $0x41c] ss:$20 sps:$4 sm:$0xff]  }
 0xb51   :  { %v2861_v12 = vpop.f32.mrb[94].mxu1 }
 0xb52   :  { %v20594_v51 = vpop.f32.mrb[95].mxu1 }
 0xb6f   :  { %v19105_v1 = vpop.f32.mrb[96].mxu1 }
 0xb70   :  { %v19106_v57 = vpop.f32.mrb[97].mxu1 }
 0xb71   :  { %v19107_v0 = vadd.f32 %v19106_v57, %v19105_v1  ;;  %v19108_v54 = vpop.f32.mrb[98].mxu1  ;;  %v21253_v57 = vld [vmem:[%s28269_s3 + $0x3f0] ss:$20 sps:$4 sm:$0xff]  }
 0xb72   :  { %v19109_v3 = vpop.f32.mrb[99].mxu1  ;;  %v21257_v54 = vld [vmem:[%s28269_s3 + $0x3f8] ss:$20 sps:$4 sm:$0xff]  }
 0xb73   :  { %v2913_v2 = vadd.f32 %v23265_v28, %v19107_v0  ;;  %v21256_v0 = vld [vmem:[%s28269_s3 + $0x3d0] ss:$20 sps:$4 sm:$0xff]   ;;  %v17297_v3 = vld [vmem:[%s28268_s0 + $0x68] sm:$0xff] }
 0xb75   :  { %v2918_v16 = vmax.f32 %v2913_v2, 0.0  ;;  %v17299_v2 = vcombine.high %v17297_v3, %v17297_v3 }
 0xb77   :  { %v2919_v11 = vpack.c.bf16 %v2918_v16, %v2918_v16  ;;  %v23603_v16 = vld [vmem:[%s28267_s1 + $0x78] sm:$0xff]  }
 0xb79   :  { %17266 = vmatmul.mubr.msk.bf16.vlgmr.msra.gmra.mrb[80].mxu0 %vm352_vm1, %v2919_v11 }
 0xb7a   :  { %3030 = vmatpush1.bf16.msra.mxu0 %v21234_v55  ;;  %3061 = vmatprep.mubr.bf16.mxu0 %v22336_v30  ;;  %v17298_v55 = vcombine.low %v17297_v3, %v17297_v3  ;;  %v21284_v3 = vld [vmem:[%s28269_s3 + $0x46c] ss:$20 sps:$4 sm:$0xff]  }
 0xb7b   :  { %3031 = vmatprep.subr.bf16.mxu0 %v21239_v18  ;;  %v21262_v18 = vld [vmem:[%s28269_s3 + $0x414] ss:$20 sps:$4 sm:$0xff]  }
 0xb7e   :  { %3032 = vmatpush1.bf16.msra.mxu0 %v21237_v6  ;;  %v21260_v6 = vld [vmem:[%s28269_s3 + $0x410] ss:$20 sps:$4 sm:$0xff]  }
 0xb7f   :  { %20595 = vmatprep.subr.bf16.mxu0 %v22335_v23 }
 0xb81   :  { %17267 = vmatmul.mubr.msk.bf16.vlgmr.msra.gmra.mrb[84].mxu0 %vm352_vm1, %v2919_v11 }
 0xb82   :  { %20596 = vmatpush3.bf16.msra.mxu0 %v21240_v19  ;;  %20599 = vmatprep.mubr.msk.bf16.mxu0 %vm22337_vm0, %v22335_v23  ;;  %v21265_v19 = vld [vmem:[%s28269_s3 + $0x43c] ss:$20 sps:$4 sm:$0xff]  }
 0xb83   :  { %20597 = vmatprep.subr.bf16.mxu0 %v22335_v23 }
 0xb86   :  { %20598 = vmatpush3.bf16.msra.mxu0 %v21241_v59  ;;  %v21263_v59 = vld [vmem:[%s28269_s3 + $0x438] ss:$20 sps:$4 sm:$0xff]  }
 0xb87   :  { %19114 = vmatprep.subr.bf16.mxu0 %v23370_v37 }
 0xb89   :  { %20600 = vmatmul.mubr.msk.bf16.vlgmr.msra.gmra.mrb[88].mxu0 %vm352_vm1, %v2919_v11  ;;  %v23609_v11 = vld [vmem:[%s28267_s1 + $0x38] sm:$0xff]  }
 0xb8a   :  { %19115 = vmatpush3.bf16.msra.mxu0 %v23377_v56  ;;  %3156 = vmatprep.mubr.bf16.mxu0 %v17271_v8 }
 0xb8b   :  { %19116 = vmatprep.subr.bf16.mxu0 %v23383_v31 }
 0xb8e   :  { %19117 = vmatpush3.bf16.msra.mxu0 %v23463_v20 }
 0xb8f   :  { %19118 = vmatprep.subr.bf16.mxu0 %v23469_v14 }
 0xb92   :  { %19119 = vmatpush3.bf16.msra.mxu0 %v23475_v9 }
 0xb93   :  { %19120 = vmatprep.subr.bf16.mxu0 %v23481_v17 }
 0xb96   :  { %19121 = vmatpush3.bf16.msra.mxu0 %v23487_v25 }
 0xb97   :  { %19122 = vmatprep.subr.bf16.mxu0 %v23493_v26 }
 0xb9a   :  { %19123 = vmatpush3.bf16.msra.mxu0 %v23499_v27 }
 0xb9b   :  { %19124 = vmatprep.subr.bf16.mxu0 %v23505_v34 }
 0xb9e   :  { %19125 = vmatpush3.bf16.msra.mxu0 %v23511_v21 }
 0xb9f   :  { %19126 = vmatprep.subr.bf16.mxu0 %v23517_v38 }
 0xba2   :  { %19127 = vmatpush3.bf16.msra.mxu0 %v23523_v62 }
 0xba3   :  { %19128 = vmatprep.subr.bf16.mxu0 %v23000_v29  ;;  %v21249_v29 = vld [vmem:[%s28269_s3 + $0x3ec] ss:$20 sps:$4 sm:$0xff]  }
 0xba4   :  { %3236 = vmatprep.subr.bf16.mxu1 %v21249_v29 }
 0xba6   :  { %19129 = vmatpush3.bf16.msra.mxu0 %v23006_v32  ;;  %v21247_v32 = vld [vmem:[%s28269_s3 + $0x3e8] ss:$20 sps:$4 sm:$0xff]  }
 0xba7   :  { %3237 = vmatpush1.bf16.msra.mxu1 %v21247_v32  ;;  %3480 = vmatprep.subr.bf16.mxu0 %v21262_v18 }
 0xba8   :  { %3275 = vmatprep.subr.bf16.mxu1 %v21252_v48 }
 0xba9   :  { %3157 = vmatmul.mubr.bf16.vlgmr.msra.gmra.mrb[92].mxu0 %v17270_v24 }
 0xbaa   :  { %3512 = vmatprep.mubr.bf16.mxu0 %v22336_v30  ;;  %3481 = vmatpush1.bf16.msra.mxu0 %v21260_v6 }
 0xbab   :  { %3482 = vmatprep.subr.bf16.mxu0 %v21265_v19 }
 0xbae   :  { %3483 = vmatpush1.bf16.msra.mxu0 %v21263_v59 }
 0xbaf   :  { %3521 = vmatprep.subr.bf16.mxu0 %v21268_v63 }
 0xc4c   :  { %v3022_v15 = vpop.f32.mrb[80].mxu0 }
 0xc4d   :  { %v23545_v53 = vadd.f32 %v3022_v15, %v23416_v49  ;;  %v3024_v35 = vpop.f32.mrb[81].mxu0 }
 0xc4e   :  { %v23548_v41 = vadd.f32 %v3024_v35, %v23419_v50  ;;  %v3026_v42 = vpop.f32.mrb[82].mxu0 }
 0xc4f   :  { %v3027_v43 = vpop.f32.mrb[83].mxu0 }
 0xc54   :  { %v3063_v44 = vpop.f32.mrb[84].mxu0 }
 0xc55   :  { %v23551_v45 = vadd.f32 %v3063_v44, %v23422_v52  ;;  %v3065_v46 = vpop.f32.mrb[85].mxu0 }
 0xc56   :  { %v23554_v47 = vadd.f32 %v3065_v46, %v23425_v40  ;;  %v3067_v33 = vpop.f32.mrb[86].mxu0  ;;  %v21250_v40 = vld [vmem:[%s28269_s3 + $0x3c8] ss:$20 sps:$4 sm:$0xff]  }
 0xc57   :  { %v3068_v36 = vpop.f32.mrb[87].mxu0 }
 0xc5c   :  { %v3104_v4 = vpop.f32.mrb[88].mxu0 }
 0xc5d   :  { %v23557_v49 = vadd.f32 %v3104_v4, %v23428_v60  ;;  %v20601_v5 = vpop.f32.mrb[89].mxu0  ;;  %v21255_v60 = vld [vmem:[%s28269_s3 + $0x3f4] ss:$20 sps:$4 sm:$0xff]  }
 0xc5e   :  { %v3107_v7 = vpop.f32.mrb[90].mxu0 }
 0xc5f   :  { %v20602_v50 = vpop.f32.mrb[91].mxu0 }
 0xc7c   :  { %v19130_v10 = vpop.f32.mrb[92].mxu0 }
 0xc7d   :  { %v19131_v13 = vpop.f32.mrb[93].mxu0 }
 0xc7e   :  { %v19132_v58 = vadd.f32 %v19131_v13, %v19130_v10  ;;  %v19133_v61 = vpop.f32.mrb[94].mxu0 }
 0xc7f   :  { %v19134_v12 = vpop.f32.mrb[95].mxu0  ;;  %v21269_v61 = vld [vmem:[%s28269_s3 + $0x440] ss:$20 sps:$4 sm:$0xff]  }
 0xc80   :  { %v3159_v52 = vadd.f32 %v23265_v28, %v19132_v58  ;;  %v21272_v12 = vld [vmem:[%s28269_s3 + $0x420] ss:$20 sps:$4 sm:$0xff]  }
 0xc82   :  { %v3164_v51 = vmax.f32 %v3159_v52, 0.0  ;;  %v21273_v52 = vld [vmem:[%s28269_s3 + $0x448] ss:$20 sps:$4 sm:$0xff]  }
 0xc84   :  { %v3165_v1 = vpack.c.bf16 %v3164_v51, %v3164_v51  ;;  %v17325_v51 = vld [vmem:[%s28268_s0 + $0x70] sm:$0xff] }
 0xc86   :  { %17294 = vmatmul.mubr.msk.bf16.vlgmr.msra.gmra.mrb[100].mxu1 %vm352_vm1, %v3165_v1 }
 0xc87   :  { %3276 = vmatpush1.bf16.msra.mxu1 %v21250_v40  ;;  %3307 = vmatprep.mubr.bf16.mxu1 %v22336_v30  ;;  %v17327_v40 = vcombine.high %v17325_v51, %v17325_v51 }
 0xc88   :  { %3277 = vmatprep.subr.bf16.mxu1 %v21255_v60  ;;  %v21278_v60 = vld [vmem:[%s28269_s3 + $0x464] ss:$20 sps:$4 sm:$0xff]  }
 0xc8b   :  { %3278 = vmatpush1.bf16.msra.mxu1 %v21253_v57  ;;  %v21276_v57 = vld [vmem:[%s28269_s3 + $0x460] ss:$20 sps:$4 sm:$0xff]  }
 0xc8c   :  { %20603 = vmatprep.subr.bf16.mxu1 %v22335_v23 }
 0xc8e   :  { %17295 = vmatmul.mubr.msk.bf16.vlgmr.msra.gmra.mrb[104].mxu1 %vm352_vm1, %v3165_v1 }
 0xc8f   :  { %20604 = vmatpush3.bf16.msra.mxu1 %v21256_v0  ;;  %20607 = vmatprep.mubr.msk.bf16.mxu1 %vm22337_vm0, %v22335_v23  ;;  %v21281_v0 = vld [vmem:[%s28269_s3 + $0x48c] ss:$20 sps:$4 sm:$0xff]  }
 0xc90   :  { %20605 = vmatprep.subr.bf16.mxu1 %v22335_v23 }
 0xc93   :  { %20606 = vmatpush3.bf16.msra.mxu1 %v21257_v54  ;;  %v21279_v54 = vld [vmem:[%s28269_s3 + $0x488] ss:$20 sps:$4 sm:$0xff]  }
 0xc94   :  { %19139 = vmatprep.subr.bf16.mxu1 %v23370_v37 }
 0xc96   :  { %20608 = vmatmul.mubr.msk.bf16.vlgmr.msra.gmra.mrb[108].mxu1 %vm352_vm1, %v3165_v1  ;;  %v17326_v1 = vcombine.low %v17325_v51, %v17325_v51  ;;  %v21300_v51 = vld [vmem:[%s28269_s3 + $0x4bc] ss:$20 sps:$4 sm:$0xff]  }
 0xc97   :  { %19140 = vmatpush3.bf16.msra.mxu1 %v23377_v56  ;;  %3402 = vmatprep.mubr.bf16.mxu1 %v17299_v2 }
 0xc98   :  { %19141 = vmatprep.subr.bf16.mxu1 %v23383_v31 }
 0xc9b   :  { %19142 = vmatpush3.bf16.msra.mxu1 %v23463_v20 }
 0xc9c   :  { %19143 = vmatprep.subr.bf16.mxu1 %v23469_v14 }
 0xc9f   :  { %19144 = vmatpush3.bf16.msra.mxu1 %v23475_v9 }
 0xca0   :  { %19145 = vmatprep.subr.bf16.mxu1 %v23481_v17 }
 0xca3   :  { %19146 = vmatpush3.bf16.msra.mxu1 %v23487_v25 }
 0xca4   :  { %19147 = vmatprep.subr.bf16.mxu1 %v23493_v26 }
 0xca7   :  { %19148 = vmatpush3.bf16.msra.mxu1 %v23499_v27 }
 0xca8   :  { %19149 = vmatprep.subr.bf16.mxu1 %v23505_v34 }
 0xcab   :  { %19150 = vmatpush3.bf16.msra.mxu1 %v23511_v21 }
 0xcac   :  { %19151 = vmatprep.subr.bf16.mxu1 %v23517_v38 }
 0xcaf   :  { %19152 = vmatpush3.bf16.msra.mxu1 %v23523_v62 }
 0xcb0   :  { %19153 = vmatprep.subr.bf16.mxu1 %v23603_v16 }
 0xcb3   :  { %19154 = vmatpush3.bf16.msra.mxu1 %v23609_v11 }
 0xcb4   :  { %3726 = vmatprep.subr.bf16.mxu1 %v21278_v60 }
 0xcb6   :  { %3403 = vmatmul.mubr.bf16.vlgmr.msra.gmra.mrb[112].mxu1 %v17298_v55 }
 0xcb7   :  { %3758 = vmatprep.mubr.bf16.mxu1 %v22336_v30  ;;  %3727 = vmatpush1.bf16.msra.mxu1 %v21276_v57 }
 0xcb8   :  { %3728 = vmatprep.subr.bf16.mxu1 %v21281_v0 }
 0xcbb   :  { %3729 = vmatpush1.bf16.msra.mxu1 %v21279_v54 }
 0xcbc   :  { %3767 = vmatprep.subr.bf16.mxu1 %v21284_v3 }
 0xd59   :  { %v3268_v8 = vpop.f32.mrb[100].mxu1 }
 0xd5a   :  { %v23629_v24 = vadd.f32 %v3268_v8, %v23545_v53  ;;  %v3270_v22 = vpop.f32.mrb[101].mxu1 }
 0xd5b   :  { %v23632_v39 = vadd.f32 %v3270_v22, %v23548_v41  ;;  %v3272_v29 = vpop.f32.mrb[102].mxu1 }
 0xd5c   :  { %v3273_v32 = vpop.f32.mrb[103].mxu1 }
 0xd61   :  { %v3309_v48 = vpop.f32.mrb[104].mxu1 }
 0xd62   :  { %v23635_v15 = vadd.f32 %v3309_v48, %v23551_v45  ;;  %v3311_v35 = vpop.f32.mrb[105].mxu1 }
 0xd63   :  { %v23638_v42 = vadd.f32 %v3311_v35, %v23554_v47  ;;  %v3313_v43 = vpop.f32.mrb[106].mxu1  ;;  %v21266_v47 = vld [vmem:[%s28269_s3 + $0x418] ss:$20 sps:$4 sm:$0xff]  }
 0xd64   :  { %v3314_v44 = vpop.f32.mrb[107].mxu1 }
 0xd69   :  { %v3350_v46 = vpop.f32.mrb[108].mxu1 }
 0xd6a   :  { %v23641_v53 = vadd.f32 %v3350_v46, %v23557_v49  ;;  %v20609_v33 = vpop.f32.mrb[109].mxu1  ;;  %v21271_v49 = vld [vmem:[%s28269_s3 + $0x444] ss:$20 sps:$4 sm:$0xff]  }
 0xd6b   :  { %v3353_v36 = vpop.f32.mrb[110].mxu1 }
 0xd6c   :  { %v20610_v41 = vpop.f32.mrb[111].mxu1 }
 0xd89   :  { %v19155_v4 = vpop.f32.mrb[112].mxu1 }
 0xd8a   :  { %v19156_v5 = vpop.f32.mrb[113].mxu1 }
 0xd8b   :  { %v19157_v7 = vadd.f32 %v19156_v5, %v19155_v4  ;;  %v19158_v50 = vpop.f32.mrb[114].mxu1 }
 0xd8c   :  { %v19159_v10 = vpop.f32.mrb[115].mxu1  ;;  %v21285_v50 = vld [vmem:[%s28269_s3 + $0x490] ss:$20 sps:$4 sm:$0xff]  }
 0xd8d   :  { %v3405_v45 = vadd.f32 %v23265_v28, %v19157_v7  ;;  %v21288_v10 = vld [vmem:[%s28269_s3 + $0x470] ss:$20 sps:$4 sm:$0xff]  }
 0xd8f   :  { %v3410_v13 = vmax.f32 %v3405_v45, 0.0  ;;  %v21289_v45 = vld [vmem:[%s28269_s3 + $0x498] ss:$20 sps:$4 sm:$0xff]  }
 0xd91   :  { %v3411_v58 = vpack.c.bf16 %v3410_v13, %v3410_v13  ;;  %v17353_v13 = vld [vmem:[%s28268_s0 + $0x78] sm:$0xff] }
 0xd93   :  { %17322 = vmatmul.mubr.msk.bf16.vlgmr.msra.gmra.mrb[96].mxu0 %vm352_vm1, %v3411_v58 }
 0xd94   :  { %3522 = vmatpush1.bf16.msra.mxu0 %v21266_v47  ;;  %3553 = vmatprep.mubr.bf16.mxu0 %v22336_v30  ;;  %v17355_v47 = vcombine.high %v17353_v13, %v17353_v13 }
 0xd95   :  { %3523 = vmatprep.subr.bf16.mxu0 %v21271_v49  ;;  %v21294_v49 = vld [vmem:[%s28269_s3 + $0x4b4] ss:$20 sps:$4 sm:$0xff]  }
 0xd98   :  { %3524 = vmatpush1.bf16.msra.mxu0 %v21269_v61  ;;  %v21292_v61 = vld [vmem:[%s28269_s3 + $0x4b0] ss:$20 sps:$4 sm:$0xff]  }
 0xd99   :  { %20611 = vmatprep.subr.bf16.mxu0 %v22335_v23 }
 0xd9b   :  { %17323 = vmatmul.mubr.msk.bf16.vlgmr.msra.gmra.mrb[100].mxu0 %vm352_vm1, %v3411_v58 }
 0xd9c   :  { %20612 = vmatpush3.bf16.msra.mxu0 %v21272_v12  ;;  %20615 = vmatprep.mubr.msk.bf16.mxu0 %vm22337_vm0, %v22335_v23  ;;  %v21297_v12 = vld [vmem:[%s28269_s3 + $0x4dc] ss:$20 sps:$4 sm:$0xff]  }
 0xd9d   :  { %20613 = vmatprep.subr.bf16.mxu0 %v22335_v23 }
 0xda0   :  { %20614 = vmatpush3.bf16.msra.mxu0 %v21273_v52  ;;  %v21295_v52 = vld [vmem:[%s28269_s3 + $0x4d8] ss:$20 sps:$4 sm:$0xff]  }
 0xda1   :  { %19164 = vmatprep.subr.bf16.mxu0 %v23370_v37 }
 0xda3   :  { %20616 = vmatmul.mubr.msk.bf16.vlgmr.msra.gmra.mrb[104].mxu0 %vm352_vm1, %v3411_v58  ;;  %v17354_v58 = vcombine.low %v17353_v13, %v17353_v13 }
 0xda4   :  { %19165 = vmatpush3.bf16.msra.mxu0 %v23377_v56  ;;  %3648 = vmatprep.mubr.bf16.mxu0 %v17327_v40 }
 0xda5   :  { %19166 = vmatprep.subr.bf16.mxu0 %v23383_v31 }
 0xda8   :  { %19167 = vmatpush3.bf16.msra.mxu0 %v23463_v20 }
 0xda9   :  { %19168 = vmatprep.subr.bf16.mxu0 %v23469_v14 }
 0xdac   :  { %19169 = vmatpush3.bf16.msra.mxu0 %v23475_v9 }
 0xdad   :  { %19170 = vmatprep.subr.bf16.mxu0 %v23481_v17 }
 0xdb0   :  { %19171 = vmatpush3.bf16.msra.mxu0 %v23487_v25 }
 0xdb1   :  { %19172 = vmatprep.subr.bf16.mxu0 %v23493_v26 }
 0xdb4   :  { %19173 = vmatpush3.bf16.msra.mxu0 %v23499_v27 }
 0xdb5   :  { %19174 = vmatprep.subr.bf16.mxu0 %v23505_v34 }
 0xdb8   :  { %19175 = vmatpush3.bf16.msra.mxu0 %v23511_v21 }
 0xdb9   :  { %19176 = vmatprep.subr.bf16.mxu0 %v23517_v38 }
 0xdbc   :  { %19177 = vmatpush3.bf16.msra.mxu0 %v23523_v62 }
 0xdbd   :  { %19178 = vmatprep.subr.bf16.mxu0 %v23603_v16 }
 0xdc0   :  { %19179 = vmatpush3.bf16.msra.mxu0 %v23609_v11 }
 0xdc1   :  { %3972 = vmatprep.subr.bf16.mxu0 %v21294_v49 }
 0xdc3   :  { %3649 = vmatmul.mubr.bf16.vlgmr.msra.gmra.mrb[108].mxu0 %v17326_v1 }
 0xdc4   :  { %4004 = vmatprep.mubr.bf16.mxu0 %v22336_v30  ;;  %3973 = vmatpush1.bf16.msra.mxu0 %v21292_v61 }
 0xdc5   :  { %3974 = vmatprep.subr.bf16.mxu0 %v21297_v12 }
 0xdc8   :  { %3975 = vmatpush1.bf16.msra.mxu0 %v21295_v52 }
 0xdc9   :  { %4013 = vmatprep.subr.bf16.mxu0 %v21300_v51 }
 0xe66   :  { %v3514_v2 = vpop.f32.mrb[96].mxu0 }
 0xe67   :  { %v23703_v55 = vadd.f32 %v3514_v2, %v23629_v24  ;;  %v3516_v18 = vpop.f32.mrb[97].mxu0 }
 0xe68   :  { %v23706_v6 = vadd.f32 %v3516_v18, %v23632_v39  ;;  %v3518_v19 = vpop.f32.mrb[98].mxu0 }
 0xe69   :  { %v3519_v59 = vpop.f32.mrb[99].mxu0 }
 0xe6e   :  { %v3555_v63 = vpop.f32.mrb[100].mxu0 }
 0xe6f   :  { %v23709_v8 = vadd.f32 %v3555_v63, %v23635_v15  ;;  %v3557_v22 = vpop.f32.mrb[101].mxu0 }
 0xe70   :  { %v23712_v29 = vadd.f32 %v3557_v22, %v23638_v42  ;;  %v3559_v32 = vpop.f32.mrb[102].mxu0  ;;  %v21282_v42 = vld [vmem:[%s28269_s3 + $0x468] ss:$20 sps:$4 sm:$0xff]  }
 0xe71   :  { %v3560_v48 = vpop.f32.mrb[103].mxu0 }
 0xe76   :  { %v3596_v35 = vpop.f32.mrb[104].mxu0 }
 0xe77   :  { %v23715_v24 = vadd.f32 %v3596_v35, %v23641_v53  ;;  %v20617_v43 = vpop.f32.mrb[105].mxu0  ;;  %v21287_v53 = vld [vmem:[%s28269_s3 + $0x494] ss:$20 sps:$4 sm:$0xff]  }
 0xe78   :  { %v3599_v44 = vpop.f32.mrb[106].mxu0 }
 0xe79   :  { %v20618_v39 = vpop.f32.mrb[107].mxu0 }
 0xe96   :  { %v19180_v46 = vpop.f32.mrb[108].mxu0 }
 0xe97   :  { %v19181_v33 = vpop.f32.mrb[109].mxu0 }
 0xe98   :  { %v19182_v36 = vadd.f32 %v19181_v33, %v19180_v46  ;;  %v19183_v41 = vpop.f32.mrb[110].mxu0 }
 0xe99   :  { %v19184_v4 = vpop.f32.mrb[111].mxu0  ;;  %v21301_v41 = vld [vmem:[%s28269_s3 + $0x4e0] ss:$20 sps:$4 sm:$0xff]  }
 0xe9a   :  { %v3651_v15 = vadd.f32 %v23265_v28, %v19182_v36  ;;  %v21305_v4 = vld [vmem:[%s28269_s3 + $0x4e8] ss:$20 sps:$4 sm:$0xff]  }
 0xe9c   :  { %v3656_v5 = vmax.f32 %v3651_v15, 0.0  ;;  %v17381_v15 = vld [vmem:[%s28268_s0 + $0x80] sm:$0xff] }
 0xe9e   :  { %v3657_v7 = vpack.c.bf16 %v3656_v5, %v3656_v5  ;;  %v17383_v5 = vcombine.high %v17381_v15, %v17381_v15 }
 0xea0   :  { %17350 = vmatmul.mubr.msk.bf16.vlgmr.msra.gmra.mrb[116].mxu1 %vm352_vm1, %v3657_v7 }
 0xea1   :  { %3768 = vmatpush1.bf16.msra.mxu1 %v21282_v42  ;;  %3799 = vmatprep.mubr.bf16.mxu1 %v22336_v30  ;;  %v17382_v42 = vcombine.low %v17381_v15, %v17381_v15 }
 0xea2   :  { %3769 = vmatprep.subr.bf16.mxu1 %v21287_v53  ;;  %v21308_v53 = vld [vmem:[%s28269_s3 + $0x500] ss:$20 sps:$4 sm:$0xff]  }
 0xea5   :  { %3770 = vmatpush1.bf16.msra.mxu1 %v21285_v50  ;;  %v21313_v50 = vld [vmem:[%s28269_s3 + $0x52c] ss:$20 sps:$4 sm:$0xff]  }
 0xea6   :  { %20619 = vmatprep.subr.bf16.mxu1 %v22335_v23 }
 0xea8   :  { %17351 = vmatmul.mubr.msk.bf16.vlgmr.msra.gmra.mrb[120].mxu1 %vm352_vm1, %v3657_v7 }
 0xea9   :  { %20620 = vmatpush3.bf16.msra.mxu1 %v21288_v10  ;;  %20623 = vmatprep.mubr.msk.bf16.mxu1 %vm22337_vm0, %v22335_v23  ;;  %v21311_v10 = vld [vmem:[%s28269_s3 + $0x528] ss:$20 sps:$4 sm:$0xff]  }
 0xeaa   :  { %20621 = vmatprep.subr.bf16.mxu1 %v22335_v23 }
 0xead   :  { %20622 = vmatpush3.bf16.msra.mxu1 %v21289_v45  ;;  %v21316_v45 = vld [vmem:[%s28269_s3 + $0x50c] ss:$20 sps:$4 sm:$0xff]  }
 0xeae   :  { %19189 = vmatprep.subr.bf16.mxu1 %v23370_v37 }
 0xeb0   :  { %20624 = vmatmul.mubr.msk.bf16.vlgmr.msra.gmra.mrb[124].mxu1 %vm352_vm1, %v3657_v7  ;;  %v21310_v7 = vld [vmem:[%s28269_s3 + $0x504] ss:$20 sps:$4 sm:$0xff]  }
 0xeb1   :  { %19190 = vmatpush3.bf16.msra.mxu1 %v23377_v56  ;;  %3894 = vmatprep.mubr.bf16.mxu1 %v17355_v47 }
 0xeb2   :  { %19191 = vmatprep.subr.bf16.mxu1 %v23383_v31 }
 0xeb5   :  { %19192 = vmatpush3.bf16.msra.mxu1 %v23463_v20 }
 0xeb6   :  { %19193 = vmatprep.subr.bf16.mxu1 %v23469_v14 }
 0xeb9   :  { %19194 = vmatpush3.bf16.msra.mxu1 %v23475_v9 }
 0xeba   :  { %19195 = vmatprep.subr.bf16.mxu1 %v23481_v17 }
 0xebd   :  { %19196 = vmatpush3.bf16.msra.mxu1 %v23487_v25 }
 0xebe   :  { %19197 = vmatprep.subr.bf16.mxu1 %v23493_v26 }
 0xec1   :  { %19198 = vmatpush3.bf16.msra.mxu1 %v23499_v27 }
 0xec2   :  { %19199 = vmatprep.subr.bf16.mxu1 %v23505_v34 }
 0xec5   :  { %19200 = vmatpush3.bf16.msra.mxu1 %v23511_v21 }
 0xec6   :  { %19201 = vmatprep.subr.bf16.mxu1 %v23517_v38 }
 0xec9   :  { %19202 = vmatpush3.bf16.msra.mxu1 %v23523_v62 }
 0xeca   :  { %19203 = vmatprep.subr.bf16.mxu1 %v23603_v16 }
 0xecd   :  { %19204 = vmatpush3.bf16.msra.mxu1 %v23609_v11 }
 0xece   :  { %4218 = vmatprep.subr.bf16.mxu1 %v21310_v7 }
 0xed0   :  { %3895 = vmatmul.mubr.bf16.vlgmr.msra.gmra.mrb[128].mxu1 %v17354_v58 }
 0xed1   :  { %4250 = vmatprep.mubr.bf16.mxu1 %v22336_v30  ;;  %4219 = vmatpush1.bf16.msra.mxu1 %v21308_v53 }
 0xed2   :  { %4220 = vmatprep.subr.bf16.mxu1 %v21313_v50 }
 0xed5   :  { %4221 = vmatpush1.bf16.msra.mxu1 %v21311_v10 }
 0xed6   :  { %4259 = vmatprep.subr.bf16.mxu1 %v21316_v45 }
 0xf73   :  { %v3760_v40 = vpop.f32.mrb[116].mxu1 }
 0xf74   :  { %v23777_v1 = vadd.f32 %v3760_v40, %v23703_v55  ;;  %v3762_v60 = vpop.f32.mrb[117].mxu1 }
 0xf75   :  { %v23780_v57 = vadd.f32 %v3762_v60, %v23706_v6  ;;  %v3764_v0 = vpop.f32.mrb[118].mxu1 }
 0xf76   :  { %v3765_v54 = vpop.f32.mrb[119].mxu1 }
 0xf7b   :  { %v3801_v3 = vpop.f32.mrb[120].mxu1 }
 0xf7c   :  { %v23783_v2 = vadd.f32 %v3801_v3, %v23709_v8  ;;  %v3803_v18 = vpop.f32.mrb[121].mxu1 }
 0xf7d   :  { %v23786_v19 = vadd.f32 %v3803_v18, %v23712_v29  ;;  %v3805_v59 = vpop.f32.mrb[122].mxu1  ;;  %v21298_v29 = vld [vmem:[%s28269_s3 + $0x4b8] ss:$20 sps:$4 sm:$0xff]  }
 0xf7e   :  { %v3806_v63 = vpop.f32.mrb[123].mxu1 }
 0xf83   :  { %v3842_v22 = vpop.f32.mrb[124].mxu1 }
 0xf84   :  { %v23789_v55 = vadd.f32 %v3842_v22, %v23715_v24  ;;  %v20625_v32 = vpop.f32.mrb[125].mxu1  ;;  %v21303_v24 = vld [vmem:[%s28269_s3 + $0x4e4] ss:$20 sps:$4 sm:$0xff]  }
 0xf85   :  { %v3845_v48 = vpop.f32.mrb[126].mxu1 }
 0xf86   :  { %v20626_v6 = vpop.f32.mrb[127].mxu1 }
 0xfa3   :  { %v19205_v35 = vpop.f32.mrb[128].mxu1 }
 0xfa4   :  { %v19206_v43 = vpop.f32.mrb[129].mxu1 }
 0xfa5   :  { %v19207_v44 = vadd.f32 %v19206_v43, %v19205_v35  ;;  %v19208_v39 = vpop.f32.mrb[130].mxu1 }
 0xfa6   :  { %v19209_v46 = vpop.f32.mrb[131].mxu1  ;;  %v21317_v39 = vld [vmem:[%s28269_s3 + $0x530] ss:$20 sps:$4 sm:$0xff]  }
 0xfa7   :  { %v3897_v8 = vadd.f32 %v23265_v28, %v19207_v44  ;;  %v21304_v28 = vld [vmem:[%s28269_s3 + $0x4c0] ss:$20 sps:$4 sm:$0xff]   ;;  %v21320_v46 = vld [vmem:[%s28269_s3 + $0x510] ss:$20 sps:$4 sm:$0xff]  }
 0xfa8   :  { %v21319_v44 = vld [vmem:[%s28269_s3 + $0x534] ss:$20 sps:$4 sm:$0xff]  }
 0xfa9   :  { %v3902_v33 = vmax.f32 %v3897_v8, 0.0  ;;  %v21321_v8 = vld [vmem:[%s28269_s3 + $0x538] ss:$20 sps:$4 sm:$0xff]  }
 0xfab   :  { %v3903_v36 = vpack.c.bf16 %v3902_v33, %v3902_v33  ;;  %v17409_v33 = vld [vmem:[%s28268_s0 + $0x88] sm:$0xff] }
 0xfad   :  { %17378 = vmatmul.mubr.msk.bf16.vlgmr.msra.gmra.mrb[112].mxu0 %vm352_vm1, %v3903_v36 }
 0xfae   :  { %4014 = vmatpush1.bf16.msra.mxu0 %v21298_v29  ;;  %4045 = vmatprep.mubr.bf16.mxu0 %v22336_v30  ;;  %v17411_v29 = vcombine.high %v17409_v33, %v17409_v33 }
 0xfaf   :  { %4015 = vmatprep.subr.bf16.mxu0 %v21303_v24  ;;  %v21327_v24 = vld [vmem:[%s28269_s3 + $0x578] ss:$20 sps:$4 sm:$0xff]  }
 0xfb2   :  { %4016 = vmatpush1.bf16.msra.mxu0 %v21301_v41  ;;  %v21332_v41 = vld [vmem:[%s28269_s3 + $0x55c] ss:$20 sps:$4 sm:$0xff]  }
 0xfb3   :  { %20627 = vmatprep.subr.bf16.mxu0 %v22335_v23 }
 0xfb5   :  { %17379 = vmatmul.mubr.msk.bf16.vlgmr.msra.gmra.mrb[116].mxu0 %vm352_vm1, %v3903_v36 }
 0xfb6   :  { %20628 = vmatpush3.bf16.msra.mxu0 %v21304_v28  ;;  %20631 = vmatprep.mubr.msk.bf16.mxu0 %vm22337_vm0, %v22335_v23 }
 0xfb7   :  { %20629 = vmatprep.subr.bf16.mxu0 %v22335_v23 }
 0xfba   :  { %20630 = vmatpush3.bf16.msra.mxu0 %v21305_v4 }
 0xfbb   :  { %19214 = vmatprep.subr.bf16.mxu0 %v23370_v37 }
 0xfbd   :  { %20632 = vmatmul.mubr.msk.bf16.vlgmr.msra.gmra.mrb[120].mxu0 %vm352_vm1, %v3903_v36  ;;  %v21329_v36 = vld [vmem:[%s28269_s3 + $0x57c] ss:$20 sps:$4 sm:$0xff]  }
 0xfbe   :  { %19215 = vmatpush3.bf16.msra.mxu0 %v23377_v56  ;;  %4140 = vmatprep.mubr.bf16.mxu0 %v17383_v5 }
 0xfbf   :  { %19216 = vmatprep.subr.bf16.mxu0 %v23383_v31 }
 0xfc2   :  { %19217 = vmatpush3.bf16.msra.mxu0 %v23463_v20 }
 0xfc3   :  { %19218 = vmatprep.subr.bf16.mxu0 %v23469_v14 }
 0xfc6   :  { %19219 = vmatpush3.bf16.msra.mxu0 %v23475_v9 }
 0xfc7   :  { %19220 = vmatprep.subr.bf16.mxu0 %v23481_v17 }
 0xfca   :  { %19221 = vmatpush3.bf16.msra.mxu0 %v23487_v25 }
 0xfcb   :  { %19222 = vmatprep.subr.bf16.mxu0 %v23493_v26 }
 0xfce   :  { %19223 = vmatpush3.bf16.msra.mxu0 %v23499_v27 }
 0xfcf   :  { %19224 = vmatprep.subr.bf16.mxu0 %v23505_v34 }
 0xfd2   :  { %19225 = vmatpush3.bf16.msra.mxu0 %v23511_v21 }
 0xfd3   :  { %19226 = vmatprep.subr.bf16.mxu0 %v23517_v38 }
 0xfd6   :  { %19227 = vmatpush3.bf16.msra.mxu0 %v23523_v62 }
 0xfd7   :  { %19228 = vmatprep.subr.bf16.mxu0 %v23603_v16 }
 0xfda   :  { %19229 = vmatpush3.bf16.msra.mxu0 %v23609_v11 }
 0xfdd   :  { %4141 = vmatmul.mubr.bf16.vlgmr.msra.gmra.mrb[124].mxu0 %v17382_v42 }
 0xfde   :  { %4496 = vmatprep.mubr.bf16.mxu0 %v22336_v30 }
0x1080   :  { %v4006_v13 = vpop.f32.mrb[112].mxu0 }
0x1081   :  { %v23851_v47 = vadd.f32 %v4006_v13, %v23777_v1  ;;  %v4008_v58 = vpop.f32.mrb[113].mxu0 }
0x1082   :  { %v23854_v49 = vadd.f32 %v4008_v58, %v23780_v57  ;;  %v4010_v61 = vpop.f32.mrb[114].mxu0 }
0x1083   :  { %v4011_v12 = vpop.f32.mrb[115].mxu0 }
0x1088   :  { %v4047_v52 = vpop.f32.mrb[116].mxu0 }
0x1089   :  { %v23857_v51 = vadd.f32 %v4047_v52, %v23783_v2  ;;  %v4049_v40 = vpop.f32.mrb[117].mxu0  ;;  %v23868_v2 = vld [vmem:[%s28270_s2] ss:$0 sm:$0xff] }
0x108a   :  { %v23860_v60 = vadd.f32 %v4049_v40, %v23786_v19  ;;  %v4051_v0 = vpop.f32.mrb[118].mxu0 }
0x108b   :  { %v4052_v54 = vpop.f32.mrb[119].mxu0 }
0x1090   :  { %v4088_v3 = vpop.f32.mrb[120].mxu0 }
0x1091   :  { %v23863_v1 = vadd.f32 %v4088_v3, %v23789_v55  ;;  %v20633_v18 = vpop.f32.mrb[121].mxu0  ;;  %v21314_v55 = vld [vmem:[%s28269_s3 + $0x508] ss:$20 sps:$4 sm:$0xff]  }
0x1092   :  { %v4091_v59 = vpop.f32.mrb[122].mxu0 }
0x1093   :  { %v20634_v57 = vpop.f32.mrb[123].mxu0 }
0x10b0   :  { %v19230_v63 = vpop.f32.mrb[124].mxu0 }
0x10b1   :  { %v19231_v22 = vpop.f32.mrb[125].mxu0 }
0x10b2   :  { %v19232_v32 = vadd.f32 %v19231_v22, %v19230_v63  ;;  %v19233_v48 = vpop.f32.mrb[126].mxu0  ;;  %v21333_v63 = vld [vmem:[%s28269_s3 + $0x580] ss:$20 sps:$4 sm:$0xff]  }
0x10b3   :  { %v19234_v6 = vpop.f32.mrb[127].mxu0  ;;  %v21336_v22 = vld [vmem:[%s28269_s3 + $0x560] ss:$20 sps:$4 sm:$0xff]  }
0x10b4   :  { %v4143_v19 = vadd.f32 %v23868_v2, %v19232_v32  ;;  %v21337_v32 = vld [vmem:[%s28269_s3 + $0x588] ss:$20 sps:$4 sm:$0xff]   ;;  %v17437_v48 = vld [vmem:[%s28268_s0 + $0x90] sm:$0xff] }
0x10b5   :  { %v17439_v6 = vcombine.high %v17437_v48, %v17437_v48 }
0x10b6   :  { %v4148_v35 = vmax.f32 %v4143_v19, 0.0  ;;  %v23973_v19 = vld [vmem:[%s28267_s1 + $0x40] sm:$0xff]  }
0x10b8   :  { %v4149_v43 = vpack.c.bf16 %v4148_v35, %v4148_v35  ;;  %v23980_v35 = vld [vmem:[%s28267_s1] sm:$0xff]  }
0x10ba   :  { %17406 = vmatmul.mubr.msk.bf16.vlgmr.msra.gmra.mrb[132].mxu1 %vm352_vm1, %v4149_v43 }
0x10bb   :  { %4260 = vmatpush1.bf16.msra.mxu1 %v21314_v55  ;;  %4291 = vmatprep.mubr.bf16.mxu1 %v22336_v30  ;;  %v23986_v55 = vld [vmem:[%s28267_s1 + $0x48] sm:$0xff]  }
0x10bc   :  { %4261 = vmatprep.subr.bf16.mxu1 %v21319_v44 }
0x10bf   :  { %4262 = vmatpush1.bf16.msra.mxu1 %v21317_v39 }
0x10c0   :  { %20635 = vmatprep.subr.bf16.mxu1 %v22335_v23 }
0x10c2   :  { %17407 = vmatmul.mubr.msk.bf16.vlgmr.msra.gmra.mrb[136].mxu1 %vm352_vm1, %v4149_v43 }
0x10c3   :  { %20636 = vmatpush3.bf16.msra.mxu1 %v21320_v46  ;;  %20639 = vmatprep.mubr.msk.bf16.mxu1 %vm22337_vm0, %v22335_v23 }
0x10c4   :  { %20637 = vmatprep.subr.bf16.mxu1 %v22335_v23 }
0x10c7   :  { %20638 = vmatpush3.bf16.msra.mxu1 %v21321_v8 }
0x10c8   :  { %19239 = vmatprep.subr.bf16.mxu1 %v23370_v37  ;;  %v17410_v37 = vcombine.low %v17409_v33, %v17409_v33 }
0x10ca   :  { %20640 = vmatmul.mubr.msk.bf16.vlgmr.msra.gmra.mrb[140].mxu1 %vm352_vm1, %v4149_v43 }
0x10cb   :  { %19240 = vmatpush3.bf16.msra.mxu1 %v23377_v56  ;;  %4386 = vmatprep.mubr.bf16.mxu1 %v17411_v29  ;;  %v21326_v56 = vld [vmem:[%s28269_s3 + $0x554] ss:$20 sps:$4 sm:$0xff]  }
0x10cc   :  { %19241 = vmatprep.subr.bf16.mxu1 %v23383_v31  ;;  %v21324_v31 = vld [vmem:[%s28269_s3 + $0x550] ss:$20 sps:$4 sm:$0xff]   ;;  %4464 = vmatprep.subr.bf16.mxu0 %v21326_v56 }
0x10cd   :  { %4465 = vmatpush1.bf16.msra.mxu0 %v21324_v31 }
0x10ce   :  { %4466 = vmatprep.subr.bf16.mxu0 %v21329_v36 }
0x10cf   :  { %19242 = vmatpush3.bf16.msra.mxu1 %v23463_v20 }
0x10d0   :  { %19243 = vmatprep.subr.bf16.mxu1 %v23469_v14 }
0x10d1   :  { %4467 = vmatpush1.bf16.msra.mxu0 %v21327_v24 }
0x10d2   :  { %4505 = vmatprep.subr.bf16.mxu0 %v21332_v41 }
0x10d3   :  { %19244 = vmatpush3.bf16.msra.mxu1 %v23475_v9 }
0x10d4   :  { %19245 = vmatprep.subr.bf16.mxu1 %v23481_v17 }
0x10d7   :  { %19246 = vmatpush3.bf16.msra.mxu1 %v23487_v25 }
0x10d8   :  { %19247 = vmatprep.subr.bf16.mxu1 %v23493_v26 }
0x10db   :  { %19248 = vmatpush3.bf16.msra.mxu1 %v23499_v27 }
0x10dc   :  { %19249 = vmatprep.subr.bf16.mxu1 %v23505_v34 }
0x10df   :  { %19250 = vmatpush3.bf16.msra.mxu1 %v23511_v21 }
0x10e0   :  { %19251 = vmatprep.subr.bf16.mxu1 %v23517_v38 }
0x10e3   :  { %19252 = vmatpush3.bf16.msra.mxu1 %v23523_v62 }
0x10e4   :  { %19253 = vmatprep.subr.bf16.mxu1 %v23603_v16 }
0x10e7   :  { %19254 = vmatpush3.bf16.msra.mxu1 %v23609_v11 }
0x10ea   :  { %4387 = vmatmul.mubr.bf16.vlgmr.msra.gmra.mrb[144].mxu1 %v17410_v37 }
0x10eb   :  { %4742 = vmatprep.mubr.bf16.mxu1 %v22336_v30 }
0x118d   :  { %v4252_v28 = vpop.f32.mrb[132].mxu1 }
0x118e   :  { %v23930_v4 = vadd.f32 %v4252_v28, %v23851_v47  ;;  %v4254_v15 = vpop.f32.mrb[133].mxu1 }
0x118f   :  { %v23933_v5 = vadd.f32 %v4254_v15, %v23854_v49  ;;  %v4256_v42 = vpop.f32.mrb[134].mxu1 }
0x1190   :  { %v4257_v7 = vpop.f32.mrb[135].mxu1 }
0x1195   :  { %v4293_v53 = vpop.f32.mrb[136].mxu1 }
0x1196   :  { %v23936_v50 = vadd.f32 %v4293_v53, %v23857_v51  ;;  %v4295_v10 = vpop.f32.mrb[137].mxu1  ;;  %v21346_v53 = vld [vmem:[%s28269_s3 + $0x5a8] ss:$20 sps:$4 sm:$0xff]  }
0x1197   :  { %v23939_v45 = vadd.f32 %v4295_v10, %v23860_v60  ;;  %v4297_v13 = vpop.f32.mrb[138].mxu1  ;;  %v21330_v60 = vld [vmem:[%s28269_s3 + $0x558] ss:$20 sps:$4 sm:$0xff]   ;;  %v21351_v10 = vld [vmem:[%s28269_s3 + $0x5d4] ss:$20 sps:$4 sm:$0xff]  }
0x1198   :  { %v4298_v58 = vpop.f32.mrb[139].mxu1  ;;  %v21352_v13 = vld [vmem:[%s28269_s3 + $0x5b0] ss:$20 sps:$4 sm:$0xff]  }
0x1199   :  { %v21353_v58 = vld [vmem:[%s28269_s3 + $0x5d8] ss:$20 sps:$4 sm:$0xff]  }
0x119d   :  { %v4334_v61 = vpop.f32.mrb[140].mxu1 }
0x119e   :  { %v23942_v47 = vadd.f32 %v4334_v61, %v23863_v1  ;;  %v20641_v12 = vpop.f32.mrb[141].mxu1  ;;  %v21335_v1 = vld [vmem:[%s28269_s3 + $0x584] ss:$20 sps:$4 sm:$0xff]  }
0x119f   :  { %v4337_v52 = vpop.f32.mrb[142].mxu1  ;;  %v17465_v61 = vld [vmem:[%s28268_s0 + $0x98] sm:$0xff]  ;;  %v24066_v12 = vld [vmem:[%s28267_s1 + $0x8] sm:$0xff]  }
0x11a0   :  { %v20642_v49 = vpop.f32.mrb[143].mxu1  ;;  %v24072_v52 = vld [vmem:[%s28267_s1 + $0x50] sm:$0xff]  }
0x11a1   :  { %v24078_v49 = vld [vmem:[%s28267_s1 + $0x10] sm:$0xff]  }
0x11bd   :  { %v19255_v40 = vpop.f32.mrb[144].mxu1 }
0x11be   :  { %v19256_v0 = vpop.f32.mrb[145].mxu1 }
0x11bf   :  { %v19257_v54 = vadd.f32 %v19256_v0, %v19255_v40  ;;  %v19258_v3 = vpop.f32.mrb[146].mxu1  ;;  %v24084_v40 = vld [vmem:[%s28267_s1 + $0x58] sm:$0xff]  }
0x11c0   :  { %v19259_v18 = vpop.f32.mrb[147].mxu1  ;;  %v24090_v0 = vld [vmem:[%s28267_s1 + $0x18] sm:$0xff]   ;;  %v24102_v3 = vld [vmem:[%s28267_s1 + $0x20] sm:$0xff]  }
0x11c1   :  { %v4389_v51 = vadd.f32 %v23868_v2, %v19257_v54  ;;  %v24096_v54 = vld [vmem:[%s28267_s1 + $0x60] sm:$0xff]   ;;  %v24108_v18 = vld [vmem:[%s28267_s1 + $0x68] sm:$0xff]  }
0x11c3   :  { %v4394_v59 = vmax.f32 %v4389_v51, 0.0  ;;  %v24114_v51 = vld [vmem:[%s28267_s1 + $0x28] sm:$0xff]  }
0x11c5   :  { %v4395_v57 = vpack.c.bf16 %v4394_v59, %v4394_v59  ;;  %v24120_v59 = vld [vmem:[%s28267_s1 + $0x70] sm:$0xff]  }
0x11c7   :  { %17434 = vmatmul.mubr.msk.bf16.vlgmr.msra.gmra.mrb[128].mxu0 %vm352_vm1, %v4395_v57 }
0x11c8   :  { %4506 = vmatpush1.bf16.msra.mxu0 %v21330_v60  ;;  %4537 = vmatprep.mubr.bf16.mxu0 %v22336_v30  ;;  %v24126_v60 = vld [vmem:[%s28267_s1 + $0x30] sm:$0xff]  }
0x11c9   :  { %4507 = vmatprep.subr.bf16.mxu0 %v21335_v1  ;;  %v21358_v1 = vld [vmem:[%s28269_s3 + $0x5f4] ss:$20 sps:$4 sm:$0xff]  }
0x11cc   :  { %4508 = vmatpush1.bf16.msra.mxu0 %v21333_v63  ;;  %v21356_v63 = vld [vmem:[%s28269_s3 + $0x5f0] ss:$20 sps:$4 sm:$0xff]  }
0x11cd   :  { %20643 = vmatprep.subr.bf16.mxu0 %v22335_v23 }
0x11cf   :  { %17435 = vmatmul.mubr.msk.bf16.vlgmr.msra.gmra.mrb[132].mxu0 %vm352_vm1, %v4395_v57 }
0x11d0   :  { %20644 = vmatpush3.bf16.msra.mxu0 %v21336_v22  ;;  %20647 = vmatprep.mubr.msk.bf16.mxu0 %vm22337_vm0, %v22335_v23  ;;  %v21364_v22 = vld [vmem:[%s28269_s3 + $0x5fc] ss:$20 sps:$4 sm:$0xff]  }
0x11d1   :  { %20645 = vmatprep.subr.bf16.mxu0 %v22335_v23 }
0x11d4   :  { %20646 = vmatpush3.bf16.msra.mxu0 %v21337_v32 }
0x11d5   :  { %19264 = vmatprep.subr.bf16.mxu0 %v23973_v19 }
0x11d7   :  { %20648 = vmatmul.mubr.msk.bf16.vlgmr.msra.gmra.mrb[136].mxu0 %vm352_vm1, %v4395_v57  ;;  %v17466_v57 = vcombine.low %v17465_v61, %v17465_v61 }
0x11d8   :  { %19265 = vmatpush3.bf16.msra.mxu0 %v23980_v35  ;;  %4632 = vmatprep.mubr.bf16.mxu0 %v17439_v6 }
0x11d9   :  { %19266 = vmatprep.subr.bf16.mxu0 %v23986_v55 }
0x11dc   :  { %19267 = vmatpush3.bf16.msra.mxu0 %v23463_v20  ;;  %v17438_v20 = vcombine.low %v17437_v48, %v17437_v48 }
0x11dd   :  { %19268 = vmatprep.subr.bf16.mxu0 %v23469_v14  ;;  %v21342_v14 = vld [vmem:[%s28269_s3 + $0x5a4] ss:$20 sps:$4 sm:$0xff]  }
0x11de   :  { %4710 = vmatprep.subr.bf16.mxu1 %v21342_v14 }
0x11e0   :  { %19269 = vmatpush3.bf16.msra.mxu0 %v23475_v9  ;;  %v21340_v9 = vld [vmem:[%s28269_s3 + $0x5a0] ss:$20 sps:$4 sm:$0xff]  }
0x11e1   :  { %19270 = vmatprep.subr.bf16.mxu0 %v23481_v17  ;;  %4711 = vmatpush1.bf16.msra.mxu1 %v21340_v9  ;;  %v21345_v17 = vld [vmem:[%s28269_s3 + $0x5cc] ss:$20 sps:$4 sm:$0xff]  }
0x11e2   :  { %4712 = vmatprep.subr.bf16.mxu1 %v21345_v17 }
0x11e4   :  { %19271 = vmatpush3.bf16.msra.mxu0 %v23487_v25  ;;  %v21343_v25 = vld [vmem:[%s28269_s3 + $0x5c8] ss:$20 sps:$4 sm:$0xff]  }
0x11e5   :  { %19272 = vmatprep.subr.bf16.mxu0 %v23493_v26  ;;  %4713 = vmatpush1.bf16.msra.mxu1 %v21343_v25  ;;  %v21348_v26 = vld [vmem:[%s28269_s3 + $0x5ac] ss:$20 sps:$4 sm:$0xff]  }
0x11e6   :  { %4751 = vmatprep.subr.bf16.mxu1 %v21348_v26 }
0x11e8   :  { %19273 = vmatpush3.bf16.msra.mxu0 %v23499_v27 }
0x11e9   :  { %19274 = vmatprep.subr.bf16.mxu0 %v23505_v34 }
0x11ec   :  { %19275 = vmatpush3.bf16.msra.mxu0 %v23511_v21 }
0x11ed   :  { %19276 = vmatprep.subr.bf16.mxu0 %v23517_v38 }
0x11f0   :  { %19277 = vmatpush3.bf16.msra.mxu0 %v23523_v62 }
0x11f1   :  { %19278 = vmatprep.subr.bf16.mxu0 %v23603_v16 }
0x11f4   :  { %19279 = vmatpush3.bf16.msra.mxu0 %v23609_v11 }
0x11f5   :  { %4956 = vmatprep.subr.bf16.mxu0 %v21358_v1 }
0x11f7   :  { %4633 = vmatmul.mubr.bf16.vlgmr.msra.gmra.mrb[140].mxu0 %v17438_v20 }
0x11f8   :  { %4988 = vmatprep.mubr.bf16.mxu0 %v22336_v30  ;;  %4957 = vmatpush1.bf16.msra.mxu0 %v21356_v63 }
0x129a   :  { %v4498_v27 = vpop.f32.mrb[128].mxu0 }
0x129b   :  { %v24019_v34 = vadd.f32 %v4498_v27, %v23930_v4  ;;  %v4500_v21 = vpop.f32.mrb[129].mxu0 }
0x129c   :  { %v24022_v38 = vadd.f32 %v4500_v21, %v23933_v5  ;;  %v4502_v62 = vpop.f32.mrb[130].mxu0 }
0x129d   :  { %v4503_v43 = vpop.f32.mrb[131].mxu0 }
0x12a2   :  { %v4539_v44 = vpop.f32.mrb[132].mxu0 }
0x12a3   :  { %v24025_v39 = vadd.f32 %v4539_v44, %v23936_v50  ;;  %v4541_v46 = vpop.f32.mrb[133].mxu0 }
0x12a4   :  { %v24028_v8 = vadd.f32 %v4541_v46, %v23939_v45  ;;  %v4543_v33 = vpop.f32.mrb[134].mxu0  ;;  %v21349_v45 = vld [vmem:[%s28269_s3 + $0x5d0] ss:$20 sps:$4 sm:$0xff]  }
0x12a5   :  { %v4544_v29 = vpop.f32.mrb[135].mxu0 }
0x12aa   :  { %v4580_v37 = vpop.f32.mrb[136].mxu0 }
0x12ab   :  { %v24031_v56 = vadd.f32 %v4580_v37, %v23942_v47  ;;  %v20649_v31 = vpop.f32.mrb[137].mxu0  ;;  %v17467_v47 = vcombine.high %v17465_v61, %v17465_v61  ;;  %v21380_v61 = vld [vmem:[%s28269_s3 + $0x64c] ss:$20 sps:$4 sm:$0xff]  }
0x12ac   :  { %v4583_v36 = vpop.f32.mrb[138].mxu0 }
0x12ad   :  { %v20650_v24 = vpop.f32.mrb[139].mxu0 }
0x12ca   :  { %v19280_v41 = vpop.f32.mrb[140].mxu0 }
0x12cb   :  { %v19281_v28 = vpop.f32.mrb[141].mxu0 }
0x12cc   :  { %v19282_v4 = vadd.f32 %v19281_v28, %v19280_v41  ;;  %v19283_v15 = vpop.f32.mrb[142].mxu0  ;;  %v21365_v28 = vld [vmem:[%s28269_s3 + $0x620] ss:$20 sps:$4 sm:$0xff]  }
0x12cd   :  { %v19284_v5 = vpop.f32.mrb[143].mxu0  ;;  %v21369_v15 = vld [vmem:[%s28269_s3 + $0x628] ss:$20 sps:$4 sm:$0xff]  }
0x12ce   :  { %v4635_v42 = vadd.f32 %v23868_v2, %v19282_v4  ;;  %v21368_v4 = vld [vmem:[%s28269_s3 + $0x600] ss:$20 sps:$4 sm:$0xff]  }
0x12cf   :  { %v17493_v5 = vld [vmem:[%s28268_s0 + $0xa0] sm:$0xff] }
0x12d0   :  { %v4640_v7 = vmax.f32 %v4635_v42, 0.0  ;;  %v17495_v42 = vcombine.high %v17493_v5, %v17493_v5 }
0x12d2   :  { %v4641_v50 = vpack.c.bf16 %v4640_v7, %v4640_v7  ;;  %v24206_v7 = vld [vmem:[%s28267_s1 + $0x78] sm:$0xff]  }
0x12d4   :  { %17462 = vmatmul.mubr.msk.bf16.vlgmr.msra.gmra.mrb[148].mxu1 %vm352_vm1, %v4641_v50 }
0x12d5   :  { %4752 = vmatpush1.bf16.msra.mxu1 %v21346_v53  ;;  %4783 = vmatprep.mubr.bf16.mxu1 %v22336_v30  ;;  %v17494_v53 = vcombine.low %v17493_v5, %v17493_v5  ;;  %v21396_v5 = vld [vmem:[%s28269_s3 + $0x69c] ss:$20 sps:$4 sm:$0xff]  }
0x12d6   :  { %4753 = vmatprep.subr.bf16.mxu1 %v21351_v10  ;;  %v21374_v10 = vld [vmem:[%s28269_s3 + $0x644] ss:$20 sps:$4 sm:$0xff]  }
0x12d9   :  { %4754 = vmatpush1.bf16.msra.mxu1 %v21349_v45  ;;  %v21372_v45 = vld [vmem:[%s28269_s3 + $0x640] ss:$20 sps:$4 sm:$0xff]  }
0x12da   :  { %20651 = vmatprep.subr.bf16.mxu1 %v22335_v23 }
0x12dc   :  { %17463 = vmatmul.mubr.msk.bf16.vlgmr.msra.gmra.mrb[152].mxu1 %vm352_vm1, %v4641_v50 }
0x12dd   :  { %20652 = vmatpush3.bf16.msra.mxu1 %v21352_v13  ;;  %20655 = vmatprep.mubr.msk.bf16.mxu1 %vm22337_vm0, %v22335_v23  ;;  %v21377_v13 = vld [vmem:[%s28269_s3 + $0x66c] ss:$20 sps:$4 sm:$0xff]  }
0x12de   :  { %20653 = vmatprep.subr.bf16.mxu1 %v22335_v23 }
0x12e1   :  { %20654 = vmatpush3.bf16.msra.mxu1 %v21353_v58  ;;  %v21375_v58 = vld [vmem:[%s28269_s3 + $0x668] ss:$20 sps:$4 sm:$0xff]  }
0x12e2   :  { %19289 = vmatprep.subr.bf16.mxu1 %v23973_v19 }
0x12e4   :  { %20656 = vmatmul.mubr.msk.bf16.vlgmr.msra.gmra.mrb[156].mxu1 %vm352_vm1, %v4641_v50  ;;  %v24212_v50 = vld [vmem:[%s28267_s1 + $0x38] sm:$0xff]  }
0x12e5   :  { %19290 = vmatpush3.bf16.msra.mxu1 %v23980_v35  ;;  %4878 = vmatprep.mubr.bf16.mxu1 %v17467_v47 }
0x12e6   :  { %19291 = vmatprep.subr.bf16.mxu1 %v23986_v55 }
0x12e9   :  { %19292 = vmatpush3.bf16.msra.mxu1 %v24066_v12 }
0x12ea   :  { %19293 = vmatprep.subr.bf16.mxu1 %v24072_v52 }
0x12ed   :  { %19294 = vmatpush3.bf16.msra.mxu1 %v24078_v49 }
0x12ee   :  { %19295 = vmatprep.subr.bf16.mxu1 %v24084_v40 }
0x12f1   :  { %19296 = vmatpush3.bf16.msra.mxu1 %v24090_v0 }
0x12f2   :  { %19297 = vmatprep.subr.bf16.mxu1 %v24096_v54 }
0x12f5   :  { %19298 = vmatpush3.bf16.msra.mxu1 %v24102_v3 }
0x12f6   :  { %19299 = vmatprep.subr.bf16.mxu1 %v24108_v18 }
0x12f9   :  { %19300 = vmatpush3.bf16.msra.mxu1 %v24114_v51 }
0x12fa   :  { %19301 = vmatprep.subr.bf16.mxu1 %v24120_v59 }
0x12fd   :  { %19302 = vmatpush3.bf16.msra.mxu1 %v24126_v60 }
0x12fe   :  { %19303 = vmatprep.subr.bf16.mxu1 %v23603_v16  ;;  %v21361_v16 = vld [vmem:[%s28269_s3 + $0x61c] ss:$20 sps:$4 sm:$0xff]  }
0x12ff   :  { %4958 = vmatprep.subr.bf16.mxu0 %v21361_v16 }
0x1301   :  { %19304 = vmatpush3.bf16.msra.mxu1 %v23609_v11  ;;  %v21359_v11 = vld [vmem:[%s28269_s3 + $0x618] ss:$20 sps:$4 sm:$0xff]  }
0x1302   :  { %4959 = vmatpush1.bf16.msra.mxu0 %v21359_v11  ;;  %5202 = vmatprep.subr.bf16.mxu1 %v21374_v10 }
0x1303   :  { %4997 = vmatprep.subr.bf16.mxu0 %v21364_v22 }
0x1304   :  { %4879 = vmatmul.mubr.bf16.vlgmr.msra.gmra.mrb[160].mxu1 %v17466_v57 }
0x1305   :  { %5234 = vmatprep.mubr.bf16.mxu1 %v22336_v30  ;;  %5203 = vmatpush1.bf16.msra.mxu1 %v21372_v45 }
0x1306   :  { %5204 = vmatprep.subr.bf16.mxu1 %v21377_v13 }
0x1309   :  { %5205 = vmatpush1.bf16.msra.mxu1 %v21375_v58 }
0x130a   :  { %5243 = vmatprep.subr.bf16.mxu1 %v21380_v61 }
0x13a7   :  { %v4744_v32 = vpop.f32.mrb[148].mxu1 }
0x13a8   :  { %v24148_v48 = vadd.f32 %v4744_v32, %v24019_v34  ;;  %v4746_v6 = vpop.f32.mrb[149].mxu1 }
0x13a9   :  { %v24151_v20 = vadd.f32 %v4746_v6, %v24022_v38  ;;  %v4748_v14 = vpop.f32.mrb[150].mxu1 }
0x13aa   :  { %v4749_v9 = vpop.f32.mrb[151].mxu1 }
0x13af   :  { %v4785_v17 = vpop.f32.mrb[152].mxu1 }
0x13b0   :  { %v24154_v25 = vadd.f32 %v4785_v17, %v24025_v39  ;;  %v4787_v26 = vpop.f32.mrb[153].mxu1 }
0x13b1   :  { %v24157_v27 = vadd.f32 %v4787_v26, %v24028_v8  ;;  %v4789_v21 = vpop.f32.mrb[154].mxu1  ;;  %v21362_v8 = vld [vmem:[%s28269_s3 + $0x5f8] ss:$20 sps:$4 sm:$0xff]  }
0x13b2   :  { %v4790_v62 = vpop.f32.mrb[155].mxu1 }
0x13b7   :  { %v4826_v43 = vpop.f32.mrb[156].mxu1 }
0x13b8   :  { %v24160_v34 = vadd.f32 %v4826_v43, %v24031_v56  ;;  %v20657_v44 = vpop.f32.mrb[157].mxu1  ;;  %v21367_v56 = vld [vmem:[%s28269_s3 + $0x624] ss:$20 sps:$4 sm:$0xff]  }
0x13b9   :  { %v4829_v46 = vpop.f32.mrb[158].mxu1 }
0x13ba   :  { %v20658_v38 = vpop.f32.mrb[159].mxu1 }
0x13d7   :  { %v19305_v33 = vpop.f32.mrb[160].mxu1 }
0x13d8   :  { %v19306_v29 = vpop.f32.mrb[161].mxu1 }
0x13d9   :  { %v19307_v37 = vadd.f32 %v19306_v29, %v19305_v33  ;;  %v19308_v31 = vpop.f32.mrb[162].mxu1 }
0x13da   :  { %v19309_v36 = vpop.f32.mrb[163].mxu1  ;;  %v21381_v31 = vld [vmem:[%s28269_s3 + $0x670] ss:$20 sps:$4 sm:$0xff]  }
0x13db   :  { %v4881_v39 = vadd.f32 %v23868_v2, %v19307_v37  ;;  %v21384_v36 = vld [vmem:[%s28269_s3 + $0x650] ss:$20 sps:$4 sm:$0xff]  }
0x13dd   :  { %v4886_v24 = vmax.f32 %v4881_v39, 0.0  ;;  %v21385_v39 = vld [vmem:[%s28269_s3 + $0x678] ss:$20 sps:$4 sm:$0xff]  }
0x13df   :  { %v4887_v41 = vpack.c.bf16 %v4886_v24, %v4886_v24  ;;  %v17521_v24 = vld [vmem:[%s28268_s0 + $0xa8] sm:$0xff] }
0x13e1   :  { %17490 = vmatmul.mubr.msk.bf16.vlgmr.msra.gmra.mrb[144].mxu0 %vm352_vm1, %v4887_v41 }
0x13e2   :  { %4998 = vmatpush1.bf16.msra.mxu0 %v21362_v8  ;;  %5029 = vmatprep.mubr.bf16.mxu0 %v22336_v30  ;;  %v17523_v8 = vcombine.high %v17521_v24, %v17521_v24 }
0x13e3   :  { %4999 = vmatprep.subr.bf16.mxu0 %v21367_v56  ;;  %v21390_v56 = vld [vmem:[%s28269_s3 + $0x694] ss:$20 sps:$4 sm:$0xff]  }
0x13e6   :  { %5000 = vmatpush1.bf16.msra.mxu0 %v21365_v28  ;;  %v21388_v28 = vld [vmem:[%s28269_s3 + $0x690] ss:$20 sps:$4 sm:$0xff]  }
0x13e7   :  { %20659 = vmatprep.subr.bf16.mxu0 %v22335_v23 }
0x13e9   :  { %17491 = vmatmul.mubr.msk.bf16.vlgmr.msra.gmra.mrb[148].mxu0 %vm352_vm1, %v4887_v41 }
0x13ea   :  { %20660 = vmatpush3.bf16.msra.mxu0 %v21368_v4  ;;  %20663 = vmatprep.mubr.msk.bf16.mxu0 %vm22337_vm0, %v22335_v23  ;;  %v21393_v4 = vld [vmem:[%s28269_s3 + $0x6bc] ss:$20 sps:$4 sm:$0xff]  }
0x13eb   :  { %20661 = vmatprep.subr.bf16.mxu0 %v22335_v23 }
0x13ee   :  { %20662 = vmatpush3.bf16.msra.mxu0 %v21369_v15  ;;  %v21391_v15 = vld [vmem:[%s28269_s3 + $0x6b8] ss:$20 sps:$4 sm:$0xff]  }
0x13ef   :  { %19314 = vmatprep.subr.bf16.mxu0 %v23973_v19 }
0x13f1   :  { %20664 = vmatmul.mubr.msk.bf16.vlgmr.msra.gmra.mrb[152].mxu0 %vm352_vm1, %v4887_v41  ;;  %v17522_v41 = vcombine.low %v17521_v24, %v17521_v24  ;;  %v21412_v24 = vld [vmem:[%s28269_s3 + $0x6ec] ss:$20 sps:$4 sm:$0xff]  }
0x13f2   :  { %19315 = vmatpush3.bf16.msra.mxu0 %v23980_v35  ;;  %5124 = vmatprep.mubr.bf16.mxu0 %v17495_v42 }
0x13f3   :  { %19316 = vmatprep.subr.bf16.mxu0 %v23986_v55 }
0x13f6   :  { %19317 = vmatpush3.bf16.msra.mxu0 %v24066_v12 }
0x13f7   :  { %19318 = vmatprep.subr.bf16.mxu0 %v24072_v52 }
0x13fa   :  { %19319 = vmatpush3.bf16.msra.mxu0 %v24078_v49 }
0x13fb   :  { %19320 = vmatprep.subr.bf16.mxu0 %v24084_v40 }
0x13fe   :  { %19321 = vmatpush3.bf16.msra.mxu0 %v24090_v0 }
0x13ff   :  { %19322 = vmatprep.subr.bf16.mxu0 %v24096_v54 }
0x1402   :  { %19323 = vmatpush3.bf16.msra.mxu0 %v24102_v3 }
0x1403   :  { %19324 = vmatprep.subr.bf16.mxu0 %v24108_v18 }
0x1406   :  { %19325 = vmatpush3.bf16.msra.mxu0 %v24114_v51 }
0x1407   :  { %19326 = vmatprep.subr.bf16.mxu0 %v24120_v59 }
0x140a   :  { %19327 = vmatpush3.bf16.msra.mxu0 %v24126_v60 }
0x140b   :  { %19328 = vmatprep.subr.bf16.mxu0 %v24206_v7 }
0x140e   :  { %19329 = vmatpush3.bf16.msra.mxu0 %v24212_v50 }
0x140f   :  { %5448 = vmatprep.subr.bf16.mxu0 %v21390_v56 }
0x1411   :  { %5125 = vmatmul.mubr.bf16.vlgmr.msra.gmra.mrb[156].mxu0 %v17494_v53 }
0x1412   :  { %5480 = vmatprep.mubr.bf16.mxu0 %v22336_v30  ;;  %5449 = vmatpush1.bf16.msra.mxu0 %v21388_v28 }
0x1413   :  { %5450 = vmatprep.subr.bf16.mxu0 %v21393_v4 }
0x1416   :  { %5451 = vmatpush1.bf16.msra.mxu0 %v21391_v15 }
0x1417   :  { %5489 = vmatprep.subr.bf16.mxu0 %v21396_v5 }
0x14b4   :  { %v4990_v47 = vpop.f32.mrb[144].mxu0 }
0x14b5   :  { %v24232_v57 = vadd.f32 %v4990_v47, %v24148_v48  ;;  %v4992_v1 = vpop.f32.mrb[145].mxu0 }
0x14b6   :  { %v24235_v63 = vadd.f32 %v4992_v1, %v24151_v20  ;;  %v4994_v16 = vpop.f32.mrb[146].mxu0 }
0x14b7   :  { %v4995_v11 = vpop.f32.mrb[147].mxu0 }
0x14bc   :  { %v5031_v22 = vpop.f32.mrb[148].mxu0 }
0x14bd   :  { %v24238_v32 = vadd.f32 %v5031_v22, %v24154_v25  ;;  %v5033_v6 = vpop.f32.mrb[149].mxu0 }
0x14be   :  { %v24241_v14 = vadd.f32 %v5033_v6, %v24157_v27  ;;  %v5035_v9 = vpop.f32.mrb[150].mxu0  ;;  %v21378_v27 = vld [vmem:[%s28269_s3 + $0x648] ss:$20 sps:$4 sm:$0xff]  }
0x14bf   :  { %v5036_v17 = vpop.f32.mrb[151].mxu0 }
0x14c4   :  { %v5072_v26 = vpop.f32.mrb[152].mxu0 }
0x14c5   :  { %v24244_v48 = vadd.f32 %v5072_v26, %v24160_v34  ;;  %v20665_v21 = vpop.f32.mrb[153].mxu0  ;;  %v21383_v34 = vld [vmem:[%s28269_s3 + $0x674] ss:$20 sps:$4 sm:$0xff]  }
0x14c6   :  { %v5075_v62 = vpop.f32.mrb[154].mxu0 }
0x14c7   :  { %v20666_v20 = vpop.f32.mrb[155].mxu0 }
0x14e4   :  { %v19330_v43 = vpop.f32.mrb[156].mxu0 }
0x14e5   :  { %v19331_v44 = vpop.f32.mrb[157].mxu0 }
0x14e6   :  { %v19332_v46 = vadd.f32 %v19331_v44, %v19330_v43  ;;  %v19333_v38 = vpop.f32.mrb[158].mxu0 }
0x14e7   :  { %v19334_v33 = vpop.f32.mrb[159].mxu0  ;;  %v21397_v38 = vld [vmem:[%s28269_s3 + $0x6c0] ss:$20 sps:$4 sm:$0xff]  }
0x14e8   :  { %v5127_v25 = vadd.f32 %v23868_v2, %v19332_v46  ;;  %v21400_v33 = vld [vmem:[%s28269_s3 + $0x6a0] ss:$20 sps:$4 sm:$0xff]  }
0x14ea   :  { %v5132_v29 = vmax.f32 %v5127_v25, 0.0  ;;  %v21401_v25 = vld [vmem:[%s28269_s3 + $0x6c8] ss:$20 sps:$4 sm:$0xff]  }
0x14ec   :  { %v5133_v37 = vpack.c.bf16 %v5132_v29, %v5132_v29  ;;  %v17549_v29 = vld [vmem:[%s28268_s0 + $0xb0] sm:$0xff] }
0x14ee   :  { %17518 = vmatmul.mubr.msk.bf16.vlgmr.msra.gmra.mrb[164].mxu1 %vm352_vm1, %v5133_v37 }
0x14ef   :  { %5244 = vmatpush1.bf16.msra.mxu1 %v21378_v27  ;;  %5275 = vmatprep.mubr.bf16.mxu1 %v22336_v30  ;;  %v17551_v27 = vcombine.high %v17549_v29, %v17549_v29 }
0x14f0   :  { %5245 = vmatprep.subr.bf16.mxu1 %v21383_v34  ;;  %v21406_v34 = vld [vmem:[%s28269_s3 + $0x6e4] ss:$20 sps:$4 sm:$0xff]  }
0x14f3   :  { %5246 = vmatpush1.bf16.msra.mxu1 %v21381_v31  ;;  %v21404_v31 = vld [vmem:[%s28269_s3 + $0x6e0] ss:$20 sps:$4 sm:$0xff]  }
0x14f4   :  { %20667 = vmatprep.subr.bf16.mxu1 %v22335_v23 }
0x14f6   :  { %17519 = vmatmul.mubr.msk.bf16.vlgmr.msra.gmra.mrb[168].mxu1 %vm352_vm1, %v5133_v37 }
0x14f7   :  { %20668 = vmatpush3.bf16.msra.mxu1 %v21384_v36  ;;  %20671 = vmatprep.mubr.msk.bf16.mxu1 %vm22337_vm0, %v22335_v23  ;;  %v21409_v36 = vld [vmem:[%s28269_s3 + $0x70c] ss:$20 sps:$4 sm:$0xff]  }
0x14f8   :  { %20669 = vmatprep.subr.bf16.mxu1 %v22335_v23 }
0x14fb   :  { %20670 = vmatpush3.bf16.msra.mxu1 %v21385_v39  ;;  %v21407_v39 = vld [vmem:[%s28269_s3 + $0x708] ss:$20 sps:$4 sm:$0xff]  }
0x14fc   :  { %19339 = vmatprep.subr.bf16.mxu1 %v23973_v19 }
0x14fe   :  { %20672 = vmatmul.mubr.msk.bf16.vlgmr.msra.gmra.mrb[172].mxu1 %vm352_vm1, %v5133_v37  ;;  %v17550_v37 = vcombine.low %v17549_v29, %v17549_v29 }
0x14ff   :  { %19340 = vmatpush3.bf16.msra.mxu1 %v23980_v35  ;;  %5370 = vmatprep.mubr.bf16.mxu1 %v17523_v8 }
0x1500   :  { %19341 = vmatprep.subr.bf16.mxu1 %v23986_v55 }
0x1503   :  { %19342 = vmatpush3.bf16.msra.mxu1 %v24066_v12 }
0x1504   :  { %19343 = vmatprep.subr.bf16.mxu1 %v24072_v52 }
0x1507   :  { %19344 = vmatpush3.bf16.msra.mxu1 %v24078_v49 }
0x1508   :  { %19345 = vmatprep.subr.bf16.mxu1 %v24084_v40 }
0x150b   :  { %19346 = vmatpush3.bf16.msra.mxu1 %v24090_v0 }
0x150c   :  { %19347 = vmatprep.subr.bf16.mxu1 %v24096_v54 }
0x150f   :  { %19348 = vmatpush3.bf16.msra.mxu1 %v24102_v3 }
0x1510   :  { %19349 = vmatprep.subr.bf16.mxu1 %v24108_v18 }
0x1513   :  { %19350 = vmatpush3.bf16.msra.mxu1 %v24114_v51 }
0x1514   :  { %19351 = vmatprep.subr.bf16.mxu1 %v24120_v59 }
0x1517   :  { %19352 = vmatpush3.bf16.msra.mxu1 %v24126_v60 }
0x1518   :  { %19353 = vmatprep.subr.bf16.mxu1 %v24206_v7 }
0x151b   :  { %19354 = vmatpush3.bf16.msra.mxu1 %v24212_v50 }
0x151c   :  { %5694 = vmatprep.subr.bf16.mxu1 %v21406_v34 }
0x151e   :  { %5371 = vmatmul.mubr.bf16.vlgmr.msra.gmra.mrb[176].mxu1 %v17522_v41 }
0x151f   :  { %5726 = vmatprep.mubr.bf16.mxu1 %v22336_v30  ;;  %5695 = vmatpush1.bf16.msra.mxu1 %v21404_v31 }
0x1520   :  { %5696 = vmatprep.subr.bf16.mxu1 %v21409_v36 }
0x1523   :  { %5697 = vmatpush1.bf16.msra.mxu1 %v21407_v39 }
0x1524   :  { %5735 = vmatprep.subr.bf16.mxu1 %v21412_v24 }
0x15c1   :  { %v5236_v42 = vpop.f32.mrb[164].mxu1 }
0x15c2   :  { %v24306_v53 = vadd.f32 %v5236_v42, %v24232_v57  ;;  %v5238_v10 = vpop.f32.mrb[165].mxu1 }
0x15c3   :  { %v24309_v45 = vadd.f32 %v5238_v10, %v24235_v63  ;;  %v5240_v13 = vpop.f32.mrb[166].mxu1 }
0x15c4   :  { %v5241_v58 = vpop.f32.mrb[167].mxu1 }
0x15c9   :  { %v5277_v61 = vpop.f32.mrb[168].mxu1 }
0x15ca   :  { %v24312_v47 = vadd.f32 %v5277_v61, %v24238_v32  ;;  %v5279_v1 = vpop.f32.mrb[169].mxu1 }
0x15cb   :  { %v24315_v16 = vadd.f32 %v5279_v1, %v24241_v14  ;;  %v5281_v11 = vpop.f32.mrb[170].mxu1  ;;  %v21394_v14 = vld [vmem:[%s28269_s3 + $0x698] ss:$20 sps:$4 sm:$0xff]  }
0x15cc   :  { %v5282_v22 = vpop.f32.mrb[171].mxu1 }
0x15d1   :  { %v5318_v6 = vpop.f32.mrb[172].mxu1 }
0x15d2   :  { %v24318_v57 = vadd.f32 %v5318_v6, %v24244_v48  ;;  %v20673_v9 = vpop.f32.mrb[173].mxu1  ;;  %v21399_v48 = vld [vmem:[%s28269_s3 + $0x6c4] ss:$20 sps:$4 sm:$0xff]  }
0x15d3   :  { %v5321_v17 = vpop.f32.mrb[174].mxu1 }
0x15d4   :  { %v20674_v63 = vpop.f32.mrb[175].mxu1 }
0x15f1   :  { %v19355_v26 = vpop.f32.mrb[176].mxu1 }
0x15f2   :  { %v19356_v21 = vpop.f32.mrb[177].mxu1 }
0x15f3   :  { %v19357_v62 = vadd.f32 %v19356_v21, %v19355_v26  ;;  %v19358_v20 = vpop.f32.mrb[178].mxu1 }
0x15f4   :  { %v19359_v43 = vpop.f32.mrb[179].mxu1  ;;  %v21413_v20 = vld [vmem:[%s28269_s3 + $0x710] ss:$20 sps:$4 sm:$0xff]  }
0x15f5   :  { %v5373_v32 = vadd.f32 %v23868_v2, %v19357_v62  ;;  %v21417_v43 = vld [vmem:[%s28269_s3 + $0x718] ss:$20 sps:$4 sm:$0xff]  }
0x15f7   :  { %v5378_v44 = vmax.f32 %v5373_v32, 0.0  ;;  %v17577_v32 = vld [vmem:[%s28268_s0 + $0xb8] sm:$0xff] }
0x15f9   :  { %v5379_v46 = vpack.c.bf16 %v5378_v44, %v5378_v44  ;;  %v17579_v44 = vcombine.high %v17577_v32, %v17577_v32 }
0x15fb   :  { %17546 = vmatmul.mubr.msk.bf16.vlgmr.msra.gmra.mrb[160].mxu0 %vm352_vm1, %v5379_v46 }
0x15fc   :  { %5490 = vmatpush1.bf16.msra.mxu0 %v21394_v14  ;;  %5521 = vmatprep.mubr.bf16.mxu0 %v22336_v30  ;;  %v17578_v14 = vcombine.low %v17577_v32, %v17577_v32 }
0x15fd   :  { %5491 = vmatprep.subr.bf16.mxu0 %v21399_v48  ;;  %v21420_v48 = vld [vmem:[%s28269_s3 + $0x730] ss:$20 sps:$4 sm:$0xff]  }
0x1600   :  { %5492 = vmatpush1.bf16.msra.mxu0 %v21397_v38  ;;  %v21425_v38 = vld [vmem:[%s28269_s3 + $0x75c] ss:$20 sps:$4 sm:$0xff]  }
0x1601   :  { %20675 = vmatprep.subr.bf16.mxu0 %v22335_v23 }
0x1603   :  { %17547 = vmatmul.mubr.msk.bf16.vlgmr.msra.gmra.mrb[164].mxu0 %vm352_vm1, %v5379_v46 }
0x1604   :  { %20676 = vmatpush3.bf16.msra.mxu0 %v21400_v33  ;;  %20679 = vmatprep.mubr.msk.bf16.mxu0 %vm22337_vm0, %v22335_v23  ;;  %v21423_v33 = vld [vmem:[%s28269_s3 + $0x758] ss:$20 sps:$4 sm:$0xff]  }
0x1605   :  { %20677 = vmatprep.subr.bf16.mxu0 %v22335_v23 }
0x1608   :  { %20678 = vmatpush3.bf16.msra.mxu0 %v21401_v25  ;;  %v21428_v25 = vld [vmem:[%s28269_s3 + $0x73c] ss:$20 sps:$4 sm:$0xff]  }
0x1609   :  { %19364 = vmatprep.subr.bf16.mxu0 %v23973_v19 }
0x160b   :  { %20680 = vmatmul.mubr.msk.bf16.vlgmr.msra.gmra.mrb[168].mxu0 %vm352_vm1, %v5379_v46  ;;  %v21422_v46 = vld [vmem:[%s28269_s3 + $0x734] ss:$20 sps:$4 sm:$0xff]  }
0x160c   :  { %19365 = vmatpush3.bf16.msra.mxu0 %v23980_v35  ;;  %5616 = vmatprep.mubr.bf16.mxu0 %v17551_v27 }
0x160d   :  { %19366 = vmatprep.subr.bf16.mxu0 %v23986_v55 }
0x1610   :  { %19367 = vmatpush3.bf16.msra.mxu0 %v24066_v12 }
0x1611   :  { %19368 = vmatprep.subr.bf16.mxu0 %v24072_v52 }
0x1614   :  { %19369 = vmatpush3.bf16.msra.mxu0 %v24078_v49 }
0x1615   :  { %19370 = vmatprep.subr.bf16.mxu0 %v24084_v40 }
0x1618   :  { %19371 = vmatpush3.bf16.msra.mxu0 %v24090_v0 }
0x1619   :  { %19372 = vmatprep.subr.bf16.mxu0 %v24096_v54 }
0x161c   :  { %19373 = vmatpush3.bf16.msra.mxu0 %v24102_v3 }
0x161d   :  { %19374 = vmatprep.subr.bf16.mxu0 %v24108_v18 }
0x1620   :  { %19375 = vmatpush3.bf16.msra.mxu0 %v24114_v51 }
0x1621   :  { %19376 = vmatprep.subr.bf16.mxu0 %v24120_v59 }
0x1624   :  { %19377 = vmatpush3.bf16.msra.mxu0 %v24126_v60 }
0x1625   :  { %19378 = vmatprep.subr.bf16.mxu0 %v24206_v7 }
0x1628   :  { %19379 = vmatpush3.bf16.msra.mxu0 %v24212_v50 }
0x1629   :  { %5940 = vmatprep.subr.bf16.mxu0 %v21422_v46 }
0x162b   :  { %5617 = vmatmul.mubr.bf16.vlgmr.msra.gmra.mrb[172].mxu0 %v17550_v37 }
0x162c   :  { %5972 = vmatprep.mubr.bf16.mxu0 %v22336_v30  ;;  %5941 = vmatpush1.bf16.msra.mxu0 %v21420_v48 }
0x162d   :  { %5942 = vmatprep.subr.bf16.mxu0 %v21425_v38 }
0x1630   :  { %5943 = vmatpush1.bf16.msra.mxu0 %v21423_v33 }
0x1631   :  { %5981 = vmatprep.subr.bf16.mxu0 %v21428_v25 }
0x16ce   :  { %v5482_v8 = vpop.f32.mrb[160].mxu0 }
0x16cf   :  { %v24380_v41 = vadd.f32 %v5482_v8, %v24306_v53  ;;  %v5484_v56 = vpop.f32.mrb[161].mxu0 }
0x16d0   :  { %v24383_v28 = vadd.f32 %v5484_v56, %v24309_v45  ;;  %v5486_v4 = vpop.f32.mrb[162].mxu0 }
0x16d1   :  { %v5487_v15 = vpop.f32.mrb[163].mxu0 }
0x16d6   :  { %v5523_v5 = vpop.f32.mrb[164].mxu0 }
0x16d7   :  { %v24386_v42 = vadd.f32 %v5523_v5, %v24312_v47  ;;  %v5525_v10 = vpop.f32.mrb[165].mxu0 }
0x16d8   :  { %v24389_v13 = vadd.f32 %v5525_v10, %v24315_v16  ;;  %v5527_v58 = vpop.f32.mrb[166].mxu0  ;;  %v21410_v16 = vld [vmem:[%s28269_s3 + $0x6e8] ss:$20 sps:$4 sm:$0xff]  }
0x16d9   :  { %v5528_v61 = vpop.f32.mrb[167].mxu0 }
0x16de   :  { %v5564_v1 = vpop.f32.mrb[168].mxu0 }
0x16df   :  { %v24392_v53 = vadd.f32 %v5564_v1, %v24318_v57  ;;  %v20681_v11 = vpop.f32.mrb[169].mxu0  ;;  %v21415_v57 = vld [vmem:[%s28269_s3 + $0x714] ss:$20 sps:$4 sm:$0xff]  }
0x16e0   :  { %v5567_v22 = vpop.f32.mrb[170].mxu0 }
0x16e1   :  { %v20682_v45 = vpop.f32.mrb[171].mxu0 }
0x16fe   :  { %v19380_v6 = vpop.f32.mrb[172].mxu0 }
0x16ff   :  { %v19381_v9 = vpop.f32.mrb[173].mxu0 }
0x1700   :  { %v19382_v17 = vadd.f32 %v19381_v9, %v19380_v6  ;;  %v19383_v63 = vpop.f32.mrb[174].mxu0 }
0x1701   :  { %v19384_v26 = vpop.f32.mrb[175].mxu0  ;;  %v21429_v63 = vld [vmem:[%s28269_s3 + $0x760] ss:$20 sps:$4 sm:$0xff]  }
0x1702   :  { %v5619_v47 = vadd.f32 %v23868_v2, %v19382_v17  ;;  %v21416_v2 = vld [vmem:[%s28269_s3 + $0x6f0] ss:$20 sps:$4 sm:$0xff]   ;;  %v21432_v26 = vld [vmem:[%s28269_s3 + $0x740] ss:$20 sps:$4 sm:$0xff]  }
0x1703   :  { %v21431_v17 = vld [vmem:[%s28269_s3 + $0x764] ss:$20 sps:$4 sm:$0xff]  }
0x1704   :  { %v5624_v21 = vmax.f32 %v5619_v47, 0.0  ;;  %v21433_v47 = vld [vmem:[%s28269_s3 + $0x768] ss:$20 sps:$4 sm:$0xff]  }
0x1706   :  { %v5625_v62 = vpack.c.bf16 %v5624_v21, %v5624_v21  ;;  %v17605_v21 = vld [vmem:[%s28268_s0 + $0xc0] sm:$0xff] }
0x1708   :  { %17574 = vmatmul.mubr.msk.bf16.vlgmr.msra.gmra.mrb[180].mxu1 %vm352_vm1, %v5625_v62 }
0x1709   :  { %5736 = vmatpush1.bf16.msra.mxu1 %v21410_v16  ;;  %5767 = vmatprep.mubr.bf16.mxu1 %v22336_v30  ;;  %v17607_v16 = vcombine.high %v17605_v21, %v17605_v21 }
0x170a   :  { %5737 = vmatprep.subr.bf16.mxu1 %v21415_v57  ;;  %v21439_v57 = vld [vmem:[%s28269_s3 + $0x7a8] ss:$20 sps:$4 sm:$0xff]  }
0x170d   :  { %5738 = vmatpush1.bf16.msra.mxu1 %v21413_v20  ;;  %v21444_v20 = vld [vmem:[%s28269_s3 + $0x78c] ss:$20 sps:$4 sm:$0xff]  }
0x170e   :  { %20683 = vmatprep.subr.bf16.mxu1 %v22335_v23 }
0x1710   :  { %17575 = vmatmul.mubr.msk.bf16.vlgmr.msra.gmra.mrb[184].mxu1 %vm352_vm1, %v5625_v62 }
0x1711   :  { %20684 = vmatpush3.bf16.msra.mxu1 %v21416_v2  ;;  %20687 = vmatprep.mubr.msk.bf16.mxu1 %vm22337_vm0, %v22335_v23 }
0x1712   :  { %20685 = vmatprep.subr.bf16.mxu1 %v22335_v23 }
0x1715   :  { %20686 = vmatpush3.bf16.msra.mxu1 %v21417_v43 }
0x1716   :  { %19389 = vmatprep.subr.bf16.mxu1 %v23973_v19 }
0x1718   :  { %20688 = vmatmul.mubr.msk.bf16.vlgmr.msra.gmra.mrb[188].mxu1 %vm352_vm1, %v5625_v62  ;;  %v21441_v62 = vld [vmem:[%s28269_s3 + $0x7ac] ss:$20 sps:$4 sm:$0xff]  }
0x1719   :  { %19390 = vmatpush3.bf16.msra.mxu1 %v23980_v35  ;;  %5862 = vmatprep.mubr.bf16.mxu1 %v17579_v44 }
0x171a   :  { %19391 = vmatprep.subr.bf16.mxu1 %v23986_v55 }
0x171d   :  { %19392 = vmatpush3.bf16.msra.mxu1 %v24066_v12 }
0x171e   :  { %19393 = vmatprep.subr.bf16.mxu1 %v24072_v52 }
0x1721   :  { %19394 = vmatpush3.bf16.msra.mxu1 %v24078_v49 }
0x1722   :  { %19395 = vmatprep.subr.bf16.mxu1 %v24084_v40 }
0x1725   :  { %19396 = vmatpush3.bf16.msra.mxu1 %v24090_v0 }
0x1726   :  { %19397 = vmatprep.subr.bf16.mxu1 %v24096_v54 }
0x1729   :  { %19398 = vmatpush3.bf16.msra.mxu1 %v24102_v3 }
0x172a   :  { %19399 = vmatprep.subr.bf16.mxu1 %v24108_v18 }
0x172d   :  { %19400 = vmatpush3.bf16.msra.mxu1 %v24114_v51 }
0x172e   :  { %19401 = vmatprep.subr.bf16.mxu1 %v24120_v59 }
0x1731   :  { %19402 = vmatpush3.bf16.msra.mxu1 %v24126_v60 }
0x1732   :  { %19403 = vmatprep.subr.bf16.mxu1 %v24206_v7 }
0x1735   :  { %19404 = vmatpush3.bf16.msra.mxu1 %v24212_v50 }
0x1738   :  { %5863 = vmatmul.mubr.bf16.vlgmr.msra.gmra.mrb[192].mxu1 %v17578_v14 }
0x1739   :  { %6218 = vmatprep.mubr.bf16.mxu1 %v22336_v30 }
0x17db   :  { %v5728_v29 = vpop.f32.mrb[180].mxu1 }
0x17dc   :  { %v24454_v27 = vadd.f32 %v5728_v29, %v24380_v41  ;;  %v5730_v37 = vpop.f32.mrb[181].mxu1 }
0x17dd   :  { %v24457_v34 = vadd.f32 %v5730_v37, %v24383_v28  ;;  %v5732_v31 = vpop.f32.mrb[182].mxu1 }
0x17de   :  { %v5733_v36 = vpop.f32.mrb[183].mxu1 }
0x17e3   :  { %v5769_v39 = vpop.f32.mrb[184].mxu1 }
0x17e4   :  { %v24460_v24 = vadd.f32 %v5769_v39, %v24386_v42  ;;  %v5771_v8 = vpop.f32.mrb[185].mxu1  ;;  %v24471_v42 = vld [vmem:[%s28270_s2] ss:$0 sm:$0xff] }
0x17e5   :  { %v24463_v56 = vadd.f32 %v5771_v8, %v24389_v13  ;;  %v5773_v4 = vpop.f32.mrb[186].mxu1 }
0x17e6   :  { %v5774_v15 = vpop.f32.mrb[187].mxu1 }
0x17eb   :  { %v5810_v5 = vpop.f32.mrb[188].mxu1 }
0x17ec   :  { %v24466_v41 = vadd.f32 %v5810_v5, %v24392_v53  ;;  %v20689_v10 = vpop.f32.mrb[189].mxu1  ;;  %v21426_v53 = vld [vmem:[%s28269_s3 + $0x738] ss:$20 sps:$4 sm:$0xff]  }
0x17ed   :  { %v5813_v58 = vpop.f32.mrb[190].mxu1 }
0x17ee   :  { %v20690_v28 = vpop.f32.mrb[191].mxu1 }
0x180b   :  { %v19405_v61 = vpop.f32.mrb[192].mxu1 }
0x180c   :  { %v19406_v1 = vpop.f32.mrb[193].mxu1 }
0x180d   :  { %v19407_v11 = vadd.f32 %v19406_v1, %v19405_v61  ;;  %v19408_v22 = vpop.f32.mrb[194].mxu1  ;;  %v21445_v61 = vld [vmem:[%s28269_s3 + $0x7b0] ss:$20 sps:$4 sm:$0xff]  }
0x180e   :  { %v19409_v45 = vpop.f32.mrb[195].mxu1  ;;  %v21448_v1 = vld [vmem:[%s28269_s3 + $0x790] ss:$20 sps:$4 sm:$0xff]   ;;  %v17633_v22 = vld [vmem:[%s28268_s0 + $0xc8] sm:$0xff] }
0x180f   :  { %v5865_v13 = vadd.f32 %v24471_v42, %v19407_v11  ;;  %v21449_v11 = vld [vmem:[%s28269_s3 + $0x7b8] ss:$20 sps:$4 sm:$0xff]   ;;  %v17635_v45 = vcombine.high %v17633_v22, %v17633_v22 }
0x1811   :  { %v5870_v6 = vmax.f32 %v5865_v13, 0.0  ;;  %v24576_v13 = vld [vmem:[%s28267_s1 + $0x40] sm:$0xff]  }
0x1813   :  { %v5871_v9 = vpack.c.bf16 %v5870_v6, %v5870_v6  ;;  %v24583_v6 = vld [vmem:[%s28267_s1] sm:$0xff]  }
0x1815   :  { %17602 = vmatmul.mubr.msk.bf16.vlgmr.msra.gmra.mrb[176].mxu0 %vm352_vm1, %v5871_v9 }
0x1816   :  { %5982 = vmatpush1.bf16.msra.mxu0 %v21426_v53  ;;  %6013 = vmatprep.mubr.bf16.mxu0 %v22336_v30  ;;  %v24589_v53 = vld [vmem:[%s28267_s1 + $0x48] sm:$0xff]  }
0x1817   :  { %5983 = vmatprep.subr.bf16.mxu0 %v21431_v17 }
0x181a   :  { %5984 = vmatpush1.bf16.msra.mxu0 %v21429_v63 }
0x181b   :  { %20691 = vmatprep.subr.bf16.mxu0 %v22335_v23 }
0x181d   :  { %17603 = vmatmul.mubr.msk.bf16.vlgmr.msra.gmra.mrb[180].mxu0 %vm352_vm1, %v5871_v9 }
0x181e   :  { %20692 = vmatpush3.bf16.msra.mxu0 %v21432_v26  ;;  %20695 = vmatprep.mubr.msk.bf16.mxu0 %vm22337_vm0, %v22335_v23 }
0x181f   :  { %20693 = vmatprep.subr.bf16.mxu0 %v22335_v23 }
0x1822   :  { %20694 = vmatpush3.bf16.msra.mxu0 %v21433_v47 }
0x1823   :  { %19414 = vmatprep.subr.bf16.mxu0 %v23973_v19  ;;  %v17606_v19 = vcombine.low %v17605_v21, %v17605_v21 }
0x1825   :  { %20696 = vmatmul.mubr.msk.bf16.vlgmr.msra.gmra.mrb[184].mxu0 %vm352_vm1, %v5871_v9 }
0x1826   :  { %19415 = vmatpush3.bf16.msra.mxu0 %v23980_v35  ;;  %6108 = vmatprep.mubr.bf16.mxu0 %v17607_v16  ;;  %v21438_v35 = vld [vmem:[%s28269_s3 + $0x784] ss:$20 sps:$4 sm:$0xff]  }
0x1827   :  { %19416 = vmatprep.subr.bf16.mxu0 %v23986_v55  ;;  %v21436_v55 = vld [vmem:[%s28269_s3 + $0x780] ss:$20 sps:$4 sm:$0xff]   ;;  %6186 = vmatprep.subr.bf16.mxu1 %v21438_v35 }
0x1828   :  { %6187 = vmatpush1.bf16.msra.mxu1 %v21436_v55 }
0x1829   :  { %6188 = vmatprep.subr.bf16.mxu1 %v21441_v62 }
0x182a   :  { %19417 = vmatpush3.bf16.msra.mxu0 %v24066_v12 }
0x182b   :  { %19418 = vmatprep.subr.bf16.mxu0 %v24072_v52 }
0x182c   :  { %6189 = vmatpush1.bf16.msra.mxu1 %v21439_v57 }
0x182d   :  { %6227 = vmatprep.subr.bf16.mxu1 %v21444_v20 }
0x182e   :  { %19419 = vmatpush3.bf16.msra.mxu0 %v24078_v49 }
0x182f   :  { %19420 = vmatprep.subr.bf16.mxu0 %v24084_v40 }
0x1832   :  { %19421 = vmatpush3.bf16.msra.mxu0 %v24090_v0 }
0x1833   :  { %19422 = vmatprep.subr.bf16.mxu0 %v24096_v54 }
0x1836   :  { %19423 = vmatpush3.bf16.msra.mxu0 %v24102_v3 }
0x1837   :  { %19424 = vmatprep.subr.bf16.mxu0 %v24108_v18 }
0x183a   :  { %19425 = vmatpush3.bf16.msra.mxu0 %v24114_v51 }
0x183b   :  { %19426 = vmatprep.subr.bf16.mxu0 %v24120_v59 }
0x183e   :  { %19427 = vmatpush3.bf16.msra.mxu0 %v24126_v60 }
0x183f   :  { %19428 = vmatprep.subr.bf16.mxu0 %v24206_v7 }
0x1842   :  { %19429 = vmatpush3.bf16.msra.mxu0 %v24212_v50 }
0x1845   :  { %6109 = vmatmul.mubr.bf16.vlgmr.msra.gmra.mrb[188].mxu0 %v17606_v19 }
0x1846   :  { %6464 = vmatprep.mubr.bf16.mxu0 %v22336_v30 }
0x18e8   :  { %v5974_v2 = vpop.f32.mrb[176].mxu0 }
0x18e9   :  { %v24533_v43 = vadd.f32 %v5974_v2, %v24454_v27  ;;  %v5976_v32 = vpop.f32.mrb[177].mxu0 }
0x18ea   :  { %v24536_v44 = vadd.f32 %v5976_v32, %v24457_v34  ;;  %v5978_v14 = vpop.f32.mrb[178].mxu0 }
0x18eb   :  { %v5979_v46 = vpop.f32.mrb[179].mxu0 }
0x18f0   :  { %v6015_v48 = vpop.f32.mrb[180].mxu0 }
0x18f1   :  { %v24539_v38 = vadd.f32 %v6015_v48, %v24460_v24  ;;  %v6017_v33 = vpop.f32.mrb[181].mxu0  ;;  %v21458_v48 = vld [vmem:[%s28269_s3 + $0x7d8] ss:$20 sps:$4 sm:$0xff]  }
0x18f2   :  { %v24542_v25 = vadd.f32 %v6017_v33, %v24463_v56  ;;  %v6019_v29 = vpop.f32.mrb[182].mxu0  ;;  %v21442_v56 = vld [vmem:[%s28269_s3 + $0x788] ss:$20 sps:$4 sm:$0xff]   ;;  %v21463_v33 = vld [vmem:[%s28269_s3 + $0x804] ss:$20 sps:$4 sm:$0xff]  }
0x18f3   :  { %v6020_v37 = vpop.f32.mrb[183].mxu0  ;;  %v21464_v29 = vld [vmem:[%s28269_s3 + $0x7e0] ss:$20 sps:$4 sm:$0xff]  }
0x18f4   :  { %v21465_v37 = vld [vmem:[%s28269_s3 + $0x808] ss:$20 sps:$4 sm:$0xff]  }
0x18f8   :  { %v6056_v31 = vpop.f32.mrb[184].mxu0 }
0x18f9   :  { %v24545_v27 = vadd.f32 %v6056_v31, %v24466_v41  ;;  %v20697_v36 = vpop.f32.mrb[185].mxu0  ;;  %v21447_v41 = vld [vmem:[%s28269_s3 + $0x7b4] ss:$20 sps:$4 sm:$0xff]  }
0x18fa   :  { %v6059_v39 = vpop.f32.mrb[186].mxu0  ;;  %v17661_v31 = vld [vmem:[%s28268_s0 + $0xd0] sm:$0xff]  ;;  %v24669_v36 = vld [vmem:[%s28267_s1 + $0x8] sm:$0xff]  }
0x18fb   :  { %v20698_v34 = vpop.f32.mrb[187].mxu0  ;;  %v24675_v39 = vld [vmem:[%s28267_s1 + $0x50] sm:$0xff]  }
0x18fc   :  { %v24681_v34 = vld [vmem:[%s28267_s1 + $0x10] sm:$0xff]  }
0x1918   :  { %v19430_v8 = vpop.f32.mrb[188].mxu0 }
0x1919   :  { %v19431_v4 = vpop.f32.mrb[189].mxu0 }
0x191a   :  { %v19432_v15 = vadd.f32 %v19431_v4, %v19430_v8  ;;  %v19433_v5 = vpop.f32.mrb[190].mxu0  ;;  %v24687_v8 = vld [vmem:[%s28267_s1 + $0x58] sm:$0xff]  }
0x191b   :  { %v19434_v10 = vpop.f32.mrb[191].mxu0  ;;  %v24693_v4 = vld [vmem:[%s28267_s1 + $0x18] sm:$0xff]   ;;  %v24705_v5 = vld [vmem:[%s28267_s1 + $0x20] sm:$0xff]  }
0x191c   :  { %v6111_v24 = vadd.f32 %v24471_v42, %v19432_v15  ;;  %v24699_v15 = vld [vmem:[%s28267_s1 + $0x60] sm:$0xff]   ;;  %v24711_v10 = vld [vmem:[%s28267_s1 + $0x68] sm:$0xff]  }
0x191e   :  { %v6116_v58 = vmax.f32 %v6111_v24, 0.0  ;;  %v24717_v24 = vld [vmem:[%s28267_s1 + $0x28] sm:$0xff]  }
0x1920   :  { %v6117_v28 = vpack.c.bf16 %v6116_v58, %v6116_v58  ;;  %v24723_v58 = vld [vmem:[%s28267_s1 + $0x70] sm:$0xff]  }
0x1922   :  { %17630 = vmatmul.mubr.msk.bf16.vlgmr.msra.gmra.mrb[196].mxu1 %vm352_vm1, %v6117_v28 }
0x1923   :  { %6228 = vmatpush1.bf16.msra.mxu1 %v21442_v56  ;;  %6259 = vmatprep.mubr.bf16.mxu1 %v22336_v30  ;;  %v24729_v56 = vld [vmem:[%s28267_s1 + $0x30] sm:$0xff]  }
0x1924   :  { %6229 = vmatprep.subr.bf16.mxu1 %v21447_v41  ;;  %v21470_v41 = vld [vmem:[%s28269_s3 + $0x824] ss:$20 sps:$4 sm:$0xff]  }
0x1927   :  { %6230 = vmatpush1.bf16.msra.mxu1 %v21445_v61  ;;  %v21468_v61 = vld [vmem:[%s28269_s3 + $0x820] ss:$20 sps:$4 sm:$0xff]  }
0x1928   :  { %20699 = vmatprep.subr.bf16.mxu1 %v22335_v23 }
0x192a   :  { %17631 = vmatmul.mubr.msk.bf16.vlgmr.msra.gmra.mrb[200].mxu1 %vm352_vm1, %v6117_v28 }
0x192b   :  { %20700 = vmatpush3.bf16.msra.mxu1 %v21448_v1  ;;  %20703 = vmatprep.mubr.msk.bf16.mxu1 %vm22337_vm0, %v22335_v23  ;;  %v21476_v1 = vld [vmem:[%s28269_s3 + $0x82c] ss:$20 sps:$4 sm:$0xff]  }
0x192c   :  { %20701 = vmatprep.subr.bf16.mxu1 %v22335_v23 }
0x192f   :  { %20702 = vmatpush3.bf16.msra.mxu1 %v21449_v11 }
0x1930   :  { %19439 = vmatprep.subr.bf16.mxu1 %v24576_v13 }
0x1932   :  { %20704 = vmatmul.mubr.msk.bf16.vlgmr.msra.gmra.mrb[204].mxu1 %vm352_vm1, %v6117_v28  ;;  %v17662_v28 = vcombine.low %v17661_v31, %v17661_v31 }
0x1933   :  { %19440 = vmatpush3.bf16.msra.mxu1 %v24583_v6  ;;  %6354 = vmatprep.mubr.bf16.mxu1 %v17635_v45 }
0x1934   :  { %19441 = vmatprep.subr.bf16.mxu1 %v24589_v53 }
0x1937   :  { %19442 = vmatpush3.bf16.msra.mxu1 %v24066_v12  ;;  %v17634_v12 = vcombine.low %v17633_v22, %v17633_v22 }
0x1938   :  { %19443 = vmatprep.subr.bf16.mxu1 %v24072_v52  ;;  %v21454_v52 = vld [vmem:[%s28269_s3 + $0x7d4] ss:$20 sps:$4 sm:$0xff]  }
0x1939   :  { %6432 = vmatprep.subr.bf16.mxu0 %v21454_v52 }
0x193b   :  { %19444 = vmatpush3.bf16.msra.mxu1 %v24078_v49  ;;  %v21452_v49 = vld [vmem:[%s28269_s3 + $0x7d0] ss:$20 sps:$4 sm:$0xff]  }
0x193c   :  { %19445 = vmatprep.subr.bf16.mxu1 %v24084_v40  ;;  %6433 = vmatpush1.bf16.msra.mxu0 %v21452_v49  ;;  %v21457_v40 = vld [vmem:[%s28269_s3 + $0x7fc] ss:$20 sps:$4 sm:$0xff]  }
0x193d   :  { %6434 = vmatprep.subr.bf16.mxu0 %v21457_v40 }
0x193f   :  { %19446 = vmatpush3.bf16.msra.mxu1 %v24090_v0  ;;  %v21455_v0 = vld [vmem:[%s28269_s3 + $0x7f8] ss:$20 sps:$4 sm:$0xff]  }
0x1940   :  { %19447 = vmatprep.subr.bf16.mxu1 %v24096_v54  ;;  %6435 = vmatpush1.bf16.msra.mxu0 %v21455_v0  ;;  %v21460_v54 = vld [vmem:[%s28269_s3 + $0x7dc] ss:$20 sps:$4 sm:$0xff]  }
0x1941   :  { %6473 = vmatprep.subr.bf16.mxu0 %v21460_v54 }
0x1943   :  { %19448 = vmatpush3.bf16.msra.mxu1 %v24102_v3 }
0x1944   :  { %19449 = vmatprep.subr.bf16.mxu1 %v24108_v18 }
0x1947   :  { %19450 = vmatpush3.bf16.msra.mxu1 %v24114_v51 }
0x1948   :  { %19451 = vmatprep.subr.bf16.mxu1 %v24120_v59 }
0x194b   :  { %19452 = vmatpush3.bf16.msra.mxu1 %v24126_v60 }
0x194c   :  { %19453 = vmatprep.subr.bf16.mxu1 %v24206_v7 }
0x194f   :  { %19454 = vmatpush3.bf16.msra.mxu1 %v24212_v50 }
0x1950   :  { %6678 = vmatprep.subr.bf16.mxu1 %v21470_v41 }
0x1952   :  { %6355 = vmatmul.mubr.bf16.vlgmr.msra.gmra.mrb[208].mxu1 %v17634_v12 }
0x1953   :  { %6710 = vmatprep.mubr.bf16.mxu1 %v22336_v30  ;;  %6679 = vmatpush1.bf16.msra.mxu1 %v21468_v61 }
0x19f5   :  { %v6220_v3 = vpop.f32.mrb[196].mxu1 }
0x19f6   :  { %v24622_v18 = vadd.f32 %v6220_v3, %v24533_v43  ;;  %v6222_v51 = vpop.f32.mrb[197].mxu1 }
0x19f7   :  { %v24625_v59 = vadd.f32 %v6222_v51, %v24536_v44  ;;  %v6224_v60 = vpop.f32.mrb[198].mxu1 }
0x19f8   :  { %v6225_v9 = vpop.f32.mrb[199].mxu1 }
0x19fd   :  { %v6261_v17 = vpop.f32.mrb[200].mxu1 }
0x19fe   :  { %v24628_v63 = vadd.f32 %v6261_v17, %v24539_v38  ;;  %v6263_v26 = vpop.f32.mrb[201].mxu1 }
0x19ff   :  { %v24631_v47 = vadd.f32 %v6263_v26, %v24542_v25  ;;  %v6265_v21 = vpop.f32.mrb[202].mxu1  ;;  %v21461_v25 = vld [vmem:[%s28269_s3 + $0x800] ss:$20 sps:$4 sm:$0xff]  }
0x1a00   :  { %v6266_v16 = vpop.f32.mrb[203].mxu1 }
0x1a05   :  { %v6302_v19 = vpop.f32.mrb[204].mxu1 }
0x1a06   :  { %v24634_v35 = vadd.f32 %v6302_v19, %v24545_v27  ;;  %v20705_v55 = vpop.f32.mrb[205].mxu1  ;;  %v17663_v27 = vcombine.high %v17661_v31, %v17661_v31  ;;  %v21492_v31 = vld [vmem:[%s28269_s3 + $0x87c] ss:$20 sps:$4 sm:$0xff]  }
0x1a07   :  { %v6305_v62 = vpop.f32.mrb[206].mxu1 }
0x1a08   :  { %v20706_v57 = vpop.f32.mrb[207].mxu1 }
0x1a25   :  { %v19455_v20 = vpop.f32.mrb[208].mxu1 }
0x1a26   :  { %v19456_v2 = vpop.f32.mrb[209].mxu1 }
0x1a27   :  { %v19457_v43 = vadd.f32 %v19456_v2, %v19455_v20  ;;  %v19458_v32 = vpop.f32.mrb[210].mxu1  ;;  %v21477_v2 = vld [vmem:[%s28269_s3 + $0x850] ss:$20 sps:$4 sm:$0xff]  }
0x1a28   :  { %v19459_v44 = vpop.f32.mrb[211].mxu1  ;;  %v21481_v32 = vld [vmem:[%s28269_s3 + $0x858] ss:$20 sps:$4 sm:$0xff]  }
0x1a29   :  { %v6357_v14 = vadd.f32 %v24471_v42, %v19457_v43  ;;  %v21480_v43 = vld [vmem:[%s28269_s3 + $0x830] ss:$20 sps:$4 sm:$0xff]   ;;  %v17689_v44 = vld [vmem:[%s28268_s0 + $0xd8] sm:$0xff] }
0x1a2b   :  { %v6362_v46 = vmax.f32 %v6357_v14, 0.0  ;;  %v17691_v14 = vcombine.high %v17689_v44, %v17689_v44 }
0x1a2d   :  { %v6363_v38 = vpack.c.bf16 %v6362_v46, %v6362_v46  ;;  %v24809_v46 = vld [vmem:[%s28267_s1 + $0x78] sm:$0xff]  }
0x1a2f   :  { %17658 = vmatmul.mubr.msk.bf16.vlgmr.msra.gmra.mrb[192].mxu0 %vm352_vm1, %v6363_v38 }
0x1a30   :  { %6474 = vmatpush1.bf16.msra.mxu0 %v21458_v48  ;;  %6505 = vmatprep.mubr.bf16.mxu0 %v22336_v30  ;;  %v17690_v48 = vcombine.low %v17689_v44, %v17689_v44  ;;  %v21508_v44 = vld [vmem:[%s28269_s3 + $0x8cc] ss:$20 sps:$4 sm:$0xff]  }
0x1a31   :  { %6475 = vmatprep.subr.bf16.mxu0 %v21463_v33  ;;  %v21486_v33 = vld [vmem:[%s28269_s3 + $0x874] ss:$20 sps:$4 sm:$0xff]  }
0x1a34   :  { %6476 = vmatpush1.bf16.msra.mxu0 %v21461_v25  ;;  %v21484_v25 = vld [vmem:[%s28269_s3 + $0x870] ss:$20 sps:$4 sm:$0xff]  }
0x1a35   :  { %20707 = vmatprep.subr.bf16.mxu0 %v22335_v23 }
0x1a37   :  { %17659 = vmatmul.mubr.msk.bf16.vlgmr.msra.gmra.mrb[196].mxu0 %vm352_vm1, %v6363_v38 }
0x1a38   :  { %20708 = vmatpush3.bf16.msra.mxu0 %v21464_v29  ;;  %20711 = vmatprep.mubr.msk.bf16.mxu0 %vm22337_vm0, %v22335_v23  ;;  %v21489_v29 = vld [vmem:[%s28269_s3 + $0x89c] ss:$20 sps:$4 sm:$0xff]  }
0x1a39   :  { %20709 = vmatprep.subr.bf16.mxu0 %v22335_v23 }
0x1a3c   :  { %20710 = vmatpush3.bf16.msra.mxu0 %v21465_v37  ;;  %v21487_v37 = vld [vmem:[%s28269_s3 + $0x898] ss:$20 sps:$4 sm:$0xff]  }
0x1a3d   :  { %19464 = vmatprep.subr.bf16.mxu0 %v24576_v13 }
0x1a3f   :  { %20712 = vmatmul.mubr.msk.bf16.vlgmr.msra.gmra.mrb[200].mxu0 %vm352_vm1, %v6363_v38  ;;  %v24815_v38 = vld [vmem:[%s28267_s1 + $0x38] sm:$0xff]  }
0x1a40   :  { %19465 = vmatpush3.bf16.msra.mxu0 %v24583_v6  ;;  %6600 = vmatprep.mubr.bf16.mxu0 %v17663_v27 }
0x1a41   :  { %19466 = vmatprep.subr.bf16.mxu0 %v24589_v53 }
0x1a44   :  { %19467 = vmatpush3.bf16.msra.mxu0 %v24669_v36 }
0x1a45   :  { %19468 = vmatprep.subr.bf16.mxu0 %v24675_v39 }
0x1a48   :  { %19469 = vmatpush3.bf16.msra.mxu0 %v24681_v34 }
0x1a49   :  { %19470 = vmatprep.subr.bf16.mxu0 %v24687_v8 }
0x1a4c   :  { %19471 = vmatpush3.bf16.msra.mxu0 %v24693_v4 }
0x1a4d   :  { %19472 = vmatprep.subr.bf16.mxu0 %v24699_v15 }
0x1a50   :  { %19473 = vmatpush3.bf16.msra.mxu0 %v24705_v5 }
0x1a51   :  { %19474 = vmatprep.subr.bf16.mxu0 %v24711_v10 }
0x1a54   :  { %19475 = vmatpush3.bf16.msra.mxu0 %v24717_v24 }
0x1a55   :  { %19476 = vmatprep.subr.bf16.mxu0 %v24723_v58 }
0x1a58   :  { %19477 = vmatpush3.bf16.msra.mxu0 %v24729_v56 }
0x1a59   :  { %19478 = vmatprep.subr.bf16.mxu0 %v24206_v7  ;;  %v21473_v7 = vld [vmem:[%s28269_s3 + $0x84c] ss:$20 sps:$4 sm:$0xff]  }
0x1a5a   :  { %6680 = vmatprep.subr.bf16.mxu1 %v21473_v7 }
0x1a5c   :  { %19479 = vmatpush3.bf16.msra.mxu0 %v24212_v50  ;;  %v21471_v50 = vld [vmem:[%s28269_s3 + $0x848] ss:$20 sps:$4 sm:$0xff]  }
0x1a5d   :  { %6681 = vmatpush1.bf16.msra.mxu1 %v21471_v50  ;;  %6924 = vmatprep.subr.bf16.mxu0 %v21486_v33 }
0x1a5e   :  { %6719 = vmatprep.subr.bf16.mxu1 %v21476_v1 }
0x1a5f   :  { %6601 = vmatmul.mubr.bf16.vlgmr.msra.gmra.mrb[204].mxu0 %v17662_v28 }
0x1a60   :  { %6956 = vmatprep.mubr.bf16.mxu0 %v22336_v30  ;;  %6925 = vmatpush1.bf16.msra.mxu0 %v21484_v25 }
0x1a61   :  { %6926 = vmatprep.subr.bf16.mxu0 %v21489_v29 }
0x1a64   :  { %6927 = vmatpush1.bf16.msra.mxu0 %v21487_v37 }
0x1a65   :  { %6965 = vmatprep.subr.bf16.mxu0 %v21492_v31 }
0x1b02   :  { %v6466_v11 = vpop.f32.mrb[192].mxu0 }
0x1b03   :  { %v24751_v22 = vadd.f32 %v6466_v11, %v24622_v18  ;;  %v6468_v45 = vpop.f32.mrb[193].mxu0 }
0x1b04   :  { %v24754_v12 = vadd.f32 %v6468_v45, %v24625_v59  ;;  %v6470_v52 = vpop.f32.mrb[194].mxu0 }
0x1b05   :  { %v6471_v49 = vpop.f32.mrb[195].mxu0 }
0x1b0a   :  { %v6507_v40 = vpop.f32.mrb[196].mxu0 }
0x1b0b   :  { %v24757_v0 = vadd.f32 %v6507_v40, %v24628_v63  ;;  %v6509_v54 = vpop.f32.mrb[197].mxu0 }
0x1b0c   :  { %v24760_v3 = vadd.f32 %v6509_v54, %v24631_v47  ;;  %v6511_v51 = vpop.f32.mrb[198].mxu0  ;;  %v21474_v47 = vld [vmem:[%s28269_s3 + $0x828] ss:$20 sps:$4 sm:$0xff]  }
0x1b0d   :  { %v6512_v60 = vpop.f32.mrb[199].mxu0 }
0x1b12   :  { %v6548_v9 = vpop.f32.mrb[200].mxu0 }
0x1b13   :  { %v24763_v18 = vadd.f32 %v6548_v9, %v24634_v35  ;;  %v20713_v17 = vpop.f32.mrb[201].mxu0  ;;  %v21479_v35 = vld [vmem:[%s28269_s3 + $0x854] ss:$20 sps:$4 sm:$0xff]  }
0x1b14   :  { %v6551_v26 = vpop.f32.mrb[202].mxu0 }
0x1b15   :  { %v20714_v59 = vpop.f32.mrb[203].mxu0 }
0x1b32   :  { %v19480_v21 = vpop.f32.mrb[204].mxu0 }
0x1b33   :  { %v19481_v16 = vpop.f32.mrb[205].mxu0 }
0x1b34   :  { %v19482_v19 = vadd.f32 %v19481_v16, %v19480_v21  ;;  %v19483_v55 = vpop.f32.mrb[206].mxu0 }
0x1b35   :  { %v19484_v62 = vpop.f32.mrb[207].mxu0  ;;  %v21493_v55 = vld [vmem:[%s28269_s3 + $0x8a0] ss:$20 sps:$4 sm:$0xff]  }
0x1b36   :  { %v6603_v63 = vadd.f32 %v24471_v42, %v19482_v19  ;;  %v21496_v62 = vld [vmem:[%s28269_s3 + $0x880] ss:$20 sps:$4 sm:$0xff]  }
0x1b38   :  { %v6608_v57 = vmax.f32 %v6603_v63, 0.0  ;;  %v21497_v63 = vld [vmem:[%s28269_s3 + $0x8a8] ss:$20 sps:$4 sm:$0xff]  }
0x1b3a   :  { %v6609_v20 = vpack.c.bf16 %v6608_v57, %v6608_v57  ;;  %v17717_v57 = vld [vmem:[%s28268_s0 + $0xe0] sm:$0xff] }
0x1b3c   :  { %17686 = vmatmul.mubr.msk.bf16.vlgmr.msra.gmra.mrb[212].mxu1 %vm352_vm1, %v6609_v20 }
0x1b3d   :  { %6720 = vmatpush1.bf16.msra.mxu1 %v21474_v47  ;;  %6751 = vmatprep.mubr.bf16.mxu1 %v22336_v30  ;;  %v17719_v47 = vcombine.high %v17717_v57, %v17717_v57 }
0x1b3e   :  { %6721 = vmatprep.subr.bf16.mxu1 %v21479_v35  ;;  %v21502_v35 = vld [vmem:[%s28269_s3 + $0x8c4] ss:$20 sps:$4 sm:$0xff]  }
0x1b41   :  { %6722 = vmatpush1.bf16.msra.mxu1 %v21477_v2  ;;  %v21500_v2 = vld [vmem:[%s28269_s3 + $0x8c0] ss:$20 sps:$4 sm:$0xff]  }
0x1b42   :  { %20715 = vmatprep.subr.bf16.mxu1 %v22335_v23 }
0x1b44   :  { %17687 = vmatmul.mubr.msk.bf16.vlgmr.msra.gmra.mrb[216].mxu1 %vm352_vm1, %v6609_v20 }
0x1b45   :  { %20716 = vmatpush3.bf16.msra.mxu1 %v21480_v43  ;;  %20719 = vmatprep.mubr.msk.bf16.mxu1 %vm22337_vm0, %v22335_v23  ;;  %v21505_v43 = vld [vmem:[%s28269_s3 + $0x8ec] ss:$20 sps:$4 sm:$0xff]  }
0x1b46   :  { %20717 = vmatprep.subr.bf16.mxu1 %v22335_v23 }
0x1b49   :  { %20718 = vmatpush3.bf16.msra.mxu1 %v21481_v32  ;;  %v21503_v32 = vld [vmem:[%s28269_s3 + $0x8e8] ss:$20 sps:$4 sm:$0xff]  }
0x1b4a   :  { %19489 = vmatprep.subr.bf16.mxu1 %v24576_v13 }
0x1b4c   :  { %20720 = vmatmul.mubr.msk.bf16.vlgmr.msra.gmra.mrb[220].mxu1 %vm352_vm1, %v6609_v20  ;;  %v17718_v20 = vcombine.low %v17717_v57, %v17717_v57  ;;  %v21524_v57 = vld [vmem:[%s28269_s3 + $0x91c] ss:$20 sps:$4 sm:$0xff]  }
0x1b4d   :  { %19490 = vmatpush3.bf16.msra.mxu1 %v24583_v6  ;;  %6846 = vmatprep.mubr.bf16.mxu1 %v17691_v14 }
0x1b4e   :  { %19491 = vmatprep.subr.bf16.mxu1 %v24589_v53 }
0x1b51   :  { %19492 = vmatpush3.bf16.msra.mxu1 %v24669_v36 }
0x1b52   :  { %19493 = vmatprep.subr.bf16.mxu1 %v24675_v39 }
0x1b55   :  { %19494 = vmatpush3.bf16.msra.mxu1 %v24681_v34 }
0x1b56   :  { %19495 = vmatprep.subr.bf16.mxu1 %v24687_v8 }
0x1b59   :  { %19496 = vmatpush3.bf16.msra.mxu1 %v24693_v4 }
0x1b5a   :  { %19497 = vmatprep.subr.bf16.mxu1 %v24699_v15 }
0x1b5d   :  { %19498 = vmatpush3.bf16.msra.mxu1 %v24705_v5 }
0x1b5e   :  { %19499 = vmatprep.subr.bf16.mxu1 %v24711_v10 }
0x1b61   :  { %19500 = vmatpush3.bf16.msra.mxu1 %v24717_v24 }
0x1b62   :  { %19501 = vmatprep.subr.bf16.mxu1 %v24723_v58 }
0x1b65   :  { %19502 = vmatpush3.bf16.msra.mxu1 %v24729_v56 }
0x1b66   :  { %19503 = vmatprep.subr.bf16.mxu1 %v24809_v46 }
0x1b69   :  { %19504 = vmatpush3.bf16.msra.mxu1 %v24815_v38 }
0x1b6a   :  { %7170 = vmatprep.subr.bf16.mxu1 %v21502_v35 }
0x1b6c   :  { %6847 = vmatmul.mubr.bf16.vlgmr.msra.gmra.mrb[224].mxu1 %v17690_v48 }
0x1b6d   :  { %7202 = vmatprep.mubr.bf16.mxu1 %v22336_v30  ;;  %7171 = vmatpush1.bf16.msra.mxu1 %v21500_v2 }
0x1b6e   :  { %7172 = vmatprep.subr.bf16.mxu1 %v21505_v43 }
0x1b71   :  { %7173 = vmatpush1.bf16.msra.mxu1 %v21503_v32 }
0x1b72   :  { %7211 = vmatprep.subr.bf16.mxu1 %v21508_v44 }
0x1c0f   :  { %v6712_v27 = vpop.f32.mrb[212].mxu1 }
0x1c10   :  { %v24835_v28 = vadd.f32 %v6712_v27, %v24751_v22  ;;  %v6714_v41 = vpop.f32.mrb[213].mxu1 }
0x1c11   :  { %v24838_v61 = vadd.f32 %v6714_v41, %v24754_v12  ;;  %v6716_v7 = vpop.f32.mrb[214].mxu1 }
0x1c12   :  { %v6717_v50 = vpop.f32.mrb[215].mxu1 }
0x1c17   :  { %v6753_v1 = vpop.f32.mrb[216].mxu1 }
0x1c18   :  { %v24841_v11 = vadd.f32 %v6753_v1, %v24757_v0  ;;  %v6755_v45 = vpop.f32.mrb[217].mxu1 }
0x1c19   :  { %v24844_v52 = vadd.f32 %v6755_v45, %v24760_v3  ;;  %v6757_v49 = vpop.f32.mrb[218].mxu1  ;;  %v21490_v3 = vld [vmem:[%s28269_s3 + $0x878] ss:$20 sps:$4 sm:$0xff]  }
0x1c1a   :  { %v6758_v40 = vpop.f32.mrb[219].mxu1 }
0x1c1f   :  { %v6794_v54 = vpop.f32.mrb[220].mxu1 }
0x1c20   :  { %v24847_v22 = vadd.f32 %v6794_v54, %v24763_v18  ;;  %v20721_v51 = vpop.f32.mrb[221].mxu1  ;;  %v21495_v18 = vld [vmem:[%s28269_s3 + $0x8a4] ss:$20 sps:$4 sm:$0xff]  }
0x1c21   :  { %v6797_v60 = vpop.f32.mrb[222].mxu1 }
0x1c22   :  { %v20722_v12 = vpop.f32.mrb[223].mxu1 }
0x1c3f   :  { %v19505_v9 = vpop.f32.mrb[224].mxu1 }
0x1c40   :  { %v19506_v17 = vpop.f32.mrb[225].mxu1 }
0x1c41   :  { %v19507_v26 = vadd.f32 %v19506_v17, %v19505_v9  ;;  %v19508_v59 = vpop.f32.mrb[226].mxu1 }
0x1c42   :  { %v19509_v21 = vpop.f32.mrb[227].mxu1  ;;  %v21509_v59 = vld [vmem:[%s28269_s3 + $0x8f0] ss:$20 sps:$4 sm:$0xff]  }
0x1c43   :  { %v6849_v0 = vadd.f32 %v24471_v42, %v19507_v26  ;;  %v21512_v21 = vld [vmem:[%s28269_s3 + $0x8d0] ss:$20 sps:$4 sm:$0xff]  }
0x1c45   :  { %v6854_v16 = vmax.f32 %v6849_v0, 0.0  ;;  %v21513_v0 = vld [vmem:[%s28269_s3 + $0x8f8] ss:$20 sps:$4 sm:$0xff]  }
0x1c47   :  { %v6855_v19 = vpack.c.bf16 %v6854_v16, %v6854_v16  ;;  %v17745_v16 = vld [vmem:[%s28268_s0 + $0xe8] sm:$0xff] }
0x1c49   :  { %17714 = vmatmul.mubr.msk.bf16.vlgmr.msra.gmra.mrb[208].mxu0 %vm352_vm1, %v6855_v19 }
0x1c4a   :  { %6966 = vmatpush1.bf16.msra.mxu0 %v21490_v3  ;;  %6997 = vmatprep.mubr.bf16.mxu0 %v22336_v30  ;;  %v17747_v3 = vcombine.high %v17745_v16, %v17745_v16 }
0x1c4b   :  { %6967 = vmatprep.subr.bf16.mxu0 %v21495_v18  ;;  %v21518_v18 = vld [vmem:[%s28269_s3 + $0x914] ss:$20 sps:$4 sm:$0xff]  }
0x1c4e   :  { %6968 = vmatpush1.bf16.msra.mxu0 %v21493_v55  ;;  %v21516_v55 = vld [vmem:[%s28269_s3 + $0x910] ss:$20 sps:$4 sm:$0xff]  }
0x1c4f   :  { %20723 = vmatprep.subr.bf16.mxu0 %v22335_v23 }
0x1c51   :  { %17715 = vmatmul.mubr.msk.bf16.vlgmr.msra.gmra.mrb[212].mxu0 %vm352_vm1, %v6855_v19 }
0x1c52   :  { %20724 = vmatpush3.bf16.msra.mxu0 %v21496_v62  ;;  %20727 = vmatprep.mubr.msk.bf16.mxu0 %vm22337_vm0, %v22335_v23  ;;  %v21521_v62 = vld [vmem:[%s28269_s3 + $0x93c] ss:$20 sps:$4 sm:$0xff]  }
0x1c53   :  { %20725 = vmatprep.subr.bf16.mxu0 %v22335_v23 }
0x1c56   :  { %20726 = vmatpush3.bf16.msra.mxu0 %v21497_v63  ;;  %v21519_v63 = vld [vmem:[%s28269_s3 + $0x938] ss:$20 sps:$4 sm:$0xff]  }
0x1c57   :  { %19514 = vmatprep.subr.bf16.mxu0 %v24576_v13 }
0x1c59   :  { %20728 = vmatmul.mubr.msk.bf16.vlgmr.msra.gmra.mrb[216].mxu0 %vm352_vm1, %v6855_v19  ;;  %v17746_v19 = vcombine.low %v17745_v16, %v17745_v16 }
0x1c5a   :  { %19515 = vmatpush3.bf16.msra.mxu0 %v24583_v6  ;;  %7092 = vmatprep.mubr.bf16.mxu0 %v17719_v47 }
0x1c5b   :  { %19516 = vmatprep.subr.bf16.mxu0 %v24589_v53 }
0x1c5e   :  { %19517 = vmatpush3.bf16.msra.mxu0 %v24669_v36 }
0x1c5f   :  { %19518 = vmatprep.subr.bf16.mxu0 %v24675_v39 }
0x1c62   :  { %19519 = vmatpush3.bf16.msra.mxu0 %v24681_v34 }
0x1c63   :  { %19520 = vmatprep.subr.bf16.mxu0 %v24687_v8 }
0x1c66   :  { %19521 = vmatpush3.bf16.msra.mxu0 %v24693_v4 }
0x1c67   :  { %19522 = vmatprep.subr.bf16.mxu0 %v24699_v15 }
0x1c6a   :  { %19523 = vmatpush3.bf16.msra.mxu0 %v24705_v5 }
0x1c6b   :  { %19524 = vmatprep.subr.bf16.mxu0 %v24711_v10 }
0x1c6e   :  { %19525 = vmatpush3.bf16.msra.mxu0 %v24717_v24 }
0x1c6f   :  { %19526 = vmatprep.subr.bf16.mxu0 %v24723_v58 }
0x1c72   :  { %19527 = vmatpush3.bf16.msra.mxu0 %v24729_v56 }
0x1c73   :  { %19528 = vmatprep.subr.bf16.mxu0 %v24809_v46 }
0x1c76   :  { %19529 = vmatpush3.bf16.msra.mxu0 %v24815_v38 }
0x1c77   :  { %7416 = vmatprep.subr.bf16.mxu0 %v21518_v18 }
0x1c79   :  { %7093 = vmatmul.mubr.bf16.vlgmr.msra.gmra.mrb[220].mxu0 %v17718_v20 }
0x1c7a   :  { %7448 = vmatprep.mubr.bf16.mxu0 %v22336_v30  ;;  %7417 = vmatpush1.bf16.msra.mxu0 %v21516_v55 }
0x1c7b   :  { %7418 = vmatprep.subr.bf16.mxu0 %v21521_v62 }
0x1c7e   :  { %7419 = vmatpush1.bf16.msra.mxu0 %v21519_v63 }
0x1c7f   :  { %7457 = vmatprep.subr.bf16.mxu0 %v21524_v57 }
0x1d1c   :  { %v6958_v14 = vpop.f32.mrb[208].mxu0 }
0x1d1d   :  { %v24909_v48 = vadd.f32 %v6958_v14, %v24835_v28  ;;  %v6960_v33 = vpop.f32.mrb[209].mxu0 }
0x1d1e   :  { %v24912_v25 = vadd.f32 %v6960_v33, %v24838_v61  ;;  %v6962_v29 = vpop.f32.mrb[210].mxu0 }
0x1d1f   :  { %v6963_v37 = vpop.f32.mrb[211].mxu0 }
0x1d24   :  { %v6999_v31 = vpop.f32.mrb[212].mxu0 }
0x1d25   :  { %v24915_v27 = vadd.f32 %v6999_v31, %v24841_v11  ;;  %v7001_v41 = vpop.f32.mrb[213].mxu0 }
0x1d26   :  { %v24918_v7 = vadd.f32 %v7001_v41, %v24844_v52  ;;  %v7003_v50 = vpop.f32.mrb[214].mxu0  ;;  %v21506_v52 = vld [vmem:[%s28269_s3 + $0x8c8] ss:$20 sps:$4 sm:$0xff]  }
0x1d27   :  { %v7004_v1 = vpop.f32.mrb[215].mxu0 }
0x1d2c   :  { %v7040_v45 = vpop.f32.mrb[216].mxu0 }
0x1d2d   :  { %v24921_v28 = vadd.f32 %v7040_v45, %v24847_v22  ;;  %v20729_v49 = vpop.f32.mrb[217].mxu0  ;;  %v21511_v22 = vld [vmem:[%s28269_s3 + $0x8f4] ss:$20 sps:$4 sm:$0xff]  }
0x1d2e   :  { %v7043_v40 = vpop.f32.mrb[218].mxu0 }
0x1d2f   :  { %v20730_v61 = vpop.f32.mrb[219].mxu0 }
0x1d4c   :  { %v19530_v54 = vpop.f32.mrb[220].mxu0 }
0x1d4d   :  { %v19531_v51 = vpop.f32.mrb[221].mxu0 }
0x1d4e   :  { %v19532_v60 = vadd.f32 %v19531_v51, %v19530_v54  ;;  %v19533_v12 = vpop.f32.mrb[222].mxu0 }
0x1d4f   :  { %v19534_v9 = vpop.f32.mrb[223].mxu0  ;;  %v21525_v12 = vld [vmem:[%s28269_s3 + $0x940] ss:$20 sps:$4 sm:$0xff]  }
0x1d50   :  { %v7095_v11 = vadd.f32 %v24471_v42, %v19532_v60  ;;  %v21529_v9 = vld [vmem:[%s28269_s3 + $0x948] ss:$20 sps:$4 sm:$0xff]  }
0x1d52   :  { %v7100_v17 = vmax.f32 %v7095_v11, 0.0  ;;  %v17773_v11 = vld [vmem:[%s28268_s0 + $0xf0] sm:$0xff] }
0x1d54   :  { %v7101_v26 = vpack.c.bf16 %v7100_v17, %v7100_v17  ;;  %v17775_v17 = vcombine.high %v17773_v11, %v17773_v11 }
0x1d56   :  { %17742 = vmatmul.mubr.msk.bf16.vlgmr.msra.gmra.mrb[228].mxu1 %vm352_vm1, %v7101_v26 }
0x1d57   :  { %7212 = vmatpush1.bf16.msra.mxu1 %v21506_v52  ;;  %7243 = vmatprep.mubr.bf16.mxu1 %v22336_v30  ;;  %v17774_v52 = vcombine.low %v17773_v11, %v17773_v11 }
0x1d58   :  { %7213 = vmatprep.subr.bf16.mxu1 %v21511_v22  ;;  %v21532_v22 = vld [vmem:[%s28269_s3 + $0x960] ss:$20 sps:$4 sm:$0xff]  }
0x1d5b   :  { %7214 = vmatpush1.bf16.msra.mxu1 %v21509_v59  ;;  %v21537_v59 = vld [vmem:[%s28269_s3 + $0x98c] ss:$20 sps:$4 sm:$0xff]  }
0x1d5c   :  { %20731 = vmatprep.subr.bf16.mxu1 %v22335_v23 }
0x1d5e   :  { %17743 = vmatmul.mubr.msk.bf16.vlgmr.msra.gmra.mrb[232].mxu1 %vm352_vm1, %v7101_v26 }
0x1d5f   :  { %20732 = vmatpush3.bf16.msra.mxu1 %v21512_v21  ;;  %20735 = vmatprep.mubr.msk.bf16.mxu1 %vm22337_vm0, %v22335_v23  ;;  %v21535_v21 = vld [vmem:[%s28269_s3 + $0x988] ss:$20 sps:$4 sm:$0xff]  }
0x1d60   :  { %20733 = vmatprep.subr.bf16.mxu1 %v22335_v23 }
0x1d63   :  { %20734 = vmatpush3.bf16.msra.mxu1 %v21513_v0  ;;  %v21540_v0 = vld [vmem:[%s28269_s3 + $0x96c] ss:$20 sps:$4 sm:$0xff]  }
0x1d64   :  { %19539 = vmatprep.subr.bf16.mxu1 %v24576_v13 }
0x1d66   :  { %20736 = vmatmul.mubr.msk.bf16.vlgmr.msra.gmra.mrb[236].mxu1 %vm352_vm1, %v7101_v26  ;;  %v21534_v26 = vld [vmem:[%s28269_s3 + $0x964] ss:$20 sps:$4 sm:$0xff]  }
0x1d67   :  { %19540 = vmatpush3.bf16.msra.mxu1 %v24583_v6  ;;  %7338 = vmatprep.mubr.bf16.mxu1 %v17747_v3 }
0x1d68   :  { %19541 = vmatprep.subr.bf16.mxu1 %v24589_v53 }
0x1d6b   :  { %19542 = vmatpush3.bf16.msra.mxu1 %v24669_v36 }
0x1d6c   :  { %19543 = vmatprep.subr.bf16.mxu1 %v24675_v39 }
0x1d6f   :  { %19544 = vmatpush3.bf16.msra.mxu1 %v24681_v34 }
0x1d70   :  { %19545 = vmatprep.subr.bf16.mxu1 %v24687_v8 }
0x1d73   :  { %19546 = vmatpush3.bf16.msra.mxu1 %v24693_v4 }
0x1d74   :  { %19547 = vmatprep.subr.bf16.mxu1 %v24699_v15 }
0x1d77   :  { %19548 = vmatpush3.bf16.msra.mxu1 %v24705_v5 }
0x1d78   :  { %19549 = vmatprep.subr.bf16.mxu1 %v24711_v10 }
0x1d7b   :  { %19550 = vmatpush3.bf16.msra.mxu1 %v24717_v24 }
0x1d7c   :  { %19551 = vmatprep.subr.bf16.mxu1 %v24723_v58 }
0x1d7f   :  { %19552 = vmatpush3.bf16.msra.mxu1 %v24729_v56 }
0x1d80   :  { %19553 = vmatprep.subr.bf16.mxu1 %v24809_v46 }
0x1d83   :  { %19554 = vmatpush3.bf16.msra.mxu1 %v24815_v38 }
0x1d84   :  { %7662 = vmatprep.subr.bf16.mxu1 %v21534_v26 }
0x1d86   :  { %7339 = vmatmul.mubr.bf16.vlgmr.msra.gmra.mrb[240].mxu1 %v17746_v19 }
0x1d87   :  { %7694 = vmatprep.mubr.bf16.mxu1 %v22336_v30  ;;  %7663 = vmatpush1.bf16.msra.mxu1 %v21532_v22 }
0x1d88   :  { %7664 = vmatprep.subr.bf16.mxu1 %v21537_v59 }
0x1d8b   :  { %7665 = vmatpush1.bf16.msra.mxu1 %v21535_v21 }
0x1d8c   :  { %7703 = vmatprep.subr.bf16.mxu1 %v21540_v0 }
0x1e29   :  { %v7204_v47 = vpop.f32.mrb[228].mxu1 }
0x1e2a   :  { %v24983_v20 = vadd.f32 %v7204_v47, %v24909_v48  ;;  %v7206_v35 = vpop.f32.mrb[229].mxu1 }
0x1e2b   :  { %v24986_v2 = vadd.f32 %v7206_v35, %v24912_v25  ;;  %v7208_v43 = vpop.f32.mrb[230].mxu1 }
0x1e2c   :  { %v7209_v32 = vpop.f32.mrb[231].mxu1 }
0x1e31   :  { %v7245_v44 = vpop.f32.mrb[232].mxu1 }
0x1e32   :  { %v24989_v14 = vadd.f32 %v7245_v44, %v24915_v27  ;;  %v7247_v33 = vpop.f32.mrb[233].mxu1 }
0x1e33   :  { %v24992_v29 = vadd.f32 %v7247_v33, %v24918_v7  ;;  %v7249_v37 = vpop.f32.mrb[234].mxu1  ;;  %v21522_v7 = vld [vmem:[%s28269_s3 + $0x918] ss:$20 sps:$4 sm:$0xff]  }
0x1e34   :  { %v7250_v31 = vpop.f32.mrb[235].mxu1 }
0x1e39   :  { %v7286_v41 = vpop.f32.mrb[236].mxu1 }
0x1e3a   :  { %v24995_v48 = vadd.f32 %v7286_v41, %v24921_v28  ;;  %v20737_v50 = vpop.f32.mrb[237].mxu1  ;;  %v21527_v28 = vld [vmem:[%s28269_s3 + $0x944] ss:$20 sps:$4 sm:$0xff]  }
0x1e3b   :  { %v7289_v1 = vpop.f32.mrb[238].mxu1 }
0x1e3c   :  { %v20738_v25 = vpop.f32.mrb[239].mxu1 }
0x1e59   :  { %v19555_v45 = vpop.f32.mrb[240].mxu1 }
0x1e5a   :  { %v19556_v49 = vpop.f32.mrb[241].mxu1 }
0x1e5b   :  { %v19557_v40 = vadd.f32 %v19556_v49, %v19555_v45  ;;  %v19558_v61 = vpop.f32.mrb[242].mxu1 }
0x1e5c   :  { %v19559_v54 = vpop.f32.mrb[243].mxu1  ;;  %v21541_v61 = vld [vmem:[%s28269_s3 + $0x990] ss:$20 sps:$4 sm:$0xff]  }
0x1e5d   :  { %v7341_v27 = vadd.f32 %v24471_v42, %v19557_v40  ;;  %v21528_v42 = vld [vmem:[%s28269_s3 + $0x920] ss:$20 sps:$4 sm:$0xff]   ;;  %v21544_v54 = vld [vmem:[%s28269_s3 + $0x970] ss:$20 sps:$4 sm:$0xff]  }
0x1e5e   :  { %v21543_v40 = vld [vmem:[%s28269_s3 + $0x994] ss:$20 sps:$4 sm:$0xff]  }
0x1e5f   :  { %v7346_v51 = vmax.f32 %v7341_v27, 0.0  ;;  %v21545_v27 = vld [vmem:[%s28269_s3 + $0x998] ss:$20 sps:$4 sm:$0xff]  }
0x1e61   :  { %v7347_v60 = vpack.c.bf16 %v7346_v51, %v7346_v51  ;;  %v17801_v51 = vld [vmem:[%s28268_s0 + $0xf8] sm:$0xff] }
0x1e63   :  { %17770 = vmatmul.mubr.msk.bf16.vlgmr.msra.gmra.mrb[224].mxu0 %vm352_vm1, %v7347_v60 }
0x1e64   :  { %7458 = vmatpush1.bf16.msra.mxu0 %v21522_v7  ;;  %7489 = vmatprep.mubr.bf16.mxu0 %v22336_v30  ;;  %v17803_v7 = vcombine.high %v17801_v51, %v17801_v51 }
0x1e65   :  { %7459 = vmatprep.subr.bf16.mxu0 %v21527_v28  ;;  %v21551_v28 = vld [vmem:[%s28269_s3 + $0x9d8] ss:$20 sps:$4 sm:$0xff]  }
0x1e68   :  { %7460 = vmatpush1.bf16.msra.mxu0 %v21525_v12  ;;  %v21556_v12 = vld [vmem:[%s28269_s3 + $0x9bc] ss:$20 sps:$4 sm:$0xff]  }
0x1e69   :  { %20739 = vmatprep.subr.bf16.mxu0 %v22335_v23 }
0x1e6b   :  { %17771 = vmatmul.mubr.msk.bf16.vlgmr.msra.gmra.mrb[228].mxu0 %vm352_vm1, %v7347_v60 }
0x1e6c   :  { %20740 = vmatpush3.bf16.msra.mxu0 %v21528_v42  ;;  %20743 = vmatprep.mubr.msk.bf16.mxu0 %vm22337_vm0, %v22335_v23 }
0x1e6d   :  { %20741 = vmatprep.subr.bf16.mxu0 %v22335_v23 }
0x1e70   :  { %20742 = vmatpush3.bf16.msra.mxu0 %v21529_v9 }
0x1e71   :  { %19564 = vmatprep.subr.bf16.mxu0 %v24576_v13 }
0x1e73   :  { %20744 = vmatmul.mubr.msk.bf16.vlgmr.msra.gmra.mrb[232].mxu0 %vm352_vm1, %v7347_v60  ;;  %v21553_v60 = vld [vmem:[%s28269_s3 + $0x9dc] ss:$20 sps:$4 sm:$0xff]  }
0x1e74   :  { %19565 = vmatpush3.bf16.msra.mxu0 %v24583_v6  ;;  %7584 = vmatprep.mubr.bf16.mxu0 %v17775_v17 }
0x1e75   :  { %19566 = vmatprep.subr.bf16.mxu0 %v24589_v53 }
0x1e78   :  { %19567 = vmatpush3.bf16.msra.mxu0 %v24669_v36 }
0x1e79   :  { %19568 = vmatprep.subr.bf16.mxu0 %v24675_v39 }
0x1e7c   :  { %19569 = vmatpush3.bf16.msra.mxu0 %v24681_v34 }
0x1e7d   :  { %19570 = vmatprep.subr.bf16.mxu0 %v24687_v8 }
0x1e80   :  { %19571 = vmatpush3.bf16.msra.mxu0 %v24693_v4 }
0x1e81   :  { %19572 = vmatprep.subr.bf16.mxu0 %v24699_v15 }
0x1e84   :  { %19573 = vmatpush3.bf16.msra.mxu0 %v24705_v5 }
0x1e85   :  { %19574 = vmatprep.subr.bf16.mxu0 %v24711_v10 }
0x1e88   :  { %19575 = vmatpush3.bf16.msra.mxu0 %v24717_v24 }
0x1e89   :  { %19576 = vmatprep.subr.bf16.mxu0 %v24723_v58 }
0x1e8c   :  { %19577 = vmatpush3.bf16.msra.mxu0 %v24729_v56 }
0x1e8d   :  { %19578 = vmatprep.subr.bf16.mxu0 %v24809_v46 }
0x1e90   :  { %19579 = vmatpush3.bf16.msra.mxu0 %v24815_v38 }
0x1e93   :  { %7585 = vmatmul.mubr.bf16.vlgmr.msra.gmra.mrb[236].mxu0 %v17774_v52 }
0x1e94   :  { %7940 = vmatprep.mubr.bf16.mxu0 %v22336_v30 }
0x1f36   :  { %v7450_v16 = vpop.f32.mrb[224].mxu0 }
0x1f37   :  { %v25057_v3 = vadd.f32 %v7450_v16, %v24983_v20  ;;  %v7452_v19 = vpop.f32.mrb[225].mxu0 }
0x1f38   :  { %v25060_v18 = vadd.f32 %v7452_v19, %v24986_v2  ;;  %v7454_v55 = vpop.f32.mrb[226].mxu0 }
0x1f39   :  { %v7455_v62 = vpop.f32.mrb[227].mxu0 }
0x1f3e   :  { %v7491_v63 = vpop.f32.mrb[228].mxu0 }
0x1f3f   :  { %v25063_v57 = vadd.f32 %v7491_v63, %v24989_v14  ;;  %v7493_v47 = vpop.f32.mrb[229].mxu0  ;;  %v25074_v14 = vld [vmem:[%s28270_s2] ss:$0 sm:$0xff] }
0x1f40   :  { %v25066_v35 = vadd.f32 %v7493_v47, %v24992_v29  ;;  %v7495_v43 = vpop.f32.mrb[230].mxu0 }
0x1f41   :  { %v7496_v32 = vpop.f32.mrb[231].mxu0 }
0x1f46   :  { %v7532_v44 = vpop.f32.mrb[232].mxu0 }
0x1f47   :  { %v25069_v20 = vadd.f32 %v7532_v44, %v24995_v48  ;;  %v20745_v33 = vpop.f32.mrb[233].mxu0  ;;  %v21538_v48 = vld [vmem:[%s28269_s3 + $0x968] ss:$20 sps:$4 sm:$0xff]  }
0x1f48   :  { %v7535_v37 = vpop.f32.mrb[234].mxu0 }
0x1f49   :  { %v20746_v2 = vpop.f32.mrb[235].mxu0 }
0x1f66   :  { %v19580_v31 = vpop.f32.mrb[236].mxu0 }
0x1f67   :  { %v19581_v41 = vpop.f32.mrb[237].mxu0 }
0x1f68   :  { %v19582_v50 = vadd.f32 %v19581_v41, %v19580_v31  ;;  %v19583_v1 = vpop.f32.mrb[238].mxu0  ;;  %v21557_v31 = vld [vmem:[%s28269_s3 + $0x9e0] ss:$20 sps:$4 sm:$0xff]  }
0x1f69   :  { %v19584_v25 = vpop.f32.mrb[239].mxu0  ;;  %v21560_v41 = vld [vmem:[%s28269_s3 + $0x9c0] ss:$20 sps:$4 sm:$0xff]  }
0x1f6a   :  { %v7587_v29 = vadd.f32 %v25074_v14, %v19582_v50  ;;  %v21561_v50 = vld [vmem:[%s28269_s3 + $0x9e8] ss:$20 sps:$4 sm:$0xff]   ;;  %v17829_v1 = vld [vmem:[%s28268_s0 + $0x100] sm:$0xff] }
0x1f6b   :  { %v17831_v25 = vcombine.high %v17829_v1, %v17829_v1 }
0x1f6c   :  { %v7592_v45 = vmax.f32 %v7587_v29, 0.0  ;;  %v25179_v29 = vld [vmem:[%s28267_s1 + $0x40] sm:$0xff]  }
0x1f6e   :  { %v7593_v49 = vpack.c.bf16 %v7592_v45, %v7592_v45  ;;  %v25186_v45 = vld [vmem:[%s28267_s1] sm:$0xff]  }
0x1f70   :  { %17798 = vmatmul.mubr.msk.bf16.vlgmr.msra.gmra.mrb[244].mxu1 %vm352_vm1, %v7593_v49 }
0x1f71   :  { %7704 = vmatpush1.bf16.msra.mxu1 %v21538_v48  ;;  %7735 = vmatprep.mubr.bf16.mxu1 %v22336_v30  ;;  %v25192_v48 = vld [vmem:[%s28267_s1 + $0x48] sm:$0xff]  }
0x1f72   :  { %7705 = vmatprep.subr.bf16.mxu1 %v21543_v40 }
0x1f75   :  { %7706 = vmatpush1.bf16.msra.mxu1 %v21541_v61 }
0x1f76   :  { %20747 = vmatprep.subr.bf16.mxu1 %v22335_v23 }
0x1f78   :  { %17799 = vmatmul.mubr.msk.bf16.vlgmr.msra.gmra.mrb[248].mxu1 %vm352_vm1, %v7593_v49 }
0x1f79   :  { %20748 = vmatpush3.bf16.msra.mxu1 %v21544_v54  ;;  %20751 = vmatprep.mubr.msk.bf16.mxu1 %vm22337_vm0, %v22335_v23 }
0x1f7a   :  { %20749 = vmatprep.subr.bf16.mxu1 %v22335_v23 }
0x1f7d   :  { %20750 = vmatpush3.bf16.msra.mxu1 %v21545_v27 }
0x1f7e   :  { %19589 = vmatprep.subr.bf16.mxu1 %v24576_v13  ;;  %v17802_v13 = vcombine.low %v17801_v51, %v17801_v51 }
0x1f80   :  { %20752 = vmatmul.mubr.msk.bf16.vlgmr.msra.gmra.mrb[252].mxu1 %vm352_vm1, %v7593_v49 }
0x1f81   :  { %19590 = vmatpush3.bf16.msra.mxu1 %v24583_v6  ;;  %7830 = vmatprep.mubr.bf16.mxu1 %v17803_v7  ;;  %v21550_v6 = vld [vmem:[%s28269_s3 + $0x9b4] ss:$20 sps:$4 sm:$0xff]  }
0x1f82   :  { %19591 = vmatprep.subr.bf16.mxu1 %v24589_v53  ;;  %v21548_v53 = vld [vmem:[%s28269_s3 + $0x9b0] ss:$20 sps:$4 sm:$0xff]   ;;  %7908 = vmatprep.subr.bf16.mxu0 %v21550_v6 }
0x1f83   :  { %7909 = vmatpush1.bf16.msra.mxu0 %v21548_v53 }
0x1f84   :  { %7910 = vmatprep.subr.bf16.mxu0 %v21553_v60 }
0x1f85   :  { %19592 = vmatpush3.bf16.msra.mxu1 %v24669_v36 }
0x1f86   :  { %19593 = vmatprep.subr.bf16.mxu1 %v24675_v39 }
0x1f87   :  { %7911 = vmatpush1.bf16.msra.mxu0 %v21551_v28 }
0x1f88   :  { %7949 = vmatprep.subr.bf16.mxu0 %v21556_v12 }
0x1f89   :  { %19594 = vmatpush3.bf16.msra.mxu1 %v24681_v34 }
0x1f8a   :  { %19595 = vmatprep.subr.bf16.mxu1 %v24687_v8 }
0x1f8d   :  { %19596 = vmatpush3.bf16.msra.mxu1 %v24693_v4 }
0x1f8e   :  { %19597 = vmatprep.subr.bf16.mxu1 %v24699_v15 }
0x1f91   :  { %19598 = vmatpush3.bf16.msra.mxu1 %v24705_v5 }
0x1f92   :  { %19599 = vmatprep.subr.bf16.mxu1 %v24711_v10 }
0x1f95   :  { %19600 = vmatpush3.bf16.msra.mxu1 %v24717_v24 }
0x1f96   :  { %19601 = vmatprep.subr.bf16.mxu1 %v24723_v58 }
0x1f99   :  { %19602 = vmatpush3.bf16.msra.mxu1 %v24729_v56 }
0x1f9a   :  { %19603 = vmatprep.subr.bf16.mxu1 %v24809_v46 }
0x1f9d   :  { %19604 = vmatpush3.bf16.msra.mxu1 %v24815_v38 }
0x1fa0   :  { %7831 = vmatmul.mubr.bf16.vlgmr.msra.gmra.mrb[0].mxu1 %v17802_v13 }
0x1fa1   :  { %8186 = vmatprep.mubr.bf16.mxu1 %v22336_v30 }
0x2043   :  { %v7696_v42 = vpop.f32.mrb[244].mxu1 }
0x2044   :  { %v25136_v9 = vadd.f32 %v7696_v42, %v25057_v3  ;;  %v7698_v11 = vpop.f32.mrb[245].mxu1 }
0x2045   :  { %v25139_v17 = vadd.f32 %v7698_v11, %v25060_v18  ;;  %v7700_v52 = vpop.f32.mrb[246].mxu1 }
0x2046   :  { %v7701_v26 = vpop.f32.mrb[247].mxu1 }
0x204b   :  { %v7737_v22 = vpop.f32.mrb[248].mxu1 }
0x204c   :  { %v25142_v59 = vadd.f32 %v7737_v22, %v25063_v57  ;;  %v7739_v21 = vpop.f32.mrb[249].mxu1  ;;  %v21570_v22 = vld [vmem:[%s28269_s3 + $0xa08] ss:$20 sps:$4 sm:$0xff]  }
0x204d   :  { %v25145_v0 = vadd.f32 %v7739_v21, %v25066_v35  ;;  %v7741_v16 = vpop.f32.mrb[250].mxu1  ;;  %v21554_v35 = vld [vmem:[%s28269_s3 + $0x9b8] ss:$20 sps:$4 sm:$0xff]   ;;  %v21575_v21 = vld [vmem:[%s28269_s3 + $0xa34] ss:$20 sps:$4 sm:$0xff]  }
0x204e   :  { %v7742_v19 = vpop.f32.mrb[251].mxu1  ;;  %v21576_v16 = vld [vmem:[%s28269_s3 + $0xa10] ss:$20 sps:$4 sm:$0xff]  }
0x204f   :  { %v21577_v19 = vld [vmem:[%s28269_s3 + $0xa38] ss:$20 sps:$4 sm:$0xff]  }
0x2053   :  { %v7778_v55 = vpop.f32.mrb[252].mxu1 }
0x2054   :  { %v25148_v3 = vadd.f32 %v7778_v55, %v25069_v20  ;;  %v20753_v62 = vpop.f32.mrb[253].mxu1  ;;  %v21559_v20 = vld [vmem:[%s28269_s3 + $0x9e4] ss:$20 sps:$4 sm:$0xff]   ;;  %v17857_v55 = vld [vmem:[%s28268_s0 + $0x108] sm:$0xff] }
0x2055   :  { %v7781_v63 = vpop.f32.mrb[254].mxu1  ;;  %v25272_v62 = vld [vmem:[%s28267_s1 + $0x8] sm:$0xff]  }
0x2056   :  { %v20754_v18 = vpop.f32.mrb[255].mxu1  ;;  %v25278_v63 = vld [vmem:[%s28267_s1 + $0x50] sm:$0xff]  }
0x2057   :  { %v25284_v18 = vld [vmem:[%s28267_s1 + $0x10] sm:$0xff]  }
0x2073   :  { %v19605_v47 = vpop.f32.mrb[0].mxu1 }
0x2074   :  { %v19606_v43 = vpop.f32.mrb[1].mxu1 }
0x2075   :  { %v19607_v32 = vadd.f32 %v19606_v43, %v19605_v47  ;;  %v19608_v44 = vpop.f32.mrb[2].mxu1  ;;  %v25290_v47 = vld [vmem:[%s28267_s1 + $0x58] sm:$0xff]  }
0x2076   :  { %v19609_v33 = vpop.f32.mrb[3].mxu1  ;;  %v25296_v43 = vld [vmem:[%s28267_s1 + $0x18] sm:$0xff]   ;;  %v25308_v44 = vld [vmem:[%s28267_s1 + $0x20] sm:$0xff]  }
0x2077   :  { %v7833_v57 = vadd.f32 %v25074_v14, %v19607_v32  ;;  %v25302_v32 = vld [vmem:[%s28267_s1 + $0x60] sm:$0xff]   ;;  %v25314_v33 = vld [vmem:[%s28267_s1 + $0x68] sm:$0xff]  }
0x2079   :  { %v7838_v37 = vmax.f32 %v7833_v57, 0.0  ;;  %v25320_v57 = vld [vmem:[%s28267_s1 + $0x28] sm:$0xff]  }
0x207b   :  { %v7839_v2 = vpack.c.bf16 %v7838_v37, %v7838_v37  ;;  %v25326_v37 = vld [vmem:[%s28267_s1 + $0x70] sm:$0xff]  }
0x207d   :  { %17826 = vmatmul.mubr.msk.bf16.vlgmr.msra.gmra.mrb[240].mxu0 %vm352_vm1, %v7839_v2 }
0x207e   :  { %7950 = vmatpush1.bf16.msra.mxu0 %v21554_v35  ;;  %7981 = vmatprep.mubr.bf16.mxu0 %v22336_v30  ;;  %v25332_v35 = vld [vmem:[%s28267_s1 + $0x30] sm:$0xff]  }
0x207f   :  { %7951 = vmatprep.subr.bf16.mxu0 %v21559_v20  ;;  %v21582_v20 = vld [vmem:[%s28269_s3 + $0xa54] ss:$20 sps:$4 sm:$0xff]  }
0x2082   :  { %7952 = vmatpush1.bf16.msra.mxu0 %v21557_v31  ;;  %v21580_v31 = vld [vmem:[%s28269_s3 + $0xa50] ss:$20 sps:$4 sm:$0xff]  }
0x2083   :  { %20755 = vmatprep.subr.bf16.mxu0 %v22335_v23 }
0x2085   :  { %17827 = vmatmul.mubr.msk.bf16.vlgmr.msra.gmra.mrb[244].mxu0 %vm352_vm1, %v7839_v2 }
0x2086   :  { %20756 = vmatpush3.bf16.msra.mxu0 %v21560_v41  ;;  %20759 = vmatprep.mubr.msk.bf16.mxu0 %vm22337_vm0, %v22335_v23  ;;  %v21588_v41 = vld [vmem:[%s28269_s3 + $0xa5c] ss:$20 sps:$4 sm:$0xff]  }
0x2087   :  { %20757 = vmatprep.subr.bf16.mxu0 %v22335_v23 }
0x208a   :  { %20758 = vmatpush3.bf16.msra.mxu0 %v21561_v50 }
0x208b   :  { %19614 = vmatprep.subr.bf16.mxu0 %v25179_v29 }
0x208d   :  { %20760 = vmatmul.mubr.msk.bf16.vlgmr.msra.gmra.mrb[248].mxu0 %vm352_vm1, %v7839_v2  ;;  %v17858_v2 = vcombine.low %v17857_v55, %v17857_v55 }
0x208e   :  { %19615 = vmatpush3.bf16.msra.mxu0 %v25186_v45  ;;  %8076 = vmatprep.mubr.bf16.mxu0 %v17831_v25 }
0x208f   :  { %19616 = vmatprep.subr.bf16.mxu0 %v25192_v48 }
0x2092   :  { %19617 = vmatpush3.bf16.msra.mxu0 %v24669_v36  ;;  %v17830_v36 = vcombine.low %v17829_v1, %v17829_v1 }
0x2093   :  { %19618 = vmatprep.subr.bf16.mxu0 %v24675_v39  ;;  %v21566_v39 = vld [vmem:[%s28269_s3 + $0xa04] ss:$20 sps:$4 sm:$0xff]  }
0x2094   :  { %8154 = vmatprep.subr.bf16.mxu1 %v21566_v39 }
0x2096   :  { %19619 = vmatpush3.bf16.msra.mxu0 %v24681_v34  ;;  %v21564_v34 = vld [vmem:[%s28269_s3 + $0xa00] ss:$20 sps:$4 sm:$0xff]  }
0x2097   :  { %19620 = vmatprep.subr.bf16.mxu0 %v24687_v8  ;;  %8155 = vmatpush1.bf16.msra.mxu1 %v21564_v34  ;;  %v21569_v8 = vld [vmem:[%s28269_s3 + $0xa2c] ss:$20 sps:$4 sm:$0xff]  }
0x2098   :  { %8156 = vmatprep.subr.bf16.mxu1 %v21569_v8 }
0x209a   :  { %19621 = vmatpush3.bf16.msra.mxu0 %v24693_v4  ;;  %v21567_v4 = vld [vmem:[%s28269_s3 + $0xa28] ss:$20 sps:$4 sm:$0xff]  }
0x209b   :  { %19622 = vmatprep.subr.bf16.mxu0 %v24699_v15  ;;  %8157 = vmatpush1.bf16.msra.mxu1 %v21567_v4  ;;  %v21572_v15 = vld [vmem:[%s28269_s3 + $0xa0c] ss:$20 sps:$4 sm:$0xff]  }
0x209c   :  { %8195 = vmatprep.subr.bf16.mxu1 %v21572_v15 }
0x209e   :  { %19623 = vmatpush3.bf16.msra.mxu0 %v24705_v5 }
0x209f   :  { %19624 = vmatprep.subr.bf16.mxu0 %v24711_v10 }
0x20a2   :  { %19625 = vmatpush3.bf16.msra.mxu0 %v24717_v24 }
0x20a3   :  { %19626 = vmatprep.subr.bf16.mxu0 %v24723_v58 }
0x20a6   :  { %19627 = vmatpush3.bf16.msra.mxu0 %v24729_v56 }
0x20a7   :  { %19628 = vmatprep.subr.bf16.mxu0 %v24809_v46 }
0x20aa   :  { %19629 = vmatpush3.bf16.msra.mxu0 %v24815_v38 }
0x20ab   :  { %8400 = vmatprep.subr.bf16.mxu0 %v21582_v20 }
0x20ad   :  { %8077 = vmatmul.mubr.bf16.vlgmr.msra.gmra.mrb[252].mxu0 %v17830_v36 }
0x20ae   :  { %8432 = vmatprep.mubr.bf16.mxu0 %v22336_v30  ;;  %8401 = vmatpush1.bf16.msra.mxu0 %v21580_v31 }
0x2150   :  { %v7942_v5 = vpop.f32.mrb[240].mxu0 }
0x2151   :  { %v25225_v10 = vadd.f32 %v7942_v5, %v25136_v9  ;;  %v7944_v24 = vpop.f32.mrb[241].mxu0 }
0x2152   :  { %v25228_v58 = vadd.f32 %v7944_v24, %v25139_v17  ;;  %v7946_v56 = vpop.f32.mrb[242].mxu0 }
0x2153   :  { %v7947_v49 = vpop.f32.mrb[243].mxu0 }
0x2158   :  { %v7983_v40 = vpop.f32.mrb[244].mxu0 }
0x2159   :  { %v25231_v61 = vadd.f32 %v7983_v40, %v25142_v59  ;;  %v7985_v54 = vpop.f32.mrb[245].mxu0 }
0x215a   :  { %v25234_v27 = vadd.f32 %v7985_v54, %v25145_v0  ;;  %v7987_v51 = vpop.f32.mrb[246].mxu0  ;;  %v21573_v0 = vld [vmem:[%s28269_s3 + $0xa30] ss:$20 sps:$4 sm:$0xff]  }
0x215b   :  { %v7988_v7 = vpop.f32.mrb[247].mxu0 }
0x2160   :  { %v8024_v13 = vpop.f32.mrb[248].mxu0 }
0x2161   :  { %v25237_v6 = vadd.f32 %v8024_v13, %v25148_v3  ;;  %v20761_v53 = vpop.f32.mrb[249].mxu0  ;;  %v17859_v3 = vcombine.high %v17857_v55, %v17857_v55  ;;  %v21604_v55 = vld [vmem:[%s28269_s3 + $0xaac] ss:$20 sps:$4 sm:$0xff]  }
0x2162   :  { %v8027_v60 = vpop.f32.mrb[250].mxu0 }
0x2163   :  { %v20762_v28 = vpop.f32.mrb[251].mxu0 }
0x2180   :  { %v19630_v12 = vpop.f32.mrb[252].mxu0 }
0x2181   :  { %v19631_v42 = vpop.f32.mrb[253].mxu0 }
0x2182   :  { %v19632_v9 = vadd.f32 %v19631_v42, %v19630_v12  ;;  %v19633_v11 = vpop.f32.mrb[254].mxu0  ;;  %v21589_v42 = vld [vmem:[%s28269_s3 + $0xa80] ss:$20 sps:$4 sm:$0xff]  }
0x2183   :  { %v19634_v17 = vpop.f32.mrb[255].mxu0  ;;  %v21593_v11 = vld [vmem:[%s28269_s3 + $0xa88] ss:$20 sps:$4 sm:$0xff]  }
0x2184   :  { %v8079_v52 = vadd.f32 %v25074_v14, %v19632_v9  ;;  %v21592_v9 = vld [vmem:[%s28269_s3 + $0xa60] ss:$20 sps:$4 sm:$0xff]  }
0x2185   :  { %v17885_v17 = vld [vmem:[%s28268_s0 + $0x110] sm:$0xff] }
0x2186   :  { %v8084_v26 = vmax.f32 %v8079_v52, 0.0  ;;  %v17887_v52 = vcombine.high %v17885_v17, %v17885_v17 }
0x2188   :  { %v8085_v59 = vpack.c.bf16 %v8084_v26, %v8084_v26  ;;  %v25412_v26 = vld [vmem:[%s28267_s1 + $0x78] sm:$0xff]  }
0x218a   :  { %17854 = vmatmul.mubr.msk.bf16.vlgmr.msra.gmra.mrb[4].mxu1 %vm352_vm1, %v8085_v59 }
0x218b   :  { %8196 = vmatpush1.bf16.msra.mxu1 %v21570_v22  ;;  %8227 = vmatprep.mubr.bf16.mxu1 %v22336_v30  ;;  %v17886_v22 = vcombine.low %v17885_v17, %v17885_v17  ;;  %v21620_v17 = vld [vmem:[%s28269_s3 + $0xafc] ss:$20 sps:$4 sm:$0xff]  }
0x218c   :  { %8197 = vmatprep.subr.bf16.mxu1 %v21575_v21  ;;  %v21598_v21 = vld [vmem:[%s28269_s3 + $0xaa4] ss:$20 sps:$4 sm:$0xff]  }
0x218f   :  { %8198 = vmatpush1.bf16.msra.mxu1 %v21573_v0  ;;  %v21596_v0 = vld [vmem:[%s28269_s3 + $0xaa0] ss:$20 sps:$4 sm:$0xff]  }
0x2190   :  { %20763 = vmatprep.subr.bf16.mxu1 %v22335_v23 }
0x2192   :  { %17855 = vmatmul.mubr.msk.bf16.vlgmr.msra.gmra.mrb[8].mxu1 %vm352_vm1, %v8085_v59 }
0x2193   :  { %20764 = vmatpush3.bf16.msra.mxu1 %v21576_v16  ;;  %20767 = vmatprep.mubr.msk.bf16.mxu1 %vm22337_vm0, %v22335_v23  ;;  %v21601_v16 = vld [vmem:[%s28269_s3 + $0xacc] ss:$20 sps:$4 sm:$0xff]  }
0x2194   :  { %20765 = vmatprep.subr.bf16.mxu1 %v22335_v23 }
0x2197   :  { %20766 = vmatpush3.bf16.msra.mxu1 %v21577_v19  ;;  %v21599_v19 = vld [vmem:[%s28269_s3 + $0xac8] ss:$20 sps:$4 sm:$0xff]  }
0x2198   :  { %19639 = vmatprep.subr.bf16.mxu1 %v25179_v29 }
0x219a   :  { %20768 = vmatmul.mubr.msk.bf16.vlgmr.msra.gmra.mrb[12].mxu1 %vm352_vm1, %v8085_v59  ;;  %v25418_v59 = vld [vmem:[%s28267_s1 + $0x38] sm:$0xff]  }
0x219b   :  { %19640 = vmatpush3.bf16.msra.mxu1 %v25186_v45  ;;  %8322 = vmatprep.mubr.bf16.mxu1 %v17859_v3 }
0x219c   :  { %19641 = vmatprep.subr.bf16.mxu1 %v25192_v48 }
0x219f   :  { %19642 = vmatpush3.bf16.msra.mxu1 %v25272_v62 }
0x21a0   :  { %19643 = vmatprep.subr.bf16.mxu1 %v25278_v63 }
0x21a3   :  { %19644 = vmatpush3.bf16.msra.mxu1 %v25284_v18 }
0x21a4   :  { %19645 = vmatprep.subr.bf16.mxu1 %v25290_v47 }
0x21a7   :  { %19646 = vmatpush3.bf16.msra.mxu1 %v25296_v43 }
0x21a8   :  { %19647 = vmatprep.subr.bf16.mxu1 %v25302_v32 }
0x21ab   :  { %19648 = vmatpush3.bf16.msra.mxu1 %v25308_v44 }
0x21ac   :  { %19649 = vmatprep.subr.bf16.mxu1 %v25314_v33 }
0x21af   :  { %19650 = vmatpush3.bf16.msra.mxu1 %v25320_v57 }
0x21b0   :  { %19651 = vmatprep.subr.bf16.mxu1 %v25326_v37 }
0x21b3   :  { %19652 = vmatpush3.bf16.msra.mxu1 %v25332_v35 }
0x21b4   :  { %19653 = vmatprep.subr.bf16.mxu1 %v24809_v46  ;;  %v21585_v46 = vld [vmem:[%s28269_s3 + $0xa7c] ss:$20 sps:$4 sm:$0xff]  }
0x21b5   :  { %8402 = vmatprep.subr.bf16.mxu0 %v21585_v46 }
0x21b7   :  { %19654 = vmatpush3.bf16.msra.mxu1 %v24815_v38  ;;  %v21583_v38 = vld [vmem:[%s28269_s3 + $0xa78] ss:$20 sps:$4 sm:$0xff]  }
0x21b8   :  { %8403 = vmatpush1.bf16.msra.mxu0 %v21583_v38  ;;  %8646 = vmatprep.subr.bf16.mxu1 %v21598_v21 }
0x21b9   :  { %8441 = vmatprep.subr.bf16.mxu0 %v21588_v41 }
0x21ba   :  { %8323 = vmatmul.mubr.bf16.vlgmr.msra.gmra.mrb[16].mxu1 %v17858_v2 }
0x21bb   :  { %8678 = vmatprep.mubr.bf16.mxu1 %v22336_v30  ;;  %8647 = vmatpush1.bf16.msra.mxu1 %v21596_v0 }
0x21bc   :  { %8648 = vmatprep.subr.bf16.mxu1 %v21601_v16 }
0x21bf   :  { %8649 = vmatpush1.bf16.msra.mxu1 %v21599_v19 }
0x21c0   :  { %8687 = vmatprep.subr.bf16.mxu1 %v21604_v55 }
0x225d   :  { %v8188_v50 = vpop.f32.mrb[4].mxu1 }
0x225e   :  { %v25354_v1 = vadd.f32 %v8188_v50, %v25225_v10  ;;  %v8190_v25 = vpop.f32.mrb[5].mxu1 }
0x225f   :  { %v25357_v36 = vadd.f32 %v8190_v25, %v25228_v58  ;;  %v8192_v39 = vpop.f32.mrb[6].mxu1 }
0x2260   :  { %v8193_v34 = vpop.f32.mrb[7].mxu1 }
0x2265   :  { %v8229_v8 = vpop.f32.mrb[8].mxu1 }
0x2266   :  { %v25360_v4 = vadd.f32 %v8229_v8, %v25231_v61  ;;  %v8231_v15 = vpop.f32.mrb[9].mxu1 }
0x2267   :  { %v25363_v5 = vadd.f32 %v8231_v15, %v25234_v27  ;;  %v8233_v24 = vpop.f32.mrb[10].mxu1  ;;  %v21586_v27 = vld [vmem:[%s28269_s3 + $0xa58] ss:$20 sps:$4 sm:$0xff]  }
0x2268   :  { %v8234_v56 = vpop.f32.mrb[11].mxu1 }
0x226d   :  { %v8270_v49 = vpop.f32.mrb[12].mxu1 }
0x226e   :  { %v25366_v10 = vadd.f32 %v8270_v49, %v25237_v6  ;;  %v20769_v40 = vpop.f32.mrb[13].mxu1  ;;  %v21591_v6 = vld [vmem:[%s28269_s3 + $0xa84] ss:$20 sps:$4 sm:$0xff]  }
0x226f   :  { %v8273_v54 = vpop.f32.mrb[14].mxu1 }
0x2270   :  { %v20770_v58 = vpop.f32.mrb[15].mxu1 }
0x228d   :  { %v19655_v51 = vpop.f32.mrb[16].mxu1 }
0x228e   :  { %v19656_v7 = vpop.f32.mrb[17].mxu1 }
0x228f   :  { %v19657_v13 = vadd.f32 %v19656_v7, %v19655_v51  ;;  %v19658_v53 = vpop.f32.mrb[18].mxu1 }
0x2290   :  { %v19659_v60 = vpop.f32.mrb[19].mxu1  ;;  %v21605_v53 = vld [vmem:[%s28269_s3 + $0xad0] ss:$20 sps:$4 sm:$0xff]  }
0x2291   :  { %v8325_v61 = vadd.f32 %v25074_v14, %v19657_v13  ;;  %v21608_v60 = vld [vmem:[%s28269_s3 + $0xab0] ss:$20 sps:$4 sm:$0xff]  }
0x2293   :  { %v8330_v28 = vmax.f32 %v8325_v61, 0.0  ;;  %v21609_v61 = vld [vmem:[%s28269_s3 + $0xad8] ss:$20 sps:$4 sm:$0xff]  }
0x2295   :  { %v8331_v12 = vpack.c.bf16 %v8330_v28, %v8330_v28  ;;  %v17913_v28 = vld [vmem:[%s28268_s0 + $0x118] sm:$0xff] }
0x2297   :  { %17882 = vmatmul.mubr.msk.bf16.vlgmr.msra.gmra.mrb[0].mxu0 %vm352_vm1, %v8331_v12 }
0x2298   :  { %8442 = vmatpush1.bf16.msra.mxu0 %v21586_v27  ;;  %8473 = vmatprep.mubr.bf16.mxu0 %v22336_v30  ;;  %v17915_v27 = vcombine.high %v17913_v28, %v17913_v28 }
0x2299   :  { %8443 = vmatprep.subr.bf16.mxu0 %v21591_v6  ;;  %v21614_v6 = vld [vmem:[%s28269_s3 + $0xaf4] ss:$20 sps:$4 sm:$0xff]  }
0x229c   :  { %8444 = vmatpush1.bf16.msra.mxu0 %v21589_v42  ;;  %v21612_v42 = vld [vmem:[%s28269_s3 + $0xaf0] ss:$20 sps:$4 sm:$0xff]  }
0x229d   :  { %20771 = vmatprep.subr.bf16.mxu0 %v22335_v23 }
0x229f   :  { %17883 = vmatmul.mubr.msk.bf16.vlgmr.msra.gmra.mrb[4].mxu0 %vm352_vm1, %v8331_v12 }
0x22a0   :  { %20772 = vmatpush3.bf16.msra.mxu0 %v21592_v9  ;;  %20775 = vmatprep.mubr.msk.bf16.mxu0 %vm22337_vm0, %v22335_v23  ;;  %v21617_v9 = vld [vmem:[%s28269_s3 + $0xb1c] ss:$20 sps:$4 sm:$0xff]  }
0x22a1   :  { %20773 = vmatprep.subr.bf16.mxu0 %v22335_v23 }
0x22a4   :  { %20774 = vmatpush3.bf16.msra.mxu0 %v21593_v11  ;;  %v21615_v11 = vld [vmem:[%s28269_s3 + $0xb18] ss:$20 sps:$4 sm:$0xff]  }
0x22a5   :  { %19664 = vmatprep.subr.bf16.mxu0 %v25179_v29 }
0x22a7   :  { %20776 = vmatmul.mubr.msk.bf16.vlgmr.msra.gmra.mrb[8].mxu0 %vm352_vm1, %v8331_v12  ;;  %v17914_v12 = vcombine.low %v17913_v28, %v17913_v28  ;;  %v21636_v28 = vld [vmem:[%s28269_s3 + $0xb4c] ss:$20 sps:$4 sm:$0xff]  }
0x22a8   :  { %19665 = vmatpush3.bf16.msra.mxu0 %v25186_v45  ;;  %8568 = vmatprep.mubr.bf16.mxu0 %v17887_v52 }
0x22a9   :  { %19666 = vmatprep.subr.bf16.mxu0 %v25192_v48 }
0x22ac   :  { %19667 = vmatpush3.bf16.msra.mxu0 %v25272_v62 }
0x22ad   :  { %19668 = vmatprep.subr.bf16.mxu0 %v25278_v63 }
0x22b0   :  { %19669 = vmatpush3.bf16.msra.mxu0 %v25284_v18 }
0x22b1   :  { %19670 = vmatprep.subr.bf16.mxu0 %v25290_v47 }
0x22b4   :  { %19671 = vmatpush3.bf16.msra.mxu0 %v25296_v43 }
0x22b5   :  { %19672 = vmatprep.subr.bf16.mxu0 %v25302_v32 }
0x22b8   :  { %19673 = vmatpush3.bf16.msra.mxu0 %v25308_v44 }
0x22b9   :  { %19674 = vmatprep.subr.bf16.mxu0 %v25314_v33 }
0x22bc   :  { %19675 = vmatpush3.bf16.msra.mxu0 %v25320_v57 }
0x22bd   :  { %19676 = vmatprep.subr.bf16.mxu0 %v25326_v37 }
0x22c0   :  { %19677 = vmatpush3.bf16.msra.mxu0 %v25332_v35 }
0x22c1   :  { %19678 = vmatprep.subr.bf16.mxu0 %v25412_v26 }
0x22c4   :  { %19679 = vmatpush3.bf16.msra.mxu0 %v25418_v59 }
0x22c5   :  { %8892 = vmatprep.subr.bf16.mxu0 %v21614_v6 }
0x22c7   :  { %8569 = vmatmul.mubr.bf16.vlgmr.msra.gmra.mrb[12].mxu0 %v17886_v22 }
0x22c8   :  { %8924 = vmatprep.mubr.bf16.mxu0 %v22336_v30  ;;  %8893 = vmatpush1.bf16.msra.mxu0 %v21612_v42 }
0x22c9   :  { %8894 = vmatprep.subr.bf16.mxu0 %v21617_v9 }
0x22cc   :  { %8895 = vmatpush1.bf16.msra.mxu0 %v21615_v11 }
0x22cd   :  { %8933 = vmatprep.subr.bf16.mxu0 %v21620_v17 }
0x236a   :  { %v8434_v3 = vpop.f32.mrb[0].mxu0 }
0x236b   :  { %v25438_v2 = vadd.f32 %v8434_v3, %v25354_v1  ;;  %v8436_v20 = vpop.f32.mrb[1].mxu0 }
0x236c   :  { %v25441_v31 = vadd.f32 %v8436_v20, %v25357_v36  ;;  %v8438_v46 = vpop.f32.mrb[2].mxu0 }
0x236d   :  { %v8439_v38 = vpop.f32.mrb[3].mxu0 }
0x2372   :  { %v8475_v41 = vpop.f32.mrb[4].mxu0 }
0x2373   :  { %v25444_v50 = vadd.f32 %v8475_v41, %v25360_v4  ;;  %v8477_v25 = vpop.f32.mrb[5].mxu0 }
0x2374   :  { %v25447_v39 = vadd.f32 %v8477_v25, %v25363_v5  ;;  %v8479_v34 = vpop.f32.mrb[6].mxu0  ;;  %v21602_v5 = vld [vmem:[%s28269_s3 + $0xaa8] ss:$20 sps:$4 sm:$0xff]  }
0x2375   :  { %v8480_v8 = vpop.f32.mrb[7].mxu0 }
0x237a   :  { %v8516_v15 = vpop.f32.mrb[8].mxu0 }
0x237b   :  { %v25450_v1 = vadd.f32 %v8516_v15, %v25366_v10  ;;  %v20777_v24 = vpop.f32.mrb[9].mxu0  ;;  %v21607_v10 = vld [vmem:[%s28269_s3 + $0xad4] ss:$20 sps:$4 sm:$0xff]  }
0x237c   :  { %v8519_v56 = vpop.f32.mrb[10].mxu0 }
0x237d   :  { %v20778_v36 = vpop.f32.mrb[11].mxu0 }
0x239a   :  { %v19680_v49 = vpop.f32.mrb[12].mxu0 }
0x239b   :  { %v19681_v40 = vpop.f32.mrb[13].mxu0 }
0x239c   :  { %v19682_v54 = vadd.f32 %v19681_v40, %v19680_v49  ;;  %v19683_v58 = vpop.f32.mrb[14].mxu0 }
0x239d   :  { %v19684_v51 = vpop.f32.mrb[15].mxu0  ;;  %v21621_v58 = vld [vmem:[%s28269_s3 + $0xb20] ss:$20 sps:$4 sm:$0xff]  }
0x239e   :  { %v8571_v4 = vadd.f32 %v25074_v14, %v19682_v54  ;;  %v21624_v51 = vld [vmem:[%s28269_s3 + $0xb00] ss:$20 sps:$4 sm:$0xff]  }
0x23a0   :  { %v8576_v7 = vmax.f32 %v8571_v4, 0.0  ;;  %v21625_v4 = vld [vmem:[%s28269_s3 + $0xb28] ss:$20 sps:$4 sm:$0xff]  }
0x23a2   :  { %v8577_v13 = vpack.c.bf16 %v8576_v7, %v8576_v7  ;;  %v17941_v7 = vld [vmem:[%s28268_s0 + $0x120] sm:$0xff] }
0x23a4   :  { %17910 = vmatmul.mubr.msk.bf16.vlgmr.msra.gmra.mrb[20].mxu1 %vm352_vm1, %v8577_v13 }
0x23a5   :  { %8688 = vmatpush1.bf16.msra.mxu1 %v21602_v5  ;;  %8719 = vmatprep.mubr.bf16.mxu1 %v22336_v30  ;;  %v17943_v5 = vcombine.high %v17941_v7, %v17941_v7 }
0x23a6   :  { %8689 = vmatprep.subr.bf16.mxu1 %v21607_v10  ;;  %v21630_v10 = vld [vmem:[%s28269_s3 + $0xb44] ss:$20 sps:$4 sm:$0xff]  }
0x23a9   :  { %8690 = vmatpush1.bf16.msra.mxu1 %v21605_v53  ;;  %v21628_v53 = vld [vmem:[%s28269_s3 + $0xb40] ss:$20 sps:$4 sm:$0xff]  }
0x23aa   :  { %20779 = vmatprep.subr.bf16.mxu1 %v22335_v23 }
0x23ac   :  { %17911 = vmatmul.mubr.msk.bf16.vlgmr.msra.gmra.mrb[24].mxu1 %vm352_vm1, %v8577_v13 }
0x23ad   :  { %20780 = vmatpush3.bf16.msra.mxu1 %v21608_v60  ;;  %20783 = vmatprep.mubr.msk.bf16.mxu1 %vm22337_vm0, %v22335_v23  ;;  %v21633_v60 = vld [vmem:[%s28269_s3 + $0xb6c] ss:$20 sps:$4 sm:$0xff]  }
0x23ae   :  { %20781 = vmatprep.subr.bf16.mxu1 %v22335_v23 }
0x23b1   :  { %20782 = vmatpush3.bf16.msra.mxu1 %v21609_v61  ;;  %v21631_v61 = vld [vmem:[%s28269_s3 + $0xb68] ss:$20 sps:$4 sm:$0xff]  }
0x23b2   :  { %19689 = vmatprep.subr.bf16.mxu1 %v25179_v29 }
0x23b4   :  { %20784 = vmatmul.mubr.msk.bf16.vlgmr.msra.gmra.mrb[28].mxu1 %vm352_vm1, %v8577_v13  ;;  %v17942_v13 = vcombine.low %v17941_v7, %v17941_v7 }
0x23b5   :  { %19690 = vmatpush3.bf16.msra.mxu1 %v25186_v45  ;;  %8814 = vmatprep.mubr.bf16.mxu1 %v17915_v27 }
0x23b6   :  { %19691 = vmatprep.subr.bf16.mxu1 %v25192_v48 }
0x23b9   :  { %19692 = vmatpush3.bf16.msra.mxu1 %v25272_v62 }
0x23ba   :  { %19693 = vmatprep.subr.bf16.mxu1 %v25278_v63 }
0x23bd   :  { %19694 = vmatpush3.bf16.msra.mxu1 %v25284_v18 }
0x23be   :  { %19695 = vmatprep.subr.bf16.mxu1 %v25290_v47 }
0x23c1   :  { %19696 = vmatpush3.bf16.msra.mxu1 %v25296_v43 }
0x23c2   :  { %19697 = vmatprep.subr.bf16.mxu1 %v25302_v32 }
0x23c5   :  { %19698 = vmatpush3.bf16.msra.mxu1 %v25308_v44 }
0x23c6   :  { %19699 = vmatprep.subr.bf16.mxu1 %v25314_v33 }
0x23c9   :  { %19700 = vmatpush3.bf16.msra.mxu1 %v25320_v57 }
0x23ca   :  { %19701 = vmatprep.subr.bf16.mxu1 %v25326_v37 }
0x23cd   :  { %19702 = vmatpush3.bf16.msra.mxu1 %v25332_v35 }
0x23ce   :  { %19703 = vmatprep.subr.bf16.mxu1 %v25412_v26 }
0x23d1   :  { %19704 = vmatpush3.bf16.msra.mxu1 %v25418_v59 }
0x23d2   :  { %9138 = vmatprep.subr.bf16.mxu1 %v21630_v10 }
0x23d4   :  { %8815 = vmatmul.mubr.bf16.vlgmr.msra.gmra.mrb[32].mxu1 %v17914_v12 }
0x23d5   :  { %9170 = vmatprep.mubr.bf16.mxu1 %v22336_v30  ;;  %9139 = vmatpush1.bf16.msra.mxu1 %v21628_v53 }
0x23d6   :  { %9140 = vmatprep.subr.bf16.mxu1 %v21633_v60 }
0x23d9   :  { %9141 = vmatpush1.bf16.msra.mxu1 %v21631_v61 }
0x23da   :  { %9179 = vmatprep.subr.bf16.mxu1 %v21636_v28 }
0x2477   :  { %v8680_v52 = vpop.f32.mrb[20].mxu1 }
0x2478   :  { %v25512_v22 = vadd.f32 %v8680_v52, %v25438_v2  ;;  %v8682_v21 = vpop.f32.mrb[21].mxu1 }
0x2479   :  { %v25515_v0 = vadd.f32 %v8682_v21, %v25441_v31  ;;  %v8684_v16 = vpop.f32.mrb[22].mxu1 }
0x247a   :  { %v8685_v19 = vpop.f32.mrb[23].mxu1 }
0x247f   :  { %v8721_v55 = vpop.f32.mrb[24].mxu1 }
0x2480   :  { %v25518_v3 = vadd.f32 %v8721_v55, %v25444_v50  ;;  %v8723_v20 = vpop.f32.mrb[25].mxu1 }
0x2481   :  { %v25521_v46 = vadd.f32 %v8723_v20, %v25447_v39  ;;  %v8725_v38 = vpop.f32.mrb[26].mxu1  ;;  %v21618_v39 = vld [vmem:[%s28269_s3 + $0xaf8] ss:$20 sps:$4 sm:$0xff]  }
0x2482   :  { %v8726_v41 = vpop.f32.mrb[27].mxu1 }
0x2487   :  { %v8762_v25 = vpop.f32.mrb[28].mxu1 }
0x2488   :  { %v25524_v2 = vadd.f32 %v8762_v25, %v25450_v1  ;;  %v20785_v34 = vpop.f32.mrb[29].mxu1  ;;  %v21623_v1 = vld [vmem:[%s28269_s3 + $0xb24] ss:$20 sps:$4 sm:$0xff]  }
0x2489   :  { %v8765_v8 = vpop.f32.mrb[30].mxu1 }
0x248a   :  { %v20786_v31 = vpop.f32.mrb[31].mxu1 }
0x24a7   :  { %v19705_v15 = vpop.f32.mrb[32].mxu1 }
0x24a8   :  { %v19706_v24 = vpop.f32.mrb[33].mxu1 }
0x24a9   :  { %v19707_v56 = vadd.f32 %v19706_v24, %v19705_v15  ;;  %v19708_v36 = vpop.f32.mrb[34].mxu1 }
0x24aa   :  { %v19709_v49 = vpop.f32.mrb[35].mxu1  ;;  %v21637_v36 = vld [vmem:[%s28269_s3 + $0xb70] ss:$20 sps:$4 sm:$0xff]  }
0x24ab   :  { %v8817_v50 = vadd.f32 %v25074_v14, %v19707_v56  ;;  %v21641_v49 = vld [vmem:[%s28269_s3 + $0xb78] ss:$20 sps:$4 sm:$0xff]  }
0x24ad   :  { %v8822_v40 = vmax.f32 %v8817_v50, 0.0  ;;  %v17969_v50 = vld [vmem:[%s28268_s0 + $0x128] sm:$0xff] }
0x24af   :  { %v8823_v54 = vpack.c.bf16 %v8822_v40, %v8822_v40  ;;  %v17971_v40 = vcombine.high %v17969_v50, %v17969_v50 }
0x24b1   :  { %17938 = vmatmul.mubr.msk.bf16.vlgmr.msra.gmra.mrb[16].mxu0 %vm352_vm1, %v8823_v54 }
0x24b2   :  { %8934 = vmatpush1.bf16.msra.mxu0 %v21618_v39  ;;  %8965 = vmatprep.mubr.bf16.mxu0 %v22336_v30  ;;  %v17970_v39 = vcombine.low %v17969_v50, %v17969_v50 }
0x24b3   :  { %8935 = vmatprep.subr.bf16.mxu0 %v21623_v1  ;;  %v21644_v1 = vld [vmem:[%s28269_s3 + $0xb90] ss:$20 sps:$4 sm:$0xff]  }
0x24b6   :  { %8936 = vmatpush1.bf16.msra.mxu0 %v21621_v58  ;;  %v21649_v58 = vld [vmem:[%s28269_s3 + $0xbbc] ss:$20 sps:$4 sm:$0xff]  }
0x24b7   :  { %20787 = vmatprep.subr.bf16.mxu0 %v22335_v23 }
0x24b9   :  { %17939 = vmatmul.mubr.msk.bf16.vlgmr.msra.gmra.mrb[20].mxu0 %vm352_vm1, %v8823_v54 }
0x24ba   :  { %20788 = vmatpush3.bf16.msra.mxu0 %v21624_v51  ;;  %20791 = vmatprep.mubr.msk.bf16.mxu0 %vm22337_vm0, %v22335_v23  ;;  %v21647_v51 = vld [vmem:[%s28269_s3 + $0xbb8] ss:$20 sps:$4 sm:$0xff]  }
0x24bb   :  { %20789 = vmatprep.subr.bf16.mxu0 %v22335_v23 }
0x24be   :  { %20790 = vmatpush3.bf16.msra.mxu0 %v21625_v4  ;;  %v21652_v4 = vld [vmem:[%s28269_s3 + $0xb9c] ss:$20 sps:$4 sm:$0xff]  }
0x24bf   :  { %19714 = vmatprep.subr.bf16.mxu0 %v25179_v29 }
0x24c1   :  { %20792 = vmatmul.mubr.msk.bf16.vlgmr.msra.gmra.mrb[24].mxu0 %vm352_vm1, %v8823_v54  ;;  %v21646_v54 = vld [vmem:[%s28269_s3 + $0xb94] ss:$20 sps:$4 sm:$0xff]  }
0x24c2   :  { %19715 = vmatpush3.bf16.msra.mxu0 %v25186_v45  ;;  %9060 = vmatprep.mubr.bf16.mxu0 %v17943_v5 }
0x24c3   :  { %19716 = vmatprep.subr.bf16.mxu0 %v25192_v48 }
0x24c6   :  { %19717 = vmatpush3.bf16.msra.mxu0 %v25272_v62 }
0x24c7   :  { %19718 = vmatprep.subr.bf16.mxu0 %v25278_v63 }
0x24ca   :  { %19719 = vmatpush3.bf16.msra.mxu0 %v25284_v18 }
0x24cb   :  { %19720 = vmatprep.subr.bf16.mxu0 %v25290_v47 }
0x24ce   :  { %19721 = vmatpush3.bf16.msra.mxu0 %v25296_v43 }
0x24cf   :  { %19722 = vmatprep.subr.bf16.mxu0 %v25302_v32 }
0x24d2   :  { %19723 = vmatpush3.bf16.msra.mxu0 %v25308_v44 }
0x24d3   :  { %19724 = vmatprep.subr.bf16.mxu0 %v25314_v33 }
0x24d6   :  { %19725 = vmatpush3.bf16.msra.mxu0 %v25320_v57 }
0x24d7   :  { %19726 = vmatprep.subr.bf16.mxu0 %v25326_v37 }
0x24da   :  { %19727 = vmatpush3.bf16.msra.mxu0 %v25332_v35 }
0x24db   :  { %19728 = vmatprep.subr.bf16.mxu0 %v25412_v26 }
0x24de   :  { %19729 = vmatpush3.bf16.msra.mxu0 %v25418_v59 }
0x24df   :  { %9384 = vmatprep.subr.bf16.mxu0 %v21646_v54 }
0x24e1   :  { %9061 = vmatmul.mubr.bf16.vlgmr.msra.gmra.mrb[28].mxu0 %v17942_v13 }
0x24e2   :  { %9416 = vmatprep.mubr.bf16.mxu0 %v22336_v30  ;;  %9385 = vmatpush1.bf16.msra.mxu0 %v21644_v1 }
0x24e3   :  { %9386 = vmatprep.subr.bf16.mxu0 %v21649_v58 }
0x24e6   :  { %9387 = vmatpush1.bf16.msra.mxu0 %v21647_v51 }
0x24e7   :  { %9425 = vmatprep.subr.bf16.mxu0 %v21652_v4 }
0x2584   :  { %v8926_v27 = vpop.f32.mrb[16].mxu0 }
0x2585   :  { %v25586_v12 = vadd.f32 %v8926_v27, %v25512_v22  ;;  %v8928_v6 = vpop.f32.mrb[17].mxu0 }
0x2586   :  { %v25589_v42 = vadd.f32 %v8928_v6, %v25515_v0  ;;  %v8930_v9 = vpop.f32.mrb[18].mxu0 }
0x2587   :  { %v8931_v11 = vpop.f32.mrb[19].mxu0 }
0x258c   :  { %v8967_v17 = vpop.f32.mrb[20].mxu0 }
0x258d   :  { %v25592_v52 = vadd.f32 %v8967_v17, %v25518_v3  ;;  %v8969_v21 = vpop.f32.mrb[21].mxu0 }
0x258e   :  { %v25595_v16 = vadd.f32 %v8969_v21, %v25521_v46  ;;  %v8971_v19 = vpop.f32.mrb[22].mxu0  ;;  %v21634_v46 = vld [vmem:[%s28269_s3 + $0xb48] ss:$20 sps:$4 sm:$0xff]  }
0x258f   :  { %v8972_v55 = vpop.f32.mrb[23].mxu0 }
0x2594   :  { %v9008_v20 = vpop.f32.mrb[24].mxu0 }
0x2595   :  { %v25598_v22 = vadd.f32 %v9008_v20, %v25524_v2  ;;  %v20793_v38 = vpop.f32.mrb[25].mxu0  ;;  %v21639_v2 = vld [vmem:[%s28269_s3 + $0xb74] ss:$20 sps:$4 sm:$0xff]  }
0x2596   :  { %v9011_v41 = vpop.f32.mrb[26].mxu0 }
0x2597   :  { %v20794_v0 = vpop.f32.mrb[27].mxu0 }
0x25b4   :  { %v19730_v25 = vpop.f32.mrb[28].mxu0 }
0x25b5   :  { %v19731_v34 = vpop.f32.mrb[29].mxu0 }
0x25b6   :  { %v19732_v8 = vadd.f32 %v19731_v34, %v19730_v25  ;;  %v19733_v31 = vpop.f32.mrb[30].mxu0 }
0x25b7   :  { %v19734_v15 = vpop.f32.mrb[31].mxu0  ;;  %v21653_v31 = vld [vmem:[%s28269_s3 + $0xbc0] ss:$20 sps:$4 sm:$0xff]  }
0x25b8   :  { %v9063_v3 = vadd.f32 %v25074_v14, %v19732_v8  ;;  %v21640_v14 = vld [vmem:[%s28269_s3 + $0xb50] ss:$20 sps:$4 sm:$0xff]   ;;  %v21656_v15 = vld [vmem:[%s28269_s3 + $0xba0] ss:$20 sps:$4 sm:$0xff]  }
0x25b9   :  { %v21655_v8 = vld [vmem:[%s28269_s3 + $0xbc4] ss:$20 sps:$4 sm:$0xff]  }
0x25ba   :  { %v9068_v24 = vmax.f32 %v9063_v3, 0.0  ;;  %v21657_v3 = vld [vmem:[%s28269_s3 + $0xbc8] ss:$20 sps:$4 sm:$0xff]  }
0x25bc   :  { %v9069_v56 = vpack.c.bf16 %v9068_v24, %v9068_v24  ;;  %v17997_v24 = vld [vmem:[%s28268_s0 + $0x130] sm:$0xff] }
0x25be   :  { %17966 = vmatmul.mubr.msk.bf16.vlgmr.msra.gmra.mrb[36].mxu1 %vm352_vm1, %v9069_v56 }
0x25bf   :  { %9180 = vmatpush1.bf16.msra.mxu1 %v21634_v46  ;;  %9211 = vmatprep.mubr.bf16.mxu1 %v22336_v30  ;;  %v17999_v46 = vcombine.high %v17997_v24, %v17997_v24 }
0x25c0   :  { %9181 = vmatprep.subr.bf16.mxu1 %v21639_v2  ;;  %v21663_v2 = vld [vmem:[%s28269_s3 + $0xc08] ss:$20 sps:$4 sm:$0xff]  }
0x25c3   :  { %9182 = vmatpush1.bf16.msra.mxu1 %v21637_v36  ;;  %v21668_v36 = vld [vmem:[%s28269_s3 + $0xbec] ss:$20 sps:$4 sm:$0xff]  }
0x25c4   :  { %20795 = vmatprep.subr.bf16.mxu1 %v22335_v23 }
0x25c6   :  { %17967 = vmatmul.mubr.msk.bf16.vlgmr.msra.gmra.mrb[40].mxu1 %vm352_vm1, %v9069_v56 }
0x25c7   :  { %20796 = vmatpush3.bf16.msra.mxu1 %v21640_v14  ;;  %20799 = vmatprep.mubr.msk.bf16.mxu1 %vm22337_vm0, %v22335_v23 }
0x25c8   :  { %20797 = vmatprep.subr.bf16.mxu1 %v22335_v23 }
0x25cb   :  { %20798 = vmatpush3.bf16.msra.mxu1 %v21641_v49 }
0x25cc   :  { %19739 = vmatprep.subr.bf16.mxu1 %v25179_v29 }
0x25ce   :  { %20800 = vmatmul.mubr.msk.bf16.vlgmr.msra.gmra.mrb[44].mxu1 %vm352_vm1, %v9069_v56  ;;  %v21665_v56 = vld [vmem:[%s28269_s3 + $0xc0c] ss:$20 sps:$4 sm:$0xff]  }
0x25cf   :  { %19740 = vmatpush3.bf16.msra.mxu1 %v25186_v45  ;;  %9306 = vmatprep.mubr.bf16.mxu1 %v17971_v40 }
0x25d0   :  { %19741 = vmatprep.subr.bf16.mxu1 %v25192_v48 }
0x25d3   :  { %19742 = vmatpush3.bf16.msra.mxu1 %v25272_v62 }
0x25d4   :  { %19743 = vmatprep.subr.bf16.mxu1 %v25278_v63 }
0x25d7   :  { %19744 = vmatpush3.bf16.msra.mxu1 %v25284_v18 }
0x25d8   :  { %19745 = vmatprep.subr.bf16.mxu1 %v25290_v47 }
0x25db   :  { %19746 = vmatpush3.bf16.msra.mxu1 %v25296_v43 }
0x25dc   :  { %19747 = vmatprep.subr.bf16.mxu1 %v25302_v32 }
0x25df   :  { %19748 = vmatpush3.bf16.msra.mxu1 %v25308_v44 }
0x25e0   :  { %19749 = vmatprep.subr.bf16.mxu1 %v25314_v33 }
0x25e3   :  { %19750 = vmatpush3.bf16.msra.mxu1 %v25320_v57 }
0x25e4   :  { %19751 = vmatprep.subr.bf16.mxu1 %v25326_v37 }
0x25e7   :  { %19752 = vmatpush3.bf16.msra.mxu1 %v25332_v35 }
0x25e8   :  { %19753 = vmatprep.subr.bf16.mxu1 %v25412_v26 }
0x25eb   :  { %19754 = vmatpush3.bf16.msra.mxu1 %v25418_v59 }
0x25ee   :  { %9307 = vmatmul.mubr.bf16.vlgmr.msra.gmra.mrb[48].mxu1 %v17970_v39 }
0x25ef   :  { %9662 = vmatprep.mubr.bf16.mxu1 %v22336_v30 }
0x2691   :  { %v9172_v7 = vpop.f32.mrb[36].mxu1 }
0x2692   :  { %v25660_v5 = vadd.f32 %v9172_v7, %v25586_v12  ;;  %v9174_v13 = vpop.f32.mrb[37].mxu1 }
0x2693   :  { %v25663_v10 = vadd.f32 %v9174_v13, %v25589_v42  ;;  %v9176_v53 = vpop.f32.mrb[38].mxu1 }
0x2694   :  { %v9177_v60 = vpop.f32.mrb[39].mxu1 }
0x2699   :  { %v9213_v61 = vpop.f32.mrb[40].mxu1 }
0x269a   :  { %v25666_v28 = vadd.f32 %v9213_v61, %v25592_v52  ;;  %v9215_v27 = vpop.f32.mrb[41].mxu1  ;;  %v25677_v52 = vld [vmem:[%s28270_s2] ss:$0 sm:$0xff] }
0x269b   :  { %v25669_v6 = vadd.f32 %v9215_v27, %v25595_v16  ;;  %v9217_v9 = vpop.f32.mrb[42].mxu1 }
0x269c   :  { %v9218_v11 = vpop.f32.mrb[43].mxu1 }
0x26a1   :  { %v9254_v17 = vpop.f32.mrb[44].mxu1 }
0x26a2   :  { %v25672_v12 = vadd.f32 %v9254_v17, %v25598_v22  ;;  %v20801_v21 = vpop.f32.mrb[45].mxu1  ;;  %v21650_v22 = vld [vmem:[%s28269_s3 + $0xb98] ss:$20 sps:$4 sm:$0xff]  }
0x26a3   :  { %v9257_v19 = vpop.f32.mrb[46].mxu1 }
0x26a4   :  { %v20802_v42 = vpop.f32.mrb[47].mxu1 }
0x26c1   :  { %v19755_v55 = vpop.f32.mrb[48].mxu1 }
0x26c2   :  { %v19756_v20 = vpop.f32.mrb[49].mxu1 }
0x26c3   :  { %v19757_v38 = vadd.f32 %v19756_v20, %v19755_v55  ;;  %v19758_v41 = vpop.f32.mrb[50].mxu1  ;;  %v21669_v55 = vld [vmem:[%s28269_s3 + $0xc10] ss:$20 sps:$4 sm:$0xff]  }
0x26c4   :  { %v19759_v0 = vpop.f32.mrb[51].mxu1  ;;  %v21672_v20 = vld [vmem:[%s28269_s3 + $0xbf0] ss:$20 sps:$4 sm:$0xff]   ;;  %v18025_v41 = vld [vmem:[%s28268_s0 + $0x138] sm:$0xff] }
0x26c5   :  { %v9309_v16 = vadd.f32 %v25677_v52, %v19757_v38  ;;  %v21673_v38 = vld [vmem:[%s28269_s3 + $0xc18] ss:$20 sps:$4 sm:$0xff]   ;;  %v18027_v0 = vcombine.high %v18025_v41, %v18025_v41 }
0x26c7   :  { %v9314_v25 = vmax.f32 %v9309_v16, 0.0  ;;  %v25782_v16 = vld [vmem:[%s28267_s1 + $0x40] sm:$0xff]  }
0x26c9   :  { %v9315_v34 = vpack.c.bf16 %v9314_v25, %v9314_v25  ;;  %v25789_v25 = vld [vmem:[%s28267_s1] sm:$0xff]  }
0x26cb   :  { %17994 = vmatmul.mubr.msk.bf16.vlgmr.msra.gmra.mrb[32].mxu0 %vm352_vm1, %v9315_v34 }
0x26cc   :  { %9426 = vmatpush1.bf16.msra.mxu0 %v21650_v22  ;;  %9457 = vmatprep.mubr.bf16.mxu0 %v22336_v30  ;;  %v25795_v22 = vld [vmem:[%s28267_s1 + $0x48] sm:$0xff]  }
0x26cd   :  { %9427 = vmatprep.subr.bf16.mxu0 %v21655_v8 }
0x26d0   :  { %9428 = vmatpush1.bf16.msra.mxu0 %v21653_v31 }
0x26d1   :  { %20803 = vmatprep.subr.bf16.mxu0 %v22335_v23 }
0x26d3   :  { %17995 = vmatmul.mubr.msk.bf16.vlgmr.msra.gmra.mrb[36].mxu0 %vm352_vm1, %v9315_v34 }
0x26d4   :  { %20804 = vmatpush3.bf16.msra.mxu0 %v21656_v15  ;;  %20807 = vmatprep.mubr.msk.bf16.mxu0 %vm22337_vm0, %v22335_v23 }
0x26d5   :  { %20805 = vmatprep.subr.bf16.mxu0 %v22335_v23 }
0x26d8   :  { %20806 = vmatpush3.bf16.msra.mxu0 %v21657_v3 }
0x26d9   :  { %19764 = vmatprep.subr.bf16.mxu0 %v25179_v29  ;;  %v17998_v29 = vcombine.low %v17997_v24, %v17997_v24 }
0x26db   :  { %20808 = vmatmul.mubr.msk.bf16.vlgmr.msra.gmra.mrb[40].mxu0 %vm352_vm1, %v9315_v34 }
0x26dc   :  { %19765 = vmatpush3.bf16.msra.mxu0 %v25186_v45  ;;  %9552 = vmatprep.mubr.bf16.mxu0 %v17999_v46  ;;  %v21662_v45 = vld [vmem:[%s28269_s3 + $0xbe4] ss:$20 sps:$4 sm:$0xff]  }
0x26dd   :  { %19766 = vmatprep.subr.bf16.mxu0 %v25192_v48  ;;  %v21660_v48 = vld [vmem:[%s28269_s3 + $0xbe0] ss:$20 sps:$4 sm:$0xff]   ;;  %9630 = vmatprep.subr.bf16.mxu1 %v21662_v45 }
0x26de   :  { %9631 = vmatpush1.bf16.msra.mxu1 %v21660_v48 }
0x26df   :  { %9632 = vmatprep.subr.bf16.mxu1 %v21665_v56 }
0x26e0   :  { %19767 = vmatpush3.bf16.msra.mxu0 %v25272_v62 }
0x26e1   :  { %19768 = vmatprep.subr.bf16.mxu0 %v25278_v63 }
0x26e2   :  { %9633 = vmatpush1.bf16.msra.mxu1 %v21663_v2 }
0x26e3   :  { %9671 = vmatprep.subr.bf16.mxu1 %v21668_v36 }
0x26e4   :  { %19769 = vmatpush3.bf16.msra.mxu0 %v25284_v18 }
0x26e5   :  { %19770 = vmatprep.subr.bf16.mxu0 %v25290_v47 }
0x26e8   :  { %19771 = vmatpush3.bf16.msra.mxu0 %v25296_v43 }
0x26e9   :  { %19772 = vmatprep.subr.bf16.mxu0 %v25302_v32 }
0x26ec   :  { %19773 = vmatpush3.bf16.msra.mxu0 %v25308_v44 }
0x26ed   :  { %19774 = vmatprep.subr.bf16.mxu0 %v25314_v33 }
0x26f0   :  { %19775 = vmatpush3.bf16.msra.mxu0 %v25320_v57 }
0x26f1   :  { %19776 = vmatprep.subr.bf16.mxu0 %v25326_v37 }
0x26f4   :  { %19777 = vmatpush3.bf16.msra.mxu0 %v25332_v35 }
0x26f5   :  { %19778 = vmatprep.subr.bf16.mxu0 %v25412_v26 }
0x26f8   :  { %19779 = vmatpush3.bf16.msra.mxu0 %v25418_v59 }
0x26fb   :  { %9553 = vmatmul.mubr.bf16.vlgmr.msra.gmra.mrb[44].mxu0 %v17998_v29 }
0x26fc   :  { %9908 = vmatprep.mubr.bf16.mxu0 %v22336_v30 }
0x279e   :  { %v9418_v14 = vpop.f32.mrb[32].mxu0 }
0x279f   :  { %v25739_v49 = vadd.f32 %v9418_v14, %v25660_v5  ;;  %v9420_v50 = vpop.f32.mrb[33].mxu0 }
0x27a0   :  { %v25742_v40 = vadd.f32 %v9420_v50, %v25663_v10  ;;  %v9422_v39 = vpop.f32.mrb[34].mxu0 }
0x27a1   :  { %v9423_v54 = vpop.f32.mrb[35].mxu0 }
0x27a6   :  { %v9459_v1 = vpop.f32.mrb[36].mxu0 }
0x27a7   :  { %v25745_v58 = vadd.f32 %v9459_v1, %v25666_v28  ;;  %v9461_v51 = vpop.f32.mrb[37].mxu0  ;;  %v21682_v1 = vld [vmem:[%s28269_s3 + $0xc38] ss:$20 sps:$4 sm:$0xff]  }
0x27a8   :  { %v25748_v4 = vadd.f32 %v9461_v51, %v25669_v6  ;;  %v9463_v7 = vpop.f32.mrb[38].mxu0  ;;  %v21666_v6 = vld [vmem:[%s28269_s3 + $0xbe8] ss:$20 sps:$4 sm:$0xff]   ;;  %v21687_v51 = vld [vmem:[%s28269_s3 + $0xc64] ss:$20 sps:$4 sm:$0xff]  }
0x27a9   :  { %v9464_v13 = vpop.f32.mrb[39].mxu0  ;;  %v21688_v7 = vld [vmem:[%s28269_s3 + $0xc40] ss:$20 sps:$4 sm:$0xff]  }
0x27aa   :  { %v21689_v13 = vld [vmem:[%s28269_s3 + $0xc68] ss:$20 sps:$4 sm:$0xff]  }
0x27ae   :  { %v9500_v53 = vpop.f32.mrb[40].mxu0 }
0x27af   :  { %v25751_v5 = vadd.f32 %v9500_v53, %v25672_v12  ;;  %v20809_v60 = vpop.f32.mrb[41].mxu0  ;;  %v21671_v12 = vld [vmem:[%s28269_s3 + $0xc14] ss:$20 sps:$4 sm:$0xff]   ;;  %v18053_v53 = vld [vmem:[%s28268_s0 + $0x140] sm:$0xff] }
0x27b0   :  { %v9503_v61 = vpop.f32.mrb[42].mxu0  ;;  %v25875_v60 = vld [vmem:[%s28267_s1 + $0x8] sm:$0xff]  }
0x27b1   :  { %v20810_v10 = vpop.f32.mrb[43].mxu0  ;;  %v25881_v61 = vld [vmem:[%s28267_s1 + $0x50] sm:$0xff]  }
0x27b2   :  { %v25887_v10 = vld [vmem:[%s28267_s1 + $0x10] sm:$0xff]  }
0x27ce   :  { %v19780_v27 = vpop.f32.mrb[44].mxu0 }
0x27cf   :  { %v19781_v9 = vpop.f32.mrb[45].mxu0 }
0x27d0   :  { %v19782_v11 = vadd.f32 %v19781_v9, %v19780_v27  ;;  %v19783_v17 = vpop.f32.mrb[46].mxu0  ;;  %v25893_v27 = vld [vmem:[%s28267_s1 + $0x58] sm:$0xff]  }
0x27d1   :  { %v19784_v21 = vpop.f32.mrb[47].mxu0  ;;  %v25899_v9 = vld [vmem:[%s28267_s1 + $0x18] sm:$0xff]   ;;  %v25911_v17 = vld [vmem:[%s28267_s1 + $0x20] sm:$0xff]  }
0x27d2   :  { %v9555_v28 = vadd.f32 %v25677_v52, %v19782_v11  ;;  %v25905_v11 = vld [vmem:[%s28267_s1 + $0x60] sm:$0xff]   ;;  %v25917_v21 = vld [vmem:[%s28267_s1 + $0x68] sm:$0xff]  }
0x27d4   :  { %v9560_v19 = vmax.f32 %v9555_v28, 0.0  ;;  %v25923_v28 = vld [vmem:[%s28267_s1 + $0x28] sm:$0xff]  }
0x27d6   :  { %v9561_v42 = vpack.c.bf16 %v9560_v19, %v9560_v19  ;;  %v25929_v19 = vld [vmem:[%s28267_s1 + $0x70] sm:$0xff]  }
0x27d8   :  { %18022 = vmatmul.mubr.msk.bf16.vlgmr.msra.gmra.mrb[52].mxu1 %vm352_vm1, %v9561_v42 }
0x27d9   :  { %9672 = vmatpush1.bf16.msra.mxu1 %v21666_v6  ;;  %9703 = vmatprep.mubr.bf16.mxu1 %v22336_v30  ;;  %v25935_v6 = vld [vmem:[%s28267_s1 + $0x30] sm:$0xff]  }
0x27da   :  { %9673 = vmatprep.subr.bf16.mxu1 %v21671_v12  ;;  %v21694_v12 = vld [vmem:[%s28269_s3 + $0xc84] ss:$20 sps:$4 sm:$0xff]  }
0x27dd   :  { %9674 = vmatpush1.bf16.msra.mxu1 %v21669_v55  ;;  %v21692_v55 = vld [vmem:[%s28269_s3 + $0xc80] ss:$20 sps:$4 sm:$0xff]  }
0x27de   :  { %20811 = vmatprep.subr.bf16.mxu1 %v22335_v23 }
0x27e0   :  { %18023 = vmatmul.mubr.msk.bf16.vlgmr.msra.gmra.mrb[56].mxu1 %vm352_vm1, %v9561_v42 }
0x27e1   :  { %20812 = vmatpush3.bf16.msra.mxu1 %v21672_v20  ;;  %20815 = vmatprep.mubr.msk.bf16.mxu1 %vm22337_vm0, %v22335_v23  ;;  %v21700_v20 = vld [vmem:[%s28269_s3 + $0xc8c] ss:$20 sps:$4 sm:$0xff]  }
0x27e2   :  { %20813 = vmatprep.subr.bf16.mxu1 %v22335_v23 }
0x27e5   :  { %20814 = vmatpush3.bf16.msra.mxu1 %v21673_v38 }
0x27e6   :  { %19789 = vmatprep.subr.bf16.mxu1 %v25782_v16 }
0x27e8   :  { %20816 = vmatmul.mubr.msk.bf16.vlgmr.msra.gmra.mrb[60].mxu1 %vm352_vm1, %v9561_v42  ;;  %v18054_v42 = vcombine.low %v18053_v53, %v18053_v53 }
0x27e9   :  { %19790 = vmatpush3.bf16.msra.mxu1 %v25789_v25  ;;  %9798 = vmatprep.mubr.bf16.mxu1 %v18027_v0 }
0x27ea   :  { %19791 = vmatprep.subr.bf16.mxu1 %v25795_v22 }
0x27ed   :  { %19792 = vmatpush3.bf16.msra.mxu1 %v25272_v62  ;;  %v18026_v62 = vcombine.low %v18025_v41, %v18025_v41 }
0x27ee   :  { %19793 = vmatprep.subr.bf16.mxu1 %v25278_v63  ;;  %v21678_v63 = vld [vmem:[%s28269_s3 + $0xc34] ss:$20 sps:$4 sm:$0xff]  }
0x27ef   :  { %9876 = vmatprep.subr.bf16.mxu0 %v21678_v63 }
0x27f1   :  { %19794 = vmatpush3.bf16.msra.mxu1 %v25284_v18  ;;  %v21676_v18 = vld [vmem:[%s28269_s3 + $0xc30] ss:$20 sps:$4 sm:$0xff]  }
0x27f2   :  { %19795 = vmatprep.subr.bf16.mxu1 %v25290_v47  ;;  %9877 = vmatpush1.bf16.msra.mxu0 %v21676_v18  ;;  %v21681_v47 = vld [vmem:[%s28269_s3 + $0xc5c] ss:$20 sps:$4 sm:$0xff]  }
0x27f3   :  { %9878 = vmatprep.subr.bf16.mxu0 %v21681_v47 }
0x27f5   :  { %19796 = vmatpush3.bf16.msra.mxu1 %v25296_v43  ;;  %v21679_v43 = vld [vmem:[%s28269_s3 + $0xc58] ss:$20 sps:$4 sm:$0xff]  }
0x27f6   :  { %19797 = vmatprep.subr.bf16.mxu1 %v25302_v32  ;;  %9879 = vmatpush1.bf16.msra.mxu0 %v21679_v43  ;;  %v21684_v32 = vld [vmem:[%s28269_s3 + $0xc3c] ss:$20 sps:$4 sm:$0xff]  }
0x27f7   :  { %9917 = vmatprep.subr.bf16.mxu0 %v21684_v32 }
0x27f9   :  { %19798 = vmatpush3.bf16.msra.mxu1 %v25308_v44 }
0x27fa   :  { %19799 = vmatprep.subr.bf16.mxu1 %v25314_v33 }
0x27fd   :  { %19800 = vmatpush3.bf16.msra.mxu1 %v25320_v57 }
0x27fe   :  { %19801 = vmatprep.subr.bf16.mxu1 %v25326_v37 }
0x2801   :  { %19802 = vmatpush3.bf16.msra.mxu1 %v25332_v35 }
0x2802   :  { %19803 = vmatprep.subr.bf16.mxu1 %v25412_v26 }
0x2805   :  { %19804 = vmatpush3.bf16.msra.mxu1 %v25418_v59 }
0x2806   :  { %10122 = vmatprep.subr.bf16.mxu1 %v21694_v12 }
0x2808   :  { %9799 = vmatmul.mubr.bf16.vlgmr.msra.gmra.mrb[64].mxu1 %v18026_v62 }
0x2809   :  { %10154 = vmatprep.mubr.bf16.mxu1 %v22336_v30  ;;  %10123 = vmatpush1.bf16.msra.mxu1 %v21692_v55 }
0x28ab   :  { %v9664_v44 = vpop.f32.mrb[52].mxu1 }
0x28ac   :  { %v25828_v33 = vadd.f32 %v9664_v44, %v25739_v49  ;;  %v9666_v57 = vpop.f32.mrb[53].mxu1 }
0x28ad   :  { %v25831_v37 = vadd.f32 %v9666_v57, %v25742_v40  ;;  %v9668_v35 = vpop.f32.mrb[54].mxu1 }
0x28ae   :  { %v9669_v34 = vpop.f32.mrb[55].mxu1 }
0x28b3   :  { %v9705_v8 = vpop.f32.mrb[56].mxu1 }
0x28b4   :  { %v25834_v31 = vadd.f32 %v9705_v8, %v25745_v58  ;;  %v9707_v15 = vpop.f32.mrb[57].mxu1 }
0x28b5   :  { %v25837_v3 = vadd.f32 %v9707_v15, %v25748_v4  ;;  %v9709_v24 = vpop.f32.mrb[58].mxu1  ;;  %v21685_v4 = vld [vmem:[%s28269_s3 + $0xc60] ss:$20 sps:$4 sm:$0xff]  }
0x28b6   :  { %v9710_v46 = vpop.f32.mrb[59].mxu1 }
0x28bb   :  { %v9746_v29 = vpop.f32.mrb[60].mxu1 }
0x28bc   :  { %v25840_v45 = vadd.f32 %v9746_v29, %v25751_v5  ;;  %v20817_v48 = vpop.f32.mrb[61].mxu1  ;;  %v18055_v5 = vcombine.high %v18053_v53, %v18053_v53  ;;  %v21716_v53 = vld [vmem:[%s28269_s3 + $0xcdc] ss:$20 sps:$4 sm:$0xff]  }
0x28bd   :  { %v9749_v56 = vpop.f32.mrb[62].mxu1 }
0x28be   :  { %v20818_v2 = vpop.f32.mrb[63].mxu1 }
0x28db   :  { %v19805_v36 = vpop.f32.mrb[64].mxu1 }
0x28dc   :  { %v19806_v14 = vpop.f32.mrb[65].mxu1 }
0x28dd   :  { %v19807_v49 = vadd.f32 %v19806_v14, %v19805_v36  ;;  %v19808_v50 = vpop.f32.mrb[66].mxu1  ;;  %v21701_v14 = vld [vmem:[%s28269_s3 + $0xcb0] ss:$20 sps:$4 sm:$0xff]  }
0x28de   :  { %v19809_v40 = vpop.f32.mrb[67].mxu1  ;;  %v21705_v50 = vld [vmem:[%s28269_s3 + $0xcb8] ss:$20 sps:$4 sm:$0xff]  }
0x28df   :  { %v9801_v39 = vadd.f32 %v25677_v52, %v19807_v49  ;;  %v21704_v49 = vld [vmem:[%s28269_s3 + $0xc90] ss:$20 sps:$4 sm:$0xff]   ;;  %v18081_v40 = vld [vmem:[%s28268_s0 + $0x148] sm:$0xff] }
0x28e1   :  { %v9806_v54 = vmax.f32 %v9801_v39, 0.0  ;;  %v18083_v39 = vcombine.high %v18081_v40, %v18081_v40 }
0x28e3   :  { %v9807_v58 = vpack.c.bf16 %v9806_v54, %v9806_v54  ;;  %v26015_v54 = vld [vmem:[%s28267_s1 + $0x78] sm:$0xff]  }
0x28e5   :  { %18050 = vmatmul.mubr.msk.bf16.vlgmr.msra.gmra.mrb[48].mxu0 %vm352_vm1, %v9807_v58 }
0x28e6   :  { %9918 = vmatpush1.bf16.msra.mxu0 %v21682_v1  ;;  %9949 = vmatprep.mubr.bf16.mxu0 %v22336_v30  ;;  %v18082_v1 = vcombine.low %v18081_v40, %v18081_v40  ;;  %v21732_v40 = vld [vmem:[%s28269_s3 + $0xd2c] ss:$20 sps:$4 sm:$0xff]  }
0x28e7   :  { %9919 = vmatprep.subr.bf16.mxu0 %v21687_v51  ;;  %v21710_v51 = vld [vmem:[%s28269_s3 + $0xcd4] ss:$20 sps:$4 sm:$0xff]  }
0x28ea   :  { %9920 = vmatpush1.bf16.msra.mxu0 %v21685_v4  ;;  %v21708_v4 = vld [vmem:[%s28269_s3 + $0xcd0] ss:$20 sps:$4 sm:$0xff]  }
0x28eb   :  { %20819 = vmatprep.subr.bf16.mxu0 %v22335_v23 }
0x28ed   :  { %18051 = vmatmul.mubr.msk.bf16.vlgmr.msra.gmra.mrb[52].mxu0 %vm352_vm1, %v9807_v58 }
0x28ee   :  { %20820 = vmatpush3.bf16.msra.mxu0 %v21688_v7  ;;  %20823 = vmatprep.mubr.msk.bf16.mxu0 %vm22337_vm0, %v22335_v23  ;;  %v21713_v7 = vld [vmem:[%s28269_s3 + $0xcfc] ss:$20 sps:$4 sm:$0xff]  }
0x28ef   :  { %20821 = vmatprep.subr.bf16.mxu0 %v22335_v23 }
0x28f2   :  { %20822 = vmatpush3.bf16.msra.mxu0 %v21689_v13  ;;  %v21711_v13 = vld [vmem:[%s28269_s3 + $0xcf8] ss:$20 sps:$4 sm:$0xff]  }
0x28f3   :  { %19814 = vmatprep.subr.bf16.mxu0 %v25782_v16 }
0x28f5   :  { %20824 = vmatmul.mubr.msk.bf16.vlgmr.msra.gmra.mrb[56].mxu0 %vm352_vm1, %v9807_v58  ;;  %v26021_v58 = vld [vmem:[%s28267_s1 + $0x38] sm:$0xff]  }
0x28f6   :  { %19815 = vmatpush3.bf16.msra.mxu0 %v25789_v25  ;;  %10044 = vmatprep.mubr.bf16.mxu0 %v18055_v5 }
0x28f7   :  { %19816 = vmatprep.subr.bf16.mxu0 %v25795_v22 }
0x28fa   :  { %19817 = vmatpush3.bf16.msra.mxu0 %v25875_v60 }
0x28fb   :  { %19818 = vmatprep.subr.bf16.mxu0 %v25881_v61 }
0x28fe   :  { %19819 = vmatpush3.bf16.msra.mxu0 %v25887_v10 }
0x28ff   :  { %19820 = vmatprep.subr.bf16.mxu0 %v25893_v27 }
0x2902   :  { %19821 = vmatpush3.bf16.msra.mxu0 %v25899_v9 }
0x2903   :  { %19822 = vmatprep.subr.bf16.mxu0 %v25905_v11 }
0x2906   :  { %19823 = vmatpush3.bf16.msra.mxu0 %v25911_v17 }
0x2907   :  { %19824 = vmatprep.subr.bf16.mxu0 %v25917_v21 }
0x290a   :  { %19825 = vmatpush3.bf16.msra.mxu0 %v25923_v28 }
0x290b   :  { %19826 = vmatprep.subr.bf16.mxu0 %v25929_v19 }
0x290e   :  { %19827 = vmatpush3.bf16.msra.mxu0 %v25935_v6 }
0x290f   :  { %19828 = vmatprep.subr.bf16.mxu0 %v25412_v26  ;;  %v21697_v26 = vld [vmem:[%s28269_s3 + $0xcac] ss:$20 sps:$4 sm:$0xff]  }
0x2910   :  { %10124 = vmatprep.subr.bf16.mxu1 %v21697_v26 }
0x2912   :  { %19829 = vmatpush3.bf16.msra.mxu0 %v25418_v59  ;;  %v21695_v59 = vld [vmem:[%s28269_s3 + $0xca8] ss:$20 sps:$4 sm:$0xff]  }
0x2913   :  { %10125 = vmatpush1.bf16.msra.mxu1 %v21695_v59  ;;  %10368 = vmatprep.subr.bf16.mxu0 %v21710_v51 }
0x2914   :  { %10163 = vmatprep.subr.bf16.mxu1 %v21700_v20 }
0x2915   :  { %10045 = vmatmul.mubr.bf16.vlgmr.msra.gmra.mrb[60].mxu0 %v18054_v42 }
0x2916   :  { %10400 = vmatprep.mubr.bf16.mxu0 %v22336_v30  ;;  %10369 = vmatpush1.bf16.msra.mxu0 %v21708_v4 }
0x2917   :  { %10370 = vmatprep.subr.bf16.mxu0 %v21713_v7 }
0x291a   :  { %10371 = vmatpush1.bf16.msra.mxu0 %v21711_v13 }
0x291b   :  { %10409 = vmatprep.subr.bf16.mxu0 %v21716_v53 }
0x29b8   :  { %v9910_v38 = vpop.f32.mrb[48].mxu0 }
0x29b9   :  { %v25957_v41 = vadd.f32 %v9910_v38, %v25828_v33  ;;  %v9912_v0 = vpop.f32.mrb[49].mxu0 }
0x29ba   :  { %v25960_v62 = vadd.f32 %v9912_v0, %v25831_v37  ;;  %v9914_v63 = vpop.f32.mrb[50].mxu0 }
0x29bb   :  { %v9915_v18 = vpop.f32.mrb[51].mxu0 }
0x29c0   :  { %v9951_v47 = vpop.f32.mrb[52].mxu0 }
0x29c1   :  { %v25963_v43 = vadd.f32 %v9951_v47, %v25834_v31  ;;  %v9953_v32 = vpop.f32.mrb[53].mxu0 }
0x29c2   :  { %v25966_v44 = vadd.f32 %v9953_v32, %v25837_v3  ;;  %v9955_v57 = vpop.f32.mrb[54].mxu0  ;;  %v21698_v3 = vld [vmem:[%s28269_s3 + $0xc88] ss:$20 sps:$4 sm:$0xff]  }
0x29c3   :  { %v9956_v35 = vpop.f32.mrb[55].mxu0 }
0x29c8   :  { %v9992_v34 = vpop.f32.mrb[56].mxu0 }
0x29c9   :  { %v25969_v33 = vadd.f32 %v9992_v34, %v25840_v45  ;;  %v20825_v8 = vpop.f32.mrb[57].mxu0  ;;  %v21703_v45 = vld [vmem:[%s28269_s3 + $0xcb4] ss:$20 sps:$4 sm:$0xff]  }
0x29ca   :  { %v9995_v15 = vpop.f32.mrb[58].mxu0 }
0x29cb   :  { %v20826_v37 = vpop.f32.mrb[59].mxu0 }
0x29e8   :  { %v19830_v24 = vpop.f32.mrb[60].mxu0 }
0x29e9   :  { %v19831_v46 = vpop.f32.mrb[61].mxu0 }
0x29ea   :  { %v19832_v29 = vadd.f32 %v19831_v46, %v19830_v24  ;;  %v19833_v48 = vpop.f32.mrb[62].mxu0 }
0x29eb   :  { %v19834_v56 = vpop.f32.mrb[63].mxu0  ;;  %v21717_v48 = vld [vmem:[%s28269_s3 + $0xd00] ss:$20 sps:$4 sm:$0xff]  }
0x29ec   :  { %v10047_v31 = vadd.f32 %v25677_v52, %v19832_v29  ;;  %v21720_v56 = vld [vmem:[%s28269_s3 + $0xce0] ss:$20 sps:$4 sm:$0xff]  }
0x29ee   :  { %v10052_v2 = vmax.f32 %v10047_v31, 0.0  ;;  %v21721_v31 = vld [vmem:[%s28269_s3 + $0xd08] ss:$20 sps:$4 sm:$0xff]  }
0x29f0   :  { %v10053_v36 = vpack.c.bf16 %v10052_v2, %v10052_v2  ;;  %v18109_v2 = vld [vmem:[%s28268_s0 + $0x150] sm:$0xff] }
0x29f2   :  { %18078 = vmatmul.mubr.msk.bf16.vlgmr.msra.gmra.mrb[68].mxu1 %vm352_vm1, %v10053_v36 }
0x29f3   :  { %10164 = vmatpush1.bf16.msra.mxu1 %v21698_v3  ;;  %10195 = vmatprep.mubr.bf16.mxu1 %v22336_v30  ;;  %v18111_v3 = vcombine.high %v18109_v2, %v18109_v2 }
0x29f4   :  { %10165 = vmatprep.subr.bf16.mxu1 %v21703_v45  ;;  %v21726_v45 = vld [vmem:[%s28269_s3 + $0xd24] ss:$20 sps:$4 sm:$0xff]  }
0x29f7   :  { %10166 = vmatpush1.bf16.msra.mxu1 %v21701_v14  ;;  %v21724_v14 = vld [vmem:[%s28269_s3 + $0xd20] ss:$20 sps:$4 sm:$0xff]  }
0x29f8   :  { %20827 = vmatprep.subr.bf16.mxu1 %v22335_v23 }
0x29fa   :  { %18079 = vmatmul.mubr.msk.bf16.vlgmr.msra.gmra.mrb[72].mxu1 %vm352_vm1, %v10053_v36 }
0x29fb   :  { %20828 = vmatpush3.bf16.msra.mxu1 %v21704_v49  ;;  %20831 = vmatprep.mubr.msk.bf16.mxu1 %vm22337_vm0, %v22335_v23  ;;  %v21729_v49 = vld [vmem:[%s28269_s3 + $0xd4c] ss:$20 sps:$4 sm:$0xff]  }
0x29fc   :  { %20829 = vmatprep.subr.bf16.mxu1 %v22335_v23 }
0x29ff   :  { %20830 = vmatpush3.bf16.msra.mxu1 %v21705_v50  ;;  %v21727_v50 = vld [vmem:[%s28269_s3 + $0xd48] ss:$20 sps:$4 sm:$0xff]  }
0x2a00   :  { %19839 = vmatprep.subr.bf16.mxu1 %v25782_v16 }
0x2a02   :  { %20832 = vmatmul.mubr.msk.bf16.vlgmr.msra.gmra.mrb[76].mxu1 %vm352_vm1, %v10053_v36  ;;  %v18110_v36 = vcombine.low %v18109_v2, %v18109_v2  ;;  %v21748_v2 = vld [vmem:[%s28269_s3 + $0xd7c] ss:$20 sps:$4 sm:$0xff]  }
0x2a03   :  { %19840 = vmatpush3.bf16.msra.mxu1 %v25789_v25  ;;  %10290 = vmatprep.mubr.bf16.mxu1 %v18083_v39 }
0x2a04   :  { %19841 = vmatprep.subr.bf16.mxu1 %v25795_v22 }
0x2a07   :  { %19842 = vmatpush3.bf16.msra.mxu1 %v25875_v60 }
0x2a08   :  { %19843 = vmatprep.subr.bf16.mxu1 %v25881_v61 }
0x2a0b   :  { %19844 = vmatpush3.bf16.msra.mxu1 %v25887_v10 }
0x2a0c   :  { %19845 = vmatprep.subr.bf16.mxu1 %v25893_v27 }
0x2a0f   :  { %19846 = vmatpush3.bf16.msra.mxu1 %v25899_v9 }
0x2a10   :  { %19847 = vmatprep.subr.bf16.mxu1 %v25905_v11 }
0x2a13   :  { %19848 = vmatpush3.bf16.msra.mxu1 %v25911_v17 }
0x2a14   :  { %19849 = vmatprep.subr.bf16.mxu1 %v25917_v21 }
0x2a17   :  { %19850 = vmatpush3.bf16.msra.mxu1 %v25923_v28 }
0x2a18   :  { %19851 = vmatprep.subr.bf16.mxu1 %v25929_v19 }
0x2a1b   :  { %19852 = vmatpush3.bf16.msra.mxu1 %v25935_v6 }
0x2a1c   :  { %19853 = vmatprep.subr.bf16.mxu1 %v26015_v54 }
0x2a1f   :  { %19854 = vmatpush3.bf16.msra.mxu1 %v26021_v58 }
0x2a20   :  { %10614 = vmatprep.subr.bf16.mxu1 %v21726_v45 }
0x2a22   :  { %10291 = vmatmul.mubr.bf16.vlgmr.msra.gmra.mrb[80].mxu1 %v18082_v1 }
0x2a23   :  { %10646 = vmatprep.mubr.bf16.mxu1 %v22336_v30  ;;  %10615 = vmatpush1.bf16.msra.mxu1 %v21724_v14 }
0x2a24   :  { %10616 = vmatprep.subr.bf16.mxu1 %v21729_v49 }
0x2a27   :  { %10617 = vmatpush1.bf16.msra.mxu1 %v21727_v50 }
0x2a28   :  { %10655 = vmatprep.subr.bf16.mxu1 %v21732_v40 }
0x2ac5   :  { %v10156_v5 = vpop.f32.mrb[68].mxu1 }
0x2ac6   :  { %v26041_v42 = vadd.f32 %v10156_v5, %v25957_v41  ;;  %v10158_v12 = vpop.f32.mrb[69].mxu1 }
0x2ac7   :  { %v26044_v55 = vadd.f32 %v10158_v12, %v25960_v62  ;;  %v10160_v26 = vpop.f32.mrb[70].mxu1 }
0x2ac8   :  { %v10161_v59 = vpop.f32.mrb[71].mxu1 }
0x2acd   :  { %v10197_v20 = vpop.f32.mrb[72].mxu1 }
0x2ace   :  { %v26047_v38 = vadd.f32 %v10197_v20, %v25963_v43  ;;  %v10199_v0 = vpop.f32.mrb[73].mxu1 }
0x2acf   :  { %v26050_v63 = vadd.f32 %v10199_v0, %v25966_v44  ;;  %v10201_v18 = vpop.f32.mrb[74].mxu1  ;;  %v21714_v44 = vld [vmem:[%s28269_s3 + $0xcd8] ss:$20 sps:$4 sm:$0xff]  }
0x2ad0   :  { %v10202_v47 = vpop.f32.mrb[75].mxu1 }
0x2ad5   :  { %v10238_v32 = vpop.f32.mrb[76].mxu1 }
0x2ad6   :  { %v26053_v41 = vadd.f32 %v10238_v32, %v25969_v33  ;;  %v20833_v57 = vpop.f32.mrb[77].mxu1  ;;  %v21719_v33 = vld [vmem:[%s28269_s3 + $0xd04] ss:$20 sps:$4 sm:$0xff]  }
0x2ad7   :  { %v10241_v35 = vpop.f32.mrb[78].mxu1 }
0x2ad8   :  { %v20834_v62 = vpop.f32.mrb[79].mxu1 }
0x2af5   :  { %v19855_v34 = vpop.f32.mrb[80].mxu1 }
0x2af6   :  { %v19856_v8 = vpop.f32.mrb[81].mxu1 }
0x2af7   :  { %v19857_v15 = vadd.f32 %v19856_v8, %v19855_v34  ;;  %v19858_v37 = vpop.f32.mrb[82].mxu1 }
0x2af8   :  { %v19859_v24 = vpop.f32.mrb[83].mxu1  ;;  %v21733_v37 = vld [vmem:[%s28269_s3 + $0xd50] ss:$20 sps:$4 sm:$0xff]  }
0x2af9   :  { %v10293_v43 = vadd.f32 %v25677_v52, %v19857_v15  ;;  %v21736_v24 = vld [vmem:[%s28269_s3 + $0xd30] ss:$20 sps:$4 sm:$0xff]  }
0x2afb   :  { %v10298_v46 = vmax.f32 %v10293_v43, 0.0  ;;  %v21737_v43 = vld [vmem:[%s28269_s3 + $0xd58] ss:$20 sps:$4 sm:$0xff]  }
0x2afd   :  { %v10299_v29 = vpack.c.bf16 %v10298_v46, %v10298_v46  ;;  %v18137_v46 = vld [vmem:[%s28268_s0 + $0x158] sm:$0xff] }
0x2aff   :  { %18106 = vmatmul.mubr.msk.bf16.vlgmr.msra.gmra.mrb[64].mxu0 %vm352_vm1, %v10299_v29 }
0x2b00   :  { %10410 = vmatpush1.bf16.msra.mxu0 %v21714_v44  ;;  %10441 = vmatprep.mubr.bf16.mxu0 %v22336_v30  ;;  %v18139_v44 = vcombine.high %v18137_v46, %v18137_v46 }
0x2b01   :  { %10411 = vmatprep.subr.bf16.mxu0 %v21719_v33  ;;  %v21742_v33 = vld [vmem:[%s28269_s3 + $0xd74] ss:$20 sps:$4 sm:$0xff]  }
0x2b04   :  { %10412 = vmatpush1.bf16.msra.mxu0 %v21717_v48  ;;  %v21740_v48 = vld [vmem:[%s28269_s3 + $0xd70] ss:$20 sps:$4 sm:$0xff]  }
0x2b05   :  { %20835 = vmatprep.subr.bf16.mxu0 %v22335_v23 }
0x2b07   :  { %18107 = vmatmul.mubr.msk.bf16.vlgmr.msra.gmra.mrb[68].mxu0 %vm352_vm1, %v10299_v29 }
0x2b08   :  { %20836 = vmatpush3.bf16.msra.mxu0 %v21720_v56  ;;  %20839 = vmatprep.mubr.msk.bf16.mxu0 %vm22337_vm0, %v22335_v23  ;;  %v21745_v56 = vld [vmem:[%s28269_s3 + $0xd9c] ss:$20 sps:$4 sm:$0xff]  }
0x2b09   :  { %20837 = vmatprep.subr.bf16.mxu0 %v22335_v23 }
0x2b0c   :  { %20838 = vmatpush3.bf16.msra.mxu0 %v21721_v31  ;;  %v21743_v31 = vld [vmem:[%s28269_s3 + $0xd98] ss:$20 sps:$4 sm:$0xff]  }
0x2b0d   :  { %19864 = vmatprep.subr.bf16.mxu0 %v25782_v16 }
0x2b0f   :  { %20840 = vmatmul.mubr.msk.bf16.vlgmr.msra.gmra.mrb[72].mxu0 %vm352_vm1, %v10299_v29  ;;  %v18138_v29 = vcombine.low %v18137_v46, %v18137_v46 }
0x2b10   :  { %19865 = vmatpush3.bf16.msra.mxu0 %v25789_v25  ;;  %10536 = vmatprep.mubr.bf16.mxu0 %v18111_v3 }
0x2b11   :  { %19866 = vmatprep.subr.bf16.mxu0 %v25795_v22 }
0x2b14   :  { %19867 = vmatpush3.bf16.msra.mxu0 %v25875_v60 }
0x2b15   :  { %19868 = vmatprep.subr.bf16.mxu0 %v25881_v61 }
0x2b18   :  { %19869 = vmatpush3.bf16.msra.mxu0 %v25887_v10 }
0x2b19   :  { %19870 = vmatprep.subr.bf16.mxu0 %v25893_v27 }
0x2b1c   :  { %19871 = vmatpush3.bf16.msra.mxu0 %v25899_v9 }
0x2b1d   :  { %19872 = vmatprep.subr.bf16.mxu0 %v25905_v11 }
0x2b20   :  { %19873 = vmatpush3.bf16.msra.mxu0 %v25911_v17 }
0x2b21   :  { %19874 = vmatprep.subr.bf16.mxu0 %v25917_v21 }
0x2b24   :  { %19875 = vmatpush3.bf16.msra.mxu0 %v25923_v28 }
0x2b25   :  { %19876 = vmatprep.subr.bf16.mxu0 %v25929_v19 }
0x2b28   :  { %19877 = vmatpush3.bf16.msra.mxu0 %v25935_v6 }
0x2b29   :  { %19878 = vmatprep.subr.bf16.mxu0 %v26015_v54 }
0x2b2c   :  { %19879 = vmatpush3.bf16.msra.mxu0 %v26021_v58 }
0x2b2d   :  { %10860 = vmatprep.subr.bf16.mxu0 %v21742_v33 }
0x2b2f   :  { %10537 = vmatmul.mubr.bf16.vlgmr.msra.gmra.mrb[76].mxu0 %v18110_v36 }
0x2b30   :  { %10892 = vmatprep.mubr.bf16.mxu0 %v22336_v30  ;;  %10861 = vmatpush1.bf16.msra.mxu0 %v21740_v48 }
0x2b31   :  { %10862 = vmatprep.subr.bf16.mxu0 %v21745_v56 }
0x2b34   :  { %10863 = vmatpush1.bf16.msra.mxu0 %v21743_v31 }
0x2b35   :  { %10901 = vmatprep.subr.bf16.mxu0 %v21748_v2 }
0x2bd2   :  { %v10402_v39 = vpop.f32.mrb[64].mxu0 }
0x2bd3   :  { %v26115_v1 = vadd.f32 %v10402_v39, %v26041_v42  ;;  %v10404_v51 = vpop.f32.mrb[65].mxu0 }
0x2bd4   :  { %v26118_v4 = vadd.f32 %v10404_v51, %v26044_v55  ;;  %v10406_v7 = vpop.f32.mrb[66].mxu0 }
0x2bd5   :  { %v10407_v13 = vpop.f32.mrb[67].mxu0 }
0x2bda   :  { %v10443_v53 = vpop.f32.mrb[68].mxu0 }
0x2bdb   :  { %v26121_v5 = vadd.f32 %v10443_v53, %v26047_v38  ;;  %v10445_v12 = vpop.f32.mrb[69].mxu0 }
0x2bdc   :  { %v26124_v26 = vadd.f32 %v10445_v12, %v26050_v63  ;;  %v10447_v59 = vpop.f32.mrb[70].mxu0  ;;  %v21730_v63 = vld [vmem:[%s28269_s3 + $0xd28] ss:$20 sps:$4 sm:$0xff]  }
0x2bdd   :  { %v10448_v20 = vpop.f32.mrb[71].mxu0 }
0x2be2   :  { %v10484_v0 = vpop.f32.mrb[72].mxu0 }
0x2be3   :  { %v26127_v42 = vadd.f32 %v10484_v0, %v26053_v41  ;;  %v20841_v18 = vpop.f32.mrb[73].mxu0  ;;  %v21735_v41 = vld [vmem:[%s28269_s3 + $0xd54] ss:$20 sps:$4 sm:$0xff]  }
0x2be4   :  { %v10487_v47 = vpop.f32.mrb[74].mxu0 }
0x2be5   :  { %v20842_v55 = vpop.f32.mrb[75].mxu0 }
0x2c02   :  { %v19880_v32 = vpop.f32.mrb[76].mxu0 }
0x2c03   :  { %v19881_v57 = vpop.f32.mrb[77].mxu0 }
0x2c04   :  { %v19882_v35 = vadd.f32 %v19881_v57, %v19880_v32  ;;  %v19883_v62 = vpop.f32.mrb[78].mxu0 }
0x2c05   :  { %v19884_v34 = vpop.f32.mrb[79].mxu0  ;;  %v21749_v62 = vld [vmem:[%s28269_s3 + $0xda0] ss:$20 sps:$4 sm:$0xff]  }
0x2c06   :  { %v10539_v38 = vadd.f32 %v25677_v52, %v19882_v35  ;;  %v21753_v34 = vld [vmem:[%s28269_s3 + $0xda8] ss:$20 sps:$4 sm:$0xff]  }
0x2c08   :  { %v10544_v8 = vmax.f32 %v10539_v38, 0.0  ;;  %v18165_v38 = vld [vmem:[%s28268_s0 + $0x160] sm:$0xff] }
0x2c0a   :  { %v10545_v15 = vpack.c.bf16 %v10544_v8, %v10544_v8  ;;  %v18167_v8 = vcombine.high %v18165_v38, %v18165_v38 }
0x2c0c   :  { %18134 = vmatmul.mubr.msk.bf16.vlgmr.msra.gmra.mrb[84].mxu1 %vm352_vm1, %v10545_v15 }
0x2c0d   :  { %10656 = vmatpush1.bf16.msra.mxu1 %v21730_v63  ;;  %10687 = vmatprep.mubr.bf16.mxu1 %v22336_v30  ;;  %v18166_v63 = vcombine.low %v18165_v38, %v18165_v38 }
0x2c0e   :  { %10657 = vmatprep.subr.bf16.mxu1 %v21735_v41  ;;  %v21756_v41 = vld [vmem:[%s28269_s3 + $0xdc0] ss:$20 sps:$4 sm:$0xff]  }
0x2c11   :  { %10658 = vmatpush1.bf16.msra.mxu1 %v21733_v37  ;;  %v21761_v37 = vld [vmem:[%s28269_s3 + $0xdec] ss:$20 sps:$4 sm:$0xff]  }
0x2c12   :  { %20843 = vmatprep.subr.bf16.mxu1 %v22335_v23 }
0x2c14   :  { %18135 = vmatmul.mubr.msk.bf16.vlgmr.msra.gmra.mrb[88].mxu1 %vm352_vm1, %v10545_v15 }
0x2c15   :  { %20844 = vmatpush3.bf16.msra.mxu1 %v21736_v24  ;;  %20847 = vmatprep.mubr.msk.bf16.mxu1 %vm22337_vm0, %v22335_v23  ;;  %v21759_v24 = vld [vmem:[%s28269_s3 + $0xde8] ss:$20 sps:$4 sm:$0xff]  }
0x2c16   :  { %20845 = vmatprep.subr.bf16.mxu1 %v22335_v23 }
0x2c19   :  { %20846 = vmatpush3.bf16.msra.mxu1 %v21737_v43  ;;  %v21764_v43 = vld [vmem:[%s28269_s3 + $0xdcc] ss:$20 sps:$4 sm:$0xff]  }
0x2c1a   :  { %19889 = vmatprep.subr.bf16.mxu1 %v25782_v16 }
0x2c1c   :  { %20848 = vmatmul.mubr.msk.bf16.vlgmr.msra.gmra.mrb[92].mxu1 %vm352_vm1, %v10545_v15  ;;  %v21758_v15 = vld [vmem:[%s28269_s3 + $0xdc4] ss:$20 sps:$4 sm:$0xff]  }
0x2c1d   :  { %19890 = vmatpush3.bf16.msra.mxu1 %v25789_v25  ;;  %10782 = vmatprep.mubr.bf16.mxu1 %v18139_v44 }
0x2c1e   :  { %19891 = vmatprep.subr.bf16.mxu1 %v25795_v22 }
0x2c21   :  { %19892 = vmatpush3.bf16.msra.mxu1 %v25875_v60 }
0x2c22   :  { %19893 = vmatprep.subr.bf16.mxu1 %v25881_v61 }
0x2c25   :  { %19894 = vmatpush3.bf16.msra.mxu1 %v25887_v10 }
0x2c26   :  { %19895 = vmatprep.subr.bf16.mxu1 %v25893_v27 }
0x2c29   :  { %19896 = vmatpush3.bf16.msra.mxu1 %v25899_v9 }
0x2c2a   :  { %19897 = vmatprep.subr.bf16.mxu1 %v25905_v11 }
0x2c2d   :  { %19898 = vmatpush3.bf16.msra.mxu1 %v25911_v17 }
0x2c2e   :  { %19899 = vmatprep.subr.bf16.mxu1 %v25917_v21 }
0x2c31   :  { %19900 = vmatpush3.bf16.msra.mxu1 %v25923_v28 }
0x2c32   :  { %19901 = vmatprep.subr.bf16.mxu1 %v25929_v19 }
0x2c35   :  { %19902 = vmatpush3.bf16.msra.mxu1 %v25935_v6 }
0x2c36   :  { %19903 = vmatprep.subr.bf16.mxu1 %v26015_v54 }
0x2c39   :  { %19904 = vmatpush3.bf16.msra.mxu1 %v26021_v58 }
0x2c3a   :  { %11106 = vmatprep.subr.bf16.mxu1 %v21758_v15 }
0x2c3c   :  { %10783 = vmatmul.mubr.bf16.vlgmr.msra.gmra.mrb[96].mxu1 %v18138_v29 }
0x2c3d   :  { %11138 = vmatprep.mubr.bf16.mxu1 %v22336_v30  ;;  %11107 = vmatpush1.bf16.msra.mxu1 %v21756_v41 }
0x2c3e   :  { %11108 = vmatprep.subr.bf16.mxu1 %v21761_v37 }
0x2c41   :  { %11109 = vmatpush1.bf16.msra.mxu1 %v21759_v24 }
0x2c42   :  { %11147 = vmatprep.subr.bf16.mxu1 %v21764_v43 }
0x2cdf   :  { %v10648_v3 = vpop.f32.mrb[84].mxu1 }
0x2ce0   :  { %v26189_v36 = vadd.f32 %v10648_v3, %v26115_v1  ;;  %v10650_v45 = vpop.f32.mrb[85].mxu1 }
0x2ce1   :  { %v26192_v14 = vadd.f32 %v10650_v45, %v26118_v4  ;;  %v10652_v49 = vpop.f32.mrb[86].mxu1 }
0x2ce2   :  { %v10653_v50 = vpop.f32.mrb[87].mxu1 }
0x2ce7   :  { %v10689_v40 = vpop.f32.mrb[88].mxu1 }
0x2ce8   :  { %v26195_v39 = vadd.f32 %v10689_v40, %v26121_v5  ;;  %v10691_v51 = vpop.f32.mrb[89].mxu1 }
0x2ce9   :  { %v26198_v7 = vadd.f32 %v10691_v51, %v26124_v26  ;;  %v10693_v13 = vpop.f32.mrb[90].mxu1  ;;  %v21746_v26 = vld [vmem:[%s28269_s3 + $0xd78] ss:$20 sps:$4 sm:$0xff]  }
0x2cea   :  { %v10694_v53 = vpop.f32.mrb[91].mxu1 }
0x2cef   :  { %v10730_v12 = vpop.f32.mrb[92].mxu1 }
0x2cf0   :  { %v26201_v1 = vadd.f32 %v10730_v12, %v26127_v42  ;;  %v20849_v59 = vpop.f32.mrb[93].mxu1  ;;  %v21751_v42 = vld [vmem:[%s28269_s3 + $0xda4] ss:$20 sps:$4 sm:$0xff]  }
0x2cf1   :  { %v10733_v20 = vpop.f32.mrb[94].mxu1 }
0x2cf2   :  { %v20850_v4 = vpop.f32.mrb[95].mxu1 }
0x2d0f   :  { %v19905_v0 = vpop.f32.mrb[96].mxu1 }
0x2d10   :  { %v19906_v18 = vpop.f32.mrb[97].mxu1 }
0x2d11   :  { %v19907_v47 = vadd.f32 %v19906_v18, %v19905_v0  ;;  %v19908_v55 = vpop.f32.mrb[98].mxu1 }
0x2d12   :  { %v19909_v32 = vpop.f32.mrb[99].mxu1  ;;  %v21765_v55 = vld [vmem:[%s28269_s3 + $0xdf0] ss:$20 sps:$4 sm:$0xff]  }
0x2d13   :  { %v10785_v5 = vadd.f32 %v25677_v52, %v19907_v47  ;;  %v21752_v52 = vld [vmem:[%s28269_s3 + $0xd80] ss:$20 sps:$4 sm:$0xff]   ;;  %v21768_v32 = vld [vmem:[%s28269_s3 + $0xdd0] ss:$20 sps:$4 sm:$0xff]  }
0x2d14   :  { %v21767_v47 = vld [vmem:[%s28269_s3 + $0xdf4] ss:$20 sps:$4 sm:$0xff]  }
0x2d15   :  { %v10790_v57 = vmax.f32 %v10785_v5, 0.0  ;;  %v21769_v5 = vld [vmem:[%s28269_s3 + $0xdf8] ss:$20 sps:$4 sm:$0xff]  }
0x2d17   :  { %v10791_v35 = vpack.c.bf16 %v10790_v57, %v10790_v57  ;;  %v18193_v57 = vld [vmem:[%s28268_s0 + $0x168] sm:$0xff] }
0x2d19   :  { %18162 = vmatmul.mubr.msk.bf16.vlgmr.msra.gmra.mrb[80].mxu0 %vm352_vm1, %v10791_v35 }
0x2d1a   :  { %10902 = vmatpush1.bf16.msra.mxu0 %v21746_v26  ;;  %10933 = vmatprep.mubr.bf16.mxu0 %v22336_v30  ;;  %v18195_v26 = vcombine.high %v18193_v57, %v18193_v57 }
0x2d1b   :  { %10903 = vmatprep.subr.bf16.mxu0 %v21751_v42  ;;  %v21775_v42 = vld [vmem:[%s28269_s3 + $0xe38] ss:$20 sps:$4 sm:$0xff]  }
0x2d1e   :  { %10904 = vmatpush1.bf16.msra.mxu0 %v21749_v62  ;;  %v21780_v62 = vld [vmem:[%s28269_s3 + $0xe1c] ss:$20 sps:$4 sm:$0xff]  }
0x2d1f   :  { %20851 = vmatprep.subr.bf16.mxu0 %v22335_v23 }
0x2d21   :  { %18163 = vmatmul.mubr.msk.bf16.vlgmr.msra.gmra.mrb[84].mxu0 %vm352_vm1, %v10791_v35 }
0x2d22   :  { %20852 = vmatpush3.bf16.msra.mxu0 %v21752_v52  ;;  %20855 = vmatprep.mubr.msk.bf16.mxu0 %vm22337_vm0, %v22335_v23 }
0x2d23   :  { %20853 = vmatprep.subr.bf16.mxu0 %v22335_v23 }
0x2d26   :  { %20854 = vmatpush3.bf16.msra.mxu0 %v21753_v34 }
0x2d27   :  { %19914 = vmatprep.subr.bf16.mxu0 %v25782_v16 }
0x2d29   :  { %20856 = vmatmul.mubr.msk.bf16.vlgmr.msra.gmra.mrb[88].mxu0 %vm352_vm1, %v10791_v35  ;;  %v21777_v35 = vld [vmem:[%s28269_s3 + $0xe3c] ss:$20 sps:$4 sm:$0xff]  }
0x2d2a   :  { %19915 = vmatpush3.bf16.msra.mxu0 %v25789_v25  ;;  %11028 = vmatprep.mubr.bf16.mxu0 %v18167_v8 }
0x2d2b   :  { %19916 = vmatprep.subr.bf16.mxu0 %v25795_v22 }
0x2d2e   :  { %19917 = vmatpush3.bf16.msra.mxu0 %v25875_v60 }
0x2d2f   :  { %19918 = vmatprep.subr.bf16.mxu0 %v25881_v61 }
0x2d32   :  { %19919 = vmatpush3.bf16.msra.mxu0 %v25887_v10 }
0x2d33   :  { %19920 = vmatprep.subr.bf16.mxu0 %v25893_v27 }
0x2d36   :  { %19921 = vmatpush3.bf16.msra.mxu0 %v25899_v9 }
0x2d37   :  { %19922 = vmatprep.subr.bf16.mxu0 %v25905_v11 }
0x2d3a   :  { %19923 = vmatpush3.bf16.msra.mxu0 %v25911_v17 }
0x2d3b   :  { %19924 = vmatprep.subr.bf16.mxu0 %v25917_v21 }
0x2d3e   :  { %19925 = vmatpush3.bf16.msra.mxu0 %v25923_v28 }
0x2d3f   :  { %19926 = vmatprep.subr.bf16.mxu0 %v25929_v19 }
0x2d42   :  { %19927 = vmatpush3.bf16.msra.mxu0 %v25935_v6 }
0x2d43   :  { %19928 = vmatprep.subr.bf16.mxu0 %v26015_v54 }
0x2d46   :  { %19929 = vmatpush3.bf16.msra.mxu0 %v26021_v58 }
0x2d49   :  { %11029 = vmatmul.mubr.bf16.vlgmr.msra.gmra.mrb[92].mxu0 %v18166_v63 }
0x2d4a   :  { %11384 = vmatprep.mubr.bf16.mxu0 %v22336_v30 }
0x2dec   :  { %v10894_v46 = vpop.f32.mrb[80].mxu0 }
0x2ded   :  { %v26263_v44 = vadd.f32 %v10894_v46, %v26189_v36  ;;  %v10896_v29 = vpop.f32.mrb[81].mxu0 }
0x2dee   :  { %v26266_v33 = vadd.f32 %v10896_v29, %v26192_v14  ;;  %v10898_v48 = vpop.f32.mrb[82].mxu0 }
0x2def   :  { %v10899_v56 = vpop.f32.mrb[83].mxu0 }
0x2df4   :  { %v10935_v31 = vpop.f32.mrb[84].mxu0 }
0x2df5   :  { %v26269_v2 = vadd.f32 %v10935_v31, %v26195_v39  ;;  %v10937_v3 = vpop.f32.mrb[85].mxu0  ;;  %v26280_v39 = vld [vmem:[%s28270_s2] ss:$0 sm:$0xff] }
0x2df6   :  { %v26272_v45 = vadd.f32 %v10937_v3, %v26198_v7  ;;  %v10939_v49 = vpop.f32.mrb[86].mxu0 }
0x2df7   :  { %v10940_v50 = vpop.f32.mrb[87].mxu0 }
0x2dfc   :  { %v10976_v40 = vpop.f32.mrb[88].mxu0 }
0x2dfd   :  { %v26275_v36 = vadd.f32 %v10976_v40, %v26201_v1  ;;  %v20857_v51 = vpop.f32.mrb[89].mxu0  ;;  %v21762_v1 = vld [vmem:[%s28269_s3 + $0xdc8] ss:$20 sps:$4 sm:$0xff]  }
0x2dfe   :  { %v10979_v13 = vpop.f32.mrb[90].mxu0 }
0x2dff   :  { %v20858_v14 = vpop.f32.mrb[91].mxu0 }
0x2e1c   :  { %v19930_v53 = vpop.f32.mrb[92].mxu0 }
0x2e1d   :  { %v19931_v12 = vpop.f32.mrb[93].mxu0 }
0x2e1e   :  { %v19932_v59 = vadd.f32 %v19931_v12, %v19930_v53  ;;  %v19933_v20 = vpop.f32.mrb[94].mxu0  ;;  %v21781_v53 = vld [vmem:[%s28269_s3 + $0xe40] ss:$20 sps:$4 sm:$0xff]  }
0x2e1f   :  { %v19934_v4 = vpop.f32.mrb[95].mxu0  ;;  %v21784_v12 = vld [vmem:[%s28269_s3 + $0xe20] ss:$20 sps:$4 sm:$0xff]  }
0x2e20   :  { %v11031_v7 = vadd.f32 %v26280_v39, %v19932_v59  ;;  %v21785_v59 = vld [vmem:[%s28269_s3 + $0xe48] ss:$20 sps:$4 sm:$0xff]   ;;  %v18221_v20 = vld [vmem:[%s28268_s0 + $0x170] sm:$0xff] }
0x2e21   :  { %v18223_v4 = vcombine.high %v18221_v20, %v18221_v20 }
0x2e22   :  { %v11036_v0 = vmax.f32 %v11031_v7, 0.0  ;;  %v26385_v7 = vld [vmem:[%s28267_s1 + $0x40] sm:$0xff]  }
0x2e24   :  { %v11037_v18 = vpack.c.bf16 %v11036_v0, %v11036_v0  ;;  %v26392_v0 = vld [vmem:[%s28267_s1] sm:$0xff]  }
0x2e26   :  { %18190 = vmatmul.mubr.msk.bf16.vlgmr.msra.gmra.mrb[100].mxu1 %vm352_vm1, %v11037_v18 }
0x2e27   :  { %11148 = vmatpush1.bf16.msra.mxu1 %v21762_v1  ;;  %11179 = vmatprep.mubr.bf16.mxu1 %v22336_v30  ;;  %v26398_v1 = vld [vmem:[%s28267_s1 + $0x48] sm:$0xff]  }
0x2e28   :  { %11149 = vmatprep.subr.bf16.mxu1 %v21767_v47 }
0x2e2b   :  { %11150 = vmatpush1.bf16.msra.mxu1 %v21765_v55 }
0x2e2c   :  { %20859 = vmatprep.subr.bf16.mxu1 %v22335_v23 }
0x2e2e   :  { %18191 = vmatmul.mubr.msk.bf16.vlgmr.msra.gmra.mrb[104].mxu1 %vm352_vm1, %v11037_v18 }
0x2e2f   :  { %20860 = vmatpush3.bf16.msra.mxu1 %v21768_v32  ;;  %20863 = vmatprep.mubr.msk.bf16.mxu1 %vm22337_vm0, %v22335_v23 }
0x2e30   :  { %20861 = vmatprep.subr.bf16.mxu1 %v22335_v23 }
0x2e33   :  { %20862 = vmatpush3.bf16.msra.mxu1 %v21769_v5 }
0x2e34   :  { %19939 = vmatprep.subr.bf16.mxu1 %v25782_v16  ;;  %v18194_v16 = vcombine.low %v18193_v57, %v18193_v57 }
0x2e36   :  { %20864 = vmatmul.mubr.msk.bf16.vlgmr.msra.gmra.mrb[108].mxu1 %vm352_vm1, %v11037_v18 }
0x2e37   :  { %19940 = vmatpush3.bf16.msra.mxu1 %v25789_v25  ;;  %11274 = vmatprep.mubr.bf16.mxu1 %v18195_v26  ;;  %v21774_v25 = vld [vmem:[%s28269_s3 + $0xe14] ss:$20 sps:$4 sm:$0xff]  }
0x2e38   :  { %19941 = vmatprep.subr.bf16.mxu1 %v25795_v22  ;;  %v21772_v22 = vld [vmem:[%s28269_s3 + $0xe10] ss:$20 sps:$4 sm:$0xff]   ;;  %11352 = vmatprep.subr.bf16.mxu0 %v21774_v25 }
0x2e39   :  { %11353 = vmatpush1.bf16.msra.mxu0 %v21772_v22 }
0x2e3a   :  { %11354 = vmatprep.subr.bf16.mxu0 %v21777_v35 }
0x2e3b   :  { %19942 = vmatpush3.bf16.msra.mxu1 %v25875_v60 }
0x2e3c   :  { %19943 = vmatprep.subr.bf16.mxu1 %v25881_v61 }
0x2e3d   :  { %11355 = vmatpush1.bf16.msra.mxu0 %v21775_v42 }
0x2e3e   :  { %11393 = vmatprep.subr.bf16.mxu0 %v21780_v62 }
0x2e3f   :  { %19944 = vmatpush3.bf16.msra.mxu1 %v25887_v10 }
0x2e40   :  { %19945 = vmatprep.subr.bf16.mxu1 %v25893_v27 }
0x2e43   :  { %19946 = vmatpush3.bf16.msra.mxu1 %v25899_v9 }
0x2e44   :  { %19947 = vmatprep.subr.bf16.mxu1 %v25905_v11 }
0x2e47   :  { %19948 = vmatpush3.bf16.msra.mxu1 %v25911_v17 }
0x2e48   :  { %19949 = vmatprep.subr.bf16.mxu1 %v25917_v21 }
0x2e4b   :  { %19950 = vmatpush3.bf16.msra.mxu1 %v25923_v28 }
0x2e4c   :  { %19951 = vmatprep.subr.bf16.mxu1 %v25929_v19 }
0x2e4f   :  { %19952 = vmatpush3.bf16.msra.mxu1 %v25935_v6 }
0x2e50   :  { %19953 = vmatprep.subr.bf16.mxu1 %v26015_v54 }
0x2e53   :  { %19954 = vmatpush3.bf16.msra.mxu1 %v26021_v58 }
0x2e56   :  { %11275 = vmatmul.mubr.bf16.vlgmr.msra.gmra.mrb[112].mxu1 %v18194_v16 }
0x2e57   :  { %11630 = vmatprep.mubr.bf16.mxu1 %v22336_v30 }
0x2ef9   :  { %v11140_v52 = vpop.f32.mrb[100].mxu1 }
0x2efa   :  { %v26342_v34 = vadd.f32 %v11140_v52, %v26263_v44  ;;  %v11142_v38 = vpop.f32.mrb[101].mxu1 }
0x2efb   :  { %v26345_v8 = vadd.f32 %v11142_v38, %v26266_v33  ;;  %v11144_v63 = vpop.f32.mrb[102].mxu1 }
0x2efc   :  { %v11145_v15 = vpop.f32.mrb[103].mxu1 }
0x2f01   :  { %v11181_v41 = vpop.f32.mrb[104].mxu1 }
0x2f02   :  { %v26348_v37 = vadd.f32 %v11181_v41, %v26269_v2  ;;  %v11183_v24 = vpop.f32.mrb[105].mxu1  ;;  %v21794_v41 = vld [vmem:[%s28269_s3 + $0xe68] ss:$20 sps:$4 sm:$0xff]  }
0x2f03   :  { %v26351_v43 = vadd.f32 %v11183_v24, %v26272_v45  ;;  %v11185_v46 = vpop.f32.mrb[106].mxu1  ;;  %v21778_v45 = vld [vmem:[%s28269_s3 + $0xe18] ss:$20 sps:$4 sm:$0xff]   ;;  %v21799_v24 = vld [vmem:[%s28269_s3 + $0xe94] ss:$20 sps:$4 sm:$0xff]  }
0x2f04   :  { %v11186_v29 = vpop.f32.mrb[107].mxu1  ;;  %v21800_v46 = vld [vmem:[%s28269_s3 + $0xe70] ss:$20 sps:$4 sm:$0xff]  }
0x2f05   :  { %v21801_v29 = vld [vmem:[%s28269_s3 + $0xe98] ss:$20 sps:$4 sm:$0xff]  }
0x2f09   :  { %v11222_v48 = vpop.f32.mrb[108].mxu1 }
0x2f0a   :  { %v26354_v44 = vadd.f32 %v11222_v48, %v26275_v36  ;;  %v20865_v56 = vpop.f32.mrb[109].mxu1  ;;  %v21783_v36 = vld [vmem:[%s28269_s3 + $0xe44] ss:$20 sps:$4 sm:$0xff]  }
0x2f0b   :  { %v11225_v31 = vpop.f32.mrb[110].mxu1  ;;  %v18249_v48 = vld [vmem:[%s28268_s0 + $0x178] sm:$0xff]  ;;  %v26478_v56 = vld [vmem:[%s28267_s1 + $0x8] sm:$0xff]  }
0x2f0c   :  { %v20866_v33 = vpop.f32.mrb[111].mxu1  ;;  %v26484_v31 = vld [vmem:[%s28267_s1 + $0x50] sm:$0xff]  }
0x2f0d   :  { %v26490_v33 = vld [vmem:[%s28267_s1 + $0x10] sm:$0xff]  }
0x2f29   :  { %v19955_v3 = vpop.f32.mrb[112].mxu1 }
0x2f2a   :  { %v19956_v49 = vpop.f32.mrb[113].mxu1 }
0x2f2b   :  { %v19957_v50 = vadd.f32 %v19956_v49, %v19955_v3  ;;  %v19958_v40 = vpop.f32.mrb[114].mxu1  ;;  %v26496_v3 = vld [vmem:[%s28267_s1 + $0x58] sm:$0xff]  }
0x2f2c   :  { %v19959_v51 = vpop.f32.mrb[115].mxu1  ;;  %v26502_v49 = vld [vmem:[%s28267_s1 + $0x18] sm:$0xff]   ;;  %v26514_v40 = vld [vmem:[%s28267_s1 + $0x20] sm:$0xff]  }
0x2f2d   :  { %v11277_v2 = vadd.f32 %v26280_v39, %v19957_v50  ;;  %v26508_v50 = vld [vmem:[%s28267_s1 + $0x60] sm:$0xff]   ;;  %v26520_v51 = vld [vmem:[%s28267_s1 + $0x68] sm:$0xff]  }
0x2f2f   :  { %v11282_v13 = vmax.f32 %v11277_v2, 0.0  ;;  %v26526_v2 = vld [vmem:[%s28267_s1 + $0x28] sm:$0xff]  }
0x2f31   :  { %v11283_v14 = vpack.c.bf16 %v11282_v13, %v11282_v13  ;;  %v26532_v13 = vld [vmem:[%s28267_s1 + $0x70] sm:$0xff]  }
0x2f33   :  { %18218 = vmatmul.mubr.msk.bf16.vlgmr.msra.gmra.mrb[96].mxu0 %vm352_vm1, %v11283_v14 }
0x2f34   :  { %11394 = vmatpush1.bf16.msra.mxu0 %v21778_v45  ;;  %11425 = vmatprep.mubr.bf16.mxu0 %v22336_v30  ;;  %v26538_v45 = vld [vmem:[%s28267_s1 + $0x30] sm:$0xff]  }
0x2f35   :  { %11395 = vmatprep.subr.bf16.mxu0 %v21783_v36  ;;  %v21806_v36 = vld [vmem:[%s28269_s3 + $0xeb4] ss:$20 sps:$4 sm:$0xff]  }
0x2f38   :  { %11396 = vmatpush1.bf16.msra.mxu0 %v21781_v53  ;;  %v21804_v53 = vld [vmem:[%s28269_s3 + $0xeb0] ss:$20 sps:$4 sm:$0xff]  }
0x2f39   :  { %20867 = vmatprep.subr.bf16.mxu0 %v22335_v23 }
0x2f3b   :  { %18219 = vmatmul.mubr.msk.bf16.vlgmr.msra.gmra.mrb[100].mxu0 %vm352_vm1, %v11283_v14 }
0x2f3c   :  { %20868 = vmatpush3.bf16.msra.mxu0 %v21784_v12  ;;  %20871 = vmatprep.mubr.msk.bf16.mxu0 %vm22337_vm0, %v22335_v23  ;;  %v21812_v12 = vld [vmem:[%s28269_s3 + $0xebc] ss:$20 sps:$4 sm:$0xff]  }
0x2f3d   :  { %20869 = vmatprep.subr.bf16.mxu0 %v22335_v23 }
0x2f40   :  { %20870 = vmatpush3.bf16.msra.mxu0 %v21785_v59 }
0x2f41   :  { %19964 = vmatprep.subr.bf16.mxu0 %v26385_v7 }
0x2f43   :  { %20872 = vmatmul.mubr.msk.bf16.vlgmr.msra.gmra.mrb[104].mxu0 %vm352_vm1, %v11283_v14  ;;  %v18250_v14 = vcombine.low %v18249_v48, %v18249_v48 }
0x2f44   :  { %19965 = vmatpush3.bf16.msra.mxu0 %v26392_v0  ;;  %11520 = vmatprep.mubr.bf16.mxu0 %v18223_v4 }
0x2f45   :  { %19966 = vmatprep.subr.bf16.mxu0 %v26398_v1 }
0x2f48   :  { %19967 = vmatpush3.bf16.msra.mxu0 %v25875_v60  ;;  %v18222_v60 = vcombine.low %v18221_v20, %v18221_v20 }
0x2f49   :  { %19968 = vmatprep.subr.bf16.mxu0 %v25881_v61  ;;  %v21790_v61 = vld [vmem:[%s28269_s3 + $0xe64] ss:$20 sps:$4 sm:$0xff]  }
0x2f4a   :  { %11598 = vmatprep.subr.bf16.mxu1 %v21790_v61 }
0x2f4c   :  { %19969 = vmatpush3.bf16.msra.mxu0 %v25887_v10  ;;  %v21788_v10 = vld [vmem:[%s28269_s3 + $0xe60] ss:$20 sps:$4 sm:$0xff]  }
0x2f4d   :  { %19970 = vmatprep.subr.bf16.mxu0 %v25893_v27  ;;  %11599 = vmatpush1.bf16.msra.mxu1 %v21788_v10  ;;  %v21793_v27 = vld [vmem:[%s28269_s3 + $0xe8c] ss:$20 sps:$4 sm:$0xff]  }
0x2f4e   :  { %11600 = vmatprep.subr.bf16.mxu1 %v21793_v27 }
0x2f50   :  { %19971 = vmatpush3.bf16.msra.mxu0 %v25899_v9  ;;  %v21791_v9 = vld [vmem:[%s28269_s3 + $0xe88] ss:$20 sps:$4 sm:$0xff]  }
0x2f51   :  { %19972 = vmatprep.subr.bf16.mxu0 %v25905_v11  ;;  %11601 = vmatpush1.bf16.msra.mxu1 %v21791_v9  ;;  %v21796_v11 = vld [vmem:[%s28269_s3 + $0xe6c] ss:$20 sps:$4 sm:$0xff]  }
0x2f52   :  { %11639 = vmatprep.subr.bf16.mxu1 %v21796_v11 }
0x2f54   :  { %19973 = vmatpush3.bf16.msra.mxu0 %v25911_v17 }
0x2f55   :  { %19974 = vmatprep.subr.bf16.mxu0 %v25917_v21 }
0x2f58   :  { %19975 = vmatpush3.bf16.msra.mxu0 %v25923_v28 }
0x2f59   :  { %19976 = vmatprep.subr.bf16.mxu0 %v25929_v19 }
0x2f5c   :  { %19977 = vmatpush3.bf16.msra.mxu0 %v25935_v6 }
0x2f5d   :  { %19978 = vmatprep.subr.bf16.mxu0 %v26015_v54 }
0x2f60   :  { %19979 = vmatpush3.bf16.msra.mxu0 %v26021_v58 }
0x2f61   :  { %11844 = vmatprep.subr.bf16.mxu0 %v21806_v36 }
0x2f63   :  { %11521 = vmatmul.mubr.bf16.vlgmr.msra.gmra.mrb[108].mxu0 %v18222_v60 }
0x2f64   :  { %11876 = vmatprep.mubr.bf16.mxu0 %v22336_v30  ;;  %11845 = vmatpush1.bf16.msra.mxu0 %v21804_v53 }
0x3006   :  { %v11386_v17 = vpop.f32.mrb[96].mxu0 }
0x3007   :  { %v26431_v21 = vadd.f32 %v11386_v17, %v26342_v34  ;;  %v11388_v28 = vpop.f32.mrb[97].mxu0 }
0x3008   :  { %v26434_v19 = vadd.f32 %v11388_v28, %v26345_v8  ;;  %v11390_v6 = vpop.f32.mrb[98].mxu0 }
0x3009   :  { %v11391_v18 = vpop.f32.mrb[99].mxu0 }
0x300e   :  { %v11427_v47 = vpop.f32.mrb[100].mxu0 }
0x300f   :  { %v26437_v55 = vadd.f32 %v11427_v47, %v26348_v37  ;;  %v11429_v32 = vpop.f32.mrb[101].mxu0 }
0x3010   :  { %v26440_v5 = vadd.f32 %v11429_v32, %v26351_v43  ;;  %v11431_v57 = vpop.f32.mrb[102].mxu0  ;;  %v21797_v43 = vld [vmem:[%s28269_s3 + $0xe90] ss:$20 sps:$4 sm:$0xff]  }
0x3011   :  { %v11432_v26 = vpop.f32.mrb[103].mxu0 }
0x3016   :  { %v11468_v16 = vpop.f32.mrb[104].mxu0 }
0x3017   :  { %v26443_v25 = vadd.f32 %v11468_v16, %v26354_v44  ;;  %v20873_v22 = vpop.f32.mrb[105].mxu0  ;;  %v18251_v44 = vcombine.high %v18249_v48, %v18249_v48  ;;  %v21828_v48 = vld [vmem:[%s28269_s3 + $0xf0c] ss:$20 sps:$4 sm:$0xff]  }
0x3018   :  { %v11471_v35 = vpop.f32.mrb[106].mxu0 }
0x3019   :  { %v20874_v42 = vpop.f32.mrb[107].mxu0 }
0x3036   :  { %v19980_v62 = vpop.f32.mrb[108].mxu0 }
0x3037   :  { %v19981_v52 = vpop.f32.mrb[109].mxu0 }
0x3038   :  { %v19982_v34 = vadd.f32 %v19981_v52, %v19980_v62  ;;  %v19983_v38 = vpop.f32.mrb[110].mxu0  ;;  %v21813_v52 = vld [vmem:[%s28269_s3 + $0xee0] ss:$20 sps:$4 sm:$0xff]  }
0x3039   :  { %v19984_v8 = vpop.f32.mrb[111].mxu0  ;;  %v21817_v38 = vld [vmem:[%s28269_s3 + $0xee8] ss:$20 sps:$4 sm:$0xff]  }
0x303a   :  { %v11523_v63 = vadd.f32 %v26280_v39, %v19982_v34  ;;  %v21816_v34 = vld [vmem:[%s28269_s3 + $0xec0] ss:$20 sps:$4 sm:$0xff]  }
0x303b   :  { %v18277_v8 = vld [vmem:[%s28268_s0 + $0x180] sm:$0xff] }
0x303c   :  { %v11528_v15 = vmax.f32 %v11523_v63, 0.0  ;;  %v18279_v63 = vcombine.high %v18277_v8, %v18277_v8 }
0x303e   :  { %v11529_v37 = vpack.c.bf16 %v11528_v15, %v11528_v15  ;;  %v26618_v15 = vld [vmem:[%s28267_s1 + $0x78] sm:$0xff]  }
0x3040   :  { %18246 = vmatmul.mubr.msk.bf16.vlgmr.msra.gmra.mrb[116].mxu1 %vm352_vm1, %v11529_v37 }
0x3041   :  { %11640 = vmatpush1.bf16.msra.mxu1 %v21794_v41  ;;  %11671 = vmatprep.mubr.bf16.mxu1 %v22336_v30  ;;  %v18278_v41 = vcombine.low %v18277_v8, %v18277_v8  ;;  %v21844_v8 = vld [vmem:[%s28269_s3 + $0xf5c] ss:$20 sps:$4 sm:$0xff]  }
0x3042   :  { %11641 = vmatprep.subr.bf16.mxu1 %v21799_v24  ;;  %v21822_v24 = vld [vmem:[%s28269_s3 + $0xf04] ss:$20 sps:$4 sm:$0xff]  }
0x3045   :  { %11642 = vmatpush1.bf16.msra.mxu1 %v21797_v43  ;;  %v21820_v43 = vld [vmem:[%s28269_s3 + $0xf00] ss:$20 sps:$4 sm:$0xff]  }
0x3046   :  { %20875 = vmatprep.subr.bf16.mxu1 %v22335_v23 }
0x3048   :  { %18247 = vmatmul.mubr.msk.bf16.vlgmr.msra.gmra.mrb[120].mxu1 %vm352_vm1, %v11529_v37 }
0x3049   :  { %20876 = vmatpush3.bf16.msra.mxu1 %v21800_v46  ;;  %20879 = vmatprep.mubr.msk.bf16.mxu1 %vm22337_vm0, %v22335_v23  ;;  %v21825_v46 = vld [vmem:[%s28269_s3 + $0xf2c] ss:$20 sps:$4 sm:$0xff]  }
0x304a   :  { %20877 = vmatprep.subr.bf16.mxu1 %v22335_v23 }
0x304d   :  { %20878 = vmatpush3.bf16.msra.mxu1 %v21801_v29  ;;  %v21823_v29 = vld [vmem:[%s28269_s3 + $0xf28] ss:$20 sps:$4 sm:$0xff]  }
0x304e   :  { %19989 = vmatprep.subr.bf16.mxu1 %v26385_v7 }
0x3050   :  { %20880 = vmatmul.mubr.msk.bf16.vlgmr.msra.gmra.mrb[124].mxu1 %vm352_vm1, %v11529_v37  ;;  %v26624_v37 = vld [vmem:[%s28267_s1 + $0x38] sm:$0xff]  }
0x3051   :  { %19990 = vmatpush3.bf16.msra.mxu1 %v26392_v0  ;;  %11766 = vmatprep.mubr.bf16.mxu1 %v18251_v44 }
0x3052   :  { %19991 = vmatprep.subr.bf16.mxu1 %v26398_v1 }
0x3055   :  { %19992 = vmatpush3.bf16.msra.mxu1 %v26478_v56 }
0x3056   :  { %19993 = vmatprep.subr.bf16.mxu1 %v26484_v31 }
0x3059   :  { %19994 = vmatpush3.bf16.msra.mxu1 %v26490_v33 }
0x305a   :  { %19995 = vmatprep.subr.bf16.mxu1 %v26496_v3 }
0x305d   :  { %19996 = vmatpush3.bf16.msra.mxu1 %v26502_v49 }
0x305e   :  { %19997 = vmatprep.subr.bf16.mxu1 %v26508_v50 }
0x3061   :  { %19998 = vmatpush3.bf16.msra.mxu1 %v26514_v40 }
0x3062   :  { %19999 = vmatprep.subr.bf16.mxu1 %v26520_v51 }
0x3065   :  { %20000 = vmatpush3.bf16.msra.mxu1 %v26526_v2 }
0x3066   :  { %20001 = vmatprep.subr.bf16.mxu1 %v26532_v13 }
0x3069   :  { %20002 = vmatpush3.bf16.msra.mxu1 %v26538_v45 }
0x306a   :  { %20003 = vmatprep.subr.bf16.mxu1 %v26015_v54  ;;  %v21809_v54 = vld [vmem:[%s28269_s3 + $0xedc] ss:$20 sps:$4 sm:$0xff]  }
0x306b   :  { %11846 = vmatprep.subr.bf16.mxu0 %v21809_v54 }
0x306d   :  { %20004 = vmatpush3.bf16.msra.mxu1 %v26021_v58  ;;  %v21807_v58 = vld [vmem:[%s28269_s3 + $0xed8] ss:$20 sps:$4 sm:$0xff]  }
0x306e   :  { %11847 = vmatpush1.bf16.msra.mxu0 %v21807_v58  ;;  %12090 = vmatprep.subr.bf16.mxu1 %v21822_v24 }
0x306f   :  { %11885 = vmatprep.subr.bf16.mxu0 %v21812_v12 }
0x3070   :  { %11767 = vmatmul.mubr.bf16.vlgmr.msra.gmra.mrb[128].mxu1 %v18250_v14 }
0x3071   :  { %12122 = vmatprep.mubr.bf16.mxu1 %v22336_v30  ;;  %12091 = vmatpush1.bf16.msra.mxu1 %v21820_v43 }
0x3072   :  { %12092 = vmatprep.subr.bf16.mxu1 %v21825_v46 }
0x3075   :  { %12093 = vmatpush1.bf16.msra.mxu1 %v21823_v29 }
0x3076   :  { %12131 = vmatprep.subr.bf16.mxu1 %v21828_v48 }
0x3113   :  { %v11632_v59 = vpop.f32.mrb[116].mxu1 }
0x3114   :  { %v26560_v20 = vadd.f32 %v11632_v59, %v26431_v21  ;;  %v11634_v4 = vpop.f32.mrb[117].mxu1 }
0x3115   :  { %v26563_v60 = vadd.f32 %v11634_v4, %v26434_v19  ;;  %v11636_v61 = vpop.f32.mrb[118].mxu1 }
0x3116   :  { %v11637_v10 = vpop.f32.mrb[119].mxu1 }
0x311b   :  { %v11673_v27 = vpop.f32.mrb[120].mxu1 }
0x311c   :  { %v26566_v9 = vadd.f32 %v11673_v27, %v26437_v55  ;;  %v11675_v11 = vpop.f32.mrb[121].mxu1 }
0x311d   :  { %v26569_v17 = vadd.f32 %v11675_v11, %v26440_v5  ;;  %v11677_v28 = vpop.f32.mrb[122].mxu1  ;;  %v21810_v5 = vld [vmem:[%s28269_s3 + $0xeb8] ss:$20 sps:$4 sm:$0xff]  }
0x311e   :  { %v11678_v6 = vpop.f32.mrb[123].mxu1 }
0x3123   :  { %v11714_v18 = vpop.f32.mrb[124].mxu1 }
0x3124   :  { %v26572_v21 = vadd.f32 %v11714_v18, %v26443_v25  ;;  %v20881_v47 = vpop.f32.mrb[125].mxu1  ;;  %v21815_v25 = vld [vmem:[%s28269_s3 + $0xee4] ss:$20 sps:$4 sm:$0xff]  }
0x3125   :  { %v11717_v32 = vpop.f32.mrb[126].mxu1 }
0x3126   :  { %v20882_v19 = vpop.f32.mrb[127].mxu1 }
0x3143   :  { %v20005_v57 = vpop.f32.mrb[128].mxu1 }
0x3144   :  { %v20006_v26 = vpop.f32.mrb[129].mxu1 }
0x3145   :  { %v20007_v16 = vadd.f32 %v20006_v26, %v20005_v57  ;;  %v20008_v22 = vpop.f32.mrb[130].mxu1 }
0x3146   :  { %v20009_v35 = vpop.f32.mrb[131].mxu1  ;;  %v21829_v22 = vld [vmem:[%s28269_s3 + $0xf30] ss:$20 sps:$4 sm:$0xff]  }
0x3147   :  { %v11769_v55 = vadd.f32 %v26280_v39, %v20007_v16  ;;  %v21832_v35 = vld [vmem:[%s28269_s3 + $0xf10] ss:$20 sps:$4 sm:$0xff]  }
0x3149   :  { %v11774_v42 = vmax.f32 %v11769_v55, 0.0  ;;  %v21833_v55 = vld [vmem:[%s28269_s3 + $0xf38] ss:$20 sps:$4 sm:$0xff]  }
0x314b   :  { %v11775_v62 = vpack.c.bf16 %v11774_v42, %v11774_v42  ;;  %v18305_v42 = vld [vmem:[%s28268_s0 + $0x188] sm:$0xff] }
0x314d   :  { %18274 = vmatmul.mubr.msk.bf16.vlgmr.msra.gmra.mrb[112].mxu0 %vm352_vm1, %v11775_v62 }
0x314e   :  { %11886 = vmatpush1.bf16.msra.mxu0 %v21810_v5  ;;  %11917 = vmatprep.mubr.bf16.mxu0 %v22336_v30  ;;  %v18307_v5 = vcombine.high %v18305_v42, %v18305_v42 }
0x314f   :  { %11887 = vmatprep.subr.bf16.mxu0 %v21815_v25  ;;  %v21838_v25 = vld [vmem:[%s28269_s3 + $0xf54] ss:$20 sps:$4 sm:$0xff]  }
0x3152   :  { %11888 = vmatpush1.bf16.msra.mxu0 %v21813_v52  ;;  %v21836_v52 = vld [vmem:[%s28269_s3 + $0xf50] ss:$20 sps:$4 sm:$0xff]  }
0x3153   :  { %20883 = vmatprep.subr.bf16.mxu0 %v22335_v23 }
0x3155   :  { %18275 = vmatmul.mubr.msk.bf16.vlgmr.msra.gmra.mrb[116].mxu0 %vm352_vm1, %v11775_v62 }
0x3156   :  { %20884 = vmatpush3.bf16.msra.mxu0 %v21816_v34  ;;  %20887 = vmatprep.mubr.msk.bf16.mxu0 %vm22337_vm0, %v22335_v23  ;;  %v21841_v34 = vld [vmem:[%s28269_s3 + $0xf7c] ss:$20 sps:$4 sm:$0xff]  }
0x3157   :  { %20885 = vmatprep.subr.bf16.mxu0 %v22335_v23 }
0x315a   :  { %20886 = vmatpush3.bf16.msra.mxu0 %v21817_v38  ;;  %v21839_v38 = vld [vmem:[%s28269_s3 + $0xf78] ss:$20 sps:$4 sm:$0xff]  }
0x315b   :  { %20014 = vmatprep.subr.bf16.mxu0 %v26385_v7 }
0x315d   :  { %20888 = vmatmul.mubr.msk.bf16.vlgmr.msra.gmra.mrb[120].mxu0 %vm352_vm1, %v11775_v62  ;;  %v18306_v62 = vcombine.low %v18305_v42, %v18305_v42  ;;  %v21860_v42 = vld [vmem:[%s28269_s3 + $0xfac] ss:$20 sps:$4 sm:$0xff]  }
0x315e   :  { %20015 = vmatpush3.bf16.msra.mxu0 %v26392_v0  ;;  %12012 = vmatprep.mubr.bf16.mxu0 %v18279_v63 }
0x315f   :  { %20016 = vmatprep.subr.bf16.mxu0 %v26398_v1 }
0x3162   :  { %20017 = vmatpush3.bf16.msra.mxu0 %v26478_v56 }
0x3163   :  { %20018 = vmatprep.subr.bf16.mxu0 %v26484_v31 }
0x3166   :  { %20019 = vmatpush3.bf16.msra.mxu0 %v26490_v33 }
0x3167   :  { %20020 = vmatprep.subr.bf16.mxu0 %v26496_v3 }
0x316a   :  { %20021 = vmatpush3.bf16.msra.mxu0 %v26502_v49 }
0x316b   :  { %20022 = vmatprep.subr.bf16.mxu0 %v26508_v50 }
0x316e   :  { %20023 = vmatpush3.bf16.msra.mxu0 %v26514_v40 }
0x316f   :  { %20024 = vmatprep.subr.bf16.mxu0 %v26520_v51 }
0x3172   :  { %20025 = vmatpush3.bf16.msra.mxu0 %v26526_v2 }
0x3173   :  { %20026 = vmatprep.subr.bf16.mxu0 %v26532_v13 }
0x3176   :  { %20027 = vmatpush3.bf16.msra.mxu0 %v26538_v45 }
0x3177   :  { %20028 = vmatprep.subr.bf16.mxu0 %v26618_v15 }
0x317a   :  { %20029 = vmatpush3.bf16.msra.mxu0 %v26624_v37 }
0x317b   :  { %12336 = vmatprep.subr.bf16.mxu0 %v21838_v25 }
0x317d   :  { %12013 = vmatmul.mubr.bf16.vlgmr.msra.gmra.mrb[124].mxu0 %v18278_v41 }
0x317e   :  { %12368 = vmatprep.mubr.bf16.mxu0 %v22336_v30  ;;  %12337 = vmatpush1.bf16.msra.mxu0 %v21836_v52 }
0x317f   :  { %12338 = vmatprep.subr.bf16.mxu0 %v21841_v34 }
0x3182   :  { %12339 = vmatpush1.bf16.msra.mxu0 %v21839_v38 }
0x3183   :  { %12377 = vmatprep.subr.bf16.mxu0 %v21844_v8 }
0x3220   :  { %v11878_v44 = vpop.f32.mrb[112].mxu0 }
0x3221   :  { %v26644_v14 = vadd.f32 %v11878_v44, %v26560_v20  ;;  %v11880_v36 = vpop.f32.mrb[113].mxu0 }
0x3222   :  { %v26647_v53 = vadd.f32 %v11880_v36, %v26563_v60  ;;  %v11882_v54 = vpop.f32.mrb[114].mxu0 }
0x3223   :  { %v11883_v58 = vpop.f32.mrb[115].mxu0 }
0x3228   :  { %v11919_v12 = vpop.f32.mrb[116].mxu0 }
0x3229   :  { %v26650_v59 = vadd.f32 %v11919_v12, %v26566_v9  ;;  %v11921_v4 = vpop.f32.mrb[117].mxu0 }
0x322a   :  { %v26653_v61 = vadd.f32 %v11921_v4, %v26569_v17  ;;  %v11923_v10 = vpop.f32.mrb[118].mxu0  ;;  %v21826_v17 = vld [vmem:[%s28269_s3 + $0xf08] ss:$20 sps:$4 sm:$0xff]  }
0x322b   :  { %v11924_v27 = vpop.f32.mrb[119].mxu0 }
0x3230   :  { %v11960_v11 = vpop.f32.mrb[120].mxu0 }
0x3231   :  { %v26656_v20 = vadd.f32 %v11960_v11, %v26572_v21  ;;  %v20889_v28 = vpop.f32.mrb[121].mxu0  ;;  %v21831_v21 = vld [vmem:[%s28269_s3 + $0xf34] ss:$20 sps:$4 sm:$0xff]  }
0x3232   :  { %v11963_v6 = vpop.f32.mrb[122].mxu0 }
0x3233   :  { %v20890_v60 = vpop.f32.mrb[123].mxu0 }
0x3250   :  { %v20030_v18 = vpop.f32.mrb[124].mxu0 }
0x3251   :  { %v20031_v47 = vpop.f32.mrb[125].mxu0 }
0x3252   :  { %v20032_v32 = vadd.f32 %v20031_v47, %v20030_v18  ;;  %v20033_v19 = vpop.f32.mrb[126].mxu0 }
0x3253   :  { %v20034_v57 = vpop.f32.mrb[127].mxu0  ;;  %v21845_v19 = vld [vmem:[%s28269_s3 + $0xf80] ss:$20 sps:$4 sm:$0xff]  }
0x3254   :  { %v12015_v9 = vadd.f32 %v26280_v39, %v20032_v32  ;;  %v21848_v57 = vld [vmem:[%s28269_s3 + $0xf60] ss:$20 sps:$4 sm:$0xff]  }
0x3256   :  { %v12020_v26 = vmax.f32 %v12015_v9, 0.0  ;;  %v21849_v9 = vld [vmem:[%s28269_s3 + $0xf88] ss:$20 sps:$4 sm:$0xff]  }
0x3258   :  { %v12021_v16 = vpack.c.bf16 %v12020_v26, %v12020_v26  ;;  %v18333_v26 = vld [vmem:[%s28268_s0 + $0x190] sm:$0xff] }
0x325a   :  { %18302 = vmatmul.mubr.msk.bf16.vlgmr.msra.gmra.mrb[132].mxu1 %vm352_vm1, %v12021_v16 }
0x325b   :  { %12132 = vmatpush1.bf16.msra.mxu1 %v21826_v17  ;;  %12163 = vmatprep.mubr.bf16.mxu1 %v22336_v30  ;;  %v18335_v17 = vcombine.high %v18333_v26, %v18333_v26 }
0x325c   :  { %12133 = vmatprep.subr.bf16.mxu1 %v21831_v21  ;;  %v21854_v21 = vld [vmem:[%s28269_s3 + $0xfa4] ss:$20 sps:$4 sm:$0xff]  }
0x325f   :  { %12134 = vmatpush1.bf16.msra.mxu1 %v21829_v22  ;;  %v21852_v22 = vld [vmem:[%s28269_s3 + $0xfa0] ss:$20 sps:$4 sm:$0xff]  }
0x3260   :  { %20891 = vmatprep.subr.bf16.mxu1 %v22335_v23 }
0x3262   :  { %18303 = vmatmul.mubr.msk.bf16.vlgmr.msra.gmra.mrb[136].mxu1 %vm352_vm1, %v12021_v16 }
0x3263   :  { %20892 = vmatpush3.bf16.msra.mxu1 %v21832_v35  ;;  %20895 = vmatprep.mubr.msk.bf16.mxu1 %vm22337_vm0, %v22335_v23  ;;  %v21857_v35 = vld [vmem:[%s28269_s3 + $0xfcc] ss:$20 sps:$4 sm:$0xff]  }
0x3264   :  { %20893 = vmatprep.subr.bf16.mxu1 %v22335_v23 }
0x3267   :  { %20894 = vmatpush3.bf16.msra.mxu1 %v21833_v55  ;;  %v21855_v55 = vld [vmem:[%s28269_s3 + $0xfc8] ss:$20 sps:$4 sm:$0xff]  }
0x3268   :  { %20039 = vmatprep.subr.bf16.mxu1 %v26385_v7 }
0x326a   :  { %20896 = vmatmul.mubr.msk.bf16.vlgmr.msra.gmra.mrb[140].mxu1 %vm352_vm1, %v12021_v16  ;;  %v18334_v16 = vcombine.low %v18333_v26, %v18333_v26 }
0x326b   :  { %20040 = vmatpush3.bf16.msra.mxu1 %v26392_v0  ;;  %12258 = vmatprep.mubr.bf16.mxu1 %v18307_v5 }
0x326c   :  { %20041 = vmatprep.subr.bf16.mxu1 %v26398_v1 }
0x326f   :  { %20042 = vmatpush3.bf16.msra.mxu1 %v26478_v56 }
0x3270   :  { %20043 = vmatprep.subr.bf16.mxu1 %v26484_v31 }
0x3273   :  { %20044 = vmatpush3.bf16.msra.mxu1 %v26490_v33 }
0x3274   :  { %20045 = vmatprep.subr.bf16.mxu1 %v26496_v3 }
0x3277   :  { %20046 = vmatpush3.bf16.msra.mxu1 %v26502_v49 }
0x3278   :  { %20047 = vmatprep.subr.bf16.mxu1 %v26508_v50 }
0x327b   :  { %20048 = vmatpush3.bf16.msra.mxu1 %v26514_v40 }
0x327c   :  { %20049 = vmatprep.subr.bf16.mxu1 %v26520_v51 }
0x327f   :  { %20050 = vmatpush3.bf16.msra.mxu1 %v26526_v2 }
0x3280   :  { %20051 = vmatprep.subr.bf16.mxu1 %v26532_v13 }
0x3283   :  { %20052 = vmatpush3.bf16.msra.mxu1 %v26538_v45 }
0x3284   :  { %20053 = vmatprep.subr.bf16.mxu1 %v26618_v15 }
0x3287   :  { %20054 = vmatpush3.bf16.msra.mxu1 %v26624_v37 }
0x3288   :  { %12582 = vmatprep.subr.bf16.mxu1 %v21854_v21 }
0x328a   :  { %12259 = vmatmul.mubr.bf16.vlgmr.msra.gmra.mrb[144].mxu1 %v18306_v62 }
0x328b   :  { %12614 = vmatprep.mubr.bf16.mxu1 %v22336_v30  ;;  %12583 = vmatpush1.bf16.msra.mxu1 %v21852_v22 }
0x328c   :  { %12584 = vmatprep.subr.bf16.mxu1 %v21857_v35 }
0x328f   :  { %12585 = vmatpush1.bf16.msra.mxu1 %v21855_v55 }
0x3290   :  { %12623 = vmatprep.subr.bf16.mxu1 %v21860_v42 }
0x332d   :  { %v12124_v63 = vpop.f32.mrb[132].mxu1 }
0x332e   :  { %v26718_v41 = vadd.f32 %v12124_v63, %v26644_v14  ;;  %v12126_v24 = vpop.f32.mrb[133].mxu1 }
0x332f   :  { %v26721_v43 = vadd.f32 %v12126_v24, %v26647_v53  ;;  %v12128_v46 = vpop.f32.mrb[134].mxu1 }
0x3330   :  { %v12129_v29 = vpop.f32.mrb[135].mxu1 }
0x3335   :  { %v12165_v48 = vpop.f32.mrb[136].mxu1 }
0x3336   :  { %v26724_v44 = vadd.f32 %v12165_v48, %v26650_v59  ;;  %v12167_v36 = vpop.f32.mrb[137].mxu1 }
0x3337   :  { %v26727_v54 = vadd.f32 %v12167_v36, %v26653_v61  ;;  %v12169_v58 = vpop.f32.mrb[138].mxu1  ;;  %v21842_v61 = vld [vmem:[%s28269_s3 + $0xf58] ss:$20 sps:$4 sm:$0xff]  }
0x3338   :  { %v12170_v12 = vpop.f32.mrb[139].mxu1 }
0x333d   :  { %v12206_v4 = vpop.f32.mrb[140].mxu1 }
0x333e   :  { %v26730_v14 = vadd.f32 %v12206_v4, %v26656_v20  ;;  %v20897_v10 = vpop.f32.mrb[141].mxu1  ;;  %v21847_v20 = vld [vmem:[%s28269_s3 + $0xf84] ss:$20 sps:$4 sm:$0xff]  }
0x333f   :  { %v12209_v27 = vpop.f32.mrb[142].mxu1 }
0x3340   :  { %v20898_v53 = vpop.f32.mrb[143].mxu1 }
0x335d   :  { %v20055_v11 = vpop.f32.mrb[144].mxu1 }
0x335e   :  { %v20056_v28 = vpop.f32.mrb[145].mxu1 }
0x335f   :  { %v20057_v6 = vadd.f32 %v20056_v28, %v20055_v11  ;;  %v20058_v60 = vpop.f32.mrb[146].mxu1 }
0x3360   :  { %v20059_v18 = vpop.f32.mrb[147].mxu1  ;;  %v21861_v60 = vld [vmem:[%s28269_s3 + $0xfd0] ss:$20 sps:$4 sm:$0xff]  }
0x3361   :  { %v12261_v59 = vadd.f32 %v26280_v39, %v20057_v6  ;;  %v21865_v18 = vld [vmem:[%s28269_s3 + $0xfd8] ss:$20 sps:$4 sm:$0xff]  }
0x3363   :  { %v12266_v47 = vmax.f32 %v12261_v59, 0.0  ;;  %v18361_v59 = vld [vmem:[%s28268_s0 + $0x198] sm:$0xff] }
0x3365   :  { %v12267_v32 = vpack.c.bf16 %v12266_v47, %v12266_v47  ;;  %v18363_v47 = vcombine.high %v18361_v59, %v18361_v59 }
0x3367   :  { %18330 = vmatmul.mubr.msk.bf16.vlgmr.msra.gmra.mrb[128].mxu0 %vm352_vm1, %v12267_v32 }
0x3368   :  { %12378 = vmatpush1.bf16.msra.mxu0 %v21842_v61  ;;  %12409 = vmatprep.mubr.bf16.mxu0 %v22336_v30  ;;  %v18362_v61 = vcombine.low %v18361_v59, %v18361_v59 }
0x3369   :  { %12379 = vmatprep.subr.bf16.mxu0 %v21847_v20  ;;  %v21868_v20 = vld [vmem:[%s28269_s3 + $0xff0] ss:$20 sps:$4 sm:$0xff]  }
0x336c   :  { %12380 = vmatpush1.bf16.msra.mxu0 %v21845_v19  ;;  %v21873_v19 = vld [vmem:[%s28269_s3 + $0x101c] ss:$20 sps:$4 sm:$0xff]  }
0x336d   :  { %20899 = vmatprep.subr.bf16.mxu0 %v22335_v23 }
0x336f   :  { %18331 = vmatmul.mubr.msk.bf16.vlgmr.msra.gmra.mrb[132].mxu0 %vm352_vm1, %v12267_v32 }
0x3370   :  { %20900 = vmatpush3.bf16.msra.mxu0 %v21848_v57  ;;  %20903 = vmatprep.mubr.msk.bf16.mxu0 %vm22337_vm0, %v22335_v23  ;;  %v21871_v57 = vld [vmem:[%s28269_s3 + $0x1018] ss:$20 sps:$4 sm:$0xff]  }
0x3371   :  { %20901 = vmatprep.subr.bf16.mxu0 %v22335_v23 }
0x3374   :  { %20902 = vmatpush3.bf16.msra.mxu0 %v21849_v9  ;;  %v21876_v9 = vld [vmem:[%s28269_s3 + $0xffc] ss:$20 sps:$4 sm:$0xff]  }
0x3375   :  { %20064 = vmatprep.subr.bf16.mxu0 %v26385_v7 }
0x3377   :  { %20904 = vmatmul.mubr.msk.bf16.vlgmr.msra.gmra.mrb[136].mxu0 %vm352_vm1, %v12267_v32  ;;  %v21870_v32 = vld [vmem:[%s28269_s3 + $0xff4] ss:$20 sps:$4 sm:$0xff]  }
0x3378   :  { %20065 = vmatpush3.bf16.msra.mxu0 %v26392_v0  ;;  %12504 = vmatprep.mubr.bf16.mxu0 %v18335_v17 }
0x3379   :  { %20066 = vmatprep.subr.bf16.mxu0 %v26398_v1 }
0x337c   :  { %20067 = vmatpush3.bf16.msra.mxu0 %v26478_v56 }
0x337d   :  { %20068 = vmatprep.subr.bf16.mxu0 %v26484_v31 }
0x3380   :  { %20069 = vmatpush3.bf16.msra.mxu0 %v26490_v33 }
0x3381   :  { %20070 = vmatprep.subr.bf16.mxu0 %v26496_v3 }
0x3384   :  { %20071 = vmatpush3.bf16.msra.mxu0 %v26502_v49 }
0x3385   :  { %20072 = vmatprep.subr.bf16.mxu0 %v26508_v50 }
0x3388   :  { %20073 = vmatpush3.bf16.msra.mxu0 %v26514_v40 }
0x3389   :  { %20074 = vmatprep.subr.bf16.mxu0 %v26520_v51 }
0x338c   :  { %20075 = vmatpush3.bf16.msra.mxu0 %v26526_v2 }
0x338d   :  { %20076 = vmatprep.subr.bf16.mxu0 %v26532_v13 }
0x3390   :  { %20077 = vmatpush3.bf16.msra.mxu0 %v26538_v45 }
0x3391   :  { %20078 = vmatprep.subr.bf16.mxu0 %v26618_v15 }
0x3394   :  { %20079 = vmatpush3.bf16.msra.mxu0 %v26624_v37 }
0x3395   :  { %12828 = vmatprep.subr.bf16.mxu0 %v21870_v32 }
0x3397   :  { %12505 = vmatmul.mubr.bf16.vlgmr.msra.gmra.mrb[140].mxu0 %v18334_v16 }
0x3398   :  { %12860 = vmatprep.mubr.bf16.mxu0 %v22336_v30  ;;  %12829 = vmatpush1.bf16.msra.mxu0 %v21868_v20 }
0x3399   :  { %12830 = vmatprep.subr.bf16.mxu0 %v21873_v19 }
0x339c   :  { %12831 = vmatpush1.bf16.msra.mxu0 %v21871_v57 }
0x339d   :  { %12869 = vmatprep.subr.bf16.mxu0 %v21876_v9 }
0x343a   :  { %v12370_v5 = vpop.f32.mrb[128].mxu0 }
0x343b   :  { %v26792_v62 = vadd.f32 %v12370_v5, %v26718_v41  ;;  %v12372_v25 = vpop.f32.mrb[129].mxu0 }
0x343c   :  { %v26795_v52 = vadd.f32 %v12372_v25, %v26721_v43  ;;  %v12374_v34 = vpop.f32.mrb[130].mxu0 }
0x343d   :  { %v12375_v38 = vpop.f32.mrb[131].mxu0 }
0x3442   :  { %v12411_v8 = vpop.f32.mrb[132].mxu0 }
0x3443   :  { %v26798_v63 = vadd.f32 %v12411_v8, %v26724_v44  ;;  %v12413_v24 = vpop.f32.mrb[133].mxu0 }
0x3444   :  { %v26801_v46 = vadd.f32 %v12413_v24, %v26727_v54  ;;  %v12415_v29 = vpop.f32.mrb[134].mxu0  ;;  %v21858_v54 = vld [vmem:[%s28269_s3 + $0xfa8] ss:$20 sps:$4 sm:$0xff]  }
0x3445   :  { %v12416_v48 = vpop.f32.mrb[135].mxu0 }
0x344a   :  { %v12452_v36 = vpop.f32.mrb[136].mxu0 }
0x344b   :  { %v26804_v41 = vadd.f32 %v12452_v36, %v26730_v14  ;;  %v20905_v58 = vpop.f32.mrb[137].mxu0  ;;  %v21863_v14 = vld [vmem:[%s28269_s3 + $0xfd4] ss:$20 sps:$4 sm:$0xff]  }
0x344c   :  { %v12455_v12 = vpop.f32.mrb[138].mxu0 }
0x344d   :  { %v20906_v43 = vpop.f32.mrb[139].mxu0 }
0x346a   :  { %v20080_v4 = vpop.f32.mrb[140].mxu0 }
0x346b   :  { %v20081_v10 = vpop.f32.mrb[141].mxu0 }
0x346c   :  { %v20082_v27 = vadd.f32 %v20081_v10, %v20080_v4  ;;  %v20083_v53 = vpop.f32.mrb[142].mxu0 }
0x346d   :  { %v20084_v11 = vpop.f32.mrb[143].mxu0  ;;  %v21877_v53 = vld [vmem:[%s28269_s3 + $0x1020] ss:$20 sps:$4 sm:$0xff]  }
0x346e   :  { %v12507_v44 = vadd.f32 %v26280_v39, %v20082_v27  ;;  %v21864_v39 = vld [vmem:[%s28269_s3 + $0xfb0] ss:$20 sps:$4 sm:$0xff]   ;;  %v21880_v11 = vld [vmem:[%s28269_s3 + $0x1000] ss:$20 sps:$4 sm:$0xff]  }
0x346f   :  { %v21879_v27 = vld [vmem:[%s28269_s3 + $0x1024] ss:$20 sps:$4 sm:$0xff]  }
0x3470   :  { %v12512_v28 = vmax.f32 %v12507_v44, 0.0  ;;  %v21881_v44 = vld [vmem:[%s28269_s3 + $0x1028] ss:$20 sps:$4 sm:$0xff]  }
0x3472   :  { %v12513_v6 = vpack.c.bf16 %v12512_v28, %v12512_v28  ;;  %v18389_v28 = vld [vmem:[%s28268_s0 + $0x1a0] sm:$0xff] }
0x3474   :  { %18358 = vmatmul.mubr.msk.bf16.vlgmr.msra.gmra.mrb[148].mxu1 %vm352_vm1, %v12513_v6 }
0x3475   :  { %12624 = vmatpush1.bf16.msra.mxu1 %v21858_v54  ;;  %12655 = vmatprep.mubr.bf16.mxu1 %v22336_v30  ;;  %v18391_v54 = vcombine.high %v18389_v28, %v18389_v28 }
0x3476   :  { %12625 = vmatprep.subr.bf16.mxu1 %v21863_v14  ;;  %v21887_v14 = vld [vmem:[%s28269_s3 + $0x1068] ss:$20 sps:$4 sm:$0xff]  }
0x3479   :  { %12626 = vmatpush1.bf16.msra.mxu1 %v21861_v60  ;;  %v21892_v60 = vld [vmem:[%s28269_s3 + $0x104c] ss:$20 sps:$4 sm:$0xff]  }
0x347a   :  { %20907 = vmatprep.subr.bf16.mxu1 %v22335_v23 }
0x347c   :  { %18359 = vmatmul.mubr.msk.bf16.vlgmr.msra.gmra.mrb[152].mxu1 %vm352_vm1, %v12513_v6 }
0x347d   :  { %20908 = vmatpush3.bf16.msra.mxu1 %v21864_v39  ;;  %20911 = vmatprep.mubr.msk.bf16.mxu1 %vm22337_vm0, %v22335_v23 }
0x347e   :  { %20909 = vmatprep.subr.bf16.mxu1 %v22335_v23 }
0x3481   :  { %20910 = vmatpush3.bf16.msra.mxu1 %v21865_v18 }
0x3482   :  { %20089 = vmatprep.subr.bf16.mxu1 %v26385_v7 }
0x3484   :  { %20912 = vmatmul.mubr.msk.bf16.vlgmr.msra.gmra.mrb[156].mxu1 %vm352_vm1, %v12513_v6  ;;  %v21889_v6 = vld [vmem:[%s28269_s3 + $0x106c] ss:$20 sps:$4 sm:$0xff]  }
0x3485   :  { %20090 = vmatpush3.bf16.msra.mxu1 %v26392_v0  ;;  %12750 = vmatprep.mubr.bf16.mxu1 %v18363_v47 }
0x3486   :  { %20091 = vmatprep.subr.bf16.mxu1 %v26398_v1 }
0x3489   :  { %20092 = vmatpush3.bf16.msra.mxu1 %v26478_v56 }
0x348a   :  { %20093 = vmatprep.subr.bf16.mxu1 %v26484_v31 }
0x348d   :  { %20094 = vmatpush3.bf16.msra.mxu1 %v26490_v33 }
0x348e   :  { %20095 = vmatprep.subr.bf16.mxu1 %v26496_v3 }
0x3491   :  { %20096 = vmatpush3.bf16.msra.mxu1 %v26502_v49 }
0x3492   :  { %20097 = vmatprep.subr.bf16.mxu1 %v26508_v50 }
0x3495   :  { %20098 = vmatpush3.bf16.msra.mxu1 %v26514_v40 }
0x3496   :  { %20099 = vmatprep.subr.bf16.mxu1 %v26520_v51 }
0x3499   :  { %20100 = vmatpush3.bf16.msra.mxu1 %v26526_v2 }
0x349a   :  { %20101 = vmatprep.subr.bf16.mxu1 %v26532_v13 }
0x349d   :  { %20102 = vmatpush3.bf16.msra.mxu1 %v26538_v45 }
0x349e   :  { %20103 = vmatprep.subr.bf16.mxu1 %v26618_v15 }
0x34a1   :  { %20104 = vmatpush3.bf16.msra.mxu1 %v26624_v37 }
0x34a4   :  { %12751 = vmatmul.mubr.bf16.vlgmr.msra.gmra.mrb[160].mxu1 %v18362_v61 }
0x34a5   :  { %13106 = vmatprep.mubr.bf16.mxu1 %v22336_v30 }
0x3547   :  { %v12616_v26 = vpop.f32.mrb[148].mxu1 }
0x3548   :  { %v26866_v17 = vadd.f32 %v12616_v26, %v26792_v62  ;;  %v12618_v16 = vpop.f32.mrb[149].mxu1 }
0x3549   :  { %v26869_v21 = vadd.f32 %v12618_v16, %v26795_v52  ;;  %v12620_v22 = vpop.f32.mrb[150].mxu1 }
0x354a   :  { %v12621_v35 = vpop.f32.mrb[151].mxu1 }
0x354f   :  { %v12657_v55 = vpop.f32.mrb[152].mxu1 }
0x3550   :  { %v26872_v42 = vadd.f32 %v12657_v55, %v26798_v63  ;;  %v12659_v5 = vpop.f32.mrb[153].mxu1  ;;  %v26883_v63 = vld [vmem:[%s28270_s2] ss:$0 sm:$0xff] }
0x3551   :  { %v26875_v25 = vadd.f32 %v12659_v5, %v26801_v46  ;;  %v12661_v34 = vpop.f32.mrb[154].mxu1 }
0x3552   :  { %v12662_v38 = vpop.f32.mrb[155].mxu1 }
0x3557   :  { %v12698_v8 = vpop.f32.mrb[156].mxu1 }
0x3558   :  { %v26878_v62 = vadd.f32 %v12698_v8, %v26804_v41  ;;  %v20913_v24 = vpop.f32.mrb[157].mxu1  ;;  %v21874_v41 = vld [vmem:[%s28269_s3 + $0xff8] ss:$20 sps:$4 sm:$0xff]  }
0x3559   :  { %v12701_v29 = vpop.f32.mrb[158].mxu1 }
0x355a   :  { %v20914_v52 = vpop.f32.mrb[159].mxu1 }
0x3577   :  { %v20105_v48 = vpop.f32.mrb[160].mxu1 }
0x3578   :  { %v20106_v36 = vpop.f32.mrb[161].mxu1 }
0x3579   :  { %v20107_v58 = vadd.f32 %v20106_v36, %v20105_v48  ;;  %v20108_v12 = vpop.f32.mrb[162].mxu1  ;;  %v21893_v48 = vld [vmem:[%s28269_s3 + $0x1070] ss:$20 sps:$4 sm:$0xff]  }
0x357a   :  { %v20109_v43 = vpop.f32.mrb[163].mxu1  ;;  %v21896_v36 = vld [vmem:[%s28269_s3 + $0x1050] ss:$20 sps:$4 sm:$0xff]   ;;  %v18417_v12 = vld [vmem:[%s28268_s0 + $0x1a8] sm:$0xff] }
0x357b   :  { %v12753_v46 = vadd.f32 %v26883_v63, %v20107_v58  ;;  %v21897_v58 = vld [vmem:[%s28269_s3 + $0x1078] ss:$20 sps:$4 sm:$0xff]   ;;  %v18419_v43 = vcombine.high %v18417_v12, %v18417_v12 }
0x357d   :  { %v12758_v4 = vmax.f32 %v12753_v46, 0.0  ;;  %v26988_v46 = vld [vmem:[%s28267_s1 + $0x40] sm:$0xff]  }
0x357f   :  { %v12759_v10 = vpack.c.bf16 %v12758_v4, %v12758_v4  ;;  %v26995_v4 = vld [vmem:[%s28267_s1] sm:$0xff]  }
0x3581   :  { %18386 = vmatmul.mubr.msk.bf16.vlgmr.msra.gmra.mrb[144].mxu0 %vm352_vm1, %v12759_v10 }
0x3582   :  { %12870 = vmatpush1.bf16.msra.mxu0 %v21874_v41  ;;  %12901 = vmatprep.mubr.bf16.mxu0 %v22336_v30  ;;  %v27001_v41 = vld [vmem:[%s28267_s1 + $0x48] sm:$0xff]  }
0x3583   :  { %12871 = vmatprep.subr.bf16.mxu0 %v21879_v27 }
0x3586   :  { %12872 = vmatpush1.bf16.msra.mxu0 %v21877_v53 }
0x3587   :  { %20915 = vmatprep.subr.bf16.mxu0 %v22335_v23 }
0x3589   :  { %18387 = vmatmul.mubr.msk.bf16.vlgmr.msra.gmra.mrb[148].mxu0 %vm352_vm1, %v12759_v10 }
0x358a   :  { %20916 = vmatpush3.bf16.msra.mxu0 %v21880_v11  ;;  %20919 = vmatprep.mubr.msk.bf16.mxu0 %vm22337_vm0, %v22335_v23 }
0x358b   :  { %20917 = vmatprep.subr.bf16.mxu0 %v22335_v23 }
0x358e   :  { %20918 = vmatpush3.bf16.msra.mxu0 %v21881_v44 }
0x358f   :  { %20114 = vmatprep.subr.bf16.mxu0 %v26385_v7  ;;  %v18390_v7 = vcombine.low %v18389_v28, %v18389_v28 }
0x3591   :  { %20920 = vmatmul.mubr.msk.bf16.vlgmr.msra.gmra.mrb[152].mxu0 %vm352_vm1, %v12759_v10 }
0x3592   :  { %20115 = vmatpush3.bf16.msra.mxu0 %v26392_v0  ;;  %12996 = vmatprep.mubr.bf16.mxu0 %v18391_v54  ;;  %v21886_v0 = vld [vmem:[%s28269_s3 + $0x1044] ss:$20 sps:$4 sm:$0xff]  }
0x3593   :  { %20116 = vmatprep.subr.bf16.mxu0 %v26398_v1  ;;  %v21884_v1 = vld [vmem:[%s28269_s3 + $0x1040] ss:$20 sps:$4 sm:$0xff]   ;;  %13074 = vmatprep.subr.bf16.mxu1 %v21886_v0 }
0x3594   :  { %13075 = vmatpush1.bf16.msra.mxu1 %v21884_v1 }
0x3595   :  { %13076 = vmatprep.subr.bf16.mxu1 %v21889_v6 }
0x3596   :  { %20117 = vmatpush3.bf16.msra.mxu0 %v26478_v56 }
0x3597   :  { %20118 = vmatprep.subr.bf16.mxu0 %v26484_v31 }
0x3598   :  { %13077 = vmatpush1.bf16.msra.mxu1 %v21887_v14 }
0x3599   :  { %13115 = vmatprep.subr.bf16.mxu1 %v21892_v60 }
0x359a   :  { %20119 = vmatpush3.bf16.msra.mxu0 %v26490_v33 }
0x359b   :  { %20120 = vmatprep.subr.bf16.mxu0 %v26496_v3 }
0x359e   :  { %20121 = vmatpush3.bf16.msra.mxu0 %v26502_v49 }
0x359f   :  { %20122 = vmatprep.subr.bf16.mxu0 %v26508_v50 }
0x35a2   :  { %20123 = vmatpush3.bf16.msra.mxu0 %v26514_v40 }
0x35a3   :  { %20124 = vmatprep.subr.bf16.mxu0 %v26520_v51 }
0x35a6   :  { %20125 = vmatpush3.bf16.msra.mxu0 %v26526_v2 }
0x35a7   :  { %20126 = vmatprep.subr.bf16.mxu0 %v26532_v13 }
0x35aa   :  { %20127 = vmatpush3.bf16.msra.mxu0 %v26538_v45 }
0x35ab   :  { %20128 = vmatprep.subr.bf16.mxu0 %v26618_v15 }
0x35ae   :  { %20129 = vmatpush3.bf16.msra.mxu0 %v26624_v37 }
0x35b1   :  { %12997 = vmatmul.mubr.bf16.vlgmr.msra.gmra.mrb[156].mxu0 %v18390_v7 }
0x35b2   :  { %13352 = vmatprep.mubr.bf16.mxu0 %v22336_v30 }
0x3654   :  { %v12862_v39 = vpop.f32.mrb[144].mxu0 }
0x3655   :  { %v26945_v18 = vadd.f32 %v12862_v39, %v26866_v17  ;;  %v12864_v59 = vpop.f32.mrb[145].mxu0 }
0x3656   :  { %v26948_v47 = vadd.f32 %v12864_v59, %v26869_v21  ;;  %v12866_v61 = vpop.f32.mrb[146].mxu0 }
0x3657   :  { %v12867_v32 = vpop.f32.mrb[147].mxu0 }
0x365c   :  { %v12903_v20 = vpop.f32.mrb[148].mxu0 }
0x365d   :  { %v26951_v19 = vadd.f32 %v12903_v20, %v26872_v42  ;;  %v12905_v57 = vpop.f32.mrb[149].mxu0  ;;  %v21906_v20 = vld [vmem:[%s28269_s3 + $0x1098] ss:$20 sps:$4 sm:$0xff]  }
0x365e   :  { %v26954_v9 = vadd.f32 %v12905_v57, %v26875_v25  ;;  %v12907_v26 = vpop.f32.mrb[150].mxu0  ;;  %v21890_v25 = vld [vmem:[%s28269_s3 + $0x1048] ss:$20 sps:$4 sm:$0xff]   ;;  %v21911_v57 = vld [vmem:[%s28269_s3 + $0x10c4] ss:$20 sps:$4 sm:$0xff]  }
0x365f   :  { %v12908_v16 = vpop.f32.mrb[151].mxu0  ;;  %v21912_v26 = vld [vmem:[%s28269_s3 + $0x10a0] ss:$20 sps:$4 sm:$0xff]  }
0x3660   :  { %v21913_v16 = vld [vmem:[%s28269_s3 + $0x10c8] ss:$20 sps:$4 sm:$0xff]  }
0x3664   :  { %v12944_v22 = vpop.f32.mrb[152].mxu0 }
0x3665   :  { %v26957_v17 = vadd.f32 %v12944_v22, %v26878_v62  ;;  %v20921_v35 = vpop.f32.mrb[153].mxu0  ;;  %v21895_v62 = vld [vmem:[%s28269_s3 + $0x1074] ss:$20 sps:$4 sm:$0xff]  }
0x3666   :  { %v12947_v55 = vpop.f32.mrb[154].mxu0  ;;  %v18445_v22 = vld [vmem:[%s28268_s0 + $0x1b0] sm:$0xff]  ;;  %v27081_v35 = vld [vmem:[%s28267_s1 + $0x8] sm:$0xff]  }
0x3667   :  { %v20922_v21 = vpop.f32.mrb[155].mxu0  ;;  %v27087_v55 = vld [vmem:[%s28267_s1 + $0x50] sm:$0xff]  }
0x3668   :  { %v27093_v21 = vld [vmem:[%s28267_s1 + $0x10] sm:$0xff]  }
0x3684   :  { %v20130_v5 = vpop.f32.mrb[156].mxu0 }
0x3685   :  { %v20131_v34 = vpop.f32.mrb[157].mxu0 }
0x3686   :  { %v20132_v38 = vadd.f32 %v20131_v34, %v20130_v5  ;;  %v20133_v8 = vpop.f32.mrb[158].mxu0  ;;  %v27099_v5 = vld [vmem:[%s28267_s1 + $0x58] sm:$0xff]  }
0x3687   :  { %v20134_v24 = vpop.f32.mrb[159].mxu0  ;;  %v27105_v34 = vld [vmem:[%s28267_s1 + $0x18] sm:$0xff]   ;;  %v27117_v8 = vld [vmem:[%s28267_s1 + $0x20] sm:$0xff]  }
0x3688   :  { %v12999_v42 = vadd.f32 %v26883_v63, %v20132_v38  ;;  %v27111_v38 = vld [vmem:[%s28267_s1 + $0x60] sm:$0xff]   ;;  %v27123_v24 = vld [vmem:[%s28267_s1 + $0x68] sm:$0xff]  }
0x368a   :  { %v13004_v29 = vmax.f32 %v12999_v42, 0.0  ;;  %v27129_v42 = vld [vmem:[%s28267_s1 + $0x28] sm:$0xff]  }
0x368c   :  { %v13005_v52 = vpack.c.bf16 %v13004_v29, %v13004_v29  ;;  %v27135_v29 = vld [vmem:[%s28267_s1 + $0x70] sm:$0xff]  }
0x368e   :  { %18414 = vmatmul.mubr.msk.bf16.vlgmr.msra.gmra.mrb[164].mxu1 %vm352_vm1, %v13005_v52 }
0x368f   :  { %13116 = vmatpush1.bf16.msra.mxu1 %v21890_v25  ;;  %13147 = vmatprep.mubr.bf16.mxu1 %v22336_v30  ;;  %v27141_v25 = vld [vmem:[%s28267_s1 + $0x30] sm:$0xff]  }
0x3690   :  { %13117 = vmatprep.subr.bf16.mxu1 %v21895_v62  ;;  %v21918_v62 = vld [vmem:[%s28269_s3 + $0x10e4] ss:$20 sps:$4 sm:$0xff]  }
0x3693   :  { %13118 = vmatpush1.bf16.msra.mxu1 %v21893_v48  ;;  %v21916_v48 = vld [vmem:[%s28269_s3 + $0x10e0] ss:$20 sps:$4 sm:$0xff]  }
0x3694   :  { %20923 = vmatprep.subr.bf16.mxu1 %v22335_v23 }
0x3696   :  { %18415 = vmatmul.mubr.msk.bf16.vlgmr.msra.gmra.mrb[168].mxu1 %vm352_vm1, %v13005_v52 }
0x3697   :  { %20924 = vmatpush3.bf16.msra.mxu1 %v21896_v36  ;;  %20927 = vmatprep.mubr.msk.bf16.mxu1 %vm22337_vm0, %v22335_v23  ;;  %v21924_v36 = vld [vmem:[%s28269_s3 + $0x10ec] ss:$20 sps:$4 sm:$0xff]  }
0x3698   :  { %20925 = vmatprep.subr.bf16.mxu1 %v22335_v23 }
0x369b   :  { %20926 = vmatpush3.bf16.msra.mxu1 %v21897_v58 }
0x369c   :  { %20139 = vmatprep.subr.bf16.mxu1 %v26988_v46 }
0x369e   :  { %20928 = vmatmul.mubr.msk.bf16.vlgmr.msra.gmra.mrb[172].mxu1 %vm352_vm1, %v13005_v52  ;;  %v18446_v52 = vcombine.low %v18445_v22, %v18445_v22 }
0x369f   :  { %20140 = vmatpush3.bf16.msra.mxu1 %v26995_v4  ;;  %13242 = vmatprep.mubr.bf16.mxu1 %v18419_v43 }
0x36a0   :  { %20141 = vmatprep.subr.bf16.mxu1 %v27001_v41 }
0x36a3   :  { %20142 = vmatpush3.bf16.msra.mxu1 %v26478_v56  ;;  %v18418_v56 = vcombine.low %v18417_v12, %v18417_v12 }
0x36a4   :  { %20143 = vmatprep.subr.bf16.mxu1 %v26484_v31  ;;  %v21902_v31 = vld [vmem:[%s28269_s3 + $0x1094] ss:$20 sps:$4 sm:$0xff]  }
0x36a5   :  { %13320 = vmatprep.subr.bf16.mxu0 %v21902_v31 }
0x36a7   :  { %20144 = vmatpush3.bf16.msra.mxu1 %v26490_v33  ;;  %v21900_v33 = vld [vmem:[%s28269_s3 + $0x1090] ss:$20 sps:$4 sm:$0xff]  }
0x36a8   :  { %20145 = vmatprep.subr.bf16.mxu1 %v26496_v3  ;;  %13321 = vmatpush1.bf16.msra.mxu0 %v21900_v33  ;;  %v21905_v3 = vld [vmem:[%s28269_s3 + $0x10bc] ss:$20 sps:$4 sm:$0xff]  }
0x36a9   :  { %13322 = vmatprep.subr.bf16.mxu0 %v21905_v3 }
0x36ab   :  { %20146 = vmatpush3.bf16.msra.mxu1 %v26502_v49  ;;  %v21903_v49 = vld [vmem:[%s28269_s3 + $0x10b8] ss:$20 sps:$4 sm:$0xff]  }
0x36ac   :  { %20147 = vmatprep.subr.bf16.mxu1 %v26508_v50  ;;  %13323 = vmatpush1.bf16.msra.mxu0 %v21903_v49  ;;  %v21908_v50 = vld [vmem:[%s28269_s3 + $0x109c] ss:$20 sps:$4 sm:$0xff]  }
0x36ad   :  { %13361 = vmatprep.subr.bf16.mxu0 %v21908_v50 }
0x36af   :  { %20148 = vmatpush3.bf16.msra.mxu1 %v26514_v40 }
0x36b0   :  { %20149 = vmatprep.subr.bf16.mxu1 %v26520_v51 }
0x36b3   :  { %20150 = vmatpush3.bf16.msra.mxu1 %v26526_v2 }
0x36b4   :  { %20151 = vmatprep.subr.bf16.mxu1 %v26532_v13 }
0x36b7   :  { %20152 = vmatpush3.bf16.msra.mxu1 %v26538_v45 }
0x36b8   :  { %20153 = vmatprep.subr.bf16.mxu1 %v26618_v15 }
0x36bb   :  { %20154 = vmatpush3.bf16.msra.mxu1 %v26624_v37 }
0x36bc   :  { %13566 = vmatprep.subr.bf16.mxu1 %v21918_v62 }
0x36be   :  { %13243 = vmatmul.mubr.bf16.vlgmr.msra.gmra.mrb[176].mxu1 %v18418_v56 }
0x36bf   :  { %13598 = vmatprep.mubr.bf16.mxu1 %v22336_v30  ;;  %13567 = vmatpush1.bf16.msra.mxu1 %v21916_v48 }
0x3761   :  { %v13108_v40 = vpop.f32.mrb[164].mxu1 }
0x3762   :  { %v27034_v51 = vadd.f32 %v13108_v40, %v26945_v18  ;;  %v13110_v2 = vpop.f32.mrb[165].mxu1 }
0x3763   :  { %v27037_v13 = vadd.f32 %v13110_v2, %v26948_v47  ;;  %v13112_v45 = vpop.f32.mrb[166].mxu1 }
0x3764   :  { %v13113_v10 = vpop.f32.mrb[167].mxu1 }
0x3769   :  { %v13149_v27 = vpop.f32.mrb[168].mxu1 }
0x376a   :  { %v27040_v53 = vadd.f32 %v13149_v27, %v26951_v19  ;;  %v13151_v11 = vpop.f32.mrb[169].mxu1 }
0x376b   :  { %v27043_v44 = vadd.f32 %v13151_v11, %v26954_v9  ;;  %v13153_v28 = vpop.f32.mrb[170].mxu1  ;;  %v21909_v9 = vld [vmem:[%s28269_s3 + $0x10c0] ss:$20 sps:$4 sm:$0xff]  }
0x376c   :  { %v13154_v54 = vpop.f32.mrb[171].mxu1 }
0x3771   :  { %v13190_v7 = vpop.f32.mrb[172].mxu1 }
0x3772   :  { %v27046_v0 = vadd.f32 %v13190_v7, %v26957_v17  ;;  %v20929_v1 = vpop.f32.mrb[173].mxu1  ;;  %v18447_v17 = vcombine.high %v18445_v22, %v18445_v22  ;;  %v21940_v22 = vld [vmem:[%s28269_s3 + $0x113c] ss:$20 sps:$4 sm:$0xff]  }
0x3773   :  { %v13193_v6 = vpop.f32.mrb[174].mxu1 }
0x3774   :  { %v20930_v14 = vpop.f32.mrb[175].mxu1 }
0x3791   :  { %v20155_v60 = vpop.f32.mrb[176].mxu1 }
0x3792   :  { %v20156_v39 = vpop.f32.mrb[177].mxu1 }
0x3793   :  { %v20157_v18 = vadd.f32 %v20156_v39, %v20155_v60  ;;  %v20158_v59 = vpop.f32.mrb[178].mxu1  ;;  %v21925_v39 = vld [vmem:[%s28269_s3 + $0x1110] ss:$20 sps:$4 sm:$0xff]  }
0x3794   :  { %v20159_v47 = vpop.f32.mrb[179].mxu1  ;;  %v21929_v59 = vld [vmem:[%s28269_s3 + $0x1118] ss:$20 sps:$4 sm:$0xff]  }
0x3795   :  { %v13245_v61 = vadd.f32 %v26883_v63, %v20157_v18  ;;  %v21928_v18 = vld [vmem:[%s28269_s3 + $0x10f0] ss:$20 sps:$4 sm:$0xff]   ;;  %v18473_v47 = vld [vmem:[%s28268_s0 + $0x1b8] sm:$0xff] }
0x3797   :  { %v13250_v32 = vmax.f32 %v13245_v61, 0.0  ;;  %v18475_v61 = vcombine.high %v18473_v47, %v18473_v47 }
0x3799   :  { %v13251_v19 = vpack.c.bf16 %v13250_v32, %v13250_v32  ;;  %v27221_v32 = vld [vmem:[%s28267_s1 + $0x78] sm:$0xff]  }
0x379b   :  { %18442 = vmatmul.mubr.msk.bf16.vlgmr.msra.gmra.mrb[160].mxu0 %vm352_vm1, %v13251_v19 }
0x379c   :  { %13362 = vmatpush1.bf16.msra.mxu0 %v21906_v20  ;;  %13393 = vmatprep.mubr.bf16.mxu0 %v22336_v30  ;;  %v18474_v20 = vcombine.low %v18473_v47, %v18473_v47  ;;  %v21956_v47 = vld [vmem:[%s28269_s3 + $0x118c] ss:$20 sps:$4 sm:$0xff]  }
0x379d   :  { %13363 = vmatprep.subr.bf16.mxu0 %v21911_v57  ;;  %v21934_v57 = vld [vmem:[%s28269_s3 + $0x1134] ss:$20 sps:$4 sm:$0xff]  }
0x37a0   :  { %13364 = vmatpush1.bf16.msra.mxu0 %v21909_v9  ;;  %v21932_v9 = vld [vmem:[%s28269_s3 + $0x1130] ss:$20 sps:$4 sm:$0xff]  }
0x37a1   :  { %20931 = vmatprep.subr.bf16.mxu0 %v22335_v23 }
0x37a3   :  { %18443 = vmatmul.mubr.msk.bf16.vlgmr.msra.gmra.mrb[164].mxu0 %vm352_vm1, %v13251_v19 }
0x37a4   :  { %20932 = vmatpush3.bf16.msra.mxu0 %v21912_v26  ;;  %20935 = vmatprep.mubr.msk.bf16.mxu0 %vm22337_vm0, %v22335_v23  ;;  %v21937_v26 = vld [vmem:[%s28269_s3 + $0x115c] ss:$20 sps:$4 sm:$0xff]  }
0x37a5   :  { %20933 = vmatprep.subr.bf16.mxu0 %v22335_v23 }
0x37a8   :  { %20934 = vmatpush3.bf16.msra.mxu0 %v21913_v16  ;;  %v21935_v16 = vld [vmem:[%s28269_s3 + $0x1158] ss:$20 sps:$4 sm:$0xff]  }
0x37a9   :  { %20164 = vmatprep.subr.bf16.mxu0 %v26988_v46 }
0x37ab   :  { %20936 = vmatmul.mubr.msk.bf16.vlgmr.msra.gmra.mrb[168].mxu0 %vm352_vm1, %v13251_v19  ;;  %v27227_v19 = vld [vmem:[%s28267_s1 + $0x38] sm:$0xff]  }
0x37ac   :  { %20165 = vmatpush3.bf16.msra.mxu0 %v26995_v4  ;;  %13488 = vmatprep.mubr.bf16.mxu0 %v18447_v17 }
0x37ad   :  { %20166 = vmatprep.subr.bf16.mxu0 %v27001_v41 }
0x37b0   :  { %20167 = vmatpush3.bf16.msra.mxu0 %v27081_v35 }
0x37b1   :  { %20168 = vmatprep.subr.bf16.mxu0 %v27087_v55 }
0x37b4   :  { %20169 = vmatpush3.bf16.msra.mxu0 %v27093_v21 }
0x37b5   :  { %20170 = vmatprep.subr.bf16.mxu0 %v27099_v5 }
0x37b8   :  { %20171 = vmatpush3.bf16.msra.mxu0 %v27105_v34 }
0x37b9   :  { %20172 = vmatprep.subr.bf16.mxu0 %v27111_v38 }
0x37bc   :  { %20173 = vmatpush3.bf16.msra.mxu0 %v27117_v8 }
0x37bd   :  { %20174 = vmatprep.subr.bf16.mxu0 %v27123_v24 }
0x37c0   :  { %20175 = vmatpush3.bf16.msra.mxu0 %v27129_v42 }
0x37c1   :  { %20176 = vmatprep.subr.bf16.mxu0 %v27135_v29 }
0x37c4   :  { %20177 = vmatpush3.bf16.msra.mxu0 %v27141_v25 }
0x37c5   :  { %20178 = vmatprep.subr.bf16.mxu0 %v26618_v15  ;;  %v21921_v15 = vld [vmem:[%s28269_s3 + $0x110c] ss:$20 sps:$4 sm:$0xff]  }
0x37c6   :  { %13568 = vmatprep.subr.bf16.mxu1 %v21921_v15 }
0x37c8   :  { %20179 = vmatpush3.bf16.msra.mxu0 %v26624_v37  ;;  %v21919_v37 = vld [vmem:[%s28269_s3 + $0x1108] ss:$20 sps:$4 sm:$0xff]  }
0x37c9   :  { %13569 = vmatpush1.bf16.msra.mxu1 %v21919_v37  ;;  %13812 = vmatprep.subr.bf16.mxu0 %v21934_v57 }
0x37ca   :  { %13607 = vmatprep.subr.bf16.mxu1 %v21924_v36 }
0x37cb   :  { %13489 = vmatmul.mubr.bf16.vlgmr.msra.gmra.mrb[172].mxu0 %v18446_v52 }
0x37cc   :  { %13844 = vmatprep.mubr.bf16.mxu0 %v22336_v30  ;;  %13813 = vmatpush1.bf16.msra.mxu0 %v21932_v9 }
0x37cd   :  { %13814 = vmatprep.subr.bf16.mxu0 %v21937_v26 }
0x37d0   :  { %13815 = vmatpush1.bf16.msra.mxu0 %v21935_v16 }
0x37d1   :  { %13853 = vmatprep.subr.bf16.mxu0 %v21940_v22 }
0x386e   :  { %v13354_v58 = vpop.f32.mrb[160].mxu0 }
0x386f   :  { %v27163_v12 = vadd.f32 %v13354_v58, %v27034_v51  ;;  %v13356_v43 = vpop.f32.mrb[161].mxu0 }
0x3870   :  { %v27166_v56 = vadd.f32 %v13356_v43, %v27037_v13  ;;  %v13358_v31 = vpop.f32.mrb[162].mxu0 }
0x3871   :  { %v13359_v33 = vpop.f32.mrb[163].mxu0 }
0x3876   :  { %v13395_v3 = vpop.f32.mrb[164].mxu0 }
0x3877   :  { %v27169_v49 = vadd.f32 %v13395_v3, %v27040_v53  ;;  %v13397_v50 = vpop.f32.mrb[165].mxu0 }
0x3878   :  { %v27172_v40 = vadd.f32 %v13397_v50, %v27043_v44  ;;  %v13399_v2 = vpop.f32.mrb[166].mxu0  ;;  %v21922_v44 = vld [vmem:[%s28269_s3 + $0x10e8] ss:$20 sps:$4 sm:$0xff]  }
0x3879   :  { %v13400_v45 = vpop.f32.mrb[167].mxu0 }
0x387e   :  { %v13436_v10 = vpop.f32.mrb[168].mxu0 }
0x387f   :  { %v27175_v51 = vadd.f32 %v13436_v10, %v27046_v0  ;;  %v20937_v27 = vpop.f32.mrb[169].mxu0  ;;  %v21927_v0 = vld [vmem:[%s28269_s3 + $0x1114] ss:$20 sps:$4 sm:$0xff]  }
0x3880   :  { %v13439_v11 = vpop.f32.mrb[170].mxu0 }
0x3881   :  { %v20938_v13 = vpop.f32.mrb[171].mxu0 }
0x389e   :  { %v20180_v28 = vpop.f32.mrb[172].mxu0 }
0x389f   :  { %v20181_v54 = vpop.f32.mrb[173].mxu0 }
0x38a0   :  { %v20182_v7 = vadd.f32 %v20181_v54, %v20180_v28  ;;  %v20183_v1 = vpop.f32.mrb[174].mxu0 }
0x38a1   :  { %v20184_v6 = vpop.f32.mrb[175].mxu0  ;;  %v21941_v1 = vld [vmem:[%s28269_s3 + $0x1160] ss:$20 sps:$4 sm:$0xff]  }
0x38a2   :  { %v13491_v53 = vadd.f32 %v26883_v63, %v20182_v7  ;;  %v21944_v6 = vld [vmem:[%s28269_s3 + $0x1140] ss:$20 sps:$4 sm:$0xff]  }
0x38a4   :  { %v13496_v14 = vmax.f32 %v13491_v53, 0.0  ;;  %v21945_v53 = vld [vmem:[%s28269_s3 + $0x1168] ss:$20 sps:$4 sm:$0xff]  }
0x38a6   :  { %v13497_v60 = vpack.c.bf16 %v13496_v14, %v13496_v14  ;;  %v18501_v14 = vld [vmem:[%s28268_s0 + $0x1c0] sm:$0xff] }
0x38a8   :  { %18470 = vmatmul.mubr.msk.bf16.vlgmr.msra.gmra.mrb[180].mxu1 %vm352_vm1, %v13497_v60 }
0x38a9   :  { %13608 = vmatpush1.bf16.msra.mxu1 %v21922_v44  ;;  %13639 = vmatprep.mubr.bf16.mxu1 %v22336_v30  ;;  %v18503_v44 = vcombine.high %v18501_v14, %v18501_v14 }
0x38aa   :  { %13609 = vmatprep.subr.bf16.mxu1 %v21927_v0  ;;  %v21950_v0 = vld [vmem:[%s28269_s3 + $0x1184] ss:$20 sps:$4 sm:$0xff]  }
0x38ad   :  { %13610 = vmatpush1.bf16.msra.mxu1 %v21925_v39  ;;  %v21948_v39 = vld [vmem:[%s28269_s3 + $0x1180] ss:$20 sps:$4 sm:$0xff]  }
0x38ae   :  { %20939 = vmatprep.subr.bf16.mxu1 %v22335_v23 }
0x38b0   :  { %18471 = vmatmul.mubr.msk.bf16.vlgmr.msra.gmra.mrb[184].mxu1 %vm352_vm1, %v13497_v60 }
0x38b1   :  { %20940 = vmatpush3.bf16.msra.mxu1 %v21928_v18  ;;  %20943 = vmatprep.mubr.msk.bf16.mxu1 %vm22337_vm0, %v22335_v23  ;;  %v21953_v18 = vld [vmem:[%s28269_s3 + $0x11ac] ss:$20 sps:$4 sm:$0xff]  }
0x38b2   :  { %20941 = vmatprep.subr.bf16.mxu1 %v22335_v23 }
0x38b5   :  { %20942 = vmatpush3.bf16.msra.mxu1 %v21929_v59  ;;  %v21951_v59 = vld [vmem:[%s28269_s3 + $0x11a8] ss:$20 sps:$4 sm:$0xff]  }
0x38b6   :  { %20189 = vmatprep.subr.bf16.mxu1 %v26988_v46 }
0x38b8   :  { %20944 = vmatmul.mubr.msk.bf16.vlgmr.msra.gmra.mrb[188].mxu1 %vm352_vm1, %v13497_v60  ;;  %v18502_v60 = vcombine.low %v18501_v14, %v18501_v14  ;;  %v21972_v14 = vld [vmem:[%s28269_s3 + $0x11dc] ss:$20 sps:$4 sm:$0xff]  }
0x38b9   :  { %20190 = vmatpush3.bf16.msra.mxu1 %v26995_v4  ;;  %13734 = vmatprep.mubr.bf16.mxu1 %v18475_v61 }
0x38ba   :  { %20191 = vmatprep.subr.bf16.mxu1 %v27001_v41 }
0x38bd   :  { %20192 = vmatpush3.bf16.msra.mxu1 %v27081_v35 }
0x38be   :  { %20193 = vmatprep.subr.bf16.mxu1 %v27087_v55 }
0x38c1   :  { %20194 = vmatpush3.bf16.msra.mxu1 %v27093_v21 }
0x38c2   :  { %20195 = vmatprep.subr.bf16.mxu1 %v27099_v5 }
0x38c5   :  { %20196 = vmatpush3.bf16.msra.mxu1 %v27105_v34 }
0x38c6   :  { %20197 = vmatprep.subr.bf16.mxu1 %v27111_v38 }
0x38c9   :  { %20198 = vmatpush3.bf16.msra.mxu1 %v27117_v8 }
0x38ca   :  { %20199 = vmatprep.subr.bf16.mxu1 %v27123_v24 }
0x38cd   :  { %20200 = vmatpush3.bf16.msra.mxu1 %v27129_v42 }
0x38ce   :  { %20201 = vmatprep.subr.bf16.mxu1 %v27135_v29 }
0x38d1   :  { %20202 = vmatpush3.bf16.msra.mxu1 %v27141_v25 }
0x38d2   :  { %20203 = vmatprep.subr.bf16.mxu1 %v27221_v32 }
0x38d5   :  { %20204 = vmatpush3.bf16.msra.mxu1 %v27227_v19 }
0x38d6   :  { %14058 = vmatprep.subr.bf16.mxu1 %v21950_v0 }
0x38d8   :  { %13735 = vmatmul.mubr.bf16.vlgmr.msra.gmra.mrb[192].mxu1 %v18474_v20 }
0x38d9   :  { %14090 = vmatprep.mubr.bf16.mxu1 %v22336_v30  ;;  %14059 = vmatpush1.bf16.msra.mxu1 %v21948_v39 }
0x38da   :  { %14060 = vmatprep.subr.bf16.mxu1 %v21953_v18 }
0x38dd   :  { %14061 = vmatpush1.bf16.msra.mxu1 %v21951_v59 }
0x38de   :  { %14099 = vmatprep.subr.bf16.mxu1 %v21956_v47 }
0x397b   :  { %v13600_v17 = vpop.f32.mrb[180].mxu1 }
0x397c   :  { %v27247_v52 = vadd.f32 %v13600_v17, %v27163_v12  ;;  %v13602_v62 = vpop.f32.mrb[181].mxu1 }
0x397d   :  { %v27250_v48 = vadd.f32 %v13602_v62, %v27166_v56  ;;  %v13604_v15 = vpop.f32.mrb[182].mxu1 }
0x397e   :  { %v13605_v37 = vpop.f32.mrb[183].mxu1 }
0x3983   :  { %v13641_v36 = vpop.f32.mrb[184].mxu1 }
0x3984   :  { %v27253_v58 = vadd.f32 %v13641_v36, %v27169_v49  ;;  %v13643_v43 = vpop.f32.mrb[185].mxu1 }
0x3985   :  { %v27256_v31 = vadd.f32 %v13643_v43, %v27172_v40  ;;  %v13645_v33 = vpop.f32.mrb[186].mxu1  ;;  %v21938_v40 = vld [vmem:[%s28269_s3 + $0x1138] ss:$20 sps:$4 sm:$0xff]  }
0x3986   :  { %v13646_v3 = vpop.f32.mrb[187].mxu1 }
0x398b   :  { %v13682_v50 = vpop.f32.mrb[188].mxu1 }
0x398c   :  { %v27259_v12 = vadd.f32 %v13682_v50, %v27175_v51  ;;  %v20945_v2 = vpop.f32.mrb[189].mxu1  ;;  %v21943_v51 = vld [vmem:[%s28269_s3 + $0x1164] ss:$20 sps:$4 sm:$0xff]  }
0x398d   :  { %v13685_v45 = vpop.f32.mrb[190].mxu1 }
0x398e   :  { %v20946_v56 = vpop.f32.mrb[191].mxu1 }
0x39ab   :  { %v20205_v10 = vpop.f32.mrb[192].mxu1 }
0x39ac   :  { %v20206_v27 = vpop.f32.mrb[193].mxu1 }
0x39ad   :  { %v20207_v11 = vadd.f32 %v20206_v27, %v20205_v10  ;;  %v20208_v13 = vpop.f32.mrb[194].mxu1 }
0x39ae   :  { %v20209_v28 = vpop.f32.mrb[195].mxu1  ;;  %v21957_v13 = vld [vmem:[%s28269_s3 + $0x11b0] ss:$20 sps:$4 sm:$0xff]  }
0x39af   :  { %v13737_v49 = vadd.f32 %v26883_v63, %v20207_v11  ;;  %v21960_v28 = vld [vmem:[%s28269_s3 + $0x1190] ss:$20 sps:$4 sm:$0xff]  }
0x39b1   :  { %v13742_v54 = vmax.f32 %v13737_v49, 0.0  ;;  %v21961_v49 = vld [vmem:[%s28269_s3 + $0x11b8] ss:$20 sps:$4 sm:$0xff]  }
0x39b3   :  { %v13743_v7 = vpack.c.bf16 %v13742_v54, %v13742_v54  ;;  %v18529_v54 = vld [vmem:[%s28268_s0 + $0x1c8] sm:$0xff] }
0x39b5   :  { %18498 = vmatmul.mubr.msk.bf16.vlgmr.msra.gmra.mrb[176].mxu0 %vm352_vm1, %v13743_v7 }
0x39b6   :  { %13854 = vmatpush1.bf16.msra.mxu0 %v21938_v40  ;;  %13885 = vmatprep.mubr.bf16.mxu0 %v22336_v30  ;;  %v18531_v40 = vcombine.high %v18529_v54, %v18529_v54 }
0x39b7   :  { %13855 = vmatprep.subr.bf16.mxu0 %v21943_v51  ;;  %v21966_v51 = vld [vmem:[%s28269_s3 + $0x11d4] ss:$20 sps:$4 sm:$0xff]  }
0x39ba   :  { %13856 = vmatpush1.bf16.msra.mxu0 %v21941_v1  ;;  %v21964_v1 = vld [vmem:[%s28269_s3 + $0x11d0] ss:$20 sps:$4 sm:$0xff]  }
0x39bb   :  { %20947 = vmatprep.subr.bf16.mxu0 %v22335_v23 }
0x39bd   :  { %18499 = vmatmul.mubr.msk.bf16.vlgmr.msra.gmra.mrb[180].mxu0 %vm352_vm1, %v13743_v7 }
0x39be   :  { %20948 = vmatpush3.bf16.msra.mxu0 %v21944_v6  ;;  %20951 = vmatprep.mubr.msk.bf16.mxu0 %vm22337_vm0, %v22335_v23  ;;  %v21969_v6 = vld [vmem:[%s28269_s3 + $0x11fc] ss:$20 sps:$4 sm:$0xff]  }
0x39bf   :  { %20949 = vmatprep.subr.bf16.mxu0 %v22335_v23 }
0x39c2   :  { %20950 = vmatpush3.bf16.msra.mxu0 %v21945_v53  ;;  %v21967_v53 = vld [vmem:[%s28269_s3 + $0x11f8] ss:$20 sps:$4 sm:$0xff]  }
0x39c3   :  { %20214 = vmatprep.subr.bf16.mxu0 %v26988_v46 }
0x39c5   :  { %20952 = vmatmul.mubr.msk.bf16.vlgmr.msra.gmra.mrb[184].mxu0 %vm352_vm1, %v13743_v7  ;;  %v18530_v7 = vcombine.low %v18529_v54, %v18529_v54 }
0x39c6   :  { %20215 = vmatpush3.bf16.msra.mxu0 %v26995_v4  ;;  %13980 = vmatprep.mubr.bf16.mxu0 %v18503_v44 }
0x39c7   :  { %20216 = vmatprep.subr.bf16.mxu0 %v27001_v41 }
0x39ca   :  { %20217 = vmatpush3.bf16.msra.mxu0 %v27081_v35 }
0x39cb   :  { %20218 = vmatprep.subr.bf16.mxu0 %v27087_v55 }
0x39ce   :  { %20219 = vmatpush3.bf16.msra.mxu0 %v27093_v21 }
0x39cf   :  { %20220 = vmatprep.subr.bf16.mxu0 %v27099_v5 }
0x39d2   :  { %20221 = vmatpush3.bf16.msra.mxu0 %v27105_v34 }
0x39d3   :  { %20222 = vmatprep.subr.bf16.mxu0 %v27111_v38 }
0x39d6   :  { %20223 = vmatpush3.bf16.msra.mxu0 %v27117_v8 }
0x39d7   :  { %20224 = vmatprep.subr.bf16.mxu0 %v27123_v24 }
0x39da   :  { %20225 = vmatpush3.bf16.msra.mxu0 %v27129_v42 }
0x39db   :  { %20226 = vmatprep.subr.bf16.mxu0 %v27135_v29 }
0x39de   :  { %20227 = vmatpush3.bf16.msra.mxu0 %v27141_v25 }
0x39df   :  { %20228 = vmatprep.subr.bf16.mxu0 %v27221_v32 }
0x39e2   :  { %20229 = vmatpush3.bf16.msra.mxu0 %v27227_v19 }
0x39e3   :  { %14304 = vmatprep.subr.bf16.mxu0 %v21966_v51 }
0x39e5   :  { %13981 = vmatmul.mubr.bf16.vlgmr.msra.gmra.mrb[188].mxu0 %v18502_v60 }
0x39e6   :  { %14336 = vmatprep.mubr.bf16.mxu0 %v22336_v30  ;;  %14305 = vmatpush1.bf16.msra.mxu0 %v21964_v1 }
0x39e7   :  { %14306 = vmatprep.subr.bf16.mxu0 %v21969_v6 }
0x39ea   :  { %14307 = vmatpush1.bf16.msra.mxu0 %v21967_v53 }
0x39eb   :  { %14345 = vmatprep.subr.bf16.mxu0 %v21972_v14 }
0x3a88   :  { %v13846_v61 = vpop.f32.mrb[176].mxu0 }
0x3a89   :  { %v27321_v20 = vadd.f32 %v13846_v61, %v27247_v52  ;;  %v13848_v57 = vpop.f32.mrb[177].mxu0 }
0x3a8a   :  { %v27324_v9 = vadd.f32 %v13848_v57, %v27250_v48  ;;  %v13850_v26 = vpop.f32.mrb[178].mxu0 }
0x3a8b   :  { %v13851_v16 = vpop.f32.mrb[179].mxu0 }
0x3a90   :  { %v13887_v22 = vpop.f32.mrb[180].mxu0 }
0x3a91   :  { %v27327_v17 = vadd.f32 %v13887_v22, %v27253_v58  ;;  %v13889_v62 = vpop.f32.mrb[181].mxu0 }
0x3a92   :  { %v27330_v15 = vadd.f32 %v13889_v62, %v27256_v31  ;;  %v13891_v37 = vpop.f32.mrb[182].mxu0  ;;  %v21954_v31 = vld [vmem:[%s28269_s3 + $0x1188] ss:$20 sps:$4 sm:$0xff]  }
0x3a93   :  { %v13892_v36 = vpop.f32.mrb[183].mxu0 }
0x3a98   :  { %v13928_v43 = vpop.f32.mrb[184].mxu0 }
0x3a99   :  { %v27333_v52 = vadd.f32 %v13928_v43, %v27259_v12  ;;  %v20953_v33 = vpop.f32.mrb[185].mxu0  ;;  %v21959_v12 = vld [vmem:[%s28269_s3 + $0x11b4] ss:$20 sps:$4 sm:$0xff]  }
0x3a9a   :  { %v13931_v3 = vpop.f32.mrb[186].mxu0 }
0x3a9b   :  { %v20954_v48 = vpop.f32.mrb[187].mxu0 }
0x3ab8   :  { %v20230_v50 = vpop.f32.mrb[188].mxu0 }
0x3ab9   :  { %v20231_v2 = vpop.f32.mrb[189].mxu0 }
0x3aba   :  { %v20232_v45 = vadd.f32 %v20231_v2, %v20230_v50  ;;  %v20233_v56 = vpop.f32.mrb[190].mxu0 }
0x3abb   :  { %v20234_v10 = vpop.f32.mrb[191].mxu0  ;;  %v21973_v56 = vld [vmem:[%s28269_s3 + $0x1200] ss:$20 sps:$4 sm:$0xff]  }
0x3abc   :  { %v13983_v58 = vadd.f32 %v26883_v63, %v20232_v45  ;;  %v21977_v10 = vld [vmem:[%s28269_s3 + $0x1208] ss:$20 sps:$4 sm:$0xff]  }
0x3abe   :  { %v13988_v27 = vmax.f32 %v13983_v58, 0.0  ;;  %v18557_v58 = vld [vmem:[%s28268_s0 + $0x1d0] sm:$0xff] }
0x3ac0   :  { %v13989_v11 = vpack.c.bf16 %v13988_v27, %v13988_v27  ;;  %v18559_v27 = vcombine.high %v18557_v58, %v18557_v58 }
0x3ac2   :  { %18526 = vmatmul.mubr.msk.bf16.vlgmr.msra.gmra.mrb[196].mxu1 %vm352_vm1, %v13989_v11 }
0x3ac3   :  { %14100 = vmatpush1.bf16.msra.mxu1 %v21954_v31  ;;  %14131 = vmatprep.mubr.bf16.mxu1 %v22336_v30  ;;  %v18558_v31 = vcombine.low %v18557_v58, %v18557_v58 }
0x3ac4   :  { %14101 = vmatprep.subr.bf16.mxu1 %v21959_v12  ;;  %v21980_v12 = vld [vmem:[%s28269_s3 + $0x1220] ss:$20 sps:$4 sm:$0xff]  }
0x3ac7   :  { %14102 = vmatpush1.bf16.msra.mxu1 %v21957_v13  ;;  %v21985_v13 = vld [vmem:[%s28269_s3 + $0x124c] ss:$20 sps:$4 sm:$0xff]  }
0x3ac8   :  { %20955 = vmatprep.subr.bf16.mxu1 %v22335_v23 }
0x3aca   :  { %18527 = vmatmul.mubr.msk.bf16.vlgmr.msra.gmra.mrb[200].mxu1 %vm352_vm1, %v13989_v11 }
0x3acb   :  { %20956 = vmatpush3.bf16.msra.mxu1 %v21960_v28  ;;  %20959 = vmatprep.mubr.msk.bf16.mxu1 %vm22337_vm0, %v22335_v23  ;;  %v21983_v28 = vld [vmem:[%s28269_s3 + $0x1248] ss:$20 sps:$4 sm:$0xff]  }
0x3acc   :  { %20957 = vmatprep.subr.bf16.mxu1 %v22335_v23 }
0x3acf   :  { %20958 = vmatpush3.bf16.msra.mxu1 %v21961_v49  ;;  %v21988_v49 = vld [vmem:[%s28269_s3 + $0x122c] ss:$20 sps:$4 sm:$0xff]  }
0x3ad0   :  { %20239 = vmatprep.subr.bf16.mxu1 %v26988_v46 }
0x3ad2   :  { %20960 = vmatmul.mubr.msk.bf16.vlgmr.msra.gmra.mrb[204].mxu1 %vm352_vm1, %v13989_v11  ;;  %v21982_v11 = vld [vmem:[%s28269_s3 + $0x1224] ss:$20 sps:$4 sm:$0xff]  }
0x3ad3   :  { %20240 = vmatpush3.bf16.msra.mxu1 %v26995_v4  ;;  %14226 = vmatprep.mubr.bf16.mxu1 %v18531_v40 }
0x3ad4   :  { %20241 = vmatprep.subr.bf16.mxu1 %v27001_v41 }
0x3ad7   :  { %20242 = vmatpush3.bf16.msra.mxu1 %v27081_v35 }
0x3ad8   :  { %20243 = vmatprep.subr.bf16.mxu1 %v27087_v55 }
0x3adb   :  { %20244 = vmatpush3.bf16.msra.mxu1 %v27093_v21 }
0x3adc   :  { %20245 = vmatprep.subr.bf16.mxu1 %v27099_v5 }
0x3adf   :  { %20246 = vmatpush3.bf16.msra.mxu1 %v27105_v34 }
0x3ae0   :  { %20247 = vmatprep.subr.bf16.mxu1 %v27111_v38 }
0x3ae3   :  { %20248 = vmatpush3.bf16.msra.mxu1 %v27117_v8 }
0x3ae4   :  { %20249 = vmatprep.subr.bf16.mxu1 %v27123_v24 }
0x3ae7   :  { %20250 = vmatpush3.bf16.msra.mxu1 %v27129_v42 }
0x3ae8   :  { %20251 = vmatprep.subr.bf16.mxu1 %v27135_v29 }
0x3aeb   :  { %20252 = vmatpush3.bf16.msra.mxu1 %v27141_v25 }
0x3aec   :  { %20253 = vmatprep.subr.bf16.mxu1 %v27221_v32 }
0x3aef   :  { %20254 = vmatpush3.bf16.msra.mxu1 %v27227_v19 }
0x3af0   :  { %14550 = vmatprep.subr.bf16.mxu1 %v21982_v11 }
0x3af2   :  { %14227 = vmatmul.mubr.bf16.vlgmr.msra.gmra.mrb[208].mxu1 %v18530_v7 }
0x3af3   :  { %14582 = vmatprep.mubr.bf16.mxu1 %v22336_v30  ;;  %14551 = vmatpush1.bf16.msra.mxu1 %v21980_v12 }
0x3af4   :  { %14552 = vmatprep.subr.bf16.mxu1 %v21985_v13 }
0x3af7   :  { %14553 = vmatpush1.bf16.msra.mxu1 %v21983_v28 }
0x3af8   :  { %14591 = vmatprep.subr.bf16.mxu1 %v21988_v49 }
0x3b95   :  { %v14092_v44 = vpop.f32.mrb[196].mxu1 }
0x3b96   :  { %v27395_v60 = vadd.f32 %v14092_v44, %v27321_v20  ;;  %v14094_v0 = vpop.f32.mrb[197].mxu1 }
0x3b97   :  { %v27398_v39 = vadd.f32 %v14094_v0, %v27324_v9  ;;  %v14096_v18 = vpop.f32.mrb[198].mxu1 }
0x3b98   :  { %v14097_v59 = vpop.f32.mrb[199].mxu1 }
0x3b9d   :  { %v14133_v47 = vpop.f32.mrb[200].mxu1 }
0x3b9e   :  { %v27401_v61 = vadd.f32 %v14133_v47, %v27327_v17  ;;  %v14135_v57 = vpop.f32.mrb[201].mxu1 }
0x3b9f   :  { %v27404_v26 = vadd.f32 %v14135_v57, %v27330_v15  ;;  %v14137_v16 = vpop.f32.mrb[202].mxu1  ;;  %v21970_v15 = vld [vmem:[%s28269_s3 + $0x11d8] ss:$20 sps:$4 sm:$0xff]  }
0x3ba0   :  { %v14138_v22 = vpop.f32.mrb[203].mxu1 }
0x3ba5   :  { %v14174_v62 = vpop.f32.mrb[204].mxu1 }
0x3ba6   :  { %v27407_v20 = vadd.f32 %v14174_v62, %v27333_v52  ;;  %v20961_v37 = vpop.f32.mrb[205].mxu1  ;;  %v21975_v52 = vld [vmem:[%s28269_s3 + $0x1204] ss:$20 sps:$4 sm:$0xff]  }
0x3ba7   :  { %v14177_v36 = vpop.f32.mrb[206].mxu1 }
0x3ba8   :  { %v20962_v9 = vpop.f32.mrb[207].mxu1 }
0x3bc5   :  { %v20255_v43 = vpop.f32.mrb[208].mxu1 }
0x3bc6   :  { %v20256_v33 = vpop.f32.mrb[209].mxu1 }
0x3bc7   :  { %v20257_v3 = vadd.f32 %v20256_v33, %v20255_v43  ;;  %v20258_v48 = vpop.f32.mrb[210].mxu1 }
0x3bc8   :  { %v20259_v50 = vpop.f32.mrb[211].mxu1  ;;  %v21989_v48 = vld [vmem:[%s28269_s3 + $0x1250] ss:$20 sps:$4 sm:$0xff]  }
0x3bc9   :  { %v14229_v17 = vadd.f32 %v26883_v63, %v20257_v3  ;;  %v21976_v63 = vld [vmem:[%s28269_s3 + $0x11e0] ss:$20 sps:$4 sm:$0xff]   ;;  %v21992_v50 = vld [vmem:[%s28269_s3 + $0x1230] ss:$20 sps:$4 sm:$0xff]  }
0x3bca   :  { %v21991_v3 = vld [vmem:[%s28269_s3 + $0x1254] ss:$20 sps:$4 sm:$0xff]  }
0x3bcb   :  { %v14234_v2 = vmax.f32 %v14229_v17, 0.0  ;;  %v21993_v17 = vld [vmem:[%s28269_s3 + $0x1258] ss:$20 sps:$4 sm:$0xff]  }
0x3bcd   :  { %v14235_v45 = vpack.c.bf16 %v14234_v2, %v14234_v2  ;;  %v18585_v2 = vld [vmem:[%s28268_s0 + $0x1d8] sm:$0xff] }
0x3bcf   :  { %18554 = vmatmul.mubr.msk.bf16.vlgmr.msra.gmra.mrb[192].mxu0 %vm352_vm1, %v14235_v45 }
0x3bd0   :  { %14346 = vmatpush1.bf16.msra.mxu0 %v21970_v15  ;;  %14377 = vmatprep.mubr.bf16.mxu0 %v22336_v30  ;;  %v18587_v15 = vcombine.high %v18585_v2, %v18585_v2 }
0x3bd1   :  { %14347 = vmatprep.subr.bf16.mxu0 %v21975_v52  ;;  %v21999_v52 = vld [vmem:[%s28269_s3 + $0x1298] ss:$20 sps:$4 sm:$0xff]  }
0x3bd4   :  { %14348 = vmatpush1.bf16.msra.mxu0 %v21973_v56  ;;  %v22004_v56 = vld [vmem:[%s28269_s3 + $0x127c] ss:$20 sps:$4 sm:$0xff]  }
0x3bd5   :  { %20963 = vmatprep.subr.bf16.mxu0 %v22335_v23 }
0x3bd7   :  { %18555 = vmatmul.mubr.msk.bf16.vlgmr.msra.gmra.mrb[196].mxu0 %vm352_vm1, %v14235_v45 }
0x3bd8   :  { %20964 = vmatpush3.bf16.msra.mxu0 %v21976_v63  ;;  %20967 = vmatprep.mubr.msk.bf16.mxu0 %vm22337_vm0, %v22335_v23 }
0x3bd9   :  { %20965 = vmatprep.subr.bf16.mxu0 %v22335_v23 }
0x3bdc   :  { %20966 = vmatpush3.bf16.msra.mxu0 %v21977_v10 }
0x3bdd   :  { %20264 = vmatprep.subr.bf16.mxu0 %v26988_v46 }
0x3bdf   :  { %20968 = vmatmul.mubr.msk.bf16.vlgmr.msra.gmra.mrb[200].mxu0 %vm352_vm1, %v14235_v45  ;;  %v22001_v45 = vld [vmem:[%s28269_s3 + $0x129c] ss:$20 sps:$4 sm:$0xff]  }
0x3be0   :  { %20265 = vmatpush3.bf16.msra.mxu0 %v26995_v4  ;;  %14472 = vmatprep.mubr.bf16.mxu0 %v18559_v27 }
0x3be1   :  { %20266 = vmatprep.subr.bf16.mxu0 %v27001_v41 }
0x3be4   :  { %20267 = vmatpush3.bf16.msra.mxu0 %v27081_v35 }
0x3be5   :  { %20268 = vmatprep.subr.bf16.mxu0 %v27087_v55 }
0x3be8   :  { %20269 = vmatpush3.bf16.msra.mxu0 %v27093_v21 }
0x3be9   :  { %20270 = vmatprep.subr.bf16.mxu0 %v27099_v5 }
0x3bec   :  { %20271 = vmatpush3.bf16.msra.mxu0 %v27105_v34 }
0x3bed   :  { %20272 = vmatprep.subr.bf16.mxu0 %v27111_v38 }
0x3bf0   :  { %20273 = vmatpush3.bf16.msra.mxu0 %v27117_v8 }
0x3bf1   :  { %20274 = vmatprep.subr.bf16.mxu0 %v27123_v24 }
0x3bf4   :  { %20275 = vmatpush3.bf16.msra.mxu0 %v27129_v42 }
0x3bf5   :  { %20276 = vmatprep.subr.bf16.mxu0 %v27135_v29 }
0x3bf8   :  { %20277 = vmatpush3.bf16.msra.mxu0 %v27141_v25 }
0x3bf9   :  { %20278 = vmatprep.subr.bf16.mxu0 %v27221_v32 }
0x3bfc   :  { %20279 = vmatpush3.bf16.msra.mxu0 %v27227_v19 }
0x3bff   :  { %14473 = vmatmul.mubr.bf16.vlgmr.msra.gmra.mrb[204].mxu0 %v18558_v31 }
0x3c00   :  { %14828 = vmatprep.mubr.bf16.mxu0 %v22336_v30 }
0x3ca2   :  { %v14338_v54 = vpop.f32.mrb[192].mxu0 }
0x3ca3   :  { %v27469_v40 = vadd.f32 %v14338_v54, %v27395_v60  ;;  %v14340_v7 = vpop.f32.mrb[193].mxu0 }
0x3ca4   :  { %v27472_v51 = vadd.f32 %v14340_v7, %v27398_v39  ;;  %v14342_v1 = vpop.f32.mrb[194].mxu0 }
0x3ca5   :  { %v14343_v6 = vpop.f32.mrb[195].mxu0 }
0x3caa   :  { %v14379_v53 = vpop.f32.mrb[196].mxu0 }
0x3cab   :  { %v27475_v14 = vadd.f32 %v14379_v53, %v27401_v61  ;;  %v14381_v44 = vpop.f32.mrb[197].mxu0  ;;  %v27486_v61 = vld [vmem:[%s28270_s2] ss:$0 sm:$0xff] }
0x3cac   :  { %v27478_v0 = vadd.f32 %v14381_v44, %v27404_v26  ;;  %v14383_v18 = vpop.f32.mrb[198].mxu0 }
0x3cad   :  { %v14384_v59 = vpop.f32.mrb[199].mxu0 }
0x3cb2   :  { %v14420_v47 = vpop.f32.mrb[200].mxu0 }
0x3cb3   :  { %v27481_v60 = vadd.f32 %v14420_v47, %v27407_v20  ;;  %v20969_v57 = vpop.f32.mrb[201].mxu0  ;;  %v21986_v20 = vld [vmem:[%s28269_s3 + $0x1228] ss:$20 sps:$4 sm:$0xff]  }
0x3cb4   :  { %v14423_v16 = vpop.f32.mrb[202].mxu0 }
0x3cb5   :  { %v20970_v39 = vpop.f32.mrb[203].mxu0 }
0x3cd2   :  { %v20280_v22 = vpop.f32.mrb[204].mxu0 }
0x3cd3   :  { %v20281_v62 = vpop.f32.mrb[205].mxu0 }
0x3cd4   :  { %v20282_v37 = vadd.f32 %v20281_v62, %v20280_v22  ;;  %v20283_v36 = vpop.f32.mrb[206].mxu0  ;;  %v22005_v22 = vld [vmem:[%s28269_s3 + $0x12a0] ss:$20 sps:$4 sm:$0xff]  }
0x3cd5   :  { %v20284_v9 = vpop.f32.mrb[207].mxu0  ;;  %v22008_v62 = vld [vmem:[%s28269_s3 + $0x1280] ss:$20 sps:$4 sm:$0xff]  }
0x3cd6   :  { %v14475_v26 = vadd.f32 %v27486_v61, %v20282_v37  ;;  %v22009_v37 = vld [vmem:[%s28269_s3 + $0x12a8] ss:$20 sps:$4 sm:$0xff]   ;;  %v18613_v36 = vld [vmem:[%s28268_s0 + $0x1e0] sm:$0xff] }
0x3cd7   :  { %v18615_v9 = vcombine.high %v18613_v36, %v18613_v36 }
0x3cd8   :  { %v14480_v43 = vmax.f32 %v14475_v26, 0.0  ;;  %v27591_v26 = vld [vmem:[%s28267_s1 + $0x40] sm:$0xff]  }
0x3cda   :  { %v14481_v33 = vpack.c.bf16 %v14480_v43, %v14480_v43  ;;  %v27598_v43 = vld [vmem:[%s28267_s1] sm:$0xff]  }
0x3cdc   :  { %18582 = vmatmul.mubr.msk.bf16.vlgmr.msra.gmra.mrb[212].mxu1 %vm352_vm1, %v14481_v33 }
0x3cdd   :  { %14592 = vmatpush1.bf16.msra.mxu1 %v21986_v20  ;;  %14623 = vmatprep.mubr.bf16.mxu1 %v22336_v30  ;;  %v27604_v20 = vld [vmem:[%s28267_s1 + $0x48] sm:$0xff]  }
0x3cde   :  { %14593 = vmatprep.subr.bf16.mxu1 %v21991_v3 }
0x3ce1   :  { %14594 = vmatpush1.bf16.msra.mxu1 %v21989_v48 }
0x3ce2   :  { %20971 = vmatprep.subr.bf16.mxu1 %v22335_v23 }
0x3ce4   :  { %18583 = vmatmul.mubr.msk.bf16.vlgmr.msra.gmra.mrb[216].mxu1 %vm352_vm1, %v14481_v33 }
0x3ce5   :  { %20972 = vmatpush3.bf16.msra.mxu1 %v21992_v50  ;;  %20975 = vmatprep.mubr.msk.bf16.mxu1 %vm22337_vm0, %v22335_v23 }
0x3ce6   :  { %20973 = vmatprep.subr.bf16.mxu1 %v22335_v23 }
0x3ce9   :  { %20974 = vmatpush3.bf16.msra.mxu1 %v21993_v17 }
0x3cea   :  { %20289 = vmatprep.subr.bf16.mxu1 %v26988_v46  ;;  %v18586_v46 = vcombine.low %v18585_v2, %v18585_v2 }
0x3cec   :  { %20976 = vmatmul.mubr.msk.bf16.vlgmr.msra.gmra.mrb[220].mxu1 %vm352_vm1, %v14481_v33 }
0x3ced   :  { %20290 = vmatpush3.bf16.msra.mxu1 %v26995_v4  ;;  %14718 = vmatprep.mubr.bf16.mxu1 %v18587_v15  ;;  %v21998_v4 = vld [vmem:[%s28269_s3 + $0x1274] ss:$20 sps:$4 sm:$0xff]  }
0x3cee   :  { %20291 = vmatprep.subr.bf16.mxu1 %v27001_v41  ;;  %v21996_v41 = vld [vmem:[%s28269_s3 + $0x1270] ss:$20 sps:$4 sm:$0xff]   ;;  %14796 = vmatprep.subr.bf16.mxu0 %v21998_v4 }
0x3cef   :  { %14797 = vmatpush1.bf16.msra.mxu0 %v21996_v41 }
0x3cf0   :  { %14798 = vmatprep.subr.bf16.mxu0 %v22001_v45 }
0x3cf1   :  { %20292 = vmatpush3.bf16.msra.mxu1 %v27081_v35 }
0x3cf2   :  { %20293 = vmatprep.subr.bf16.mxu1 %v27087_v55 }
0x3cf3   :  { %14799 = vmatpush1.bf16.msra.mxu0 %v21999_v52 }
0x3cf4   :  { %14837 = vmatprep.subr.bf16.mxu0 %v22004_v56 }
0x3cf5   :  { %20294 = vmatpush3.bf16.msra.mxu1 %v27093_v21 }
0x3cf6   :  { %20295 = vmatprep.subr.bf16.mxu1 %v27099_v5 }
0x3cf9   :  { %20296 = vmatpush3.bf16.msra.mxu1 %v27105_v34 }
0x3cfa   :  { %20297 = vmatprep.subr.bf16.mxu1 %v27111_v38 }
0x3cfd   :  { %20298 = vmatpush3.bf16.msra.mxu1 %v27117_v8 }
0x3cfe   :  { %20299 = vmatprep.subr.bf16.mxu1 %v27123_v24 }
0x3d01   :  { %20300 = vmatpush3.bf16.msra.mxu1 %v27129_v42 }
0x3d02   :  { %20301 = vmatprep.subr.bf16.mxu1 %v27135_v29 }
0x3d05   :  { %20302 = vmatpush3.bf16.msra.mxu1 %v27141_v25 }
0x3d06   :  { %20303 = vmatprep.subr.bf16.mxu1 %v27221_v32 }
0x3d09   :  { %20304 = vmatpush3.bf16.msra.mxu1 %v27227_v19 }
0x3d0c   :  { %14719 = vmatmul.mubr.bf16.vlgmr.msra.gmra.mrb[224].mxu1 %v18586_v46 }
0x3d0d   :  { %15074 = vmatprep.mubr.bf16.mxu1 %v22336_v30 }
0x3daf   :  { %v14584_v63 = vpop.f32.mrb[212].mxu1 }
0x3db0   :  { %v27548_v10 = vadd.f32 %v14584_v63, %v27469_v40  ;;  %v14586_v58 = vpop.f32.mrb[213].mxu1 }
0x3db1   :  { %v27551_v27 = vadd.f32 %v14586_v58, %v27472_v51  ;;  %v14588_v31 = vpop.f32.mrb[214].mxu1 }
0x3db2   :  { %v14589_v11 = vpop.f32.mrb[215].mxu1 }
0x3db7   :  { %v14625_v12 = vpop.f32.mrb[216].mxu1 }
0x3db8   :  { %v27554_v13 = vadd.f32 %v14625_v12, %v27475_v14  ;;  %v14627_v28 = vpop.f32.mrb[217].mxu1  ;;  %v22018_v12 = vld [vmem:[%s28269_s3 + $0x12c8] ss:$20 sps:$4 sm:$0xff]  }
0x3db9   :  { %v27557_v49 = vadd.f32 %v14627_v28, %v27478_v0  ;;  %v14629_v54 = vpop.f32.mrb[218].mxu1  ;;  %v22002_v0 = vld [vmem:[%s28269_s3 + $0x1278] ss:$20 sps:$4 sm:$0xff]   ;;  %v22023_v28 = vld [vmem:[%s28269_s3 + $0x12f4] ss:$20 sps:$4 sm:$0xff]  }
0x3dba   :  { %v14630_v7 = vpop.f32.mrb[219].mxu1  ;;  %v22024_v54 = vld [vmem:[%s28269_s3 + $0x12d0] ss:$20 sps:$4 sm:$0xff]  }
0x3dbb   :  { %v22025_v7 = vld [vmem:[%s28269_s3 + $0x12f8] ss:$20 sps:$4 sm:$0xff]  }
0x3dbf   :  { %v14666_v1 = vpop.f32.mrb[220].mxu1 }
0x3dc0   :  { %v27560_v40 = vadd.f32 %v14666_v1, %v27481_v60  ;;  %v20977_v6 = vpop.f32.mrb[221].mxu1  ;;  %v22007_v60 = vld [vmem:[%s28269_s3 + $0x12a4] ss:$20 sps:$4 sm:$0xff]   ;;  %v18641_v1 = vld [vmem:[%s28268_s0 + $0x1e8] sm:$0xff] }
0x3dc1   :  { %v14669_v53 = vpop.f32.mrb[222].mxu1  ;;  %v27684_v6 = vld [vmem:[%s28267_s1 + $0x8] sm:$0xff]  }
0x3dc2   :  { %v20978_v51 = vpop.f32.mrb[223].mxu1  ;;  %v27690_v53 = vld [vmem:[%s28267_s1 + $0x50] sm:$0xff]  }
0x3dc3   :  { %v27696_v51 = vld [vmem:[%s28267_s1 + $0x10] sm:$0xff]  }
0x3ddf   :  { %v20305_v44 = vpop.f32.mrb[224].mxu1 }
0x3de0   :  { %v20306_v18 = vpop.f32.mrb[225].mxu1 }
0x3de1   :  { %v20307_v59 = vadd.f32 %v20306_v18, %v20305_v44  ;;  %v20308_v47 = vpop.f32.mrb[226].mxu1  ;;  %v27702_v44 = vld [vmem:[%s28267_s1 + $0x58] sm:$0xff]  }
0x3de2   :  { %v20309_v57 = vpop.f32.mrb[227].mxu1  ;;  %v27708_v18 = vld [vmem:[%s28267_s1 + $0x18] sm:$0xff]   ;;  %v27720_v47 = vld [vmem:[%s28267_s1 + $0x20] sm:$0xff]  }
0x3de3   :  { %v14721_v14 = vadd.f32 %v27486_v61, %v20307_v59  ;;  %v27714_v59 = vld [vmem:[%s28267_s1 + $0x60] sm:$0xff]   ;;  %v27726_v57 = vld [vmem:[%s28267_s1 + $0x68] sm:$0xff]  }
0x3de5   :  { %v14726_v16 = vmax.f32 %v14721_v14, 0.0  ;;  %v27732_v14 = vld [vmem:[%s28267_s1 + $0x28] sm:$0xff]  }
0x3de7   :  { %v14727_v39 = vpack.c.bf16 %v14726_v16, %v14726_v16  ;;  %v27738_v16 = vld [vmem:[%s28267_s1 + $0x70] sm:$0xff]  }
0x3de9   :  { %18610 = vmatmul.mubr.msk.bf16.vlgmr.msra.gmra.mrb[208].mxu0 %vm352_vm1, %v14727_v39 }
0x3dea   :  { %14838 = vmatpush1.bf16.msra.mxu0 %v22002_v0  ;;  %14869 = vmatprep.mubr.bf16.mxu0 %v22336_v30  ;;  %v27744_v0 = vld [vmem:[%s28267_s1 + $0x30] sm:$0xff]  }
0x3deb   :  { %14839 = vmatprep.subr.bf16.mxu0 %v22007_v60  ;;  %v22030_v60 = vld [vmem:[%s28269_s3 + $0x1314] ss:$20 sps:$4 sm:$0xff]  }
0x3dee   :  { %14840 = vmatpush1.bf16.msra.mxu0 %v22005_v22  ;;  %v22028_v22 = vld [vmem:[%s28269_s3 + $0x1310] ss:$20 sps:$4 sm:$0xff]  }
0x3def   :  { %20979 = vmatprep.subr.bf16.mxu0 %v22335_v23 }
0x3df1   :  { %18611 = vmatmul.mubr.msk.bf16.vlgmr.msra.gmra.mrb[212].mxu0 %vm352_vm1, %v14727_v39 }
0x3df2   :  { %20980 = vmatpush3.bf16.msra.mxu0 %v22008_v62  ;;  %20983 = vmatprep.mubr.msk.bf16.mxu0 %vm22337_vm0, %v22335_v23  ;;  %v22036_v62 = vld [vmem:[%s28269_s3 + $0x131c] ss:$20 sps:$4 sm:$0xff]  }
0x3df3   :  { %20981 = vmatprep.subr.bf16.mxu0 %v22335_v23 }
0x3df6   :  { %20982 = vmatpush3.bf16.msra.mxu0 %v22009_v37 }
0x3df7   :  { %20314 = vmatprep.subr.bf16.mxu0 %v27591_v26 }
0x3df9   :  { %20984 = vmatmul.mubr.msk.bf16.vlgmr.msra.gmra.mrb[216].mxu0 %vm352_vm1, %v14727_v39  ;;  %v18642_v39 = vcombine.low %v18641_v1, %v18641_v1 }
0x3dfa   :  { %20315 = vmatpush3.bf16.msra.mxu0 %v27598_v43  ;;  %14964 = vmatprep.mubr.bf16.mxu0 %v18615_v9 }
0x3dfb   :  { %20316 = vmatprep.subr.bf16.mxu0 %v27604_v20 }
0x3dfe   :  { %20317 = vmatpush3.bf16.msra.mxu0 %v27081_v35  ;;  %v18614_v35 = vcombine.low %v18613_v36, %v18613_v36 }
0x3dff   :  { %20318 = vmatprep.subr.bf16.mxu0 %v27087_v55  ;;  %v22014_v55 = vld [vmem:[%s28269_s3 + $0x12c4] ss:$20 sps:$4 sm:$0xff]  }
0x3e00   :  { %15042 = vmatprep.subr.bf16.mxu1 %v22014_v55 }
0x3e02   :  { %20319 = vmatpush3.bf16.msra.mxu0 %v27093_v21  ;;  %v22012_v21 = vld [vmem:[%s28269_s3 + $0x12c0] ss:$20 sps:$4 sm:$0xff]  }
0x3e03   :  { %20320 = vmatprep.subr.bf16.mxu0 %v27099_v5  ;;  %15043 = vmatpush1.bf16.msra.mxu1 %v22012_v21  ;;  %v22017_v5 = vld [vmem:[%s28269_s3 + $0x12ec] ss:$20 sps:$4 sm:$0xff]  }
0x3e04   :  { %15044 = vmatprep.subr.bf16.mxu1 %v22017_v5 }
0x3e06   :  { %20321 = vmatpush3.bf16.msra.mxu0 %v27105_v34  ;;  %v22015_v34 = vld [vmem:[%s28269_s3 + $0x12e8] ss:$20 sps:$4 sm:$0xff]  }
0x3e07   :  { %20322 = vmatprep.subr.bf16.mxu0 %v27111_v38  ;;  %15045 = vmatpush1.bf16.msra.mxu1 %v22015_v34  ;;  %v22020_v38 = vld [vmem:[%s28269_s3 + $0x12cc] ss:$20 sps:$4 sm:$0xff]  }
0x3e08   :  { %15083 = vmatprep.subr.bf16.mxu1 %v22020_v38 }
0x3e0a   :  { %20323 = vmatpush3.bf16.msra.mxu0 %v27117_v8 }
0x3e0b   :  { %20324 = vmatprep.subr.bf16.mxu0 %v27123_v24 }
0x3e0e   :  { %20325 = vmatpush3.bf16.msra.mxu0 %v27129_v42 }
0x3e0f   :  { %20326 = vmatprep.subr.bf16.mxu0 %v27135_v29 }
0x3e12   :  { %20327 = vmatpush3.bf16.msra.mxu0 %v27141_v25 }
0x3e13   :  { %20328 = vmatprep.subr.bf16.mxu0 %v27221_v32 }
0x3e16   :  { %20329 = vmatpush3.bf16.msra.mxu0 %v27227_v19 }
0x3e17   :  { %15288 = vmatprep.subr.bf16.mxu0 %v22030_v60 }
0x3e19   :  { %14965 = vmatmul.mubr.bf16.vlgmr.msra.gmra.mrb[220].mxu0 %v18614_v35 }
0x3e1a   :  { %15320 = vmatprep.mubr.bf16.mxu0 %v22336_v30  ;;  %15289 = vmatpush1.bf16.msra.mxu0 %v22028_v22 }
0x3ebc   :  { %v14830_v8 = vpop.f32.mrb[208].mxu0 }
0x3ebd   :  { %v27637_v24 = vadd.f32 %v14830_v8, %v27548_v10  ;;  %v14832_v42 = vpop.f32.mrb[209].mxu0 }
0x3ebe   :  { %v27640_v29 = vadd.f32 %v14832_v42, %v27551_v27  ;;  %v14834_v25 = vpop.f32.mrb[210].mxu0 }
0x3ebf   :  { %v14835_v33 = vpop.f32.mrb[211].mxu0 }
0x3ec4   :  { %v14871_v3 = vpop.f32.mrb[212].mxu0 }
0x3ec5   :  { %v27643_v48 = vadd.f32 %v14871_v3, %v27554_v13  ;;  %v14873_v50 = vpop.f32.mrb[213].mxu0 }
0x3ec6   :  { %v27646_v17 = vadd.f32 %v14873_v50, %v27557_v49  ;;  %v14875_v2 = vpop.f32.mrb[214].mxu0  ;;  %v22021_v49 = vld [vmem:[%s28269_s3 + $0x12f0] ss:$20 sps:$4 sm:$0xff]  }
0x3ec7   :  { %v14876_v15 = vpop.f32.mrb[215].mxu0 }
0x3ecc   :  { %v14912_v46 = vpop.f32.mrb[216].mxu0 }
0x3ecd   :  { %v27649_v4 = vadd.f32 %v14912_v46, %v27560_v40  ;;  %v20985_v41 = vpop.f32.mrb[217].mxu0  ;;  %v18643_v40 = vcombine.high %v18641_v1, %v18641_v1  ;;  %v22052_v1 = vld [vmem:[%s28269_s3 + $0x136c] ss:$20 sps:$4 sm:$0xff]  }
0x3ece   :  { %v14915_v45 = vpop.f32.mrb[218].mxu0 }
0x3ecf   :  { %v20986_v52 = vpop.f32.mrb[219].mxu0 }
0x3eec   :  { %v20330_v56 = vpop.f32.mrb[220].mxu0 }
0x3eed   :  { %v20331_v63 = vpop.f32.mrb[221].mxu0 }
0x3eee   :  { %v20332_v10 = vadd.f32 %v20331_v63, %v20330_v56  ;;  %v20333_v58 = vpop.f32.mrb[222].mxu0  ;;  %v22037_v63 = vld [vmem:[%s28269_s3 + $0x1340] ss:$20 sps:$4 sm:$0xff]  }
0x3eef   :  { %v20334_v27 = vpop.f32.mrb[223].mxu0  ;;  %v22041_v58 = vld [vmem:[%s28269_s3 + $0x1348] ss:$20 sps:$4 sm:$0xff]  }
0x3ef0   :  { %v14967_v31 = vadd.f32 %v27486_v61, %v20332_v10  ;;  %v22040_v10 = vld [vmem:[%s28269_s3 + $0x1320] ss:$20 sps:$4 sm:$0xff]  }
0x3ef1   :  { %v18669_v27 = vld [vmem:[%s28268_s0 + $0x1f0] sm:$0xff] }
0x3ef2   :  { %v14972_v11 = vmax.f32 %v14967_v31, 0.0  ;;  %v18671_v31 = vcombine.high %v18669_v27, %v18669_v27 }
0x3ef4   :  { %v14973_v13 = vpack.c.bf16 %v14972_v11, %v14972_v11  ;;  %v27824_v11 = vld [vmem:[%s28267_s1 + $0x78] sm:$0xff]  }
0x3ef6   :  { %18638 = vmatmul.mubr.msk.bf16.vlgmr.msra.gmra.mrb[228].mxu1 %vm352_vm1, %v14973_v13 }
0x3ef7   :  { %15084 = vmatpush1.bf16.msra.mxu1 %v22018_v12  ;;  %15115 = vmatprep.mubr.bf16.mxu1 %v22336_v30  ;;  %v18670_v12 = vcombine.low %v18669_v27, %v18669_v27 }
0x3ef8   :  { %15085 = vmatprep.subr.bf16.mxu1 %v22023_v28  ;;  %v22046_v28 = vld [vmem:[%s28269_s3 + $0x1364] ss:$20 sps:$4 sm:$0xff]  }
0x3efb   :  { %15086 = vmatpush1.bf16.msra.mxu1 %v22021_v49  ;;  %v22044_v49 = vld [vmem:[%s28269_s3 + $0x1360] ss:$20 sps:$4 sm:$0xff]  }
0x3efc   :  { %20987 = vmatprep.subr.bf16.mxu1 %v22335_v23 }
0x3efe   :  { %18639 = vmatmul.mubr.msk.bf16.vlgmr.msra.gmra.mrb[232].mxu1 %vm352_vm1, %v14973_v13 }
0x3eff   :  { %20988 = vmatpush3.bf16.msra.mxu1 %v22024_v54  ;;  %20991 = vmatprep.mubr.msk.bf16.mxu1 %vm22337_vm0, %v22335_v23  ;;  %v22049_v54 = vld [vmem:[%s28269_s3 + $0x138c] ss:$20 sps:$4 sm:$0xff]  }
0x3f00   :  { %20989 = vmatprep.subr.bf16.mxu1 %v22335_v23 }
0x3f03   :  { %20990 = vmatpush3.bf16.msra.mxu1 %v22025_v7  ;;  %v22047_v7 = vld [vmem:[%s28269_s3 + $0x1388] ss:$20 sps:$4 sm:$0xff]  }
0x3f04   :  { %20339 = vmatprep.subr.bf16.mxu1 %v27591_v26 }
0x3f06   :  { %20992 = vmatmul.mubr.msk.bf16.vlgmr.msra.gmra.mrb[236].mxu1 %vm352_vm1, %v14973_v13  ;;  %v27830_v13 = vld [vmem:[%s28267_s1 + $0x38] sm:$0xff]  }
0x3f07   :  { %20340 = vmatpush3.bf16.msra.mxu1 %v27598_v43  ;;  %15210 = vmatprep.mubr.bf16.mxu1 %v18643_v40 }
0x3f08   :  { %20341 = vmatprep.subr.bf16.mxu1 %v27604_v20 }
0x3f0b   :  { %20342 = vmatpush3.bf16.msra.mxu1 %v27684_v6 }
0x3f0c   :  { %20343 = vmatprep.subr.bf16.mxu1 %v27690_v53 }
0x3f0f   :  { %20344 = vmatpush3.bf16.msra.mxu1 %v27696_v51 }
0x3f10   :  { %20345 = vmatprep.subr.bf16.mxu1 %v27702_v44 }
0x3f13   :  { %20346 = vmatpush3.bf16.msra.mxu1 %v27708_v18 }
0x3f14   :  { %20347 = vmatprep.subr.bf16.mxu1 %v27714_v59 }
0x3f17   :  { %20348 = vmatpush3.bf16.msra.mxu1 %v27720_v47 }
0x3f18   :  { %20349 = vmatprep.subr.bf16.mxu1 %v27726_v57 }
0x3f1b   :  { %20350 = vmatpush3.bf16.msra.mxu1 %v27732_v14 }
0x3f1c   :  { %20351 = vmatprep.subr.bf16.mxu1 %v27738_v16 }
0x3f1f   :  { %20352 = vmatpush3.bf16.msra.mxu1 %v27744_v0 }
0x3f20   :  { %20353 = vmatprep.subr.bf16.mxu1 %v27221_v32  ;;  %v22033_v32 = vld [vmem:[%s28269_s3 + $0x133c] ss:$20 sps:$4 sm:$0xff]  }
0x3f21   :  { %15290 = vmatprep.subr.bf16.mxu0 %v22033_v32 }
0x3f23   :  { %20354 = vmatpush3.bf16.msra.mxu1 %v27227_v19  ;;  %v22031_v19 = vld [vmem:[%s28269_s3 + $0x1338] ss:$20 sps:$4 sm:$0xff]  }
0x3f24   :  { %15291 = vmatpush1.bf16.msra.mxu0 %v22031_v19  ;;  %15534 = vmatprep.subr.bf16.mxu1 %v22046_v28 }
0x3f25   :  { %15329 = vmatprep.subr.bf16.mxu0 %v22036_v62 }
0x3f26   :  { %15211 = vmatmul.mubr.bf16.vlgmr.msra.gmra.mrb[240].mxu1 %v18642_v39 }
0x3f27   :  { %15566 = vmatprep.mubr.bf16.mxu1 %v22336_v30  ;;  %15535 = vmatpush1.bf16.msra.mxu1 %v22044_v49 }
0x3f28   :  { %15536 = vmatprep.subr.bf16.mxu1 %v22049_v54 }
0x3f2b   :  { %15537 = vmatpush1.bf16.msra.mxu1 %v22047_v7 }
0x3f2c   :  { %15575 = vmatprep.subr.bf16.mxu1 %v22052_v1 }
0x3fc9   :  { %v15076_v37 = vpop.f32.mrb[228].mxu1 }
0x3fca   :  { %v27766_v36 = vadd.f32 %v15076_v37, %v27637_v24  ;;  %v15078_v9 = vpop.f32.mrb[229].mxu1 }
0x3fcb   :  { %v27769_v35 = vadd.f32 %v15078_v9, %v27640_v29  ;;  %v15080_v55 = vpop.f32.mrb[230].mxu1 }
0x3fcc   :  { %v15081_v21 = vpop.f32.mrb[231].mxu1 }
0x3fd1   :  { %v15117_v5 = vpop.f32.mrb[232].mxu1 }
0x3fd2   :  { %v27772_v34 = vadd.f32 %v15117_v5, %v27643_v48  ;;  %v15119_v38 = vpop.f32.mrb[233].mxu1 }
0x3fd3   :  { %v27775_v8 = vadd.f32 %v15119_v38, %v27646_v17  ;;  %v15121_v42 = vpop.f32.mrb[234].mxu1  ;;  %v22034_v17 = vld [vmem:[%s28269_s3 + $0x1318] ss:$20 sps:$4 sm:$0xff]  }
0x3fd4   :  { %v15122_v25 = vpop.f32.mrb[235].mxu1 }
0x3fd9   :  { %v15158_v33 = vpop.f32.mrb[236].mxu1 }
0x3fda   :  { %v27778_v24 = vadd.f32 %v15158_v33, %v27649_v4  ;;  %v20993_v3 = vpop.f32.mrb[237].mxu1  ;;  %v22039_v4 = vld [vmem:[%s28269_s3 + $0x1344] ss:$20 sps:$4 sm:$0xff]  }
0x3fdb   :  { %v15161_v50 = vpop.f32.mrb[238].mxu1 }
0x3fdc   :  { %v20994_v29 = vpop.f32.mrb[239].mxu1 }
0x3ff9   :  { %v20355_v2 = vpop.f32.mrb[240].mxu1 }
0x3ffa   :  { %v20356_v15 = vpop.f32.mrb[241].mxu1 }
0x3ffb   :  { %v20357_v46 = vadd.f32 %v20356_v15, %v20355_v2  ;;  %v20358_v41 = vpop.f32.mrb[242].mxu1 }
0x3ffc   :  { %v20359_v45 = vpop.f32.mrb[243].mxu1  ;;  %v22053_v41 = vld [vmem:[%s28269_s3 + $0x1390] ss:$20 sps:$4 sm:$0xff]  }
0x3ffd   :  { %v15213_v48 = vadd.f32 %v27486_v61, %v20357_v46  ;;  %v22056_v45 = vld [vmem:[%s28269_s3 + $0x1370] ss:$20 sps:$4 sm:$0xff]  }
0x3fff   :  { %v15218_v52 = vmax.f32 %v15213_v48, 0.0  ;;  %v22057_v48 = vld [vmem:[%s28269_s3 + $0x1398] ss:$20 sps:$4 sm:$0xff]  }
0x4001   :  { %v15219_v56 = vpack.c.bf16 %v15218_v52, %v15218_v52  ;;  %v18697_v52 = vld [vmem:[%s28268_s0 + $0x1f8] sm:$0xff] }
0x4003   :  { %18666 = vmatmul.mubr.msk.bf16.vlgmr.msra.gmra.mrb[224].mxu0 %vm352_vm1, %v15219_v56 }
0x4004   :  { %15330 = vmatpush1.bf16.msra.mxu0 %v22034_v17  ;;  %15361 = vmatprep.mubr.bf16.mxu0 %v22336_v30  ;;  %v18699_v17 = vcombine.high %v18697_v52, %v18697_v52 }
0x4005   :  { %15331 = vmatprep.subr.bf16.mxu0 %v22039_v4 }
0x4008   :  { %15332 = vmatpush1.bf16.msra.mxu0 %v22037_v63 }
0x4009   :  { %20995 = vmatprep.subr.bf16.mxu0 %v22335_v23 }
0x400b   :  { %18667 = vmatmul.mubr.msk.bf16.vlgmr.msra.gmra.mrb[228].mxu0 %vm352_vm1, %v15219_v56 }
0x400c   :  { %20996 = vmatpush3.bf16.msra.mxu0 %v22040_v10  ;;  %20999 = vmatprep.mubr.msk.bf16.mxu0 %vm22337_vm0, %v22335_v23 }
0x400d   :  { %20997 = vmatprep.subr.bf16.mxu0 %v22335_v23 }
0x4010   :  { %20998 = vmatpush3.bf16.msra.mxu0 %v22041_v58 }
0x4011   :  { %20364 = vmatprep.subr.bf16.mxu0 %v27591_v26 }
0x4013   :  { %21000 = vmatmul.mubr.msk.bf16.vlgmr.msra.gmra.mrb[232].mxu0 %vm352_vm1, %v15219_v56 }
0x4014   :  { %20365 = vmatpush3.bf16.msra.mxu0 %v27598_v43  ;;  %15456 = vmatprep.mubr.bf16.mxu0 %v18671_v31 }
0x4015   :  { %20366 = vmatprep.subr.bf16.mxu0 %v27604_v20 }
0x4018   :  { %20367 = vmatpush3.bf16.msra.mxu0 %v27684_v6 }
0x4019   :  { %20368 = vmatprep.subr.bf16.mxu0 %v27690_v53 }
0x401c   :  { %20369 = vmatpush3.bf16.msra.mxu0 %v27696_v51 }
0x401d   :  { %20370 = vmatprep.subr.bf16.mxu0 %v27702_v44 }
0x4020   :  { %20371 = vmatpush3.bf16.msra.mxu0 %v27708_v18 }
0x4021   :  { %20372 = vmatprep.subr.bf16.mxu0 %v27714_v59 }
0x4024   :  { %20373 = vmatpush3.bf16.msra.mxu0 %v27720_v47 }
0x4025   :  { %20374 = vmatprep.subr.bf16.mxu0 %v27726_v57 }
0x4028   :  { %20375 = vmatpush3.bf16.msra.mxu0 %v27732_v14 }
0x4029   :  { %20376 = vmatprep.subr.bf16.mxu0 %v27738_v16 }
0x402c   :  { %20377 = vmatpush3.bf16.msra.mxu0 %v27744_v0 }
0x402d   :  { %20378 = vmatprep.subr.bf16.mxu0 %v27824_v11 }
0x4030   :  { %20379 = vmatpush3.bf16.msra.mxu0 %v27830_v13 }
0x4033   :  { %15457 = vmatmul.mubr.bf16.vlgmr.msra.gmra.mrb[236].mxu0 %v18670_v12 }
0x4034   :  { %15812 = vmatprep.mubr.bf16.mxu0 %v22336_v30 }
0x40d6   :  { %v15322_v40 = vpop.f32.mrb[224].mxu0 }
0x40d7   :  { %v27850_v39 = vadd.f32 %v15322_v40, %v27766_v36  ;;  %v15324_v60 = vpop.f32.mrb[225].mxu0 }
0x40d8   :  { %v27853_v22 = vadd.f32 %v15324_v60, %v27769_v35  ;;  %v15326_v32 = vpop.f32.mrb[226].mxu0 }
0x40d9   :  { %v15327_v19 = vpop.f32.mrb[227].mxu0 }
0x40de   :  { %v15363_v62 = vpop.f32.mrb[228].mxu0 }
0x40df   :  { %v27856_v37 = vadd.f32 %v15363_v62, %v27772_v34  ;;  %v15365_v9 = vpop.f32.mrb[229].mxu0 }
0x40e0   :  { %v27859_v55 = vadd.f32 %v15365_v9, %v27775_v8  ;;  %v15367_v21 = vpop.f32.mrb[230].mxu0  ;;  %v22050_v8 = vld [vmem:[%s28269_s3 + $0x1368] ss:$20 sps:$4 sm:$0xff]   ;;  %v22066_v9 = vld [vmem:[%s28269_s3 + $0x13b8] ss:$20 sps:$4 sm:$0xff]  }
0x40e1   :  { %v15368_v5 = vpop.f32.mrb[231].mxu0  ;;  %v22071_v21 = vld [vmem:[%s28269_s3 + $0x13e4] ss:$20 sps:$4 sm:$0xff]  }
0x40e2   :  { %v22069_v5 = vld [vmem:[%s28269_s3 + $0x13e0] ss:$20 sps:$4 sm:$0xff]  }
0x40e6   :  { %v15404_v38 = vpop.f32.mrb[232].mxu0 }
0x40e7   :  { %v27862_v36 = vadd.f32 %v15404_v38, %v27778_v24  ;;  %v21001_v42 = vpop.f32.mrb[233].mxu0  ;;  %v22055_v24 = vld [vmem:[%s28269_s3 + $0x1394] ss:$20 sps:$4 sm:$0xff]  }
0x40e8   :  { %v15407_v25 = vpop.f32.mrb[234].mxu0  ;;  %v22073_v38 = vld [vmem:[%s28269_s3 + $0x13e8] ss:$20 sps:$4 sm:$0xff]   ;;  %v22075_v42 = vld [vmem:[%s28271_s5] sm:$0xff]  }
0x40e9   :  { %v21002_v35 = vpop.f32.mrb[235].mxu0  ;;  %v22076_v25 = vld [vmem:[%s28271_s5 + $0x48] sm:$0xff]  }
0x40ea   :  { %v22077_v35 = vld [vmem:[%s28271_s5 + $0x8] sm:$0xff]  }
0x4106   :  { %v20380_v33 = vpop.f32.mrb[236].mxu0 }
0x4107   :  { %v20381_v3 = vpop.f32.mrb[237].mxu0 }
0x4108   :  { %v20382_v50 = vadd.f32 %v20381_v3, %v20380_v33  ;;  %v20383_v29 = vpop.f32.mrb[238].mxu0  ;;  %v22078_v33 = vld [vmem:[%s28271_s5 + $0x50] sm:$0xff]  }
0x4109   :  { %v20384_v2 = vpop.f32.mrb[239].mxu0  ;;  %v22079_v3 = vld [vmem:[%s28271_s5 + $0x10] sm:$0xff]   ;;  %v22083_v29 = vld [vmem:[%s28271_s5 + $0x18] sm:$0xff]  }
0x410a   :  { %v15459_v34 = vadd.f32 %v27486_v61, %v20382_v50  ;;  %v22082_v50 = vld [vmem:[%s28271_s5 + $0x58] sm:$0xff]   ;;  %v22086_v2 = vld [vmem:[%s28271_s5 + $0x60] sm:$0xff]  }
0x410c   :  { %v15464_v15 = vmax.f32 %v15459_v34, 0.0  ;;  %v22087_v34 = vld [vmem:[%s28271_s5 + $0x20] sm:$0xff]  }
0x410e   :  { %v15465_v46 = vpack.c.bf16 %v15464_v15, %v15464_v15  ;;  %v22090_v15 = vld [vmem:[%s28271_s5 + $0x68] sm:$0xff]  }
0x4110   :  { %18694 = vmatmul.mubr.msk.bf16.vlgmr.msra.gmra.mrb[244].mxu1 %vm352_vm1, %v15465_v46 }
0x4111   :  { %15576 = vmatpush1.bf16.msra.mxu1 %v22050_v8  ;;  %15607 = vmatprep.mubr.bf16.mxu1 %v22336_v30  ;;  %v22091_v8 = vld [vmem:[%s28271_s5 + $0x28] sm:$0xff]  }
0x4112   :  { %15577 = vmatprep.subr.bf16.mxu1 %v22055_v24  ;;  %v22094_v24 = vld [vmem:[%s28271_s5 + $0x70] sm:$0xff]  }
0x4115   :  { %15578 = vmatpush1.bf16.msra.mxu1 %v22053_v41  ;;  %v22095_v41 = vld [vmem:[%s28271_s5 + $0x30] sm:$0xff]  }
0x4116   :  { %21003 = vmatprep.subr.bf16.mxu1 %v22335_v23 }
0x4118   :  { %18695 = vmatmul.mubr.msk.bf16.vlgmr.msra.gmra.mrb[248].mxu1 %vm352_vm1, %v15465_v46 }
0x4119   :  { %21004 = vmatpush3.bf16.msra.mxu1 %v22056_v45  ;;  %21007 = vmatprep.mubr.msk.bf16.mxu1 %vm22337_vm0, %v22335_v23  ;;  %v22096_v45 = vld [vmem:[%s28271_s5 + $0xe0] sm:$0xff]  }
0x411a   :  { %21005 = vmatprep.subr.bf16.mxu1 %v22335_v23 }
0x411d   :  { %21006 = vmatpush3.bf16.msra.mxu1 %v22057_v48  ;;  %v22097_v48 = vld [vmem:[%s28271_s5 + $0xa0] sm:$0xff]  }
0x411e   :  { %20389 = vmatprep.subr.bf16.mxu1 %v27591_v26  ;;  %v18698_v26 = vcombine.low %v18697_v52, %v18697_v52  ;;  %v22098_v52 = vld [vmem:[%s28271_s5 + $0x78] sm:$0xff]  }
0x4120   :  { %21008 = vmatmul.mubr.msk.bf16.vlgmr.msra.gmra.mrb[252].mxu1 %vm352_vm1, %v15465_v46  ;;  %v22093_v46 = vld [vmem:[%s28271_s5 + $0x98] sm:$0xff]  }
0x4121   :  { %20390 = vmatpush3.bf16.msra.mxu1 %v27598_v43  ;;  %15702 = vmatprep.mubr.bf16.mxu1 %v18699_v17  ;;  %v22062_v43 = vld [vmem:[%s28269_s3 + $0x13b4] ss:$20 sps:$4 sm:$0xff]   ;;  %v22099_v17 = vld [vmem:[%s28271_s5 + $0x38] sm:$0xff]  }
0x4122   :  { %20391 = vmatprep.subr.bf16.mxu1 %v27604_v20  ;;  %v22060_v20 = vld [vmem:[%s28269_s3 + $0x13b0] ss:$20 sps:$4 sm:$0xff]   ;;  %15780 = vmatprep.subr.bf16.mxu0 %v22062_v43  ;;  %v22101_v43 = vld [vmem:[%s28271_s5 + $0xa8] sm:$0xff]  }
0x4123   :  { %15781 = vmatpush1.bf16.msra.mxu0 %v22060_v20  ;;  %v22102_v20 = vld [vmem:[%s28271_s5 + $0xf0] sm:$0xff]  }
0x4125   :  { %20392 = vmatpush3.bf16.msra.mxu1 %v27684_v6  ;;  %v22065_v6 = vld [vmem:[%s28269_s3 + $0x13dc] ss:$20 sps:$4 sm:$0xff]  }
0x4126   :  { %20393 = vmatprep.subr.bf16.mxu1 %v27690_v53  ;;  %v22063_v53 = vld [vmem:[%s28269_s3 + $0x13d8] ss:$20 sps:$4 sm:$0xff]   ;;  %15782 = vmatprep.subr.bf16.mxu0 %v22065_v6  ;;  %v22104_v6 = vld [vmem:[%s28271_s5 + $0xb0] sm:$0xff]  }
0x4127   :  { %15783 = vmatpush1.bf16.msra.mxu0 %v22063_v53  ;;  %v22105_v53 = vld [vmem:[%s28271_s5 + $0xf8] sm:$0xff]  }
0x4129   :  { %20394 = vmatpush3.bf16.msra.mxu1 %v27696_v51  ;;  %v22068_v51 = vld [vmem:[%s28269_s3 + $0x13bc] ss:$20 sps:$4 sm:$0xff]  }
0x412a   :  { %20395 = vmatprep.subr.bf16.mxu1 %v27702_v44  ;;  %15821 = vmatprep.subr.bf16.mxu0 %v22068_v51  ;;  %v22080_v44 = vld [vmem:[%s28271_s5 + $0xc0] sm:$0xff]   ;;  %v22107_v51 = vld [vmem:[%s28271_s5 + $0xb8] sm:$0xff]  }
0x412d   :  { %20396 = vmatpush3.bf16.msra.mxu1 %v27708_v18  ;;  %v22081_v18 = vld [vmem:[%s28271_s5 + $0x80] sm:$0xff]  }
0x412e   :  { %20397 = vmatprep.subr.bf16.mxu1 %v27714_v59  ;;  %v22084_v59 = vld [vmem:[%s28271_s5 + $0xc8] sm:$0xff]  }
0x4131   :  { %20398 = vmatpush3.bf16.msra.mxu1 %v27720_v47  ;;  %v22085_v47 = vld [vmem:[%s28271_s5 + $0x88] sm:$0xff]  }
0x4132   :  { %20399 = vmatprep.subr.bf16.mxu1 %v27726_v57  ;;  %v22088_v57 = vld [vmem:[%s28271_s5 + $0xd0] sm:$0xff]  }
0x4135   :  { %20400 = vmatpush3.bf16.msra.mxu1 %v27732_v14  ;;  %v22089_v14 = vld [vmem:[%s28271_s5 + $0x90] sm:$0xff]  }
0x4136   :  { %20401 = vmatprep.subr.bf16.mxu1 %v27738_v16  ;;  %v22092_v16 = vld [vmem:[%s28271_s5 + $0xd8] sm:$0xff]  }
0x4139   :  { %20402 = vmatpush3.bf16.msra.mxu1 %v27744_v0 }
0x413a   :  { %20403 = vmatprep.subr.bf16.mxu1 %v27824_v11 }
0x413d   :  { %20404 = vmatpush3.bf16.msra.mxu1 %v27830_v13 }
0x413e   :  { %20436 = vmatprep.subr.bf16.mxu1 %v22080_v44  ;;  %v15909_v44 = vlaneseq }
0x4140   :  { %15703 = vmatmul.mubr.bf16.vlgmr.msra.gmra.mrb[0].mxu1 %v18698_v26  ;;  %v22100_v26 = vld [vmem:[%s28271_s5 + $0xe8] sm:$0xff]  }
0x4141   :  { %20437 = vmatpush3.bf16.msra.mxu1 %v22081_v18  ;;  %v28058_v18 = vshrl.u32 %v15909_v44, 7  ;;  %v22131_v44 = vld [vmem:[%s28273_s7 + $0x68] ss:$16 sps:$4 sm:$0xff]  }
0x4142   :  { %20438 = vmatprep.subr.bf16.mxu1 %v22084_v59 }
0x4143   :  { %v15911_v59 = vsub.s32 0, %v28058_v18 }
0x4145   :  { %20439 = vmatpush3.bf16.msra.mxu1 %v22085_v47  ;;  %v15907_v47 = vld [vmem:[%s28272_s4] sm:$0x1f] }
0x4146   :  { %20440 = vmatprep.subr.bf16.mxu1 %v22088_v57  ;;  %v15915_v57 = vsub.s32 1, %v28058_v18 }
0x4149   :  { %20441 = vmatpush3.bf16.msra.mxu1 %v22089_v14  ;;  %v15912_v14 = vrot.slane %v15907_v47, %v15911_v59 }
0x414a   :  { %20442 = vmatprep.subr.bf16.mxu1 %v22092_v16 }
0x414d   :  { %20443 = vmatpush3.bf16.msra.mxu1 %v22093_v46 }
0x414e   :  { %20444 = vmatprep.subr.bf16.mxu1 %v22096_v45  ;;  %v22121_v45 = vld [vmem:[%s28273_s7 + $0x2c] ss:$16 sps:$4 sm:$0xff]  }
0x4151   :  { %20445 = vmatpush3.bf16.msra.mxu1 %v22097_v48  ;;  %v22116_v48 = vld [vmem:[%s28273_s7 + $0x20] ss:$16 sps:$4 sm:$0xff]  }
0x4152   :  { %20446 = vmatprep.subr.bf16.mxu1 %v22100_v26  ;;  %v22122_v26 = vld [vmem:[%s28273_s7 + $0x40] ss:$16 sps:$4 sm:$0xff]  }
0x4155   :  { %20447 = vmatpush3.bf16.msra.mxu1 %v22101_v43  ;;  %v22127_v43 = vld [vmem:[%s28273_s7 + $0x4c] ss:$16 sps:$4 sm:$0xff]  }
0x4156   :  { %20448 = vmatprep.subr.bf16.mxu1 %v22102_v20  ;;  %v22125_v20 = vld [vmem:[%s28273_s7 + $0x48] ss:$16 sps:$4 sm:$0xff]  }
0x4159   :  { %20449 = vmatpush3.bf16.msra.mxu1 %v22104_v6  ;;  %v22130_v6 = vld [vmem:[%s28273_s7 + $0x64] ss:$16 sps:$4 sm:$0xff]  }
0x415a   :  { %20450 = vmatprep.subr.bf16.mxu1 %v22105_v53  ;;  %v22133_v53 = vld [vmem:[%s28273_s7 + $0x6c] ss:$16 sps:$4 sm:$0xff]  }
0x415d   :  { %20451 = vmatpush3.bf16.msra.mxu1 %v22107_v51  ;;  %v22128_v51 = vld [vmem:[%s28273_s7 + $0x60] ss:$16 sps:$4 sm:$0xff]  }
0x41e3   :  { %v15568_v0 = vpop.f32.mrb[244].mxu1 }
0x41e4   :  { %v27944_v56 = vadd.f32 %v15568_v0, %v27850_v39  ;;  %v15570_v4 = vpop.f32.mrb[245].mxu1  ;;  %v15916_v0 = vrot.slane %v15907_v47, %v15915_v57 }
0x41e5   :  { %v27947_v63 = vadd.f32 %v15570_v4, %v27853_v22  ;;  %v15572_v10 = vpop.f32.mrb[246].mxu1 }
0x41e6   :  { %v15573_v58 = vpop.f32.mrb[247].mxu1 }
0x41eb   :  { %v15609_v27 = vpop.f32.mrb[248].mxu1 }
0x41ec   :  { %v27950_v31 = vadd.f32 %v15609_v27, %v27856_v37  ;;  %v15611_v11 = vpop.f32.mrb[249].mxu1 }
0x41ed   :  { %v27953_v12 = vadd.f32 %v15611_v11, %v27859_v55  ;;  %v15613_v13 = vpop.f32.mrb[250].mxu1 }
0x41ee   :  { %v15614_v28 = vpop.f32.mrb[251].mxu1 }
0x41ef   :  { %v15919_v28 = vsub.s32 2, %v28058_v18 }
0x41f3   :  { %v15650_v49 = vpop.f32.mrb[252].mxu1 }
0x41f4   :  { %v27956_v54 = vadd.f32 %v15650_v49, %v27862_v36  ;;  %v21009_v7 = vpop.f32.mrb[253].mxu1  ;;  %v22074_v36 = vld [vmem:[%s28271_s5 + $0x40] sm:$0xff]  }
0x41f5   :  { %v15653_v1 = vpop.f32.mrb[254].mxu1  ;;  %v15923_v7 = vsub.s32 3, %v28058_v18 }
0x41f6   :  { %v21010_v40 = vpop.f32.mrb[255].mxu1 }
0x4213   :  { %v20405_v39 = vpop.f32.mrb[0].mxu1 }
0x4214   :  { %v20406_v60 = vpop.f32.mrb[1].mxu1 }
0x4215   :  { %v20407_v22 = vadd.f32 %v20406_v60, %v20405_v39  ;;  %v20408_v32 = vpop.f32.mrb[2].mxu1  ;;  %v15920_v39 = vrot.slane %v15907_v47, %v15919_v28 }
0x4216   :  { %v20409_v19 = vpop.f32.mrb[3].mxu1 }
0x4217   :  { %v15705_v62 = vadd.f32 %v27486_v61, %v20407_v22  ;;  %v22072_v61 = vld [vmem:[%s28269_s3 + $0x13c0] ss:$20 sps:$4 sm:$0xff]  }
0x4219   :  { %v15710_v37 = vmax.f32 %v15705_v62, 0.0 }
0x421b   :  { %v15711_v55 = vpack.c.bf16 %v15710_v37, %v15710_v37 }
0x421d   :  { %18722 = vmatmul.mubr.msk.bf16.vlgmr.msra.gmra.mrb[240].mxu0 %vm352_vm1, %v15711_v55 }
0x421e   :  { %15822 = vmatpush1.bf16.msra.mxu0 %v22066_v9  ;;  %15853 = vmatprep.mubr.bf16.mxu0 %v22336_v30 }
0x421f   :  { %15823 = vmatprep.subr.bf16.mxu0 %v22071_v21 }
0x4222   :  { %15824 = vmatpush1.bf16.msra.mxu0 %v22069_v5  ;;  %v15927_v5 = vsub.s32 4, %v28058_v18 }
0x4223   :  { %21011 = vmatprep.subr.bf16.mxu0 %v22335_v23 }
0x4225   :  { %18723 = vmatmul.mubr.msk.bf16.vlgmr.msra.gmra.mrb[244].mxu0 %vm352_vm1, %v15711_v55 }
0x4226   :  { %21012 = vmatpush3.bf16.msra.mxu0 %v22072_v61  ;;  %21015 = vmatprep.mubr.msk.bf16.mxu0 %vm22337_vm0, %v22335_v23 }
0x4227   :  { %21013 = vmatprep.subr.bf16.mxu0 %v22335_v23 }
0x422a   :  { %21014 = vmatpush3.bf16.msra.mxu0 %v22073_v38  ;;  %v22106_v38 = vld [vmem:[%s28271_s5 + $0x108] sm:$0xff]  }
0x422b   :  { %20414 = vmatprep.subr.bf16.mxu0 %v22074_v36  ;;  %v15928_v36 = vrot.slane %v15907_v47, %v15927_v5  ;;  %v22139_v5 = vld [vmem:[%s28274_s9 + $0xc8] sm:$0xff]  }
0x422d   :  { %21016 = vmatmul.mubr.msk.bf16.vlgmr.msra.gmra.mrb[248].mxu0 %vm352_vm1, %v15711_v55 }
0x422e   :  { %20415 = vmatpush3.bf16.msra.mxu0 %v22075_v42 }
0x422f   :  { %20416 = vmatprep.subr.bf16.mxu0 %v22076_v25 }
0x4232   :  { %20417 = vmatpush3.bf16.msra.mxu0 %v22077_v35  ;;  %v22108_v35 = vld [vmem:[%s28271_s5 + $0x110] sm:$0xff]  }
0x4233   :  { %20418 = vmatprep.subr.bf16.mxu0 %v22078_v33 }
0x4236   :  { %20419 = vmatpush3.bf16.msra.mxu0 %v22079_v3 }
0x4237   :  { %20420 = vmatprep.subr.bf16.mxu0 %v22082_v50 }
0x423a   :  { %20421 = vmatpush3.bf16.msra.mxu0 %v22083_v29 }
0x423b   :  { %20422 = vmatprep.subr.bf16.mxu0 %v22086_v2 }
0x423e   :  { %20423 = vmatpush3.bf16.msra.mxu0 %v22087_v34 }
0x423f   :  { %20424 = vmatprep.subr.bf16.mxu0 %v22090_v15  ;;  %v22109_v15 = vld [vmem:[%s28271_s5 + $0x118] sm:$0xff]  }
0x4242   :  { %20425 = vmatpush3.bf16.msra.mxu0 %v22091_v8 }
0x4243   :  { %20426 = vmatprep.subr.bf16.mxu0 %v22094_v24  ;;  %v22112_v24 = vld [vmem:[%s28273_s7 + $0x4] ss:$16 sps:$4 sm:$0xff]  }
0x4244   :  { %16491 = vmatprep.subr.bf16.mxu1 %v22112_v24  ;;  %v22158_v24 = vld [vmem:[%s28274_s9 + $0x70] sm:$0xff]  }
0x4246   :  { %20427 = vmatpush3.bf16.msra.mxu0 %v22095_v41  ;;  %v22113_v41 = vld [vmem:[%s28273_s7 + $0x8] ss:$16 sps:$4 sm:$0xff]  }
0x4247   :  { %20428 = vmatprep.subr.bf16.mxu0 %v22098_v52  ;;  %v22119_v52 = vld [vmem:[%s28273_s7 + $0x28] ss:$16 sps:$4 sm:$0xff]  }
0x424a   :  { %20429 = vmatpush3.bf16.msra.mxu0 %v22099_v17  ;;  %v22124_v17 = vld [vmem:[%s28273_s7 + $0x44] ss:$16 sps:$4 sm:$0xff]  }
0x424b   :  { %21019 = vmatprep.subr.bf16.mxu0 %v22335_v23 }
0x42f0   :  { %v15814_v16 = vpop.f32.mrb[240].mxu0 }
0x42f1   :  { %v15902_v4 = vadd.f32 %v15814_v16, %v27944_v56  ;;  %v15816_v10 = vpop.f32.mrb[241].mxu0  ;;  %v15924_v56 = vrot.slane %v15907_v47, %v15923_v7  ;;  %v22134_v47 = vld [vmem:[%s28274_s9 + $0x40] sm:$0xff]  }
0x42f2   :  { %v15903_v58 = vadd.f32 %v15816_v10, %v27947_v63  ;;  %v15818_v27 = vpop.f32.mrb[242].mxu0  ;;  %v22103_v63 = vld [vmem:[%s28271_s5 + $0x100] sm:$0xff]  }
0x42f3   :  { %v15934_v11 = vadd.f32 %v15912_v14, %v15902_v4  ;;  %v15819_v13 = vpop.f32.mrb[243].mxu0  ;;  %v22135_v14 = vld [vmem:[%s28274_s9 + $0xc0] sm:$0xff]  }
0x42f4   :  { %v15935_v49 = vadd.f32 %v15916_v0, %v15903_v58  ;;  %v18725_v27 = vld [vmem:[%s28275_s6] ss:$0 sm:$0xff] }
0x42f5   :  { %v15939_v1 = vmax.f32 %v15934_v11, 0.0 }
0x42f6   :  { %v15940_v40 = vmax.f32 %v15935_v49, 0.0 }
0x42f7   :  { %v15944_v32 = vpack.c.bf16 %v15939_v1, %v15939_v1 }
0x42f8   :  { %v15945_v60 = vpack.c.bf16 %v15940_v40, %v15940_v40  ;;  %v15855_v22 = vpop.f32.mrb[244].mxu0 }
0x42f9   :  { %v15904_v19 = vadd.f32 %v15855_v22, %v27950_v31  ;;  %v15857_v62 = vpop.f32.mrb[245].mxu0 }
0x42fa   :  { %v15905_v37 = vadd.f32 %v15857_v62, %v27953_v12  ;;  %v15859_v9 = vpop.f32.mrb[246].mxu0  ;;  %16280 = vmatprep.mubr.bf16.mxu0 %v15945_v60 }
0x42fb   :  { %v15936_v55 = vadd.f32 %v15920_v39, %v15904_v19  ;;  %v15860_v21 = vpop.f32.mrb[247].mxu0  ;;  %16281 = vmatmul.mubr.bf16.vlgmr.msra.gmra.mrb[252].mxu0 %v15944_v32  ;;  %v22137_v9 = vld [vmem:[%s28274_s9 + $0x80] sm:$0xff]  }
0x42fc   :  { %v15937_v61 = vadd.f32 %v15924_v56, %v15905_v37  ;;  %21020 = vmatpush3.bf16.msra.mxu0 %v22103_v63  ;;  %21027 = vmatprep.mubr.msk.bf16.mxu0 %vm22337_vm0, %v22335_v23  ;;  %v22136_v37 = vld [vmem:[%s28274_s9] sm:$0xff]   ;;  %v22138_v21 = vld [vmem:[%s28274_s9 + $0x48] sm:$0xff]  }
0x42fd   :  { %v15941_v31 = vmax.f32 %v15936_v55, 0.0  ;;  %21021 = vmatprep.subr.bf16.mxu0 %v22335_v23 }
0x42fe   :  { %v15942_v12 = vmax.f32 %v15937_v61, 0.0  ;;  %v22140_v61 = vld [vmem:[%s28274_s9 + $0x8] sm:$0xff]  }
0x42ff   :  { %v15946_v33 = vpack.c.bf16 %v15941_v31, %v15941_v31  ;;  %v22142_v31 = vld [vmem:[%s28274_s9 + $0x50] sm:$0xff]  }
0x4300   :  { %v15947_v42 = vpack.c.bf16 %v15942_v12, %v15942_v12  ;;  %21022 = vmatpush3.bf16.msra.mxu0 %v22106_v38  ;;  %v15896_v25 = vpop.f32.mrb[248].mxu0  ;;  %v22141_v38 = vld [vmem:[%s28274_s9 + $0x88] sm:$0xff]   ;;  %v22143_v12 = vld [vmem:[%s28274_s9 + $0xd0] sm:$0xff]  }
0x4301   :  { %v15906_v3 = vadd.f32 %v15896_v25, %v27956_v54  ;;  %v21017_v50 = vpop.f32.mrb[249].mxu0  ;;  %21023 = vmatprep.subr.bf16.mxu0 %v22335_v23  ;;  %v22110_v54 = vld [vmem:[%s28273_s7] ss:$16 sps:$4 sm:$0xff]   ;;  %v22146_v25 = vld [vmem:[%s28274_s9 + $0x58] sm:$0xff]  }
0x4302   :  { %v15899_v29 = vpop.f32.mrb[250].mxu0  ;;  %16320 = vmatprep.mubr.bf16.mxu1 %v15947_v42  ;;  %v22145_v42 = vld [vmem:[%s28274_s9 + $0x90] sm:$0xff]   ;;  %v22150_v50 = vld [vmem:[%s28274_s9 + $0x60] sm:$0xff]  }
0x4303   :  { %v15938_v2 = vadd.f32 %v15928_v36, %v15906_v3  ;;  %v21018_v34 = vpop.f32.mrb[251].mxu0  ;;  %16321 = vmatmul.mubr.bf16.vlgmr.msra.gmra.mrb[4].mxu1 %v15946_v33  ;;  %v22144_v36 = vld [vmem:[%s28274_s9 + $0x10] sm:$0xff]   ;;  %v22148_v33 = vld [vmem:[%s28274_s9 + $0x18] sm:$0xff]   ;;  %v22151_v29 = vld [vmem:[%s28274_s9 + $0xe0] sm:$0xff]  }
0x4304   :  { %21024 = vmatpush3.bf16.msra.mxu0 %v22108_v35  ;;  %16523 = vmatprep.mubr.bf16.mxu1 %v22336_v30  ;;  %v22147_v35 = vld [vmem:[%s28274_s9 + $0xd8] sm:$0xff]   ;;  %v22153_v34 = vld [vmem:[%s28274_s9 + $0xa0] sm:$0xff]  }
0x4305   :  { %v15943_v8 = vmax.f32 %v15938_v2, 0.0  ;;  %21025 = vmatprep.subr.bf16.mxu0 %v22335_v23  ;;  %v22115_v23 = vld [vmem:[%s28273_s7 + $0xc] ss:$16 sps:$4 sm:$0xff]   ;;  %16492 = vmatpush1.bf16.msra.mxu1 %v22110_v54  ;;  %v22152_v2 = vld [vmem:[%s28274_s9 + $0x20] sm:$0xff]  }
0x4306   :  { %v22149_v3 = vld [vmem:[%s28274_s9 + $0x98] sm:$0xff]   ;;  %v22157_v54 = vld [vmem:[%s28274_s9 + $0xa8] sm:$0xff]  }
0x4307   :  { %v15948_v46 = vpack.c.bf16 %v15943_v8, %v15943_v8  ;;  %v22155_v8 = vld [vmem:[%s28274_s9 + $0xe8] sm:$0xff]  }
0x4308   :  { %21026 = vmatpush3.bf16.msra.mxu0 %v22109_v15  ;;  %v22154_v15 = vld [vmem:[%s28274_s9 + $0x68] sm:$0xff]  }
0x4309   :  { %16532 = vmatprep.subr.bf16.mxu0 %v22115_v23  ;;  %v22160_v23 = vld [vmem:[%s28274_s9 + $0x30] sm:$0xff]  }
0x430b   :  { %21028 = vmatmul.mubr.msk.bf16.vlgmr.msra.gmra.mrb[0].mxu0 %vm16244_vm2, %v15948_v46  ;;  %v22156_v46 = vld [vmem:[%s28274_s9 + $0x28] sm:$0xff]  }
0x430c   :  { %16564 = vmatprep.mubr.bf16.mxu0 %v22336_v30  ;;  %v22118_v30 = vld [vmem:[%s28273_s7 + $0x24] ss:$16 sps:$4 sm:$0xff]   ;;  %16533 = vmatpush1.bf16.msra.mxu0 %v22113_v41 }
0x430d   :  { %16493 = vmatprep.subr.bf16.mxu1 %v22118_v30  ;;  %16534 = vmatprep.subr.bf16.mxu0 %v22121_v45  ;;  %v22159_v41 = vld [vmem:[%s28274_s9 + $0xf0] sm:$0xff]   ;;  %v22162_v45 = vld [vmem:[%s28274_s9 + $0x78] sm:$0xff]  }
0x430e   :  { %16494 = vmatpush1.bf16.msra.mxu1 %v22116_v48  ;;  %v22161_v30 = vld [vmem:[%s28274_s9 + $0xb0] sm:$0xff]   ;;  %v22163_v48 = vld [vmem:[%s28274_s9 + $0xf8] sm:$0xff]  }
0x430f   :  { %16495 = vmatprep.subr.bf16.mxu1 %v22124_v17  ;;  %v22165_v17 = vld [vmem:[%s28274_s9 + $0xb8] sm:$0xff]  }
0x4310   :  { %16535 = vmatpush1.bf16.msra.mxu0 %v22119_v52  ;;  %v22164_v52 = vld [vmem:[%s28274_s9 + $0x38] sm:$0xff]  }
0x4311   :  { %16536 = vmatprep.subr.bf16.mxu0 %v22127_v43 }
0x4312   :  { %16496 = vmatpush1.bf16.msra.mxu1 %v22122_v26  ;;  %v16386_v26 = vld [vmem:[%s28276_s8] sm:$0xf] }
0x4313   :  { %16497 = vmatprep.subr.bf16.mxu1 %v22130_v6  ;;  %v16391_v43 = vrot.slane %v16386_v26, %v15911_v59  ;;  %v16395_v6 = vrot.slane %v16386_v26, %v15915_v57 }
0x4314   :  { %16537 = vmatpush1.bf16.msra.mxu0 %v22125_v20  ;;  %v16399_v20 = vrot.slane %v16386_v26, %v15919_v28 }
0x4315   :  { %16538 = vmatprep.subr.bf16.mxu0 %v22133_v53  ;;  %v16403_v53 = vrot.slane %v16386_v26, %v15923_v7 }
0x4316   :  { %16498 = vmatpush1.bf16.msra.mxu1 %v22128_v51 }
0x4317   :  { %20463 = vmatprep.subr.bf16.mxu1 %v22134_v47 }
0x4318   :  { %16539 = vmatpush1.bf16.msra.mxu0 %v22131_v44 }
0x4319   :  { %20485 = vmatprep.subr.bf16.mxu0 %v22135_v14 }
0x43ce   :  { %v20430_v16 = vpop.f32.mrb[252].mxu0 }
0x43cf   :  { %v20431_v0 = vpop.f32.mrb[253].mxu0 }
0x43d0   :  { %v20432_v4 = vadd.f32 %v20431_v0, %v20430_v16  ;;  %v20433_v10 = vpop.f32.mrb[254].mxu0 }
0x43d1   :  { %v20434_v58 = vpop.f32.mrb[255].mxu0 }
0x43d2   :  { %v16283_v49 = vadd.f32 %v20432_v4, %v18725_v27 }
0x43d6   :  { %v20452_v11 = vpop.f32.mrb[4].mxu1 }
0x43d7   :  { %v20453_v13 = vpop.f32.mrb[5].mxu1 }
0x43d8   :  { %v20454_v1 = vadd.f32 %v20453_v13, %v20452_v11  ;;  %v20455_v40 = vpop.f32.mrb[6].mxu1 }
0x43d9   :  { %v20456_v39 = vpop.f32.mrb[7].mxu1 }
0x43da   :  { %v16323_v60 = vadd.f32 %v20454_v1, %v16283_v49 }
0x43de   :  { %v16362_v22 = vpop.f32.mrb[0].mxu0 }
0x43df   :  { %v16363_v56 = vadd.f32 %v16362_v22, %v16323_v60  ;;  %v21029_v63 = vpop.f32.mrb[1].mxu0  ;;  %v18781_v22 = vld [vmem:[%s28277_s10] ss:$0 sm:$0xff] }
0x43e0   :  { %v16365_v32 = vpop.f32.mrb[2].mxu0 }
0x43e1   :  { %v16368_v19 = vmax.f32 %v16363_v56, 0.0  ;;  %v21030_v62 = vpop.f32.mrb[3].mxu0 }
0x43e3   :  { %v16369_v55 = vpack.c.bf16 %v16368_v19, %v16368_v19 }
0x43e5   :  { %18779 = vmatmul.mubr.msk.bf16.vlgmr.msra.gmra.mrb[8].mxu1 %vm16244_vm2, %v16369_v55  ;;  %18780 = vmatmul.mubr.msk.bf16.vlgmr.msra.gmra.mrb[4].mxu0 %vm16244_vm2, %v16369_v55 }
0x43e6   :  { %20464 = vmatpush3.bf16.msra.mxu1 %v22136_v37  ;;  %20486 = vmatpush3.bf16.msra.mxu0 %v22137_v9 }
0x43e7   :  { %20465 = vmatprep.subr.bf16.mxu1 %v22138_v21  ;;  %20487 = vmatprep.subr.bf16.mxu0 %v22139_v5 }
0x43ea   :  { %20466 = vmatpush3.bf16.msra.mxu1 %v22140_v61  ;;  %20488 = vmatpush3.bf16.msra.mxu0 %v22141_v38 }
0x43eb   :  { %20467 = vmatprep.subr.bf16.mxu1 %v22142_v31  ;;  %20489 = vmatprep.subr.bf16.mxu0 %v22143_v12 }
0x43ee   :  { %20468 = vmatpush3.bf16.msra.mxu1 %v22144_v36  ;;  %20490 = vmatpush3.bf16.msra.mxu0 %v22145_v42 }
0x43ef   :  { %20469 = vmatprep.subr.bf16.mxu1 %v22146_v25  ;;  %20491 = vmatprep.subr.bf16.mxu0 %v22147_v35 }
0x43f2   :  { %20470 = vmatpush3.bf16.msra.mxu1 %v22148_v33  ;;  %20492 = vmatpush3.bf16.msra.mxu0 %v22149_v3 }
0x43f3   :  { %20471 = vmatprep.subr.bf16.mxu1 %v22150_v50  ;;  %20493 = vmatprep.subr.bf16.mxu0 %v22151_v29 }
0x43f6   :  { %20472 = vmatpush3.bf16.msra.mxu1 %v22152_v2  ;;  %20494 = vmatpush3.bf16.msra.mxu0 %v22153_v34 }
0x43f7   :  { %20473 = vmatprep.subr.bf16.mxu1 %v22154_v15  ;;  %20495 = vmatprep.subr.bf16.mxu0 %v22155_v8 }
0x43fa   :  { %20474 = vmatpush3.bf16.msra.mxu1 %v22156_v46  ;;  %20496 = vmatpush3.bf16.msra.mxu0 %v22157_v54 }
0x43fb   :  { %20475 = vmatprep.subr.bf16.mxu1 %v22158_v24  ;;  %20497 = vmatprep.subr.bf16.mxu0 %v22159_v41 }
0x43fe   :  { %20476 = vmatpush3.bf16.msra.mxu1 %v22160_v23  ;;  %20498 = vmatpush3.bf16.msra.mxu0 %v22161_v30 }
0x43ff   :  { %20477 = vmatprep.subr.bf16.mxu1 %v22162_v45  ;;  %20499 = vmatprep.subr.bf16.mxu0 %v22163_v48 }
0x4402   :  { %20478 = vmatpush3.bf16.msra.mxu1 %v22164_v52  ;;  %20500 = vmatpush3.bf16.msra.mxu0 %v22165_v17 }
0x44b8   :  { %v16525_v51 = vpop.f32.mrb[8].mxu1  ;;  %v16566_v44 = vpop.f32.mrb[4].mxu0 }
0x44b9   :  { %v16526_v47 = vadd.f32 %v16525_v51, %v16391_v43  ;;  %v16567_v14 = vadd.f32 %v16566_v44, %v16399_v20  ;;  %v16527_v16 = vpop.f32.mrb[9].mxu1  ;;  %v16568_v0 = vpop.f32.mrb[5].mxu0 }
0x44ba   :  { %v16528_v4 = vadd.f32 %v16527_v16, %v16395_v6  ;;  %v16569_v10 = vadd.f32 %v16568_v0, %v16403_v53  ;;  %v16529_v58 = vpop.f32.mrb[10].mxu1  ;;  %v16570_v27 = vpop.f32.mrb[6].mxu0 }
0x44bb   :  { %v16573_v59 = vmax.f32 %v16526_v47, 0.0  ;;  %v16575_v11 = vmax.f32 %v16567_v14, 0.0  ;;  %v16530_v13 = vpop.f32.mrb[11].mxu1  ;;  %v16571_v28 = vpop.f32.mrb[7].mxu0 }
0x44bc   :  { %v16574_v49 = vmax.f32 %v16528_v4, 0.0  ;;  %v16576_v1 = vmax.f32 %v16569_v10, 0.0 }
0x44bd   :  { %v16577_v18 = vpack.c.bf16 %v16573_v59, %v16573_v59  ;;  %v16579_v7 = vpack.c.bf16 %v16575_v11, %v16575_v11 }
0x44be   :  { %v16578_v57 = vpack.c.bf16 %v16574_v49, %v16574_v49  ;;  %v16580_v40 = vpack.c.bf16 %v16576_v1, %v16576_v1 }
0x44c0   :  { %16876 = vmatprep.mubr.bf16.mxu1 %v16578_v57  ;;  %16916 = vmatprep.mubr.bf16.mxu0 %v16580_v40 }
0x44c1   :  { %16877 = vmatmul.mubr.bf16.vlgmr.msra.gmra.mrb[12].mxu1 %v16577_v18  ;;  %16917 = vmatmul.mubr.bf16.vlgmr.msra.gmra.mrb[8].mxu0 %v16579_v7 }
0x4594   :  { %v20479_v39 = vpop.f32.mrb[12].mxu1  ;;  %v20501_v60 = vpop.f32.mrb[8].mxu0 }
0x4595   :  { %v20480_v56 = vpop.f32.mrb[13].mxu1  ;;  %v20502_v63 = vpop.f32.mrb[9].mxu0 }
0x4596   :  { %v20481_v32 = vadd.f32 %v20480_v56, %v20479_v39  ;;  %v20503_v19 = vadd.f32 %v20502_v63, %v20501_v60  ;;  %v20482_v62 = vpop.f32.mrb[14].mxu1  ;;  %v20504_v37 = vpop.f32.mrb[10].mxu0 }
0x4597   :  { %v20483_v9 = vpop.f32.mrb[15].mxu1  ;;  %v20505_v55 = vpop.f32.mrb[11].mxu0 }
0x4598   :  { %v16879_v21 = vadd.f32 %v20481_v32, %v18781_v22 }
0x459a   :  { %v16919_v5 = vadd.f32 %v20503_v19, %v16879_v21 }
0x459c   :  { %16924 = vst [vmem:[%s28278_s11] sm:$0xff] %v16919_v5 }

</bundles_post_ra>
